<compile_context>
chip_gen: v7x
topology: tpu7x:2x2x1
jax: 0.10.0
libtpu: 0.0.40
codegen_flags: <defaults>
</compile_context>

<pallas_src>
import functools

import jax
import jax.numpy as jnp
from jax import lax
from jax.experimental import pallas as pl
from jax.experimental.pallas import tpu as pltpu


_EPS = 1e-5
_LANE_TILE = 512          # >=512 lanes keeps HBM<->VMEM pipelining efficient.


def _default_vmem_limit():
    """Per-generation scoped-VMEM budget (v5e/v6e: ~96-100 MiB of 128 MiB
    physical; v7x: ~48 MiB of 64 MiB physical)."""
    try:
        cap = int(pltpu.get_tpu_info().vmem_capacity_bytes)
        lim = cap * 3 // 4
        return max(min(lim, 100 * 1024 * 1024), 32 * 1024 * 1024)
    except Exception:
        return 48 * 1024 * 1024


_VMEM_LIMIT = _default_vmem_limit()


def _pick_lane_tile(total, target=_LANE_TILE):
    if total <= target:
        return total
    t = (target // 128) * 128
    while t >= 128:
        if total % t == 0:
            return t
        t -= 128
    return total              # TODO(synk): pad lane axis instead.


# -----------------------------------------------------------------------------
# In-kernel helpers
# -----------------------------------------------------------------------------
def _mm(w_ref, x):
    """bf16 MXU matmul with f32 accumulation: (Cout, Cin) @ (Cin, N)."""
    return jnp.dot(w_ref[...].astype(jnp.bfloat16), x.astype(jnp.bfloat16),
                   preferred_element_type=jnp.float32)


def _bn_affine(ssum, ssq, n, gamma, beta):
    """Fold training-mode batch stats into per-channel scale/shift (tiny JAX
    glue between pallas_calls).  Variance clamped to >= 0."""
    mean = ssum / n
    var = jnp.maximum(ssq / n - mean * mean, 0.0)
    scale = gamma * lax.rsqrt(var + _EPS)
    shift = beta - mean * scale
    return scale, shift


# -----------------------------------------------------------------------------
# Generic tiled conv kernels (used by encoder and both decoders)
# -----------------------------------------------------------------------------
def _conv_stats_kernel(n_parts, *refs):
    """H = sum_k W_k @ part_k + b; store H (bf16) and accumulate per-channel
    sum / sumsq across the L-tile grid axis."""
    parts = refs[:n_parts]
    ws = refs[n_parts:2 * n_parts]
    b_ref = refs[2 * n_parts]
    h_ref, ssum_ref, ssq_ref = refs[2 * n_parts + 1:]
    lt = pl.program_id(1)

    h = _mm(ws[0], parts[0][...])
    for k in range(1, n_parts):
        h = h + _mm(ws[k], parts[k][...])
    h = h + b_ref[...]
    h_ref[...] = h.astype(h_ref.dtype)

    @pl.when(lt == 0)
    def _():
        ssum_ref[...] = jnp.zeros_like(ssum_ref)
        ssq_ref[...] = jnp.zeros_like(ssq_ref)

    ssum_ref[...] += jnp.sum(h, axis=-1, keepdims=True)
    ssq_ref[...] += jnp.sum(h * h, axis=-1, keepdims=True)


def _bnrelu_conv_stats_kernel(x_ref, sc_ref, sh_ref, w_ref, b_ref,
                              h_ref, ssum_ref, ssq_ref):
    """a = relu(BN(x_prev)); H = W @ a + b; store H + stats (fused BN apply)."""
    lt = pl.program_id(1)
    a = jnp.maximum(x_ref[...].astype(jnp.float32) * sc_ref[...] + sh_ref[...],
                    0.0).astype(jnp.bfloat16)
    h = _mm(w_ref, a) + b_ref[...]
    h_ref[...] = h.astype(h_ref.dtype)

    @pl.when(lt == 0)
    def _():
        ssum_ref[...] = jnp.zeros_like(ssum_ref)
        ssq_ref[...] = jnp.zeros_like(ssq_ref)

    ssum_ref[...] += jnp.sum(h, axis=-1, keepdims=True)
    ssq_ref[...] += jnp.sum(h * h, axis=-1, keepdims=True)


def _final_tanh_kernel(has_res, *refs):
    """a = relu(BN(x_prev)); y = tanh(W @ a + b) [+ residual]."""
    if has_res:
        x_ref, sc_ref, sh_ref, w_ref, b_ref, res_ref, o_ref = refs
    else:
        x_ref, sc_ref, sh_ref, w_ref, b_ref, o_ref = refs
        res_ref = None
    a = jnp.maximum(x_ref[...].astype(jnp.float32) * sc_ref[...] + sh_ref[...],
                    0.0).astype(jnp.bfloat16)
    y = jnp.tanh(_mm(w_ref, a) + b_ref[...])
    if has_res:
        y = y + res_ref[...]
    o_ref[...] = y


def _conv_stats_call(parts, per_prim, weights, bias):
    P, cout = bias.shape[0], bias.shape[1]
    bl = parts[0].shape[-1]
    lt = _pick_lane_tile(bl)
    nlt = bl // lt

    in_specs = []
    for a, pp in zip(parts, per_prim):
        ck = a.shape[-2]
        if pp:
            in_specs.append(pl.BlockSpec((None, ck, lt), lambda p, l: (p, 0, l)))
        else:
            in_specs.append(pl.BlockSpec((ck, lt), lambda p, l: (0, l)))
    for w in weights:
        in_specs.append(pl.BlockSpec((None,) + tuple(w.shape[1:]),
                                     lambda p, l: (p, 0, 0)))
    in_specs.append(pl.BlockSpec((None, cout, 1), lambda p, l: (p, 0, 0)))

    out_shape = (jax.ShapeDtypeStruct((P, cout, bl), jnp.bfloat16),
                 jax.ShapeDtypeStruct((P, cout, 1), jnp.float32),
                 jax.ShapeDtypeStruct((P, cout, 1), jnp.float32))
    out_specs = (pl.BlockSpec((None, cout, lt), lambda p, l: (p, 0, l)),
                 pl.BlockSpec((None, cout, 1), lambda p, l: (p, 0, 0)),
                 pl.BlockSpec((None, cout, 1), lambda p, l: (p, 0, 0)))
    return pl.pallas_call(
        functools.partial(_conv_stats_kernel, len(parts)),
        out_shape=out_shape,
        grid=(P, nlt),
        in_specs=in_specs,
        out_specs=out_specs,
        compiler_params=pltpu.CompilerParams(
            dimension_semantics=("parallel", "arbitrary"),
            vmem_limit_bytes=_VMEM_LIMIT),
    )(*parts, *weights, bias)


def _bnrelu_conv_stats_call(h_in, scale, shift, w, b):
    P, cin, bl = h_in.shape
    cout = w.shape[1]
    lt = _pick_lane_tile(bl)
    nlt = bl // lt

    in_specs = [pl.BlockSpec((None, cin, lt), lambda p, l: (p, 0, l)),
                pl.BlockSpec((None, cin, 1), lambda p, l: (p, 0, 0)),
                pl.BlockSpec((None, cin, 1), lambda p, l: (p, 0, 0)),
                pl.BlockSpec((None, cout, cin), lambda p, l: (p, 0, 0)),
                pl.BlockSpec((None, cout, 1), lambda p, l: (p, 0, 0))]
    out_shape = (jax.ShapeDtypeStruct((P, cout, bl), jnp.bfloat16),
                 jax.ShapeDtypeStruct((P, cout, 1), jnp.float32),
                 jax.ShapeDtypeStruct((P, cout, 1), jnp.float32))
    out_specs = (pl.BlockSpec((None, cout, lt), lambda p, l: (p, 0, l)),
                 pl.BlockSpec((None, cout, 1), lambda p, l: (p, 0, 0)),
                 pl.BlockSpec((None, cout, 1), lambda p, l: (p, 0, 0)))
    return pl.pallas_call(
        _bnrelu_conv_stats_kernel,
        out_shape=out_shape,
        grid=(P, nlt),
        in_specs=in_specs,
        out_specs=out_specs,
        compiler_params=pltpu.CompilerParams(
            dimension_semantics=("parallel", "arbitrary"),
            vmem_limit_bytes=_VMEM_LIMIT),
    )(h_in, scale, shift, w, b)


def _final_tanh_call(h_in, scale, shift, w, b, residual=None):
    P, cin, bl = h_in.shape
    lt = _pick_lane_tile(bl)
    nlt = bl // lt
    has_res = residual is not None

    in_specs = [pl.BlockSpec((None, cin, lt), lambda p, l: (p, 0, l)),
                pl.BlockSpec((None, cin, 1), lambda p, l: (p, 0, 0)),
                pl.BlockSpec((None, cin, 1), lambda p, l: (p, 0, 0)),
                pl.BlockSpec((None, 3, cin), lambda p, l: (p, 0, 0)),
                pl.BlockSpec((None, 3, 1), lambda p, l: (p, 0, 0))]
    args = [h_in, scale, shift, w, b]
    if has_res:
        in_specs.append(pl.BlockSpec((3, lt), lambda p, l: (0, l)))
        args.append(residual)

    return pl.pallas_call(
        functools.partial(_final_tanh_kernel, has_res),
        out_shape=jax.ShapeDtypeStruct((P, 3, bl), jnp.float32),
        grid=(P, nlt),
        in_specs=in_specs,
        out_specs=pl.BlockSpec((None, 3, lt), lambda p, l: (p, 0, l)),
        compiler_params=pltpu.CompilerParams(
            dimension_semantics=("parallel", "parallel"),
            vmem_limit_bytes=_VMEM_LIMIT),
    )(*args)


# -----------------------------------------------------------------------------
# Encoder: tiled PointNetfeat convs + max-pool + Linear + BN + ReLU
# -----------------------------------------------------------------------------
def _pool_kernel(h_ref, sc_ref, sh_ref, out_ref, run_max):
    lt = pl.program_id(1)

    @pl.when(lt == 0)
    def _():
        run_max[...] = jnp.full(run_max.shape, -jnp.inf, run_max.dtype)

    t = h_ref[...].astype(jnp.float32) * sc_ref[...] + sh_ref[...]   # bn3
    run_max[...] = jnp.maximum(run_max[...],
                               jnp.max(t, axis=-1, keepdims=True))

    @pl.when(lt == pl.num_programs(1) - 1)
    def _():
        out_ref[...] = run_max[...]


def _pool_call(h3, scale, shift, B, N):
    _, c3, _ = h3.shape
    lt = _pick_lane_tile(N)
    nlt = N // lt
    sc2d = scale.reshape(c3, 1)
    sh2d = shift.reshape(c3, 1)
    return pl.pallas_call(
        _pool_kernel,
        out_shape=jax.ShapeDtypeStruct((B, c3, 1), jnp.float32),
        grid=(B, nlt),
        in_specs=[pl.BlockSpec((None, c3, lt),
                               lambda b, l: (0, 0, b * nlt + l)),
                  pl.BlockSpec((c3, 1), lambda b, l: (0, 0)),
                  pl.BlockSpec((c3, 1), lambda b, l: (0, 0))],
        out_specs=pl.BlockSpec((None, c3, 1), lambda b, l: (b, 0, 0)),
        scratch_shapes=[pltpu.VMEM((c3, 1), jnp.float32)],
        compiler_params=pltpu.CompilerParams(
            dimension_semantics=("arbitrary", "arbitrary"),
            vmem_limit_bytes=_VMEM_LIMIT),
    )(h3, sc2d, sh2d)


def _fc_head_kernel(pooled_ref, fcw_ref, fcb_ref, fg_ref, fbe_ref, out_ref):
    # One (F, C3) @ (C3, B) matmul + BatchNorm over the batch (lane) axis +
    # ReLU, single full-block store.
    fc = _mm(fcw_ref, pooled_ref[...]) + fcb_ref[...]
    inv_b = 1.0 / fc.shape[-1]
    mean = jnp.sum(fc, axis=-1, keepdims=True) * inv_b
    var = jnp.maximum(jnp.sum(fc * fc, axis=-1, keepdims=True) * inv_b
                      - mean * mean, 0.0)
    scale = fg_ref[...] * lax.rsqrt(var + _EPS)
    shift = fbe_ref[...] - mean * scale
    out_ref[...] = jnp.maximum(fc * scale + shift, 0.0)


def _fc_head_call(pooled_t, fcw, fcb, fg, fbe):
    F_ = fcw.shape[0]
    B = pooled_t.shape[1]
    return pl.pallas_call(
        _fc_head_kernel,
        out_shape=jax.ShapeDtypeStruct((F_, B), jnp.float32),
        compiler_params=pltpu.CompilerParams(vmem_limit_bytes=_VMEM_LIMIT),
    )(pooled_t, fcw, fcb, fg, fbe)


def pointnet_encoder_forward(x_m, enc, B, N):
    """x_m: (3, B*N) merged-lane points -> (F, B) latent."""
    bln = B * N
    h1, s1, q1 = _conv_stats_call([x_m], [False], [enc['w1']], enc['b1'])
    sc1, sh1 = _bn_affine(s1, q1, bln, enc['g1'], enc['be1'])
    h2, s2, q2 = _bnrelu_conv_stats_call(h1, sc1, sh1, enc['w2'], enc['b2'])
    sc2, sh2 = _bn_affine(s2, q2, bln, enc['g2'], enc['be2'])
    h3, s3, q3 = _bnrelu_conv_stats_call(h2, sc2, sh2, enc['w3'], enc['b3'])
    sc3, sh3 = _bn_affine(s3, q3, bln, enc['g3'], enc['be3'])   # bn3, no ReLU

    pooled = _pool_call(h3, sc3, sh3, B, N)                     # (B, C3, 1)
    pooled_t = jnp.transpose(pooled[:, :, 0], (1, 0))           # (C3, B)
    return _fc_head_call(pooled_t, enc['fcw'], enc['fcb'],
                         enc['fg'], enc['fbe'])                 # (F, B)


# -----------------------------------------------------------------------------
# GraphEncoder stand-in (per-point 1x1 conv + tanh -> 84 channels)
# -----------------------------------------------------------------------------
def _graph_kernel(c_ref, gw_ref, gb_ref, o_ref):
    # TODO(synk): stand-in for GraphEncoder(dense_n=3, growth_rate=12, knn=16).
    o_ref[...] = jnp.tanh(_mm(gw_ref, c_ref[...]) + gb_ref[...]
                          ).astype(o_ref.dtype)


def graph_forward(coarse_m, gp):
    G_ = gp['w'].shape[0]
    bl = coarse_m.shape[-1]
    lt = _pick_lane_tile(bl)
    nlt = bl // lt
    return pl.pallas_call(
        _graph_kernel,
        out_shape=jax.ShapeDtypeStruct((G_, bl), jnp.bfloat16),
        grid=(nlt,),
        in_specs=[pl.BlockSpec((3, lt), lambda l: (0, l)),
                  pl.BlockSpec((G_, 3), lambda l: (0, 0)),
                  pl.BlockSpec((G_, 1), lambda l: (0, 0))],
        out_specs=pl.BlockSpec((G_, lt), lambda l: (0, l)),
        compiler_params=pltpu.CompilerParams(
            dimension_semantics=("parallel",),
            vmem_limit_bytes=_VMEM_LIMIT),
    )(coarse_m, gp['w'], gp['b'])


# -----------------------------------------------------------------------------
# ResPointGenCon: 4 tiled layer calls, latent folded in as a one-hot part
# -----------------------------------------------------------------------------
def respointgen_forward(parts, per_prim, feat, wd, B, L_per_batch,
                        residual=None):
    """parts: list with one per-point channel block, (Ck, B*L) shared or
    (P, Ck, B*L) per-primitive; feat: (F, B) latent.  Returns (P, 3, B*L)."""
    bl = B * L_per_batch

    # Latent term: conv1 += (W1_feat @ feat) @ onehot  -- one MXU pass instead
    # of a per-batch VPU select loop.  lat is tiny (P, C, B) glue.
    lat = jnp.einsum('pcf,fb->pcb', wd['w1_feat'].astype(jnp.float32), feat
                     ).astype(jnp.bfloat16)
    onehot = (jnp.arange(bl, dtype=jnp.int32)[None, :] // L_per_batch
              == jnp.arange(B, dtype=jnp.int32)[:, None]).astype(jnp.bfloat16)

    all_parts = list(parts) + [onehot]
    all_pp = list(per_prim) + [False]
    all_w = [wd['w1_pts'], lat]

    h1, s1, q1 = _conv_stats_call(all_parts, all_pp, all_w, wd['b1'])
    sc1, sh1 = _bn_affine(s1, q1, bl, wd['g1'], wd['be1'])
    h2, s2, q2 = _bnrelu_conv_stats_call(h1, sc1, sh1, wd['w2'], wd['b2'])
    sc2, sh2 = _bn_affine(s2, q2, bl, wd['g2'], wd['be2'])
    h3, s3, q3 = _bnrelu_conv_stats_call(h2, sc2, sh2, wd['w3'], wd['b3'])
    sc3, sh3 = _bn_affine(s3, q3, bl, wd['g3'], wd['be3'])
    return _final_tanh_call(h3, sc3, sh3, wd['w4'], wd['b4'],
                            residual=residual)                  # (P, 3, B*L)


# -----------------------------------------------------------------------------
# Full forward
# -----------------------------------------------------------------------------
def _unmerge(out, B, L):
    # (P, 3, B*L) merged-lane -> (B, 3, P*L) (primitives concatenated along
    # the point axis, matching torch.cat(outs, 2)).
    P = out.shape[0]
    return jnp.transpose(out.reshape(P, 3, B, L), (2, 1, 0, 3)).reshape(
        B, 3, P * L)


def ae_pointnet_dcg_forward(x, enc, gp, dec1, dec2, rand_grid):
    """x: (B, num_points, 3).  Returns (coarse (B, Lc, 3), fine (B, Lf, 3))."""
    B, N, _ = x.shape
    x_m = jnp.transpose(x, (2, 0, 1)).reshape(3, B * N)            # (3, B*N)
    feat = pointnet_encoder_forward(x_m, enc, B, N)                # (F, B)

    # ---- decoder1: rand grid (2 ch, per-primitive) + latent; no residual ----
    P1, _, _, L1 = rand_grid.shape
    grid_m = jnp.transpose(rand_grid, (0, 2, 1, 3)).reshape(P1, 2, B * L1)
    out1 = respointgen_forward([grid_m], [True], feat, dec1,
                               B=B, L_per_batch=L1)                # (P1,3,B*L1)
    coarse = _unmerge(out1, B, L1)                                 # (B, 3, Lc)
    Lc = P1 * L1
    coarse_m = jnp.transpose(coarse, (1, 0, 2)).reshape(3, B * Lc)

    # ---- graph features + merged (3+84)-channel decoder2 input ----
    graph_m = graph_forward(coarse_m, gp)                          # (84,B*Lc) bf16
    comb = jnp.concatenate([coarse_m.astype(jnp.bfloat16), graph_m], axis=0)

    # ---- decoder2: merged per-point part + latent; residual = coarse ----
    out2 = respointgen_forward([comb], [False], feat, dec2,
                               B=B, L_per_batch=Lc,
                               residual=coarse_m)                  # (P2,3,B*Lc)
    fine = _unmerge(out2, B, Lc)                                   # (B, 3, Lf)

    return (jnp.transpose(coarse, (0, 2, 1)),                      # (B, Lc, 3)
            jnp.transpose(fine, (0, 2, 1)))                        # (B, Lf, 3)


# -----------------------------------------------------------------------------
# Deterministic parameter construction
# -----------------------------------------------------------------------------
def _winit(key, shape, scale=0.1):
    return (scale * jax.random.normal(key, shape, jnp.float32)).astype(
        jnp.bfloat16)


def init_encoder_params(key, c1, c2, c3, F_):
    ks = jax.random.split(key, 6)

    def conv(k, cout, cin):
        kw, kb = jax.random.split(k)
        return (_winit(kw, (1, cout, cin)),
                0.05 * jax.random.normal(kb, (1, cout, 1), jnp.float32),
                jnp.ones((1, cout, 1), jnp.float32),
                jnp.zeros((1, cout, 1), jnp.float32))

    w1, b1, g1, be1 = conv(ks[0], c1, 3)
    w2, b2, g2, be2 = conv(ks[1], c2, c1)
    w3, b3, g3, be3 = conv(ks[2], c3, c2)
    return dict(w1=w1, b1=b1, g1=g1, be1=be1,
                w2=w2, b2=b2, g2=g2, be2=be2,
                w3=w3, b3=b3, g3=g3, be3=be3,
                fcw=_winit(ks[3], (F_, c3)),
                fcb=0.05 * jax.random.normal(ks[4], (F_, 1), jnp.float32),
                fg=jnp.ones((F_, 1), jnp.float32),
                fbe=jnp.zeros((F_, 1), jnp.float32))


def init_graph_params(key, G):
    k1, k2 = jax.random.split(key)
    return dict(w=_winit(k1, (G, 3)),
                b=0.05 * jax.random.normal(k2, (G, 1), jnp.float32))


def init_respointgen_params(key, P, pts_ch, F_):
    """Per-primitive ResPointGenCon(bottleneck_size=pts_ch+F_) params; conv1
    split along its input channels into a per-point part and a latent part."""
    C = pts_ch + F_
    c2, c3 = C // 2, C // 4
    ks = jax.random.split(key, 9)

    def bias(k, c):
        return 0.05 * jax.random.normal(k, (P, c, 1), jnp.float32)

    def ones(c):
        return jnp.ones((P, c, 1), jnp.float32)

    def zeros(c):
        return jnp.zeros((P, c, 1), jnp.float32)

    return dict(
        w1_pts=_winit(ks[0], (P, C, pts_ch)),
        w1_feat=_winit(ks[1], (P, C, F_)),
        b1=bias(ks[2], C), g1=ones(C), be1=zeros(C),
        w2=_winit(ks[3], (P, c2, C)), b2=bias(ks[4], c2),
        g2=ones(c2), be2=zeros(c2),
        w3=_winit(ks[5], (P, c3, c2)), b3=bias(ks[6], c3),
        g3=ones(c3), be3=zeros(c3),
        w4=_winit(ks[7], (P, 3, c3)), b4=bias(ks[8], 3))


# -----------------------------------------------------------------------------
# Main
# -----------------------------------------------------------------------------
if __name__ == "__main__":
    # Small, module-consistent shapes (real model: bottleneck=1024, PointNet
    # widths 64/128/1024, num_points=2500, 5+5 primitives, 84 graph channels).
    B, num_points = 2, 1024
    nb_prim1, nb_prim2 = 2, 2
    L1 = num_points // (nb_prim1 * nb_prim2)          # points per dec1 primitive
    bottleneck = 32
    C1, C2, C3 = 16, 32, 64                           # scaled-down PointNet widths
    G = 84                                            # graph feature channels

    key = jax.random.PRNGKey(0)
    kx, kenc, kg, kd1, kd2, kgrid = jax.random.split(key, 6)

    x = jax.random.normal(kx, (B, num_points, 3), jnp.float32)
    enc = init_encoder_params(kenc, C1, C2, C3, bottleneck)
    gp = init_graph_params(kg, G)
    dec1 = init_respointgen_params(kd1, nb_prim1, 2, bottleneck)
    dec2 = init_respointgen_params(kd2, nb_prim2, 3 + G, bottleneck)

    # torch: rand_grid.data.uniform_(0, 1), sampled fresh per primitive
    rand_grid = jax.random.uniform(kgrid, (nb_prim1, B, 2, L1), jnp.float32)

    fwd = jax.jit(ae_pointnet_dcg_forward)
    coarse, fine = fwd(x, enc, gp, dec1, dec2, rand_grid)
    coarse = jax.block_until_ready(coarse)
    fine = jax.block_until_ready(fine)

    Lc = nb_prim1 * L1
    assert coarse.shape == (B, Lc, 3)
    assert fine.shape == (B, nb_prim2 * Lc, 3)
    assert bool(jnp.all(jnp.isfinite(coarse)))
    assert bool(jnp.all(jnp.isfinite(fine)))
    print("KERNEL_OK")
</pallas_src>

<mosaic_0001>
module attributes {stable_mosaic.version = 11 : i64} {
  func.func @_conv_stats_kernel(%arg0: i32, %arg1: i32, %arg2: memref<3x512xf32, #tpu.memory_space<vmem>>, %arg3: memref<1x16x3xbf16, #tpu.memory_space<vmem>>, %arg4: memref<1x16x1xf32, #tpu.memory_space<vmem>>, %arg5: memref<1x16x512xbf16, #tpu.memory_space<vmem>>, %arg6: memref<1x16x1xf32, #tpu.memory_space<vmem>>, %arg7: memref<1x16x1xf32, #tpu.memory_space<vmem>>) attributes {dimension_semantics = [#tpu.dimension_semantics<parallel>, #tpu.dimension_semantics<arbitrary>], iteration_bounds = array<i64: 1, 4>, scalar_prefetch = 0 : i64, scratch_operands = 0 : i64, tpu.core_type = #tpu.core_type<tc>, window_params = [{transform_indices = @transform_0, window_bounds = array<i64: 3, 512>}, {transform_indices = @transform_1, window_bounds = array<i64: 1, 16, 3>}, {transform_indices = @transform_2, window_bounds = array<i64: 1, 16, 1>}, {transform_indices = @transform_3, window_bounds = array<i64: 1, 16, 512>}, {transform_indices = @transform_4, window_bounds = array<i64: 1, 16, 1>}, {transform_indices = @transform_5, window_bounds = array<i64: 1, 16, 1>}]} {
    %c0 = arith.constant 0 : index
    %c0_0 = arith.constant 0 : index
    %0 = vector.load %arg2[%c0, %c0_0] : memref<3x512xf32, #tpu.memory_space<vmem>>, vector<3x512xf32>
    %c0_1 = arith.constant 0 : index
    %c0_2 = arith.constant 0 : index
    %c0_3 = arith.constant 0 : index
    %1 = vector.load %arg3[%c0_1, %c0_2, %c0_3] : memref<1x16x3xbf16, #tpu.memory_space<vmem>>, vector<1x16x3xbf16>
    %2 = vector.shape_cast %1 : vector<1x16x3xbf16> to vector<16x3xbf16>
    %3 = arith.truncf %0 : vector<3x512xf32> to vector<3x512xbf16>
    %cst = arith.constant dense<0.000000e+00> : vector<16x512xf32>
    %4 = tpu.matmul %2, %3, %cst {dimension_numbers = #tpu.dot_dimension_numbers<[1], [0], [0], [1], [0, 0, 1, 1], [], []>} : vector<16x3xbf16>, vector<3x512xbf16>, vector<16x512xf32> -> vector<16x512xf32>
    %c0_4 = arith.constant 0 : index
    %c0_5 = arith.constant 0 : index
    %c0_6 = arith.constant 0 : index
    %5 = vector.load %arg4[%c0_4, %c0_5, %c0_6] : memref<1x16x1xf32, #tpu.memory_space<vmem>>, vector<1x16x1xf32>
    %6 = vector.shape_cast %5 : vector<1x16x1xf32> to vector<16x1xf32>
    %7 = vector.broadcast %6 : vector<16x1xf32> to vector<16x512xf32>
    %8 = arith.addf %4, %7 : vector<16x512xf32>
    %9 = arith.truncf %8 : vector<16x512xf32> to vector<16x512xbf16>
    %c0_7 = arith.constant 0 : index
    %c0_8 = arith.constant 0 : index
    %c0_9 = arith.constant 0 : index
    %10 = vector.load %arg5[%c0_7, %c0_8, %c0_9] : memref<1x16x512xbf16, #tpu.memory_space<vmem>>, vector<1x16x512xbf16>
    %11 = vector.shape_cast %10 : vector<1x16x512xbf16> to vector<16x512xbf16>
    %12 = vector.shape_cast %9 : vector<16x512xbf16> to vector<1x16x512xbf16>
    tpu.vector_store %arg5[%c0_7, %c0_8, %c0_9], %12 {strides = array<i32>} : memref<1x16x512xbf16, #tpu.memory_space<vmem>>, vector<1x16x512xbf16>,
    %c0_i32 = arith.constant 0 : i32
    %13 = arith.cmpi eq, %arg1, %c0_i32 : i32
    %14 = arith.extui %13 : i1 to i32
    %c0_i32_10 = arith.constant 0 : i32
    %15 = arith.cmpi ne, %14, %c0_i32_10 : i32
    scf.if %15 {
      %cst_25 = arith.constant 0.000000e+00 : f32
      %33 = vector.broadcast %cst_25 : f32 to vector<16x1xf32>
      %c0_26 = arith.constant 0 : index
      %c0_27 = arith.constant 0 : index
      %c0_28 = arith.constant 0 : index
      %34 = vector.load %arg6[%c0_26, %c0_27, %c0_28] : memref<1x16x1xf32, #tpu.memory_space<vmem>>, vector<1x16x1xf32>
      %35 = vector.shape_cast %34 : vector<1x16x1xf32> to vector<16x1xf32>
      %36 = vector.shape_cast %33 : vector<16x1xf32> to vector<1x16x1xf32>
      tpu.vector_store %arg6[%c0_26, %c0_27, %c0_28], %36 {strides = array<i32>} : memref<1x16x1xf32, #tpu.memory_space<vmem>>, vector<1x16x1xf32>,
      %cst_29 = arith.constant 0.000000e+00 : f32
      %37 = vector.broadcast %cst_29 : f32 to vector<16x1xf32>
      %c0_30 = arith.constant 0 : index
      %c0_31 = arith.constant 0 : index
      %c0_32 = arith.constant 0 : index
      %38 = vector.load %arg7[%c0_30, %c0_31, %c0_32] : memref<1x16x1xf32, #tpu.memory_space<vmem>>, vector<1x16x1xf32>
      %39 = vector.shape_cast %38 : vector<1x16x1xf32> to vector<16x1xf32>
      %40 = vector.shape_cast %37 : vector<16x1xf32> to vector<1x16x1xf32>
      tpu.vector_store %arg7[%c0_30, %c0_31, %c0_32], %40 {strides = array<i32>} : memref<1x16x1xf32, #tpu.memory_space<vmem>>, vector<1x16x1xf32>,
    } else {
    }
    %c0_11 = arith.constant 0 : index
    %c0_12 = arith.constant 0 : index
    %c0_13 = arith.constant 0 : index
    %16 = vector.load %arg6[%c0_11, %c0_12, %c0_13] : memref<1x16x1xf32, #tpu.memory_space<vmem>>, vector<1x16x1xf32>
    %17 = vector.shape_cast %16 : vector<1x16x1xf32> to vector<16x1xf32>
    %cst_14 = arith.constant dense<0.000000e+00> : vector<16xf32>
    %18 = vector.multi_reduction <add>, %8, %cst_14 [1] : vector<16x512xf32> to vector<16xf32>
    %19 = vector.shape_cast %18 : vector<16xf32> to vector<16x1xf32>
    %20 = arith.addf %17, %19 : vector<16x1xf32>
    %c0_15 = arith.constant 0 : index
    %c0_16 = arith.constant 0 : index
    %c0_17 = arith.constant 0 : index
    %21 = vector.load %arg6[%c0_15, %c0_16, %c0_17] : memref<1x16x1xf32, #tpu.memory_space<vmem>>, vector<1x16x1xf32>
    %22 = vector.shape_cast %21 : vector<1x16x1xf32> to vector<16x1xf32>
    %23 = vector.shape_cast %20 : vector<16x1xf32> to vector<1x16x1xf32>
    tpu.vector_store %arg6[%c0_15, %c0_16, %c0_17], %23 {strides = array<i32>} : memref<1x16x1xf32, #tpu.memory_space<vmem>>, vector<1x16x1xf32>,
    %c0_18 = arith.constant 0 : index
    %c0_19 = arith.constant 0 : index
    %c0_20 = arith.constant 0 : index
    %24 = vector.load %arg7[%c0_18, %c0_19, %c0_20] : memref<1x16x1xf32, #tpu.memory_space<vmem>>, vector<1x16x1xf32>
    %25 = vector.shape_cast %24 : vector<1x16x1xf32> to vector<16x1xf32>
    %26 = arith.mulf %8, %8 : vector<16x512xf32>
    %cst_21 = arith.constant dense<0.000000e+00> : vector<16xf32>
    %27 = vector.multi_reduction <add>, %26, %cst_21 [1] : vector<16x512xf32> to vector<16xf32>
    %28 = vector.shape_cast %27 : vector<16xf32> to vector<16x1xf32>
    %29 = arith.addf %25, %28 : vector<16x1xf32>
    %c0_22 = arith.constant 0 : index
    %c0_23 = arith.constant 0 : index
    %c0_24 = arith.constant 0 : index
    %30 = vector.load %arg7[%c0_22, %c0_23, %c0_24] : memref<1x16x1xf32, #tpu.memory_space<vmem>>, vector<1x16x1xf32>
    %31 = vector.shape_cast %30 : vector<1x16x1xf32> to vector<16x1xf32>
    %32 = vector.shape_cast %29 : vector<16x1xf32> to vector<1x16x1xf32>
    tpu.vector_store %arg7[%c0_22, %c0_23, %c0_24], %32 {strides = array<i32>} : memref<1x16x1xf32, #tpu.memory_space<vmem>>, vector<1x16x1xf32>,
    return
  }
  func.func @transform_0(%arg0: i32, %arg1: i32) -> (i32, i32) {
    %c0_i32 = arith.constant 0 : i32
    %c0_i32_0 = arith.constant 0 : i32
    return %c0_i32, %arg1 : i32, i32
  }
  func.func @transform_1(%arg0: i32, %arg1: i32) -> (i32, i32, i32) {
    %c0_i32 = arith.constant 0 : i32
    %c0_i32_0 = arith.constant 0 : i32
    %c0_i32_1 = arith.constant 0 : i32
    return %arg0, %c0_i32, %c0_i32_0 : i32, i32, i32
  }
  func.func @transform_2(%arg0: i32, %arg1: i32) -> (i32, i32, i32) {
    %c0_i32 = arith.constant 0 : i32
    %c0_i32_0 = arith.constant 0 : i32
    %c0_i32_1 = arith.constant 0 : i32
    return %arg0, %c0_i32, %c0_i32_0 : i32, i32, i32
  }
  func.func @transform_3(%arg0: i32, %arg1: i32) -> (i32, i32, i32) {
    %c0_i32 = arith.constant 0 : i32
    %c0_i32_0 = arith.constant 0 : i32
    return %arg0, %c0_i32, %arg1 : i32, i32, i32
  }
  func.func @transform_4(%arg0: i32, %arg1: i32) -> (i32, i32, i32) {
    %c0_i32 = arith.constant 0 : i32
    %c0_i32_0 = arith.constant 0 : i32
    %c0_i32_1 = arith.constant 0 : i32
    return %arg0, %c0_i32, %c0_i32_0 : i32, i32, i32
  }
  func.func @transform_5(%arg0: i32, %arg1: i32) -> (i32, i32, i32) {
    %c0_i32 = arith.constant 0 : i32
    %c0_i32_0 = arith.constant 0 : i32
    %c0_i32_1 = arith.constant 0 : i32
    return %arg0, %c0_i32, %c0_i32_0 : i32, i32, i32
  }
}

module attributes {stable_mosaic.version = 11 : i64} {
  func.func @_bnrelu_conv_stats_kernel(%arg0: i32, %arg1: i32, %arg2: memref<1x16x512xbf16, #tpu.memory_space<vmem>>, %arg3: memref<1x16x1xf32, #tpu.memory_space<vmem>>, %arg4: memref<1x16x1xf32, #tpu.memory_space<vmem>>, %arg5: memref<1x32x16xbf16, #tpu.memory_space<vmem>>, %arg6: memref<1x32x1xf32, #tpu.memory_space<vmem>>, %arg7: memref<1x32x512xbf16, #tpu.memory_space<vmem>>, %arg8: memref<1x32x1xf32, #tpu.memory_space<vmem>>, %arg9: memref<1x32x1xf32, #tpu.memory_space<vmem>>) attributes {dimension_semantics = [#tpu.dimension_semantics<parallel>, #tpu.dimension_semantics<arbitrary>], iteration_bounds = array<i64: 1, 4>, scalar_prefetch = 0 : i64, scratch_operands = 0 : i64, tpu.core_type = #tpu.core_type<tc>, window_params = [{transform_indices = @transform_0, window_bounds = array<i64: 1, 16, 512>}, {transform_indices = @transform_1, window_bounds = array<i64: 1, 16, 1>}, {transform_indices = @transform_2, window_bounds = array<i64: 1, 16, 1>}, {transform_indices = @transform_3, window_bounds = array<i64: 1, 32, 16>}, {transform_indices = @transform_4, window_bounds = array<i64: 1, 32, 1>}, {transform_indices = @transform_5, window_bounds = array<i64: 1, 32, 512>}, {transform_indices = @transform_6, window_bounds = array<i64: 1, 32, 1>}, {transform_indices = @transform_7, window_bounds = array<i64: 1, 32, 1>}]} {
    %c0 = arith.constant 0 : index
    %c0_0 = arith.constant 0 : index
    %c0_1 = arith.constant 0 : index
    %0 = vector.load %arg2[%c0, %c0_0, %c0_1] : memref<1x16x512xbf16, #tpu.memory_space<vmem>>, vector<1x16x512xbf16>
    %1 = vector.shape_cast %0 : vector<1x16x512xbf16> to vector<16x512xbf16>
    %2 = arith.extf %1 : vector<16x512xbf16> to vector<16x512xf32>
    %c0_2 = arith.constant 0 : index
    %c0_3 = arith.constant 0 : index
    %c0_4 = arith.constant 0 : index
    %3 = vector.load %arg3[%c0_2, %c0_3, %c0_4] : memref<1x16x1xf32, #tpu.memory_space<vmem>>, vector<1x16x1xf32>
    %4 = vector.shape_cast %3 : vector<1x16x1xf32> to vector<16x1xf32>
    %5 = vector.broadcast %4 : vector<16x1xf32> to vector<16x512xf32>
    %6 = arith.mulf %2, %5 : vector<16x512xf32>
    %c0_5 = arith.constant 0 : index
    %c0_6 = arith.constant 0 : index
    %c0_7 = arith.constant 0 : index
    %7 = vector.load %arg4[%c0_5, %c0_6, %c0_7] : memref<1x16x1xf32, #tpu.memory_space<vmem>>, vector<1x16x1xf32>
    %8 = vector.shape_cast %7 : vector<1x16x1xf32> to vector<16x1xf32>
    %9 = vector.broadcast %8 : vector<16x1xf32> to vector<16x512xf32>
    %10 = arith.addf %6, %9 : vector<16x512xf32>
    %cst = arith.constant 0.000000e+00 : f32
    %11 = vector.broadcast %cst : f32 to vector<16x512xf32>
    %12 = arith.maximumf %10, %11 : vector<16x512xf32>
    %13 = arith.truncf %12 : vector<16x512xf32> to vector<16x512xbf16>
    %c0_8 = arith.constant 0 : index
    %c0_9 = arith.constant 0 : index
    %c0_10 = arith.constant 0 : index
    %14 = vector.load %arg5[%c0_8, %c0_9, %c0_10] : memref<1x32x16xbf16, #tpu.memory_space<vmem>>, vector<1x32x16xbf16>
    %15 = vector.shape_cast %14 : vector<1x32x16xbf16> to vector<32x16xbf16>
    %cst_11 = arith.constant dense<0.000000e+00> : vector<32x512xf32>
    %16 = tpu.matmul %15, %13, %cst_11 {dimension_numbers = #tpu.dot_dimension_numbers<[1], [0], [0], [1], [0, 0, 1, 1], [], []>} : vector<32x16xbf16>, vector<16x512xbf16>, vector<32x512xf32> -> vector<32x512xf32>
    %c0_12 = arith.constant 0 : index
    %c0_13 = arith.constant 0 : index
    %c0_14 = arith.constant 0 : index
    %17 = vector.load %arg6[%c0_12, %c0_13, %c0_14] : memref<1x32x1xf32, #tpu.memory_space<vmem>>, vector<1x32x1xf32>
    %18 = vector.shape_cast %17 : vector<1x32x1xf32> to vector<32x1xf32>
    %19 = vector.broadcast %18 : vector<32x1xf32> to vector<32x512xf32>
    %20 = arith.addf %16, %19 : vector<32x512xf32>
    %21 = arith.truncf %20 : vector<32x512xf32> to vector<32x512xbf16>
    %c0_15 = arith.constant 0 : index
    %c0_16 = arith.constant 0 : index
    %c0_17 = arith.constant 0 : index
    %22 = vector.load %arg7[%c0_15, %c0_16, %c0_17] : memref<1x32x512xbf16, #tpu.memory_space<vmem>>, vector<1x32x512xbf16>
    %23 = vector.shape_cast %22 : vector<1x32x512xbf16> to vector<32x512xbf16>
    %24 = vector.shape_cast %21 : vector<32x512xbf16> to vector<1x32x512xbf16>
    tpu.vector_store %arg7[%c0_15, %c0_16, %c0_17], %24 {strides = array<i32>} : memref<1x32x512xbf16, #tpu.memory_space<vmem>>, vector<1x32x512xbf16>,
    %c0_i32 = arith.constant 0 : i32
    %25 = arith.cmpi eq, %arg1, %c0_i32 : i32
    %26 = arith.extui %25 : i1 to i32
    %c0_i32_18 = arith.constant 0 : i32
    %27 = arith.cmpi ne, %26, %c0_i32_18 : i32
    scf.if %27 {
      %cst_33 = arith.constant 0.000000e+00 : f32
      %45 = vector.broadcast %cst_33 : f32 to vector<32x1xf32>
      %c0_34 = arith.constant 0 : index
      %c0_35 = arith.constant 0 : index
      %c0_36 = arith.constant 0 : index
      %46 = vector.load %arg8[%c0_34, %c0_35, %c0_36] : memref<1x32x1xf32, #tpu.memory_space<vmem>>, vector<1x32x1xf32>
      %47 = vector.shape_cast %46 : vector<1x32x1xf32> to vector<32x1xf32>
      %48 = vector.shape_cast %45 : vector<32x1xf32> to vector<1x32x1xf32>
      tpu.vector_store %arg8[%c0_34, %c0_35, %c0_36], %48 {strides = array<i32>} : memref<1x32x1xf32, #tpu.memory_space<vmem>>, vector<1x32x1xf32>,
      %cst_37 = arith.constant 0.000000e+00 : f32
      %49 = vector.broadcast %cst_37 : f32 to vector<32x1xf32>
      %c0_38 = arith.constant 0 : index
      %c0_39 = arith.constant 0 : index
      %c0_40 = arith.constant 0 : index
      %50 = vector.load %arg9[%c0_38, %c0_39, %c0_40] : memref<1x32x1xf32, #tpu.memory_space<vmem>>, vector<1x32x1xf32>
      %51 = vector.shape_cast %50 : vector<1x32x1xf32> to vector<32x1xf32>
      %52 = vector.shape_cast %49 : vector<32x1xf32> to vector<1x32x1xf32>
      tpu.vector_store %arg9[%c0_38, %c0_39, %c0_40], %52 {strides = array<i32>} : memref<1x32x1xf32, #tpu.memory_space<vmem>>, vector<1x32x1xf32>,
    } else {
    }
    %c0_19 = arith.constant 0 : index
    %c0_20 = arith.constant 0 : index
    %c0_21 = arith.constant 0 : index
    %28 = vector.load %arg8[%c0_19, %c0_20, %c0_21] : memref<1x32x1xf32, #tpu.memory_space<vmem>>, vector<1x32x1xf32>
    %29 = vector.shape_cast %28 : vector<1x32x1xf32> to vector<32x1xf32>
    %cst_22 = arith.constant dense<0.000000e+00> : vector<32xf32>
    %30 = vector.multi_reduction <add>, %20, %cst_22 [1] : vector<32x512xf32> to vector<32xf32>
    %31 = vector.shape_cast %30 : vector<32xf32> to vector<32x1xf32>
    %32 = arith.addf %29, %31 : vector<32x1xf32>
    %c0_23 = arith.constant 0 : index
    %c0_24 = arith.constant 0 : index
    %c0_25 = arith.constant 0 : index
    %33 = vector.load %arg8[%c0_23, %c0_24, %c0_25] : memref<1x32x1xf32, #tpu.memory_space<vmem>>, vector<1x32x1xf32>
    %34 = vector.shape_cast %33 : vector<1x32x1xf32> to vector<32x1xf32>
    %35 = vector.shape_cast %32 : vector<32x1xf32> to vector<1x32x1xf32>
    tpu.vector_store %arg8[%c0_23, %c0_24, %c0_25], %35 {strides = array<i32>} : memref<1x32x1xf32, #tpu.memory_space<vmem>>, vector<1x32x1xf32>,
    %c0_26 = arith.constant 0 : index
    %c0_27 = arith.constant 0 : index
    %c0_28 = arith.constant 0 : index
    %36 = vector.load %arg9[%c0_26, %c0_27, %c0_28] : memref<1x32x1xf32, #tpu.memory_space<vmem>>, vector<1x32x1xf32>
    %37 = vector.shape_cast %36 : vector<1x32x1xf32> to vector<32x1xf32>
    %38 = arith.mulf %20, %20 : vector<32x512xf32>
    %cst_29 = arith.constant dense<0.000000e+00> : vector<32xf32>
    %39 = vector.multi_reduction <add>, %38, %cst_29 [1] : vector<32x512xf32> to vector<32xf32>
    %40 = vector.shape_cast %39 : vector<32xf32> to vector<32x1xf32>
    %41 = arith.addf %37, %40 : vector<32x1xf32>
    %c0_30 = arith.constant 0 : index
    %c0_31 = arith.constant 0 : index
    %c0_32 = arith.constant 0 : index
    %42 = vector.load %arg9[%c0_30, %c0_31, %c0_32] : memref<1x32x1xf32, #tpu.memory_space<vmem>>, vector<1x32x1xf32>
    %43 = vector.shape_cast %42 : vector<1x32x1xf32> to vector<32x1xf32>
    %44 = vector.shape_cast %41 : vector<32x1xf32> to vector<1x32x1xf32>
    tpu.vector_store %arg9[%c0_30, %c0_31, %c0_32], %44 {strides = array<i32>} : memref<1x32x1xf32, #tpu.memory_space<vmem>>, vector<1x32x1xf32>,
    return
  }
  func.func @transform_0(%arg0: i32, %arg1: i32) -> (i32, i32, i32) {
    %c0_i32 = arith.constant 0 : i32
    %c0_i32_0 = arith.constant 0 : i32
    return %arg0, %c0_i32, %arg1 : i32, i32, i32
  }
  func.func @transform_1(%arg0: i32, %arg1: i32) -> (i32, i32, i32) {
    %c0_i32 = arith.constant 0 : i32
    %c0_i32_0 = arith.constant 0 : i32
    %c0_i32_1 = arith.constant 0 : i32
    return %arg0, %c0_i32, %c0_i32_0 : i32, i32, i32
  }
  func.func @transform_2(%arg0: i32, %arg1: i32) -> (i32, i32, i32) {
    %c0_i32 = arith.constant 0 : i32
    %c0_i32_0 = arith.constant 0 : i32
    %c0_i32_1 = arith.constant 0 : i32
    return %arg0, %c0_i32, %c0_i32_0 : i32, i32, i32
  }
  func.func @transform_3(%arg0: i32, %arg1: i32) -> (i32, i32, i32) {
    %c0_i32 = arith.constant 0 : i32
    %c0_i32_0 = arith.constant 0 : i32
    %c0_i32_1 = arith.constant 0 : i32
    return %arg0, %c0_i32, %c0_i32_0 : i32, i32, i32
  }
  func.func @transform_4(%arg0: i32, %arg1: i32) -> (i32, i32, i32) {
    %c0_i32 = arith.constant 0 : i32
    %c0_i32_0 = arith.constant 0 : i32
    %c0_i32_1 = arith.constant 0 : i32
    return %arg0, %c0_i32, %c0_i32_0 : i32, i32, i32
  }
  func.func @transform_5(%arg0: i32, %arg1: i32) -> (i32, i32, i32) {
    %c0_i32 = arith.constant 0 : i32
    %c0_i32_0 = arith.constant 0 : i32
    return %arg0, %c0_i32, %arg1 : i32, i32, i32
  }
  func.func @transform_6(%arg0: i32, %arg1: i32) -> (i32, i32, i32) {
    %c0_i32 = arith.constant 0 : i32
    %c0_i32_0 = arith.constant 0 : i32
    %c0_i32_1 = arith.constant 0 : i32
    return %arg0, %c0_i32, %c0_i32_0 : i32, i32, i32
  }
  func.func @transform_7(%arg0: i32, %arg1: i32) -> (i32, i32, i32) {
    %c0_i32 = arith.constant 0 : i32
    %c0_i32_0 = arith.constant 0 : i32
    %c0_i32_1 = arith.constant 0 : i32
    return %arg0, %c0_i32, %c0_i32_0 : i32, i32, i32
  }
}

module attributes {stable_mosaic.version = 11 : i64} {
  func.func @_bnrelu_conv_stats_kernel(%arg0: i32, %arg1: i32, %arg2: memref<1x32x512xbf16, #tpu.memory_space<vmem>>, %arg3: memref<1x32x1xf32, #tpu.memory_space<vmem>>, %arg4: memref<1x32x1xf32, #tpu.memory_space<vmem>>, %arg5: memref<1x64x32xbf16, #tpu.memory_space<vmem>>, %arg6: memref<1x64x1xf32, #tpu.memory_space<vmem>>, %arg7: memref<1x64x512xbf16, #tpu.memory_space<vmem>>, %arg8: memref<1x64x1xf32, #tpu.memory_space<vmem>>, %arg9: memref<1x64x1xf32, #tpu.memory_space<vmem>>) attributes {dimension_semantics = [#tpu.dimension_semantics<parallel>, #tpu.dimension_semantics<arbitrary>], iteration_bounds = array<i64: 1, 4>, scalar_prefetch = 0 : i64, scratch_operands = 0 : i64, tpu.core_type = #tpu.core_type<tc>, window_params = [{transform_indices = @transform_0, window_bounds = array<i64: 1, 32, 512>}, {transform_indices = @transform_1, window_bounds = array<i64: 1, 32, 1>}, {transform_indices = @transform_2, window_bounds = array<i64: 1, 32, 1>}, {transform_indices = @transform_3, window_bounds = array<i64: 1, 64, 32>}, {transform_indices = @transform_4, window_bounds = array<i64: 1, 64, 1>}, {transform_indices = @transform_5, window_bounds = array<i64: 1, 64, 512>}, {transform_indices = @transform_6, window_bounds = array<i64: 1, 64, 1>}, {transform_indices = @transform_7, window_bounds = array<i64: 1, 64, 1>}]} {
    %c0 = arith.constant 0 : index
    %c0_0 = arith.constant 0 : index
    %c0_1 = arith.constant 0 : index
    %0 = vector.load %arg2[%c0, %c0_0, %c0_1] : memref<1x32x512xbf16, #tpu.memory_space<vmem>>, vector<1x32x512xbf16>
    %1 = vector.shape_cast %0 : vector<1x32x512xbf16> to vector<32x512xbf16>
    %2 = arith.extf %1 : vector<32x512xbf16> to vector<32x512xf32>
    %c0_2 = arith.constant 0 : index
    %c0_3 = arith.constant 0 : index
    %c0_4 = arith.constant 0 : index
    %3 = vector.load %arg3[%c0_2, %c0_3, %c0_4] : memref<1x32x1xf32, #tpu.memory_space<vmem>>, vector<1x32x1xf32>
    %4 = vector.shape_cast %3 : vector<1x32x1xf32> to vector<32x1xf32>
    %5 = vector.broadcast %4 : vector<32x1xf32> to vector<32x512xf32>
    %6 = arith.mulf %2, %5 : vector<32x512xf32>
    %c0_5 = arith.constant 0 : index
    %c0_6 = arith.constant 0 : index
    %c0_7 = arith.constant 0 : index
    %7 = vector.load %arg4[%c0_5, %c0_6, %c0_7] : memref<1x32x1xf32, #tpu.memory_space<vmem>>, vector<1x32x1xf32>
    %8 = vector.shape_cast %7 : vector<1x32x1xf32> to vector<32x1xf32>
    %9 = vector.broadcast %8 : vector<32x1xf32> to vector<32x512xf32>
    %10 = arith.addf %6, %9 : vector<32x512xf32>
    %cst = arith.constant 0.000000e+00 : f32
    %11 = vector.broadcast %cst : f32 to vector<32x512xf32>
    %12 = arith.maximumf %10, %11 : vector<32x512xf32>
    %13 = arith.truncf %12 : vector<32x512xf32> to vector<32x512xbf16>
    %c0_8 = arith.constant 0 : index
    %c0_9 = arith.constant 0 : index
    %c0_10 = arith.constant 0 : index
    %14 = vector.load %arg5[%c0_8, %c0_9, %c0_10] : memref<1x64x32xbf16, #tpu.memory_space<vmem>>, vector<1x64x32xbf16>
    %15 = vector.shape_cast %14 : vector<1x64x32xbf16> to vector<64x32xbf16>
    %cst_11 = arith.constant dense<0.000000e+00> : vector<64x512xf32>
    %16 = tpu.matmul %15, %13, %cst_11 {dimension_numbers = #tpu.dot_dimension_numbers<[1], [0], [0], [1], [0, 0, 1, 1], [], []>} : vector<64x32xbf16>, vector<32x512xbf16>, vector<64x512xf32> -> vector<64x512xf32>
    %c0_12 = arith.constant 0 : index
    %c0_13 = arith.constant 0 : index
    %c0_14 = arith.constant 0 : index
    %17 = vector.load %arg6[%c0_12, %c0_13, %c0_14] : memref<1x64x1xf32, #tpu.memory_space<vmem>>, vector<1x64x1xf32>
    %18 = vector.shape_cast %17 : vector<1x64x1xf32> to vector<64x1xf32>
    %19 = vector.broadcast %18 : vector<64x1xf32> to vector<64x512xf32>
    %20 = arith.addf %16, %19 : vector<64x512xf32>
    %21 = arith.truncf %20 : vector<64x512xf32> to vector<64x512xbf16>
    %c0_15 = arith.constant 0 : index
    %c0_16 = arith.constant 0 : index
    %c0_17 = arith.constant 0 : index
    %22 = vector.load %arg7[%c0_15, %c0_16, %c0_17] : memref<1x64x512xbf16, #tpu.memory_space<vmem>>, vector<1x64x512xbf16>
    %23 = vector.shape_cast %22 : vector<1x64x512xbf16> to vector<64x512xbf16>
    %24 = vector.shape_cast %21 : vector<64x512xbf16> to vector<1x64x512xbf16>
    tpu.vector_store %arg7[%c0_15, %c0_16, %c0_17], %24 {strides = array<i32>} : memref<1x64x512xbf16, #tpu.memory_space<vmem>>, vector<1x64x512xbf16>,
    %c0_i32 = arith.constant 0 : i32
    %25 = arith.cmpi eq, %arg1, %c0_i32 : i32
    %26 = arith.extui %25 : i1 to i32
    %c0_i32_18 = arith.constant 0 : i32
    %27 = arith.cmpi ne, %26, %c0_i32_18 : i32
    scf.if %27 {
      %cst_33 = arith.constant 0.000000e+00 : f32
      %45 = vector.broadcast %cst_33 : f32 to vector<64x1xf32>
      %c0_34 = arith.constant 0 : index
      %c0_35 = arith.constant 0 : index
      %c0_36 = arith.constant 0 : index
      %46 = vector.load %arg8[%c0_34, %c0_35, %c0_36] : memref<1x64x1xf32, #tpu.memory_space<vmem>>, vector<1x64x1xf32>
      %47 = vector.shape_cast %46 : vector<1x64x1xf32> to vector<64x1xf32>
      %48 = vector.shape_cast %45 : vector<64x1xf32> to vector<1x64x1xf32>
      tpu.vector_store %arg8[%c0_34, %c0_35, %c0_36], %48 {strides = array<i32>} : memref<1x64x1xf32, #tpu.memory_space<vmem>>, vector<1x64x1xf32>,
      %cst_37 = arith.constant 0.000000e+00 : f32
      %49 = vector.broadcast %cst_37 : f32 to vector<64x1xf32>
      %c0_38 = arith.constant 0 : index
      %c0_39 = arith.constant 0 : index
      %c0_40 = arith.constant 0 : index
      %50 = vector.load %arg9[%c0_38, %c0_39, %c0_40] : memref<1x64x1xf32, #tpu.memory_space<vmem>>, vector<1x64x1xf32>
      %51 = vector.shape_cast %50 : vector<1x64x1xf32> to vector<64x1xf32>
      %52 = vector.shape_cast %49 : vector<64x1xf32> to vector<1x64x1xf32>
      tpu.vector_store %arg9[%c0_38, %c0_39, %c0_40], %52 {strides = array<i32>} : memref<1x64x1xf32, #tpu.memory_space<vmem>>, vector<1x64x1xf32>,
    } else {
    }
    %c0_19 = arith.constant 0 : index
    %c0_20 = arith.constant 0 : index
    %c0_21 = arith.constant 0 : index
    %28 = vector.load %arg8[%c0_19, %c0_20, %c0_21] : memref<1x64x1xf32, #tpu.memory_space<vmem>>, vector<1x64x1xf32>
    %29 = vector.shape_cast %28 : vector<1x64x1xf32> to vector<64x1xf32>
    %cst_22 = arith.constant dense<0.000000e+00> : vector<64xf32>
    %30 = vector.multi_reduction <add>, %20, %cst_22 [1] : vector<64x512xf32> to vector<64xf32>
    %31 = vector.shape_cast %30 : vector<64xf32> to vector<64x1xf32>
    %32 = arith.addf %29, %31 : vector<64x1xf32>
    %c0_23 = arith.constant 0 : index
    %c0_24 = arith.constant 0 : index
    %c0_25 = arith.constant 0 : index
    %33 = vector.load %arg8[%c0_23, %c0_24, %c0_25] : memref<1x64x1xf32, #tpu.memory_space<vmem>>, vector<1x64x1xf32>
    %34 = vector.shape_cast %33 : vector<1x64x1xf32> to vector<64x1xf32>
    %35 = vector.shape_cast %32 : vector<64x1xf32> to vector<1x64x1xf32>
    tpu.vector_store %arg8[%c0_23, %c0_24, %c0_25], %35 {strides = array<i32>} : memref<1x64x1xf32, #tpu.memory_space<vmem>>, vector<1x64x1xf32>,
    %c0_26 = arith.constant 0 : index
    %c0_27 = arith.constant 0 : index
    %c0_28 = arith.constant 0 : index
    %36 = vector.load %arg9[%c0_26, %c0_27, %c0_28] : memref<1x64x1xf32, #tpu.memory_space<vmem>>, vector<1x64x1xf32>
    %37 = vector.shape_cast %36 : vector<1x64x1xf32> to vector<64x1xf32>
    %38 = arith.mulf %20, %20 : vector<64x512xf32>
    %cst_29 = arith.constant dense<0.000000e+00> : vector<64xf32>
    %39 = vector.multi_reduction <add>, %38, %cst_29 [1] : vector<64x512xf32> to vector<64xf32>
    %40 = vector.shape_cast %39 : vector<64xf32> to vector<64x1xf32>
    %41 = arith.addf %37, %40 : vector<64x1xf32>
    %c0_30 = arith.constant 0 : index
    %c0_31 = arith.constant 0 : index
    %c0_32 = arith.constant 0 : index
    %42 = vector.load %arg9[%c0_30, %c0_31, %c0_32] : memref<1x64x1xf32, #tpu.memory_space<vmem>>, vector<1x64x1xf32>
    %43 = vector.shape_cast %42 : vector<1x64x1xf32> to vector<64x1xf32>
    %44 = vector.shape_cast %41 : vector<64x1xf32> to vector<1x64x1xf32>
    tpu.vector_store %arg9[%c0_30, %c0_31, %c0_32], %44 {strides = array<i32>} : memref<1x64x1xf32, #tpu.memory_space<vmem>>, vector<1x64x1xf32>,
    return
  }
  func.func @transform_0(%arg0: i32, %arg1: i32) -> (i32, i32, i32) {
    %c0_i32 = arith.constant 0 : i32
    %c0_i32_0 = arith.constant 0 : i32
    return %arg0, %c0_i32, %arg1 : i32, i32, i32
  }
  func.func @transform_1(%arg0: i32, %arg1: i32) -> (i32, i32, i32) {
    %c0_i32 = arith.constant 0 : i32
    %c0_i32_0 = arith.constant 0 : i32
    %c0_i32_1 = arith.constant 0 : i32
    return %arg0, %c0_i32, %c0_i32_0 : i32, i32, i32
  }
  func.func @transform_2(%arg0: i32, %arg1: i32) -> (i32, i32, i32) {
    %c0_i32 = arith.constant 0 : i32
    %c0_i32_0 = arith.constant 0 : i32
    %c0_i32_1 = arith.constant 0 : i32
    return %arg0, %c0_i32, %c0_i32_0 : i32, i32, i32
  }
  func.func @transform_3(%arg0: i32, %arg1: i32) -> (i32, i32, i32) {
    %c0_i32 = arith.constant 0 : i32
    %c0_i32_0 = arith.constant 0 : i32
    %c0_i32_1 = arith.constant 0 : i32
    return %arg0, %c0_i32, %c0_i32_0 : i32, i32, i32
  }
  func.func @transform_4(%arg0: i32, %arg1: i32) -> (i32, i32, i32) {
    %c0_i32 = arith.constant 0 : i32
    %c0_i32_0 = arith.constant 0 : i32
    %c0_i32_1 = arith.constant 0 : i32
    return %arg0, %c0_i32, %c0_i32_0 : i32, i32, i32
  }
  func.func @transform_5(%arg0: i32, %arg1: i32) -> (i32, i32, i32) {
    %c0_i32 = arith.constant 0 : i32
    %c0_i32_0 = arith.constant 0 : i32
    return %arg0, %c0_i32, %arg1 : i32, i32, i32
  }
  func.func @transform_6(%arg0: i32, %arg1: i32) -> (i32, i32, i32) {
    %c0_i32 = arith.constant 0 : i32
    %c0_i32_0 = arith.constant 0 : i32
    %c0_i32_1 = arith.constant 0 : i32
    return %arg0, %c0_i32, %c0_i32_0 : i32, i32, i32
  }
  func.func @transform_7(%arg0: i32, %arg1: i32) -> (i32, i32, i32) {
    %c0_i32 = arith.constant 0 : i32
    %c0_i32_0 = arith.constant 0 : i32
    %c0_i32_1 = arith.constant 0 : i32
    return %arg0, %c0_i32, %c0_i32_0 : i32, i32, i32
  }
}

module attributes {stable_mosaic.version = 11 : i64} {
  func.func @_pool_kernel(%arg0: i32, %arg1: i32, %arg2: memref<1x64x512xbf16, #tpu.memory_space<vmem>>, %arg3: memref<64x1xf32, #tpu.memory_space<vmem>>, %arg4: memref<64x1xf32, #tpu.memory_space<vmem>>, %arg5: memref<1x64x1xf32, #tpu.memory_space<vmem>>, %arg6: memref<64x1xf32, #tpu.memory_space<vmem>>) attributes {dimension_semantics = [#tpu.dimension_semantics<arbitrary>, #tpu.dimension_semantics<arbitrary>], iteration_bounds = array<i64: 2, 2>, scalar_prefetch = 0 : i64, scratch_operands = 1 : i64, tpu.core_type = #tpu.core_type<tc>, window_params = [{transform_indices = @transform_0, window_bounds = array<i64: 1, 64, 512>}, {pipeline_mode = #tpu.pipeline_mode<synchronous>, transform_indices = @transform_1, window_bounds = array<i64: 64, 1>}, {pipeline_mode = #tpu.pipeline_mode<synchronous>, transform_indices = @transform_2, window_bounds = array<i64: 64, 1>}, {transform_indices = @transform_3, window_bounds = array<i64: 1, 64, 1>}]} {
    %c0_i32 = arith.constant 0 : i32
    %0 = arith.cmpi eq, %arg1, %c0_i32 : i32
    %1 = arith.extui %0 : i1 to i32
    %c0_i32_0 = arith.constant 0 : i32
    %2 = arith.cmpi ne, %1, %c0_i32_0 : i32
    scf.if %2 {
      %cst_12 = arith.constant 0xFF800000 : f32
      %20 = vector.broadcast %cst_12 : f32 to vector<64x1xf32>
      %c0_13 = arith.constant 0 : index
      %c0_14 = arith.constant 0 : index
      %21 = vector.load %arg6[%c0_13, %c0_14] : memref<64x1xf32, #tpu.memory_space<vmem>>, vector<64x1xf32>
      tpu.vector_store %arg6[%c0_13, %c0_14], %20 {strides = array<i32>} : memref<64x1xf32, #tpu.memory_space<vmem>>, vector<64x1xf32>,
    } else {
    }
    %c0 = arith.constant 0 : index
    %c0_1 = arith.constant 0 : index
    %c0_2 = arith.constant 0 : index
    %3 = vector.load %arg2[%c0, %c0_1, %c0_2] : memref<1x64x512xbf16, #tpu.memory_space<vmem>>, vector<1x64x512xbf16>
    %4 = vector.shape_cast %3 : vector<1x64x512xbf16> to vector<64x512xbf16>
    %5 = arith.extf %4 : vector<64x512xbf16> to vector<64x512xf32>
    %c0_3 = arith.constant 0 : index
    %c0_4 = arith.constant 0 : index
    %6 = vector.load %arg3[%c0_3, %c0_4] : memref<64x1xf32, #tpu.memory_space<vmem>>, vector<64x1xf32>
    %7 = vector.broadcast %6 : vector<64x1xf32> to vector<64x512xf32>
    %8 = arith.mulf %5, %7 : vector<64x512xf32>
    %c0_5 = arith.constant 0 : index
    %c0_6 = arith.constant 0 : index
    %9 = vector.load %arg4[%c0_5, %c0_6] : memref<64x1xf32, #tpu.memory_space<vmem>>, vector<64x1xf32>
    %10 = vector.broadcast %9 : vector<64x1xf32> to vector<64x512xf32>
    %11 = arith.addf %8, %10 : vector<64x512xf32>
    %c0_7 = arith.constant 0 : index
    %c0_8 = arith.constant 0 : index
    %12 = vector.load %arg6[%c0_7, %c0_8] : memref<64x1xf32, #tpu.memory_space<vmem>>, vector<64x1xf32>
    %cst = arith.constant dense<0xFF800000> : vector<64xf32>
    %13 = vector.multi_reduction <maximumf>, %11, %cst [1] : vector<64x512xf32> to vector<64xf32>
    %14 = vector.shape_cast %13 : vector<64xf32> to vector<64x1xf32>
    %15 = arith.maximumf %12, %14 : vector<64x1xf32>
    %c0_9 = arith.constant 0 : index
    %c0_10 = arith.constant 0 : index
    %16 = vector.load %arg6[%c0_9, %c0_10] : memref<64x1xf32, #tpu.memory_space<vmem>>, vector<64x1xf32>
    tpu.vector_store %arg6[%c0_9, %c0_10], %15 {strides = array<i32>} : memref<64x1xf32, #tpu.memory_space<vmem>>, vector<64x1xf32>,
    %c1_i32 = arith.constant 1 : i32
    %17 = arith.cmpi eq, %arg1, %c1_i32 : i32
    %18 = arith.extui %17 : i1 to i32
    %c0_i32_11 = arith.constant 0 : i32
    %19 = arith.cmpi ne, %18, %c0_i32_11 : i32
    scf.if %19 {
      %c0_12 = arith.constant 0 : index
      %c0_13 = arith.constant 0 : index
      %20 = vector.load %arg6[%c0_12, %c0_13] : memref<64x1xf32, #tpu.memory_space<vmem>>, vector<64x1xf32>
      %c0_14 = arith.constant 0 : index
      %c0_15 = arith.constant 0 : index
      %c0_16 = arith.constant 0 : index
      %21 = vector.load %arg5[%c0_14, %c0_15, %c0_16] : memref<1x64x1xf32, #tpu.memory_space<vmem>>, vector<1x64x1xf32>
      %22 = vector.shape_cast %21 : vector<1x64x1xf32> to vector<64x1xf32>
      %23 = vector.shape_cast %20 : vector<64x1xf32> to vector<1x64x1xf32>
      tpu.vector_store %arg5[%c0_14, %c0_15, %c0_16], %23 {strides = array<i32>} : memref<1x64x1xf32, #tpu.memory_space<vmem>>, vector<1x64x1xf32>,
    } else {
    }
    return
  }
  func.func @transform_0(%arg0: i32, %arg1: i32) -> (i32, i32, i32) {
    %c2_i32 = arith.constant 2 : i32
    %0 = arith.muli %arg0, %c2_i32 : i32
    %1 = arith.addi %0, %arg1 : i32
    %c0_i32 = arith.constant 0 : i32
    %c0_i32_0 = arith.constant 0 : i32
    %c0_i32_1 = arith.constant 0 : i32
    return %c0_i32, %c0_i32_0, %1 : i32, i32, i32
  }
  func.func @transform_1(%arg0: i32, %arg1: i32) -> (i32, i32) {
    %c0_i32 = arith.constant 0 : i32
    %c0_i32_0 = arith.constant 0 : i32
    %c0_i32_1 = arith.constant 0 : i32
    return %c0_i32, %c0_i32_0 : i32, i32
  }
  func.func @transform_2(%arg0: i32, %arg1: i32) -> (i32, i32) {
    %c0_i32 = arith.constant 0 : i32
    %c0_i32_0 = arith.constant 0 : i32
    %c0_i32_1 = arith.constant 0 : i32
    return %c0_i32, %c0_i32_0 : i32, i32
  }
  func.func @transform_3(%arg0: i32, %arg1: i32) -> (i32, i32, i32) {
    %c0_i32 = arith.constant 0 : i32
    %c0_i32_0 = arith.constant 0 : i32
    %c0_i32_1 = arith.constant 0 : i32
    return %arg0, %c0_i32, %c0_i32_0 : i32, i32, i32
  }
}

module attributes {stable_mosaic.version = 11 : i64} {
  func.func @_fc_head_kernel(%arg0: memref<64x2xf32, #tpu.memory_space<vmem>>, %arg1: memref<32x64xbf16, #tpu.memory_space<vmem>>, %arg2: memref<32x1xf32, #tpu.memory_space<vmem>>, %arg3: memref<32x1xf32, #tpu.memory_space<vmem>>, %arg4: memref<32x1xf32, #tpu.memory_space<vmem>>, %arg5: memref<32x2xf32, #tpu.memory_space<vmem>>) attributes {dimension_semantics = [], scalar_prefetch = 0 : i64, scratch_operands = 0 : i64, tpu.core_type = #tpu.core_type<tc>} {
    %c0 = arith.constant 0 : index
    %c0_0 = arith.constant 0 : index
    %0 = vector.load %arg0[%c0, %c0_0] : memref<64x2xf32, #tpu.memory_space<vmem>>, vector<64x2xf32>
    %c0_1 = arith.constant 0 : index
    %c0_2 = arith.constant 0 : index
    %1 = vector.load %arg1[%c0_1, %c0_2] : memref<32x64xbf16, #tpu.memory_space<vmem>>, vector<32x64xbf16>
    %2 = arith.truncf %0 : vector<64x2xf32> to vector<64x2xbf16>
    %cst = arith.constant dense<0.000000e+00> : vector<32x2xf32>
    %3 = tpu.matmul %1, %2, %cst {dimension_numbers = #tpu.dot_dimension_numbers<[1], [0], [0], [1], [0, 0, 1, 1], [], []>} : vector<32x64xbf16>, vector<64x2xbf16>, vector<32x2xf32> -> vector<32x2xf32>
    %c0_3 = arith.constant 0 : index
    %c0_4 = arith.constant 0 : index
    %4 = vector.load %arg2[%c0_3, %c0_4] : memref<32x1xf32, #tpu.memory_space<vmem>>, vector<32x1xf32>
    %5 = vector.broadcast %4 : vector<32x1xf32> to vector<32x2xf32>
    %6 = arith.addf %3, %5 : vector<32x2xf32>
    %cst_5 = arith.constant dense<0.000000e+00> : vector<32xf32>
    %7 = vector.multi_reduction <add>, %6, %cst_5 [1] : vector<32x2xf32> to vector<32xf32>
    %8 = vector.shape_cast %7 : vector<32xf32> to vector<32x1xf32>
    %cst_6 = arith.constant 5.000000e-01 : f32
    %9 = vector.broadcast %cst_6 : f32 to vector<32x1xf32>
    %10 = arith.mulf %8, %9 : vector<32x1xf32>
    %11 = arith.mulf %6, %6 : vector<32x2xf32>
    %cst_7 = arith.constant dense<0.000000e+00> : vector<32xf32>
    %12 = vector.multi_reduction <add>, %11, %cst_7 [1] : vector<32x2xf32> to vector<32xf32>
    %13 = vector.shape_cast %12 : vector<32xf32> to vector<32x1xf32>
    %cst_8 = arith.constant 5.000000e-01 : f32
    %14 = vector.broadcast %cst_8 : f32 to vector<32x1xf32>
    %15 = arith.mulf %13, %14 : vector<32x1xf32>
    %16 = arith.mulf %10, %10 : vector<32x1xf32>
    %17 = arith.subf %15, %16 : vector<32x1xf32>
    %cst_9 = arith.constant 0.000000e+00 : f32
    %18 = vector.broadcast %cst_9 : f32 to vector<32x1xf32>
    %19 = arith.maximumf %17, %18 : vector<32x1xf32>
    %c0_10 = arith.constant 0 : index
    %c0_11 = arith.constant 0 : index
    %20 = vector.load %arg3[%c0_10, %c0_11] : memref<32x1xf32, #tpu.memory_space<vmem>>, vector<32x1xf32>
    %cst_12 = arith.constant 9.99999974E-6 : f32
    %21 = vector.broadcast %cst_12 : f32 to vector<32x1xf32>
    %22 = arith.addf %19, %21 : vector<32x1xf32>
    %23 = math.rsqrt %22 : vector<32x1xf32>
    %24 = arith.mulf %20, %23 : vector<32x1xf32>
    %c0_13 = arith.constant 0 : index
    %c0_14 = arith.constant 0 : index
    %25 = vector.load %arg4[%c0_13, %c0_14] : memref<32x1xf32, #tpu.memory_space<vmem>>, vector<32x1xf32>
    %26 = arith.mulf %10, %24 : vector<32x1xf32>
    %27 = arith.subf %25, %26 : vector<32x1xf32>
    %28 = vector.broadcast %24 : vector<32x1xf32> to vector<32x2xf32>
    %29 = arith.mulf %6, %28 : vector<32x2xf32>
    %30 = vector.broadcast %27 : vector<32x1xf32> to vector<32x2xf32>
    %31 = arith.addf %29, %30 : vector<32x2xf32>
    %cst_15 = arith.constant 0.000000e+00 : f32
    %32 = vector.broadcast %cst_15 : f32 to vector<32x2xf32>
    %33 = arith.maximumf %31, %32 : vector<32x2xf32>
    %c0_16 = arith.constant 0 : index
    %c0_17 = arith.constant 0 : index
    %34 = vector.load %arg5[%c0_16, %c0_17] : memref<32x2xf32, #tpu.memory_space<vmem>>, vector<32x2xf32>
    tpu.vector_store %arg5[%c0_16, %c0_17], %33 {strides = array<i32>} : memref<32x2xf32, #tpu.memory_space<vmem>>, vector<32x2xf32>,
    return
  }
}

module attributes {stable_mosaic.version = 11 : i64} {
  func.func @_bnrelu_conv_stats_kernel(%arg0: i32, %arg1: i32, %arg2: memref<1x34x512xbf16, #tpu.memory_space<vmem>>, %arg3: memref<1x34x1xf32, #tpu.memory_space<vmem>>, %arg4: memref<1x34x1xf32, #tpu.memory_space<vmem>>, %arg5: memref<1x17x34xbf16, #tpu.memory_space<vmem>>, %arg6: memref<1x17x1xf32, #tpu.memory_space<vmem>>, %arg7: memref<1x17x512xbf16, #tpu.memory_space<vmem>>, %arg8: memref<1x17x1xf32, #tpu.memory_space<vmem>>, %arg9: memref<1x17x1xf32, #tpu.memory_space<vmem>>) attributes {dimension_semantics = [#tpu.dimension_semantics<parallel>, #tpu.dimension_semantics<arbitrary>], iteration_bounds = array<i64: 2, 1>, scalar_prefetch = 0 : i64, scratch_operands = 0 : i64, tpu.core_type = #tpu.core_type<tc>, window_params = [{transform_indices = @transform_0, window_bounds = array<i64: 1, 34, 512>}, {transform_indices = @transform_1, window_bounds = array<i64: 1, 34, 1>}, {transform_indices = @transform_2, window_bounds = array<i64: 1, 34, 1>}, {transform_indices = @transform_3, window_bounds = array<i64: 1, 17, 34>}, {transform_indices = @transform_4, window_bounds = array<i64: 1, 17, 1>}, {transform_indices = @transform_5, window_bounds = array<i64: 1, 17, 512>}, {transform_indices = @transform_6, window_bounds = array<i64: 1, 17, 1>}, {transform_indices = @transform_7, window_bounds = array<i64: 1, 17, 1>}]} {
    %c0 = arith.constant 0 : index
    %c0_0 = arith.constant 0 : index
    %c0_1 = arith.constant 0 : index
    %0 = vector.load %arg2[%c0, %c0_0, %c0_1] : memref<1x34x512xbf16, #tpu.memory_space<vmem>>, vector<1x34x512xbf16>
    %1 = vector.shape_cast %0 : vector<1x34x512xbf16> to vector<34x512xbf16>
    %2 = arith.extf %1 : vector<34x512xbf16> to vector<34x512xf32>
    %c0_2 = arith.constant 0 : index
    %c0_3 = arith.constant 0 : index
    %c0_4 = arith.constant 0 : index
    %3 = vector.load %arg3[%c0_2, %c0_3, %c0_4] : memref<1x34x1xf32, #tpu.memory_space<vmem>>, vector<1x34x1xf32>
    %4 = vector.shape_cast %3 : vector<1x34x1xf32> to vector<34x1xf32>
    %5 = vector.broadcast %4 : vector<34x1xf32> to vector<34x512xf32>
    %6 = arith.mulf %2, %5 : vector<34x512xf32>
    %c0_5 = arith.constant 0 : index
    %c0_6 = arith.constant 0 : index
    %c0_7 = arith.constant 0 : index
    %7 = vector.load %arg4[%c0_5, %c0_6, %c0_7] : memref<1x34x1xf32, #tpu.memory_space<vmem>>, vector<1x34x1xf32>
    %8 = vector.shape_cast %7 : vector<1x34x1xf32> to vector<34x1xf32>
    %9 = vector.broadcast %8 : vector<34x1xf32> to vector<34x512xf32>
    %10 = arith.addf %6, %9 : vector<34x512xf32>
    %cst = arith.constant 0.000000e+00 : f32
    %11 = vector.broadcast %cst : f32 to vector<34x512xf32>
    %12 = arith.maximumf %10, %11 : vector<34x512xf32>
    %13 = arith.truncf %12 : vector<34x512xf32> to vector<34x512xbf16>
    %c0_8 = arith.constant 0 : index
    %c0_9 = arith.constant 0 : index
    %c0_10 = arith.constant 0 : index
    %14 = vector.load %arg5[%c0_8, %c0_9, %c0_10] : memref<1x17x34xbf16, #tpu.memory_space<vmem>>, vector<1x17x34xbf16>
    %15 = vector.shape_cast %14 : vector<1x17x34xbf16> to vector<17x34xbf16>
    %cst_11 = arith.constant dense<0.000000e+00> : vector<17x512xf32>
    %16 = tpu.matmul %15, %13, %cst_11 {dimension_numbers = #tpu.dot_dimension_numbers<[1], [0], [0], [1], [0, 0, 1, 1], [], []>} : vector<17x34xbf16>, vector<34x512xbf16>, vector<17x512xf32> -> vector<17x512xf32>
    %c0_12 = arith.constant 0 : index
    %c0_13 = arith.constant 0 : index
    %c0_14 = arith.constant 0 : index
    %17 = vector.load %arg6[%c0_12, %c0_13, %c0_14] : memref<1x17x1xf32, #tpu.memory_space<vmem>>, vector<1x17x1xf32>
    %18 = vector.shape_cast %17 : vector<1x17x1xf32> to vector<17x1xf32>
    %19 = vector.broadcast %18 : vector<17x1xf32> to vector<17x512xf32>
    %20 = arith.addf %16, %19 : vector<17x512xf32>
    %21 = arith.truncf %20 : vector<17x512xf32> to vector<17x512xbf16>
    %c0_15 = arith.constant 0 : index
    %c0_16 = arith.constant 0 : index
    %c0_17 = arith.constant 0 : index
    %22 = vector.load %arg7[%c0_15, %c0_16, %c0_17] : memref<1x17x512xbf16, #tpu.memory_space<vmem>>, vector<1x17x512xbf16>
    %23 = vector.shape_cast %22 : vector<1x17x512xbf16> to vector<17x512xbf16>
    %24 = vector.shape_cast %21 : vector<17x512xbf16> to vector<1x17x512xbf16>
    tpu.vector_store %arg7[%c0_15, %c0_16, %c0_17], %24 {strides = array<i32>} : memref<1x17x512xbf16, #tpu.memory_space<vmem>>, vector<1x17x512xbf16>,
    %c0_i32 = arith.constant 0 : i32
    %25 = arith.cmpi eq, %arg1, %c0_i32 : i32
    %26 = arith.extui %25 : i1 to i32
    %c0_i32_18 = arith.constant 0 : i32
    %27 = arith.cmpi ne, %26, %c0_i32_18 : i32
    scf.if %27 {
      %cst_33 = arith.constant 0.000000e+00 : f32
      %45 = vector.broadcast %cst_33 : f32 to vector<17x1xf32>
      %c0_34 = arith.constant 0 : index
      %c0_35 = arith.constant 0 : index
      %c0_36 = arith.constant 0 : index
      %46 = vector.load %arg8[%c0_34, %c0_35, %c0_36] : memref<1x17x1xf32, #tpu.memory_space<vmem>>, vector<1x17x1xf32>
      %47 = vector.shape_cast %46 : vector<1x17x1xf32> to vector<17x1xf32>
      %48 = vector.shape_cast %45 : vector<17x1xf32> to vector<1x17x1xf32>
      tpu.vector_store %arg8[%c0_34, %c0_35, %c0_36], %48 {strides = array<i32>} : memref<1x17x1xf32, #tpu.memory_space<vmem>>, vector<1x17x1xf32>,
      %cst_37 = arith.constant 0.000000e+00 : f32
      %49 = vector.broadcast %cst_37 : f32 to vector<17x1xf32>
      %c0_38 = arith.constant 0 : index
      %c0_39 = arith.constant 0 : index
      %c0_40 = arith.constant 0 : index
      %50 = vector.load %arg9[%c0_38, %c0_39, %c0_40] : memref<1x17x1xf32, #tpu.memory_space<vmem>>, vector<1x17x1xf32>
      %51 = vector.shape_cast %50 : vector<1x17x1xf32> to vector<17x1xf32>
      %52 = vector.shape_cast %49 : vector<17x1xf32> to vector<1x17x1xf32>
      tpu.vector_store %arg9[%c0_38, %c0_39, %c0_40], %52 {strides = array<i32>} : memref<1x17x1xf32, #tpu.memory_space<vmem>>, vector<1x17x1xf32>,
    } else {
    }
    %c0_19 = arith.constant 0 : index
    %c0_20 = arith.constant 0 : index
    %c0_21 = arith.constant 0 : index
    %28 = vector.load %arg8[%c0_19, %c0_20, %c0_21] : memref<1x17x1xf32, #tpu.memory_space<vmem>>, vector<1x17x1xf32>
    %29 = vector.shape_cast %28 : vector<1x17x1xf32> to vector<17x1xf32>
    %cst_22 = arith.constant dense<0.000000e+00> : vector<17xf32>
    %30 = vector.multi_reduction <add>, %20, %cst_22 [1] : vector<17x512xf32> to vector<17xf32>
    %31 = vector.shape_cast %30 : vector<17xf32> to vector<17x1xf32>
    %32 = arith.addf %29, %31 : vector<17x1xf32>
    %c0_23 = arith.constant 0 : index
    %c0_24 = arith.constant 0 : index
    %c0_25 = arith.constant 0 : index
    %33 = vector.load %arg8[%c0_23, %c0_24, %c0_25] : memref<1x17x1xf32, #tpu.memory_space<vmem>>, vector<1x17x1xf32>
    %34 = vector.shape_cast %33 : vector<1x17x1xf32> to vector<17x1xf32>
    %35 = vector.shape_cast %32 : vector<17x1xf32> to vector<1x17x1xf32>
    tpu.vector_store %arg8[%c0_23, %c0_24, %c0_25], %35 {strides = array<i32>} : memref<1x17x1xf32, #tpu.memory_space<vmem>>, vector<1x17x1xf32>,
    %c0_26 = arith.constant 0 : index
    %c0_27 = arith.constant 0 : index
    %c0_28 = arith.constant 0 : index
    %36 = vector.load %arg9[%c0_26, %c0_27, %c0_28] : memref<1x17x1xf32, #tpu.memory_space<vmem>>, vector<1x17x1xf32>
    %37 = vector.shape_cast %36 : vector<1x17x1xf32> to vector<17x1xf32>
    %38 = arith.mulf %20, %20 : vector<17x512xf32>
    %cst_29 = arith.constant dense<0.000000e+00> : vector<17xf32>
    %39 = vector.multi_reduction <add>, %38, %cst_29 [1] : vector<17x512xf32> to vector<17xf32>
    %40 = vector.shape_cast %39 : vector<17xf32> to vector<17x1xf32>
    %41 = arith.addf %37, %40 : vector<17x1xf32>
    %c0_30 = arith.constant 0 : index
    %c0_31 = arith.constant 0 : index
    %c0_32 = arith.constant 0 : index
    %42 = vector.load %arg9[%c0_30, %c0_31, %c0_32] : memref<1x17x1xf32, #tpu.memory_space<vmem>>, vector<1x17x1xf32>
    %43 = vector.shape_cast %42 : vector<1x17x1xf32> to vector<17x1xf32>
    %44 = vector.shape_cast %41 : vector<17x1xf32> to vector<1x17x1xf32>
    tpu.vector_store %arg9[%c0_30, %c0_31, %c0_32], %44 {strides = array<i32>} : memref<1x17x1xf32, #tpu.memory_space<vmem>>, vector<1x17x1xf32>,
    return
  }
  func.func @transform_0(%arg0: i32, %arg1: i32) -> (i32, i32, i32) {
    %c0_i32 = arith.constant 0 : i32
    %c0_i32_0 = arith.constant 0 : i32
    return %arg0, %c0_i32, %arg1 : i32, i32, i32
  }
  func.func @transform_1(%arg0: i32, %arg1: i32) -> (i32, i32, i32) {
    %c0_i32 = arith.constant 0 : i32
    %c0_i32_0 = arith.constant 0 : i32
    %c0_i32_1 = arith.constant 0 : i32
    return %arg0, %c0_i32, %c0_i32_0 : i32, i32, i32
  }
  func.func @transform_2(%arg0: i32, %arg1: i32) -> (i32, i32, i32) {
    %c0_i32 = arith.constant 0 : i32
    %c0_i32_0 = arith.constant 0 : i32
    %c0_i32_1 = arith.constant 0 : i32
    return %arg0, %c0_i32, %c0_i32_0 : i32, i32, i32
  }
  func.func @transform_3(%arg0: i32, %arg1: i32) -> (i32, i32, i32) {
    %c0_i32 = arith.constant 0 : i32
    %c0_i32_0 = arith.constant 0 : i32
    %c0_i32_1 = arith.constant 0 : i32
    return %arg0, %c0_i32, %c0_i32_0 : i32, i32, i32
  }
  func.func @transform_4(%arg0: i32, %arg1: i32) -> (i32, i32, i32) {
    %c0_i32 = arith.constant 0 : i32
    %c0_i32_0 = arith.constant 0 : i32
    %c0_i32_1 = arith.constant 0 : i32
    return %arg0, %c0_i32, %c0_i32_0 : i32, i32, i32
  }
  func.func @transform_5(%arg0: i32, %arg1: i32) -> (i32, i32, i32) {
    %c0_i32 = arith.constant 0 : i32
    %c0_i32_0 = arith.constant 0 : i32
    return %arg0, %c0_i32, %arg1 : i32, i32, i32
  }
  func.func @transform_6(%arg0: i32, %arg1: i32) -> (i32, i32, i32) {
    %c0_i32 = arith.constant 0 : i32
    %c0_i32_0 = arith.constant 0 : i32
    %c0_i32_1 = arith.constant 0 : i32
    return %arg0, %c0_i32, %c0_i32_0 : i32, i32, i32
  }
  func.func @transform_7(%arg0: i32, %arg1: i32) -> (i32, i32, i32) {
    %c0_i32 = arith.constant 0 : i32
    %c0_i32_0 = arith.constant 0 : i32
    %c0_i32_1 = arith.constant 0 : i32
    return %arg0, %c0_i32, %c0_i32_0 : i32, i32, i32
  }
}

module attributes {stable_mosaic.version = 11 : i64} {
  func.func @_conv_stats_kernel(%arg0: i32, %arg1: i32, %arg2: memref<1x2x512xf32, #tpu.memory_space<vmem>>, %arg3: memref<2x512xbf16, #tpu.memory_space<vmem>>, %arg4: memref<1x34x2xbf16, #tpu.memory_space<vmem>>, %arg5: memref<1x34x2xbf16, #tpu.memory_space<vmem>>, %arg6: memref<1x34x1xf32, #tpu.memory_space<vmem>>, %arg7: memref<1x34x512xbf16, #tpu.memory_space<vmem>>, %arg8: memref<1x34x1xf32, #tpu.memory_space<vmem>>, %arg9: memref<1x34x1xf32, #tpu.memory_space<vmem>>) attributes {dimension_semantics = [#tpu.dimension_semantics<parallel>, #tpu.dimension_semantics<arbitrary>], iteration_bounds = array<i64: 2, 1>, scalar_prefetch = 0 : i64, scratch_operands = 0 : i64, tpu.core_type = #tpu.core_type<tc>, window_params = [{transform_indices = @transform_0, window_bounds = array<i64: 1, 2, 512>}, {transform_indices = @transform_1, window_bounds = array<i64: 2, 512>}, {transform_indices = @transform_2, window_bounds = array<i64: 1, 34, 2>}, {transform_indices = @transform_3, window_bounds = array<i64: 1, 34, 2>}, {transform_indices = @transform_4, window_bounds = array<i64: 1, 34, 1>}, {transform_indices = @transform_5, window_bounds = array<i64: 1, 34, 512>}, {transform_indices = @transform_6, window_bounds = array<i64: 1, 34, 1>}, {transform_indices = @transform_7, window_bounds = array<i64: 1, 34, 1>}]} {
    %c0 = arith.constant 0 : index
    %c0_0 = arith.constant 0 : index
    %c0_1 = arith.constant 0 : index
    %0 = vector.load %arg2[%c0, %c0_0, %c0_1] : memref<1x2x512xf32, #tpu.memory_space<vmem>>, vector<1x2x512xf32>
    %1 = vector.shape_cast %0 : vector<1x2x512xf32> to vector<2x512xf32>
    %c0_2 = arith.constant 0 : index
    %c0_3 = arith.constant 0 : index
    %c0_4 = arith.constant 0 : index
    %2 = vector.load %arg4[%c0_2, %c0_3, %c0_4] : memref<1x34x2xbf16, #tpu.memory_space<vmem>>, vector<1x34x2xbf16>
    %3 = vector.shape_cast %2 : vector<1x34x2xbf16> to vector<34x2xbf16>
    %4 = arith.truncf %1 : vector<2x512xf32> to vector<2x512xbf16>
    %cst = arith.constant dense<0.000000e+00> : vector<34x512xf32>
    %5 = tpu.matmul %3, %4, %cst {dimension_numbers = #tpu.dot_dimension_numbers<[1], [0], [0], [1], [0, 0, 1, 1], [], []>} : vector<34x2xbf16>, vector<2x512xbf16>, vector<34x512xf32> -> vector<34x512xf32>
    %c0_5 = arith.constant 0 : index
    %c0_6 = arith.constant 0 : index
    %6 = vector.load %arg3[%c0_5, %c0_6] : memref<2x512xbf16, #tpu.memory_space<vmem>>, vector<2x512xbf16>
    %c0_7 = arith.constant 0 : index
    %c0_8 = arith.constant 0 : index
    %c0_9 = arith.constant 0 : index
    %7 = vector.load %arg5[%c0_7, %c0_8, %c0_9] : memref<1x34x2xbf16, #tpu.memory_space<vmem>>, vector<1x34x2xbf16>
    %8 = vector.shape_cast %7 : vector<1x34x2xbf16> to vector<34x2xbf16>
    %cst_10 = arith.constant dense<0.000000e+00> : vector<34x512xf32>
    %9 = tpu.matmul %8, %6, %cst_10 {dimension_numbers = #tpu.dot_dimension_numbers<[1], [0], [0], [1], [0, 0, 1, 1], [], []>} : vector<34x2xbf16>, vector<2x512xbf16>, vector<34x512xf32> -> vector<34x512xf32>
    %10 = arith.addf %5, %9 : vector<34x512xf32>
    %c0_11 = arith.constant 0 : index
    %c0_12 = arith.constant 0 : index
    %c0_13 = arith.constant 0 : index
    %11 = vector.load %arg6[%c0_11, %c0_12, %c0_13] : memref<1x34x1xf32, #tpu.memory_space<vmem>>, vector<1x34x1xf32>
    %12 = vector.shape_cast %11 : vector<1x34x1xf32> to vector<34x1xf32>
    %13 = vector.broadcast %12 : vector<34x1xf32> to vector<34x512xf32>
    %14 = arith.addf %10, %13 : vector<34x512xf32>
    %15 = arith.truncf %14 : vector<34x512xf32> to vector<34x512xbf16>
    %c0_14 = arith.constant 0 : index
    %c0_15 = arith.constant 0 : index
    %c0_16 = arith.constant 0 : index
    %16 = vector.load %arg7[%c0_14, %c0_15, %c0_16] : memref<1x34x512xbf16, #tpu.memory_space<vmem>>, vector<1x34x512xbf16>
    %17 = vector.shape_cast %16 : vector<1x34x512xbf16> to vector<34x512xbf16>
    %18 = vector.shape_cast %15 : vector<34x512xbf16> to vector<1x34x512xbf16>
    tpu.vector_store %arg7[%c0_14, %c0_15, %c0_16], %18 {strides = array<i32>} : memref<1x34x512xbf16, #tpu.memory_space<vmem>>, vector<1x34x512xbf16>,
    %c0_i32 = arith.constant 0 : i32
    %19 = arith.cmpi eq, %arg1, %c0_i32 : i32
    %20 = arith.extui %19 : i1 to i32
    %c0_i32_17 = arith.constant 0 : i32
    %21 = arith.cmpi ne, %20, %c0_i32_17 : i32
    scf.if %21 {
      %cst_32 = arith.constant 0.000000e+00 : f32
      %39 = vector.broadcast %cst_32 : f32 to vector<34x1xf32>
      %c0_33 = arith.constant 0 : index
      %c0_34 = arith.constant 0 : index
      %c0_35 = arith.constant 0 : index
      %40 = vector.load %arg8[%c0_33, %c0_34, %c0_35] : memref<1x34x1xf32, #tpu.memory_space<vmem>>, vector<1x34x1xf32>
      %41 = vector.shape_cast %40 : vector<1x34x1xf32> to vector<34x1xf32>
      %42 = vector.shape_cast %39 : vector<34x1xf32> to vector<1x34x1xf32>
      tpu.vector_store %arg8[%c0_33, %c0_34, %c0_35], %42 {strides = array<i32>} : memref<1x34x1xf32, #tpu.memory_space<vmem>>, vector<1x34x1xf32>,
      %cst_36 = arith.constant 0.000000e+00 : f32
      %43 = vector.broadcast %cst_36 : f32 to vector<34x1xf32>
      %c0_37 = arith.constant 0 : index
      %c0_38 = arith.constant 0 : index
      %c0_39 = arith.constant 0 : index
      %44 = vector.load %arg9[%c0_37, %c0_38, %c0_39] : memref<1x34x1xf32, #tpu.memory_space<vmem>>, vector<1x34x1xf32>
      %45 = vector.shape_cast %44 : vector<1x34x1xf32> to vector<34x1xf32>
      %46 = vector.shape_cast %43 : vector<34x1xf32> to vector<1x34x1xf32>
      tpu.vector_store %arg9[%c0_37, %c0_38, %c0_39], %46 {strides = array<i32>} : memref<1x34x1xf32, #tpu.memory_space<vmem>>, vector<1x34x1xf32>,
    } else {
    }
    %c0_18 = arith.constant 0 : index
    %c0_19 = arith.constant 0 : index
    %c0_20 = arith.constant 0 : index
    %22 = vector.load %arg8[%c0_18, %c0_19, %c0_20] : memref<1x34x1xf32, #tpu.memory_space<vmem>>, vector<1x34x1xf32>
    %23 = vector.shape_cast %22 : vector<1x34x1xf32> to vector<34x1xf32>
    %cst_21 = arith.constant dense<0.000000e+00> : vector<34xf32>
    %24 = vector.multi_reduction <add>, %14, %cst_21 [1] : vector<34x512xf32> to vector<34xf32>
    %25 = vector.shape_cast %24 : vector<34xf32> to vector<34x1xf32>
    %26 = arith.addf %23, %25 : vector<34x1xf32>
    %c0_22 = arith.constant 0 : index
    %c0_23 = arith.constant 0 : index
    %c0_24 = arith.constant 0 : index
    %27 = vector.load %arg8[%c0_22, %c0_23, %c0_24] : memref<1x34x1xf32, #tpu.memory_space<vmem>>, vector<1x34x1xf32>
    %28 = vector.shape_cast %27 : vector<1x34x1xf32> to vector<34x1xf32>
    %29 = vector.shape_cast %26 : vector<34x1xf32> to vector<1x34x1xf32>
    tpu.vector_store %arg8[%c0_22, %c0_23, %c0_24], %29 {strides = array<i32>} : memref<1x34x1xf32, #tpu.memory_space<vmem>>, vector<1x34x1xf32>,
    %c0_25 = arith.constant 0 : index
    %c0_26 = arith.constant 0 : index
    %c0_27 = arith.constant 0 : index
    %30 = vector.load %arg9[%c0_25, %c0_26, %c0_27] : memref<1x34x1xf32, #tpu.memory_space<vmem>>, vector<1x34x1xf32>
    %31 = vector.shape_cast %30 : vector<1x34x1xf32> to vector<34x1xf32>
    %32 = arith.mulf %14, %14 : vector<34x512xf32>
    %cst_28 = arith.constant dense<0.000000e+00> : vector<34xf32>
    %33 = vector.multi_reduction <add>, %32, %cst_28 [1] : vector<34x512xf32> to vector<34xf32>
    %34 = vector.shape_cast %33 : vector<34xf32> to vector<34x1xf32>
    %35 = arith.addf %31, %34 : vector<34x1xf32>
    %c0_29 = arith.constant 0 : index
    %c0_30 = arith.constant 0 : index
    %c0_31 = arith.constant 0 : index
    %36 = vector.load %arg9[%c0_29, %c0_30, %c0_31] : memref<1x34x1xf32, #tpu.memory_space<vmem>>, vector<1x34x1xf32>
    %37 = vector.shape_cast %36 : vector<1x34x1xf32> to vector<34x1xf32>
    %38 = vector.shape_cast %35 : vector<34x1xf32> to vector<1x34x1xf32>
    tpu.vector_store %arg9[%c0_29, %c0_30, %c0_31], %38 {strides = array<i32>} : memref<1x34x1xf32, #tpu.memory_space<vmem>>, vector<1x34x1xf32>,
    return
  }
  func.func @transform_0(%arg0: i32, %arg1: i32) -> (i32, i32, i32) {
    %c0_i32 = arith.constant 0 : i32
    %c0_i32_0 = arith.constant 0 : i32
    return %arg0, %c0_i32, %arg1 : i32, i32, i32
  }
  func.func @transform_1(%arg0: i32, %arg1: i32) -> (i32, i32) {
    %c0_i32 = arith.constant 0 : i32
    %c0_i32_0 = arith.constant 0 : i32
    return %c0_i32, %arg1 : i32, i32
  }
  func.func @transform_2(%arg0: i32, %arg1: i32) -> (i32, i32, i32) {
    %c0_i32 = arith.constant 0 : i32
    %c0_i32_0 = arith.constant 0 : i32
    %c0_i32_1 = arith.constant 0 : i32
    return %arg0, %c0_i32, %c0_i32_0 : i32, i32, i32
  }
  func.func @transform_3(%arg0: i32, %arg1: i32) -> (i32, i32, i32) {
    %c0_i32 = arith.constant 0 : i32
    %c0_i32_0 = arith.constant 0 : i32
    %c0_i32_1 = arith.constant 0 : i32
    return %arg0, %c0_i32, %c0_i32_0 : i32, i32, i32
  }
  func.func @transform_4(%arg0: i32, %arg1: i32) -> (i32, i32, i32) {
    %c0_i32 = arith.constant 0 : i32
    %c0_i32_0 = arith.constant 0 : i32
    %c0_i32_1 = arith.constant 0 : i32
    return %arg0, %c0_i32, %c0_i32_0 : i32, i32, i32
  }
  func.func @transform_5(%arg0: i32, %arg1: i32) -> (i32, i32, i32) {
    %c0_i32 = arith.constant 0 : i32
    %c0_i32_0 = arith.constant 0 : i32
    return %arg0, %c0_i32, %arg1 : i32, i32, i32
  }
  func.func @transform_6(%arg0: i32, %arg1: i32) -> (i32, i32, i32) {
    %c0_i32 = arith.constant 0 : i32
    %c0_i32_0 = arith.constant 0 : i32
    %c0_i32_1 = arith.constant 0 : i32
    return %arg0, %c0_i32, %c0_i32_0 : i32, i32, i32
  }
  func.func @transform_7(%arg0: i32, %arg1: i32) -> (i32, i32, i32) {
    %c0_i32 = arith.constant 0 : i32
    %c0_i32_0 = arith.constant 0 : i32
    %c0_i32_1 = arith.constant 0 : i32
    return %arg0, %c0_i32, %c0_i32_0 : i32, i32, i32
  }
}

module attributes {stable_mosaic.version = 11 : i64} {
  func.func @_bnrelu_conv_stats_kernel(%arg0: i32, %arg1: i32, %arg2: memref<1x17x512xbf16, #tpu.memory_space<vmem>>, %arg3: memref<1x17x1xf32, #tpu.memory_space<vmem>>, %arg4: memref<1x17x1xf32, #tpu.memory_space<vmem>>, %arg5: memref<1x8x17xbf16, #tpu.memory_space<vmem>>, %arg6: memref<1x8x1xf32, #tpu.memory_space<vmem>>, %arg7: memref<1x8x512xbf16, #tpu.memory_space<vmem>>, %arg8: memref<1x8x1xf32, #tpu.memory_space<vmem>>, %arg9: memref<1x8x1xf32, #tpu.memory_space<vmem>>) attributes {dimension_semantics = [#tpu.dimension_semantics<parallel>, #tpu.dimension_semantics<arbitrary>], iteration_bounds = array<i64: 2, 1>, scalar_prefetch = 0 : i64, scratch_operands = 0 : i64, tpu.core_type = #tpu.core_type<tc>, window_params = [{transform_indices = @transform_0, window_bounds = array<i64: 1, 17, 512>}, {transform_indices = @transform_1, window_bounds = array<i64: 1, 17, 1>}, {transform_indices = @transform_2, window_bounds = array<i64: 1, 17, 1>}, {transform_indices = @transform_3, window_bounds = array<i64: 1, 8, 17>}, {transform_indices = @transform_4, window_bounds = array<i64: 1, 8, 1>}, {transform_indices = @transform_5, window_bounds = array<i64: 1, 8, 512>}, {transform_indices = @transform_6, window_bounds = array<i64: 1, 8, 1>}, {transform_indices = @transform_7, window_bounds = array<i64: 1, 8, 1>}]} {
    %c0 = arith.constant 0 : index
    %c0_0 = arith.constant 0 : index
    %c0_1 = arith.constant 0 : index
    %0 = vector.load %arg2[%c0, %c0_0, %c0_1] : memref<1x17x512xbf16, #tpu.memory_space<vmem>>, vector<1x17x512xbf16>
    %1 = vector.shape_cast %0 : vector<1x17x512xbf16> to vector<17x512xbf16>
    %2 = arith.extf %1 : vector<17x512xbf16> to vector<17x512xf32>
    %c0_2 = arith.constant 0 : index
    %c0_3 = arith.constant 0 : index
    %c0_4 = arith.constant 0 : index
    %3 = vector.load %arg3[%c0_2, %c0_3, %c0_4] : memref<1x17x1xf32, #tpu.memory_space<vmem>>, vector<1x17x1xf32>
    %4 = vector.shape_cast %3 : vector<1x17x1xf32> to vector<17x1xf32>
    %5 = vector.broadcast %4 : vector<17x1xf32> to vector<17x512xf32>
    %6 = arith.mulf %2, %5 : vector<17x512xf32>
    %c0_5 = arith.constant 0 : index
    %c0_6 = arith.constant 0 : index
    %c0_7 = arith.constant 0 : index
    %7 = vector.load %arg4[%c0_5, %c0_6, %c0_7] : memref<1x17x1xf32, #tpu.memory_space<vmem>>, vector<1x17x1xf32>
    %8 = vector.shape_cast %7 : vector<1x17x1xf32> to vector<17x1xf32>
    %9 = vector.broadcast %8 : vector<17x1xf32> to vector<17x512xf32>
    %10 = arith.addf %6, %9 : vector<17x512xf32>
    %cst = arith.constant 0.000000e+00 : f32
    %11 = vector.broadcast %cst : f32 to vector<17x512xf32>
    %12 = arith.maximumf %10, %11 : vector<17x512xf32>
    %13 = arith.truncf %12 : vector<17x512xf32> to vector<17x512xbf16>
    %c0_8 = arith.constant 0 : index
    %c0_9 = arith.constant 0 : index
    %c0_10 = arith.constant 0 : index
    %14 = vector.load %arg5[%c0_8, %c0_9, %c0_10] : memref<1x8x17xbf16, #tpu.memory_space<vmem>>, vector<1x8x17xbf16>
    %15 = vector.shape_cast %14 : vector<1x8x17xbf16> to vector<8x17xbf16>
    %cst_11 = arith.constant dense<0.000000e+00> : vector<8x512xf32>
    %16 = tpu.matmul %15, %13, %cst_11 {dimension_numbers = #tpu.dot_dimension_numbers<[1], [0], [0], [1], [0, 0, 1, 1], [], []>} : vector<8x17xbf16>, vector<17x512xbf16>, vector<8x512xf32> -> vector<8x512xf32>
    %c0_12 = arith.constant 0 : index
    %c0_13 = arith.constant 0 : index
    %c0_14 = arith.constant 0 : index
    %17 = vector.load %arg6[%c0_12, %c0_13, %c0_14] : memref<1x8x1xf32, #tpu.memory_space<vmem>>, vector<1x8x1xf32>
    %18 = vector.shape_cast %17 : vector<1x8x1xf32> to vector<8x1xf32>
    %19 = vector.broadcast %18 : vector<8x1xf32> to vector<8x512xf32>
    %20 = arith.addf %16, %19 : vector<8x512xf32>
    %21 = arith.truncf %20 : vector<8x512xf32> to vector<8x512xbf16>
    %c0_15 = arith.constant 0 : index
    %c0_16 = arith.constant 0 : index
    %c0_17 = arith.constant 0 : index
    %22 = vector.load %arg7[%c0_15, %c0_16, %c0_17] : memref<1x8x512xbf16, #tpu.memory_space<vmem>>, vector<1x8x512xbf16>
    %23 = vector.shape_cast %22 : vector<1x8x512xbf16> to vector<8x512xbf16>
    %24 = vector.shape_cast %21 : vector<8x512xbf16> to vector<1x8x512xbf16>
    tpu.vector_store %arg7[%c0_15, %c0_16, %c0_17], %24 {strides = array<i32>} : memref<1x8x512xbf16, #tpu.memory_space<vmem>>, vector<1x8x512xbf16>,
    %c0_i32 = arith.constant 0 : i32
    %25 = arith.cmpi eq, %arg1, %c0_i32 : i32
    %26 = arith.extui %25 : i1 to i32
    %c0_i32_18 = arith.constant 0 : i32
    %27 = arith.cmpi ne, %26, %c0_i32_18 : i32
    scf.if %27 {
      %cst_33 = arith.constant 0.000000e+00 : f32
      %45 = vector.broadcast %cst_33 : f32 to vector<8x1xf32>
      %c0_34 = arith.constant 0 : index
      %c0_35 = arith.constant 0 : index
      %c0_36 = arith.constant 0 : index
      %46 = vector.load %arg8[%c0_34, %c0_35, %c0_36] : memref<1x8x1xf32, #tpu.memory_space<vmem>>, vector<1x8x1xf32>
      %47 = vector.shape_cast %46 : vector<1x8x1xf32> to vector<8x1xf32>
      %48 = vector.shape_cast %45 : vector<8x1xf32> to vector<1x8x1xf32>
      tpu.vector_store %arg8[%c0_34, %c0_35, %c0_36], %48 {strides = array<i32>} : memref<1x8x1xf32, #tpu.memory_space<vmem>>, vector<1x8x1xf32>,
      %cst_37 = arith.constant 0.000000e+00 : f32
      %49 = vector.broadcast %cst_37 : f32 to vector<8x1xf32>
      %c0_38 = arith.constant 0 : index
      %c0_39 = arith.constant 0 : index
      %c0_40 = arith.constant 0 : index
      %50 = vector.load %arg9[%c0_38, %c0_39, %c0_40] : memref<1x8x1xf32, #tpu.memory_space<vmem>>, vector<1x8x1xf32>
      %51 = vector.shape_cast %50 : vector<1x8x1xf32> to vector<8x1xf32>
      %52 = vector.shape_cast %49 : vector<8x1xf32> to vector<1x8x1xf32>
      tpu.vector_store %arg9[%c0_38, %c0_39, %c0_40], %52 {strides = array<i32>} : memref<1x8x1xf32, #tpu.memory_space<vmem>>, vector<1x8x1xf32>,
    } else {
    }
    %c0_19 = arith.constant 0 : index
    %c0_20 = arith.constant 0 : index
    %c0_21 = arith.constant 0 : index
    %28 = vector.load %arg8[%c0_19, %c0_20, %c0_21] : memref<1x8x1xf32, #tpu.memory_space<vmem>>, vector<1x8x1xf32>
    %29 = vector.shape_cast %28 : vector<1x8x1xf32> to vector<8x1xf32>
    %cst_22 = arith.constant dense<0.000000e+00> : vector<8xf32>
    %30 = vector.multi_reduction <add>, %20, %cst_22 [1] : vector<8x512xf32> to vector<8xf32>
    %31 = vector.shape_cast %30 : vector<8xf32> to vector<8x1xf32>
    %32 = arith.addf %29, %31 : vector<8x1xf32>
    %c0_23 = arith.constant 0 : index
    %c0_24 = arith.constant 0 : index
    %c0_25 = arith.constant 0 : index
    %33 = vector.load %arg8[%c0_23, %c0_24, %c0_25] : memref<1x8x1xf32, #tpu.memory_space<vmem>>, vector<1x8x1xf32>
    %34 = vector.shape_cast %33 : vector<1x8x1xf32> to vector<8x1xf32>
    %35 = vector.shape_cast %32 : vector<8x1xf32> to vector<1x8x1xf32>
    tpu.vector_store %arg8[%c0_23, %c0_24, %c0_25], %35 {strides = array<i32>} : memref<1x8x1xf32, #tpu.memory_space<vmem>>, vector<1x8x1xf32>,
    %c0_26 = arith.constant 0 : index
    %c0_27 = arith.constant 0 : index
    %c0_28 = arith.constant 0 : index
    %36 = vector.load %arg9[%c0_26, %c0_27, %c0_28] : memref<1x8x1xf32, #tpu.memory_space<vmem>>, vector<1x8x1xf32>
    %37 = vector.shape_cast %36 : vector<1x8x1xf32> to vector<8x1xf32>
    %38 = arith.mulf %20, %20 : vector<8x512xf32>
    %cst_29 = arith.constant dense<0.000000e+00> : vector<8xf32>
    %39 = vector.multi_reduction <add>, %38, %cst_29 [1] : vector<8x512xf32> to vector<8xf32>
    %40 = vector.shape_cast %39 : vector<8xf32> to vector<8x1xf32>
    %41 = arith.addf %37, %40 : vector<8x1xf32>
    %c0_30 = arith.constant 0 : index
    %c0_31 = arith.constant 0 : index
    %c0_32 = arith.constant 0 : index
    %42 = vector.load %arg9[%c0_30, %c0_31, %c0_32] : memref<1x8x1xf32, #tpu.memory_space<vmem>>, vector<1x8x1xf32>
    %43 = vector.shape_cast %42 : vector<1x8x1xf32> to vector<8x1xf32>
    %44 = vector.shape_cast %41 : vector<8x1xf32> to vector<1x8x1xf32>
    tpu.vector_store %arg9[%c0_30, %c0_31, %c0_32], %44 {strides = array<i32>} : memref<1x8x1xf32, #tpu.memory_space<vmem>>, vector<1x8x1xf32>,
    return
  }
  func.func @transform_0(%arg0: i32, %arg1: i32) -> (i32, i32, i32) {
    %c0_i32 = arith.constant 0 : i32
    %c0_i32_0 = arith.constant 0 : i32
    return %arg0, %c0_i32, %arg1 : i32, i32, i32
  }
  func.func @transform_1(%arg0: i32, %arg1: i32) -> (i32, i32, i32) {
    %c0_i32 = arith.constant 0 : i32
    %c0_i32_0 = arith.constant 0 : i32
    %c0_i32_1 = arith.constant 0 : i32
    return %arg0, %c0_i32, %c0_i32_0 : i32, i32, i32
  }
  func.func @transform_2(%arg0: i32, %arg1: i32) -> (i32, i32, i32) {
    %c0_i32 = arith.constant 0 : i32
    %c0_i32_0 = arith.constant 0 : i32
    %c0_i32_1 = arith.constant 0 : i32
    return %arg0, %c0_i32, %c0_i32_0 : i32, i32, i32
  }
  func.func @transform_3(%arg0: i32, %arg1: i32) -> (i32, i32, i32) {
    %c0_i32 = arith.constant 0 : i32
    %c0_i32_0 = arith.constant 0 : i32
    %c0_i32_1 = arith.constant 0 : i32
    return %arg0, %c0_i32, %c0_i32_0 : i32, i32, i32
  }
  func.func @transform_4(%arg0: i32, %arg1: i32) -> (i32, i32, i32) {
    %c0_i32 = arith.constant 0 : i32
    %c0_i32_0 = arith.constant 0 : i32
    %c0_i32_1 = arith.constant 0 : i32
    return %arg0, %c0_i32, %c0_i32_0 : i32, i32, i32
  }
  func.func @transform_5(%arg0: i32, %arg1: i32) -> (i32, i32, i32) {
    %c0_i32 = arith.constant 0 : i32
    %c0_i32_0 = arith.constant 0 : i32
    return %arg0, %c0_i32, %arg1 : i32, i32, i32
  }
  func.func @transform_6(%arg0: i32, %arg1: i32) -> (i32, i32, i32) {
    %c0_i32 = arith.constant 0 : i32
    %c0_i32_0 = arith.constant 0 : i32
    %c0_i32_1 = arith.constant 0 : i32
    return %arg0, %c0_i32, %c0_i32_0 : i32, i32, i32
  }
  func.func @transform_7(%arg0: i32, %arg1: i32) -> (i32, i32, i32) {
    %c0_i32 = arith.constant 0 : i32
    %c0_i32_0 = arith.constant 0 : i32
    %c0_i32_1 = arith.constant 0 : i32
    return %arg0, %c0_i32, %c0_i32_0 : i32, i32, i32
  }
}

module attributes {stable_mosaic.version = 11 : i64} {
  func.func @_final_tanh_kernel(%arg0: i32, %arg1: i32, %arg2: memref<1x8x512xbf16, #tpu.memory_space<vmem>>, %arg3: memref<1x8x1xf32, #tpu.memory_space<vmem>>, %arg4: memref<1x8x1xf32, #tpu.memory_space<vmem>>, %arg5: memref<1x3x8xbf16, #tpu.memory_space<vmem>>, %arg6: memref<1x3x1xf32, #tpu.memory_space<vmem>>, %arg7: memref<1x3x512xf32, #tpu.memory_space<vmem>>) attributes {dimension_semantics = [#tpu.dimension_semantics<parallel>, #tpu.dimension_semantics<parallel>], iteration_bounds = array<i64: 2, 1>, scalar_prefetch = 0 : i64, scratch_operands = 0 : i64, tpu.core_type = #tpu.core_type<tc>, window_params = [{transform_indices = @transform_0, window_bounds = array<i64: 1, 8, 512>}, {transform_indices = @transform_1, window_bounds = array<i64: 1, 8, 1>}, {transform_indices = @transform_2, window_bounds = array<i64: 1, 8, 1>}, {transform_indices = @transform_3, window_bounds = array<i64: 1, 3, 8>}, {transform_indices = @transform_4, window_bounds = array<i64: 1, 3, 1>}, {transform_indices = @transform_5, window_bounds = array<i64: 1, 3, 512>}]} {
    %c0 = arith.constant 0 : index
    %c0_0 = arith.constant 0 : index
    %c0_1 = arith.constant 0 : index
    %0 = vector.load %arg2[%c0, %c0_0, %c0_1] : memref<1x8x512xbf16, #tpu.memory_space<vmem>>, vector<1x8x512xbf16>
    %1 = vector.shape_cast %0 : vector<1x8x512xbf16> to vector<8x512xbf16>
    %2 = arith.extf %1 : vector<8x512xbf16> to vector<8x512xf32>
    %c0_2 = arith.constant 0 : index
    %c0_3 = arith.constant 0 : index
    %c0_4 = arith.constant 0 : index
    %3 = vector.load %arg3[%c0_2, %c0_3, %c0_4] : memref<1x8x1xf32, #tpu.memory_space<vmem>>, vector<1x8x1xf32>
    %4 = vector.shape_cast %3 : vector<1x8x1xf32> to vector<8x1xf32>
    %5 = vector.broadcast %4 : vector<8x1xf32> to vector<8x512xf32>
    %6 = arith.mulf %2, %5 : vector<8x512xf32>
    %c0_5 = arith.constant 0 : index
    %c0_6 = arith.constant 0 : index
    %c0_7 = arith.constant 0 : index
    %7 = vector.load %arg4[%c0_5, %c0_6, %c0_7] : memref<1x8x1xf32, #tpu.memory_space<vmem>>, vector<1x8x1xf32>
    %8 = vector.shape_cast %7 : vector<1x8x1xf32> to vector<8x1xf32>
    %9 = vector.broadcast %8 : vector<8x1xf32> to vector<8x512xf32>
    %10 = arith.addf %6, %9 : vector<8x512xf32>
    %cst = arith.constant 0.000000e+00 : f32
    %11 = vector.broadcast %cst : f32 to vector<8x512xf32>
    %12 = arith.maximumf %10, %11 : vector<8x512xf32>
    %13 = arith.truncf %12 : vector<8x512xf32> to vector<8x512xbf16>
    %c0_8 = arith.constant 0 : index
    %c0_9 = arith.constant 0 : index
    %c0_10 = arith.constant 0 : index
    %14 = vector.load %arg5[%c0_8, %c0_9, %c0_10] : memref<1x3x8xbf16, #tpu.memory_space<vmem>>, vector<1x3x8xbf16>
    %15 = vector.shape_cast %14 : vector<1x3x8xbf16> to vector<3x8xbf16>
    %cst_11 = arith.constant dense<0.000000e+00> : vector<3x512xf32>
    %16 = tpu.matmul %15, %13, %cst_11 {dimension_numbers = #tpu.dot_dimension_numbers<[1], [0], [0], [1], [0, 0, 1, 1], [], []>} : vector<3x8xbf16>, vector<8x512xbf16>, vector<3x512xf32> -> vector<3x512xf32>
    %c0_12 = arith.constant 0 : index
    %c0_13 = arith.constant 0 : index
    %c0_14 = arith.constant 0 : index
    %17 = vector.load %arg6[%c0_12, %c0_13, %c0_14] : memref<1x3x1xf32, #tpu.memory_space<vmem>>, vector<1x3x1xf32>
    %18 = vector.shape_cast %17 : vector<1x3x1xf32> to vector<3x1xf32>
    %19 = vector.broadcast %18 : vector<3x1xf32> to vector<3x512xf32>
    %20 = arith.addf %16, %19 : vector<3x512xf32>
    %21 = math.tanh %20 : vector<3x512xf32>
    %c0_15 = arith.constant 0 : index
    %c0_16 = arith.constant 0 : index
    %c0_17 = arith.constant 0 : index
    %22 = vector.load %arg7[%c0_15, %c0_16, %c0_17] : memref<1x3x512xf32, #tpu.memory_space<vmem>>, vector<1x3x512xf32>
    %23 = vector.shape_cast %22 : vector<1x3x512xf32> to vector<3x512xf32>
    %24 = vector.shape_cast %21 : vector<3x512xf32> to vector<1x3x512xf32>
    tpu.vector_store %arg7[%c0_15, %c0_16, %c0_17], %24 {strides = array<i32>} : memref<1x3x512xf32, #tpu.memory_space<vmem>>, vector<1x3x512xf32>,
    return
  }
  func.func @transform_0(%arg0: i32, %arg1: i32) -> (i32, i32, i32) {
    %c0_i32 = arith.constant 0 : i32
    %c0_i32_0 = arith.constant 0 : i32
    return %arg0, %c0_i32, %arg1 : i32, i32, i32
  }
  func.func @transform_1(%arg0: i32, %arg1: i32) -> (i32, i32, i32) {
    %c0_i32 = arith.constant 0 : i32
    %c0_i32_0 = arith.constant 0 : i32
    %c0_i32_1 = arith.constant 0 : i32
    return %arg0, %c0_i32, %c0_i32_0 : i32, i32, i32
  }
  func.func @transform_2(%arg0: i32, %arg1: i32) -> (i32, i32, i32) {
    %c0_i32 = arith.constant 0 : i32
    %c0_i32_0 = arith.constant 0 : i32
    %c0_i32_1 = arith.constant 0 : i32
    return %arg0, %c0_i32, %c0_i32_0 : i32, i32, i32
  }
  func.func @transform_3(%arg0: i32, %arg1: i32) -> (i32, i32, i32) {
    %c0_i32 = arith.constant 0 : i32
    %c0_i32_0 = arith.constant 0 : i32
    %c0_i32_1 = arith.constant 0 : i32
    return %arg0, %c0_i32, %c0_i32_0 : i32, i32, i32
  }
  func.func @transform_4(%arg0: i32, %arg1: i32) -> (i32, i32, i32) {
    %c0_i32 = arith.constant 0 : i32
    %c0_i32_0 = arith.constant 0 : i32
    %c0_i32_1 = arith.constant 0 : i32
    return %arg0, %c0_i32, %c0_i32_0 : i32, i32, i32
  }
  func.func @transform_5(%arg0: i32, %arg1: i32) -> (i32, i32, i32) {
    %c0_i32 = arith.constant 0 : i32
    %c0_i32_0 = arith.constant 0 : i32
    return %arg0, %c0_i32, %arg1 : i32, i32, i32
  }
}

module attributes {stable_mosaic.version = 11 : i64} {
  func.func @_graph_kernel(%arg0: i32, %arg1: memref<3x512xf32, #tpu.memory_space<vmem>>, %arg2: memref<84x3xbf16, #tpu.memory_space<vmem>>, %arg3: memref<84x1xf32, #tpu.memory_space<vmem>>, %arg4: memref<84x512xbf16, #tpu.memory_space<vmem>>) attributes {dimension_semantics = [#tpu.dimension_semantics<parallel>], iteration_bounds = array<i64: 2>, scalar_prefetch = 0 : i64, scratch_operands = 0 : i64, tpu.core_type = #tpu.core_type<tc>, window_params = [{transform_indices = @transform_0, window_bounds = array<i64: 3, 512>}, {pipeline_mode = #tpu.pipeline_mode<synchronous>, transform_indices = @transform_1, window_bounds = array<i64: 84, 3>}, {pipeline_mode = #tpu.pipeline_mode<synchronous>, transform_indices = @transform_2, window_bounds = array<i64: 84, 1>}, {transform_indices = @transform_3, window_bounds = array<i64: 84, 512>}]} {
    %c0 = arith.constant 0 : index
    %c0_0 = arith.constant 0 : index
    %0 = vector.load %arg1[%c0, %c0_0] : memref<3x512xf32, #tpu.memory_space<vmem>>, vector<3x512xf32>
    %c0_1 = arith.constant 0 : index
    %c0_2 = arith.constant 0 : index
    %1 = vector.load %arg2[%c0_1, %c0_2] : memref<84x3xbf16, #tpu.memory_space<vmem>>, vector<84x3xbf16>
    %2 = arith.truncf %0 : vector<3x512xf32> to vector<3x512xbf16>
    %cst = arith.constant dense<0.000000e+00> : vector<84x512xf32>
    %3 = tpu.matmul %1, %2, %cst {dimension_numbers = #tpu.dot_dimension_numbers<[1], [0], [0], [1], [0, 0, 1, 1], [], []>} : vector<84x3xbf16>, vector<3x512xbf16>, vector<84x512xf32> -> vector<84x512xf32>
    %c0_3 = arith.constant 0 : index
    %c0_4 = arith.constant 0 : index
    %4 = vector.load %arg3[%c0_3, %c0_4] : memref<84x1xf32, #tpu.memory_space<vmem>>, vector<84x1xf32>
    %5 = vector.broadcast %4 : vector<84x1xf32> to vector<84x512xf32>
    %6 = arith.addf %3, %5 : vector<84x512xf32>
    %7 = math.tanh %6 : vector<84x512xf32>
    %8 = arith.truncf %7 : vector<84x512xf32> to vector<84x512xbf16>
    %c0_5 = arith.constant 0 : index
    %c0_6 = arith.constant 0 : index
    %9 = vector.load %arg4[%c0_5, %c0_6] : memref<84x512xbf16, #tpu.memory_space<vmem>>, vector<84x512xbf16>
    tpu.vector_store %arg4[%c0_5, %c0_6], %8 {strides = array<i32>} : memref<84x512xbf16, #tpu.memory_space<vmem>>, vector<84x512xbf16>,
    return
  }
  func.func @transform_0(%arg0: i32) -> (i32, i32) {
    %c0_i32 = arith.constant 0 : i32
    %c0_i32_0 = arith.constant 0 : i32
    return %c0_i32, %arg0 : i32, i32
  }
  func.func @transform_1(%arg0: i32) -> (i32, i32) {
    %c0_i32 = arith.constant 0 : i32
    %c0_i32_0 = arith.constant 0 : i32
    %c0_i32_1 = arith.constant 0 : i32
    return %c0_i32, %c0_i32_0 : i32, i32
  }
  func.func @transform_2(%arg0: i32) -> (i32, i32) {
    %c0_i32 = arith.constant 0 : i32
    %c0_i32_0 = arith.constant 0 : i32
    %c0_i32_1 = arith.constant 0 : i32
    return %c0_i32, %c0_i32_0 : i32, i32
  }
  func.func @transform_3(%arg0: i32) -> (i32, i32) {
    %c0_i32 = arith.constant 0 : i32
    %c0_i32_0 = arith.constant 0 : i32
    return %c0_i32, %arg0 : i32, i32
  }
}

module attributes {stable_mosaic.version = 11 : i64} {
  func.func @_conv_stats_kernel(%arg0: i32, %arg1: i32, %arg2: memref<87x512xbf16, #tpu.memory_space<vmem>>, %arg3: memref<2x512xbf16, #tpu.memory_space<vmem>>, %arg4: memref<1x119x87xbf16, #tpu.memory_space<vmem>>, %arg5: memref<1x119x2xbf16, #tpu.memory_space<vmem>>, %arg6: memref<1x119x1xf32, #tpu.memory_space<vmem>>, %arg7: memref<1x119x512xbf16, #tpu.memory_space<vmem>>, %arg8: memref<1x119x1xf32, #tpu.memory_space<vmem>>, %arg9: memref<1x119x1xf32, #tpu.memory_space<vmem>>) attributes {dimension_semantics = [#tpu.dimension_semantics<parallel>, #tpu.dimension_semantics<arbitrary>], iteration_bounds = array<i64: 2, 2>, scalar_prefetch = 0 : i64, scratch_operands = 0 : i64, tpu.core_type = #tpu.core_type<tc>, window_params = [{transform_indices = @transform_0, window_bounds = array<i64: 87, 512>}, {transform_indices = @transform_1, window_bounds = array<i64: 2, 512>}, {transform_indices = @transform_2, window_bounds = array<i64: 1, 119, 87>}, {transform_indices = @transform_3, window_bounds = array<i64: 1, 119, 2>}, {transform_indices = @transform_4, window_bounds = array<i64: 1, 119, 1>}, {transform_indices = @transform_5, window_bounds = array<i64: 1, 119, 512>}, {transform_indices = @transform_6, window_bounds = array<i64: 1, 119, 1>}, {transform_indices = @transform_7, window_bounds = array<i64: 1, 119, 1>}]} {
    %c0 = arith.constant 0 : index
    %c0_0 = arith.constant 0 : index
    %0 = vector.load %arg2[%c0, %c0_0] : memref<87x512xbf16, #tpu.memory_space<vmem>>, vector<87x512xbf16>
    %c0_1 = arith.constant 0 : index
    %c0_2 = arith.constant 0 : index
    %c0_3 = arith.constant 0 : index
    %1 = vector.load %arg4[%c0_1, %c0_2, %c0_3] : memref<1x119x87xbf16, #tpu.memory_space<vmem>>, vector<1x119x87xbf16>
    %2 = vector.shape_cast %1 : vector<1x119x87xbf16> to vector<119x87xbf16>
    %cst = arith.constant dense<0.000000e+00> : vector<119x512xf32>
    %3 = tpu.matmul %2, %0, %cst {dimension_numbers = #tpu.dot_dimension_numbers<[1], [0], [0], [1], [0, 0, 1, 1], [], []>} : vector<119x87xbf16>, vector<87x512xbf16>, vector<119x512xf32> -> vector<119x512xf32>
    %c0_4 = arith.constant 0 : index
    %c0_5 = arith.constant 0 : index
    %4 = vector.load %arg3[%c0_4, %c0_5] : memref<2x512xbf16, #tpu.memory_space<vmem>>, vector<2x512xbf16>
    %c0_6 = arith.constant 0 : index
    %c0_7 = arith.constant 0 : index
    %c0_8 = arith.constant 0 : index
    %5 = vector.load %arg5[%c0_6, %c0_7, %c0_8] : memref<1x119x2xbf16, #tpu.memory_space<vmem>>, vector<1x119x2xbf16>
    %6 = vector.shape_cast %5 : vector<1x119x2xbf16> to vector<119x2xbf16>
    %cst_9 = arith.constant dense<0.000000e+00> : vector<119x512xf32>
    %7 = tpu.matmul %6, %4, %cst_9 {dimension_numbers = #tpu.dot_dimension_numbers<[1], [0], [0], [1], [0, 0, 1, 1], [], []>} : vector<119x2xbf16>, vector<2x512xbf16>, vector<119x512xf32> -> vector<119x512xf32>
    %8 = arith.addf %3, %7 : vector<119x512xf32>
    %c0_10 = arith.constant 0 : index
    %c0_11 = arith.constant 0 : index
    %c0_12 = arith.constant 0 : index
    %9 = vector.load %arg6[%c0_10, %c0_11, %c0_12] : memref<1x119x1xf32, #tpu.memory_space<vmem>>, vector<1x119x1xf32>
    %10 = vector.shape_cast %9 : vector<1x119x1xf32> to vector<119x1xf32>
    %11 = vector.broadcast %10 : vector<119x1xf32> to vector<119x512xf32>
    %12 = arith.addf %8, %11 : vector<119x512xf32>
    %13 = arith.truncf %12 : vector<119x512xf32> to vector<119x512xbf16>
    %c0_13 = arith.constant 0 : index
    %c0_14 = arith.constant 0 : index
    %c0_15 = arith.constant 0 : index
    %14 = vector.load %arg7[%c0_13, %c0_14, %c0_15] : memref<1x119x512xbf16, #tpu.memory_space<vmem>>, vector<1x119x512xbf16>
    %15 = vector.shape_cast %14 : vector<1x119x512xbf16> to vector<119x512xbf16>
    %16 = vector.shape_cast %13 : vector<119x512xbf16> to vector<1x119x512xbf16>
    tpu.vector_store %arg7[%c0_13, %c0_14, %c0_15], %16 {strides = array<i32>} : memref<1x119x512xbf16, #tpu.memory_space<vmem>>, vector<1x119x512xbf16>,
    %c0_i32 = arith.constant 0 : i32
    %17 = arith.cmpi eq, %arg1, %c0_i32 : i32
    %18 = arith.extui %17 : i1 to i32
    %c0_i32_16 = arith.constant 0 : i32
    %19 = arith.cmpi ne, %18, %c0_i32_16 : i32
    scf.if %19 {
      %cst_31 = arith.constant 0.000000e+00 : f32
      %37 = vector.broadcast %cst_31 : f32 to vector<119x1xf32>
      %c0_32 = arith.constant 0 : index
      %c0_33 = arith.constant 0 : index
      %c0_34 = arith.constant 0 : index
      %38 = vector.load %arg8[%c0_32, %c0_33, %c0_34] : memref<1x119x1xf32, #tpu.memory_space<vmem>>, vector<1x119x1xf32>
      %39 = vector.shape_cast %38 : vector<1x119x1xf32> to vector<119x1xf32>
      %40 = vector.shape_cast %37 : vector<119x1xf32> to vector<1x119x1xf32>
      tpu.vector_store %arg8[%c0_32, %c0_33, %c0_34], %40 {strides = array<i32>} : memref<1x119x1xf32, #tpu.memory_space<vmem>>, vector<1x119x1xf32>,
      %cst_35 = arith.constant 0.000000e+00 : f32
      %41 = vector.broadcast %cst_35 : f32 to vector<119x1xf32>
      %c0_36 = arith.constant 0 : index
      %c0_37 = arith.constant 0 : index
      %c0_38 = arith.constant 0 : index
      %42 = vector.load %arg9[%c0_36, %c0_37, %c0_38] : memref<1x119x1xf32, #tpu.memory_space<vmem>>, vector<1x119x1xf32>
      %43 = vector.shape_cast %42 : vector<1x119x1xf32> to vector<119x1xf32>
      %44 = vector.shape_cast %41 : vector<119x1xf32> to vector<1x119x1xf32>
      tpu.vector_store %arg9[%c0_36, %c0_37, %c0_38], %44 {strides = array<i32>} : memref<1x119x1xf32, #tpu.memory_space<vmem>>, vector<1x119x1xf32>,
    } else {
    }
    %c0_17 = arith.constant 0 : index
    %c0_18 = arith.constant 0 : index
    %c0_19 = arith.constant 0 : index
    %20 = vector.load %arg8[%c0_17, %c0_18, %c0_19] : memref<1x119x1xf32, #tpu.memory_space<vmem>>, vector<1x119x1xf32>
    %21 = vector.shape_cast %20 : vector<1x119x1xf32> to vector<119x1xf32>
    %cst_20 = arith.constant dense<0.000000e+00> : vector<119xf32>
    %22 = vector.multi_reduction <add>, %12, %cst_20 [1] : vector<119x512xf32> to vector<119xf32>
    %23 = vector.shape_cast %22 : vector<119xf32> to vector<119x1xf32>
    %24 = arith.addf %21, %23 : vector<119x1xf32>
    %c0_21 = arith.constant 0 : index
    %c0_22 = arith.constant 0 : index
    %c0_23 = arith.constant 0 : index
    %25 = vector.load %arg8[%c0_21, %c0_22, %c0_23] : memref<1x119x1xf32, #tpu.memory_space<vmem>>, vector<1x119x1xf32>
    %26 = vector.shape_cast %25 : vector<1x119x1xf32> to vector<119x1xf32>
    %27 = vector.shape_cast %24 : vector<119x1xf32> to vector<1x119x1xf32>
    tpu.vector_store %arg8[%c0_21, %c0_22, %c0_23], %27 {strides = array<i32>} : memref<1x119x1xf32, #tpu.memory_space<vmem>>, vector<1x119x1xf32>,
    %c0_24 = arith.constant 0 : index
    %c0_25 = arith.constant 0 : index
    %c0_26 = arith.constant 0 : index
    %28 = vector.load %arg9[%c0_24, %c0_25, %c0_26] : memref<1x119x1xf32, #tpu.memory_space<vmem>>, vector<1x119x1xf32>
    %29 = vector.shape_cast %28 : vector<1x119x1xf32> to vector<119x1xf32>
    %30 = arith.mulf %12, %12 : vector<119x512xf32>
    %cst_27 = arith.constant dense<0.000000e+00> : vector<119xf32>
    %31 = vector.multi_reduction <add>, %30, %cst_27 [1] : vector<119x512xf32> to vector<119xf32>
    %32 = vector.shape_cast %31 : vector<119xf32> to vector<119x1xf32>
    %33 = arith.addf %29, %32 : vector<119x1xf32>
    %c0_28 = arith.constant 0 : index
    %c0_29 = arith.constant 0 : index
    %c0_30 = arith.constant 0 : index
    %34 = vector.load %arg9[%c0_28, %c0_29, %c0_30] : memref<1x119x1xf32, #tpu.memory_space<vmem>>, vector<1x119x1xf32>
    %35 = vector.shape_cast %34 : vector<1x119x1xf32> to vector<119x1xf32>
    %36 = vector.shape_cast %33 : vector<119x1xf32> to vector<1x119x1xf32>
    tpu.vector_store %arg9[%c0_28, %c0_29, %c0_30], %36 {strides = array<i32>} : memref<1x119x1xf32, #tpu.memory_space<vmem>>, vector<1x119x1xf32>,
    return
  }
  func.func @transform_0(%arg0: i32, %arg1: i32) -> (i32, i32) {
    %c0_i32 = arith.constant 0 : i32
    %c0_i32_0 = arith.constant 0 : i32
    return %c0_i32, %arg1 : i32, i32
  }
  func.func @transform_1(%arg0: i32, %arg1: i32) -> (i32, i32) {
    %c0_i32 = arith.constant 0 : i32
    %c0_i32_0 = arith.constant 0 : i32
    return %c0_i32, %arg1 : i32, i32
  }
  func.func @transform_2(%arg0: i32, %arg1: i32) -> (i32, i32, i32) {
    %c0_i32 = arith.constant 0 : i32
    %c0_i32_0 = arith.constant 0 : i32
    %c0_i32_1 = arith.constant 0 : i32
    return %arg0, %c0_i32, %c0_i32_0 : i32, i32, i32
  }
  func.func @transform_3(%arg0: i32, %arg1: i32) -> (i32, i32, i32) {
    %c0_i32 = arith.constant 0 : i32
    %c0_i32_0 = arith.constant 0 : i32
    %c0_i32_1 = arith.constant 0 : i32
    return %arg0, %c0_i32, %c0_i32_0 : i32, i32, i32
  }
  func.func @transform_4(%arg0: i32, %arg1: i32) -> (i32, i32, i32) {
    %c0_i32 = arith.constant 0 : i32
    %c0_i32_0 = arith.constant 0 : i32
    %c0_i32_1 = arith.constant 0 : i32
    return %arg0, %c0_i32, %c0_i32_0 : i32, i32, i32
  }
  func.func @transform_5(%arg0: i32, %arg1: i32) -> (i32, i32, i32) {
    %c0_i32 = arith.constant 0 : i32
    %c0_i32_0 = arith.constant 0 : i32
    return %arg0, %c0_i32, %arg1 : i32, i32, i32
  }
  func.func @transform_6(%arg0: i32, %arg1: i32) -> (i32, i32, i32) {
    %c0_i32 = arith.constant 0 : i32
    %c0_i32_0 = arith.constant 0 : i32
    %c0_i32_1 = arith.constant 0 : i32
    return %arg0, %c0_i32, %c0_i32_0 : i32, i32, i32
  }
  func.func @transform_7(%arg0: i32, %arg1: i32) -> (i32, i32, i32) {
    %c0_i32 = arith.constant 0 : i32
    %c0_i32_0 = arith.constant 0 : i32
    %c0_i32_1 = arith.constant 0 : i32
    return %arg0, %c0_i32, %c0_i32_0 : i32, i32, i32
  }
}

module attributes {stable_mosaic.version = 11 : i64} {
  func.func @_bnrelu_conv_stats_kernel(%arg0: i32, %arg1: i32, %arg2: memref<1x119x512xbf16, #tpu.memory_space<vmem>>, %arg3: memref<1x119x1xf32, #tpu.memory_space<vmem>>, %arg4: memref<1x119x1xf32, #tpu.memory_space<vmem>>, %arg5: memref<1x59x119xbf16, #tpu.memory_space<vmem>>, %arg6: memref<1x59x1xf32, #tpu.memory_space<vmem>>, %arg7: memref<1x59x512xbf16, #tpu.memory_space<vmem>>, %arg8: memref<1x59x1xf32, #tpu.memory_space<vmem>>, %arg9: memref<1x59x1xf32, #tpu.memory_space<vmem>>) attributes {dimension_semantics = [#tpu.dimension_semantics<parallel>, #tpu.dimension_semantics<arbitrary>], iteration_bounds = array<i64: 2, 2>, scalar_prefetch = 0 : i64, scratch_operands = 0 : i64, tpu.core_type = #tpu.core_type<tc>, window_params = [{transform_indices = @transform_0, window_bounds = array<i64: 1, 119, 512>}, {transform_indices = @transform_1, window_bounds = array<i64: 1, 119, 1>}, {transform_indices = @transform_2, window_bounds = array<i64: 1, 119, 1>}, {transform_indices = @transform_3, window_bounds = array<i64: 1, 59, 119>}, {transform_indices = @transform_4, window_bounds = array<i64: 1, 59, 1>}, {transform_indices = @transform_5, window_bounds = array<i64: 1, 59, 512>}, {transform_indices = @transform_6, window_bounds = array<i64: 1, 59, 1>}, {transform_indices = @transform_7, window_bounds = array<i64: 1, 59, 1>}]} {
    %c0 = arith.constant 0 : index
    %c0_0 = arith.constant 0 : index
    %c0_1 = arith.constant 0 : index
    %0 = vector.load %arg2[%c0, %c0_0, %c0_1] : memref<1x119x512xbf16, #tpu.memory_space<vmem>>, vector<1x119x512xbf16>
    %1 = vector.shape_cast %0 : vector<1x119x512xbf16> to vector<119x512xbf16>
    %2 = arith.extf %1 : vector<119x512xbf16> to vector<119x512xf32>
    %c0_2 = arith.constant 0 : index
    %c0_3 = arith.constant 0 : index
    %c0_4 = arith.constant 0 : index
    %3 = vector.load %arg3[%c0_2, %c0_3, %c0_4] : memref<1x119x1xf32, #tpu.memory_space<vmem>>, vector<1x119x1xf32>
    %4 = vector.shape_cast %3 : vector<1x119x1xf32> to vector<119x1xf32>
    %5 = vector.broadcast %4 : vector<119x1xf32> to vector<119x512xf32>
    %6 = arith.mulf %2, %5 : vector<119x512xf32>
    %c0_5 = arith.constant 0 : index
    %c0_6 = arith.constant 0 : index
    %c0_7 = arith.constant 0 : index
    %7 = vector.load %arg4[%c0_5, %c0_6, %c0_7] : memref<1x119x1xf32, #tpu.memory_space<vmem>>, vector<1x119x1xf32>
    %8 = vector.shape_cast %7 : vector<1x119x1xf32> to vector<119x1xf32>
    %9 = vector.broadcast %8 : vector<119x1xf32> to vector<119x512xf32>
    %10 = arith.addf %6, %9 : vector<119x512xf32>
    %cst = arith.constant 0.000000e+00 : f32
    %11 = vector.broadcast %cst : f32 to vector<119x512xf32>
    %12 = arith.maximumf %10, %11 : vector<119x512xf32>
    %13 = arith.truncf %12 : vector<119x512xf32> to vector<119x512xbf16>
    %c0_8 = arith.constant 0 : index
    %c0_9 = arith.constant 0 : index
    %c0_10 = arith.constant 0 : index
    %14 = vector.load %arg5[%c0_8, %c0_9, %c0_10] : memref<1x59x119xbf16, #tpu.memory_space<vmem>>, vector<1x59x119xbf16>
    %15 = vector.shape_cast %14 : vector<1x59x119xbf16> to vector<59x119xbf16>
    %cst_11 = arith.constant dense<0.000000e+00> : vector<59x512xf32>
    %16 = tpu.matmul %15, %13, %cst_11 {dimension_numbers = #tpu.dot_dimension_numbers<[1], [0], [0], [1], [0, 0, 1, 1], [], []>} : vector<59x119xbf16>, vector<119x512xbf16>, vector<59x512xf32> -> vector<59x512xf32>
    %c0_12 = arith.constant 0 : index
    %c0_13 = arith.constant 0 : index
    %c0_14 = arith.constant 0 : index
    %17 = vector.load %arg6[%c0_12, %c0_13, %c0_14] : memref<1x59x1xf32, #tpu.memory_space<vmem>>, vector<1x59x1xf32>
    %18 = vector.shape_cast %17 : vector<1x59x1xf32> to vector<59x1xf32>
    %19 = vector.broadcast %18 : vector<59x1xf32> to vector<59x512xf32>
    %20 = arith.addf %16, %19 : vector<59x512xf32>
    %21 = arith.truncf %20 : vector<59x512xf32> to vector<59x512xbf16>
    %c0_15 = arith.constant 0 : index
    %c0_16 = arith.constant 0 : index
    %c0_17 = arith.constant 0 : index
    %22 = vector.load %arg7[%c0_15, %c0_16, %c0_17] : memref<1x59x512xbf16, #tpu.memory_space<vmem>>, vector<1x59x512xbf16>
    %23 = vector.shape_cast %22 : vector<1x59x512xbf16> to vector<59x512xbf16>
    %24 = vector.shape_cast %21 : vector<59x512xbf16> to vector<1x59x512xbf16>
    tpu.vector_store %arg7[%c0_15, %c0_16, %c0_17], %24 {strides = array<i32>} : memref<1x59x512xbf16, #tpu.memory_space<vmem>>, vector<1x59x512xbf16>,
    %c0_i32 = arith.constant 0 : i32
    %25 = arith.cmpi eq, %arg1, %c0_i32 : i32
    %26 = arith.extui %25 : i1 to i32
    %c0_i32_18 = arith.constant 0 : i32
    %27 = arith.cmpi ne, %26, %c0_i32_18 : i32
    scf.if %27 {
      %cst_33 = arith.constant 0.000000e+00 : f32
      %45 = vector.broadcast %cst_33 : f32 to vector<59x1xf32>
      %c0_34 = arith.constant 0 : index
      %c0_35 = arith.constant 0 : index
      %c0_36 = arith.constant 0 : index
      %46 = vector.load %arg8[%c0_34, %c0_35, %c0_36] : memref<1x59x1xf32, #tpu.memory_space<vmem>>, vector<1x59x1xf32>
      %47 = vector.shape_cast %46 : vector<1x59x1xf32> to vector<59x1xf32>
      %48 = vector.shape_cast %45 : vector<59x1xf32> to vector<1x59x1xf32>
      tpu.vector_store %arg8[%c0_34, %c0_35, %c0_36], %48 {strides = array<i32>} : memref<1x59x1xf32, #tpu.memory_space<vmem>>, vector<1x59x1xf32>,
      %cst_37 = arith.constant 0.000000e+00 : f32
      %49 = vector.broadcast %cst_37 : f32 to vector<59x1xf32>
      %c0_38 = arith.constant 0 : index
      %c0_39 = arith.constant 0 : index
      %c0_40 = arith.constant 0 : index
      %50 = vector.load %arg9[%c0_38, %c0_39, %c0_40] : memref<1x59x1xf32, #tpu.memory_space<vmem>>, vector<1x59x1xf32>
      %51 = vector.shape_cast %50 : vector<1x59x1xf32> to vector<59x1xf32>
      %52 = vector.shape_cast %49 : vector<59x1xf32> to vector<1x59x1xf32>
      tpu.vector_store %arg9[%c0_38, %c0_39, %c0_40], %52 {strides = array<i32>} : memref<1x59x1xf32, #tpu.memory_space<vmem>>, vector<1x59x1xf32>,
    } else {
    }
    %c0_19 = arith.constant 0 : index
    %c0_20 = arith.constant 0 : index
    %c0_21 = arith.constant 0 : index
    %28 = vector.load %arg8[%c0_19, %c0_20, %c0_21] : memref<1x59x1xf32, #tpu.memory_space<vmem>>, vector<1x59x1xf32>
    %29 = vector.shape_cast %28 : vector<1x59x1xf32> to vector<59x1xf32>
    %cst_22 = arith.constant dense<0.000000e+00> : vector<59xf32>
    %30 = vector.multi_reduction <add>, %20, %cst_22 [1] : vector<59x512xf32> to vector<59xf32>
    %31 = vector.shape_cast %30 : vector<59xf32> to vector<59x1xf32>
    %32 = arith.addf %29, %31 : vector<59x1xf32>
    %c0_23 = arith.constant 0 : index
    %c0_24 = arith.constant 0 : index
    %c0_25 = arith.constant 0 : index
    %33 = vector.load %arg8[%c0_23, %c0_24, %c0_25] : memref<1x59x1xf32, #tpu.memory_space<vmem>>, vector<1x59x1xf32>
    %34 = vector.shape_cast %33 : vector<1x59x1xf32> to vector<59x1xf32>
    %35 = vector.shape_cast %32 : vector<59x1xf32> to vector<1x59x1xf32>
    tpu.vector_store %arg8[%c0_23, %c0_24, %c0_25], %35 {strides = array<i32>} : memref<1x59x1xf32, #tpu.memory_space<vmem>>, vector<1x59x1xf32>,
    %c0_26 = arith.constant 0 : index
    %c0_27 = arith.constant 0 : index
    %c0_28 = arith.constant 0 : index
    %36 = vector.load %arg9[%c0_26, %c0_27, %c0_28] : memref<1x59x1xf32, #tpu.memory_space<vmem>>, vector<1x59x1xf32>
    %37 = vector.shape_cast %36 : vector<1x59x1xf32> to vector<59x1xf32>
    %38 = arith.mulf %20, %20 : vector<59x512xf32>
    %cst_29 = arith.constant dense<0.000000e+00> : vector<59xf32>
    %39 = vector.multi_reduction <add>, %38, %cst_29 [1] : vector<59x512xf32> to vector<59xf32>
    %40 = vector.shape_cast %39 : vector<59xf32> to vector<59x1xf32>
    %41 = arith.addf %37, %40 : vector<59x1xf32>
    %c0_30 = arith.constant 0 : index
    %c0_31 = arith.constant 0 : index
    %c0_32 = arith.constant 0 : index
    %42 = vector.load %arg9[%c0_30, %c0_31, %c0_32] : memref<1x59x1xf32, #tpu.memory_space<vmem>>, vector<1x59x1xf32>
    %43 = vector.shape_cast %42 : vector<1x59x1xf32> to vector<59x1xf32>
    %44 = vector.shape_cast %41 : vector<59x1xf32> to vector<1x59x1xf32>
    tpu.vector_store %arg9[%c0_30, %c0_31, %c0_32], %44 {strides = array<i32>} : memref<1x59x1xf32, #tpu.memory_space<vmem>>, vector<1x59x1xf32>,
    return
  }
  func.func @transform_0(%arg0: i32, %arg1: i32) -> (i32, i32, i32) {
    %c0_i32 = arith.constant 0 : i32
    %c0_i32_0 = arith.constant 0 : i32
    return %arg0, %c0_i32, %arg1 : i32, i32, i32
  }
  func.func @transform_1(%arg0: i32, %arg1: i32) -> (i32, i32, i32) {
    %c0_i32 = arith.constant 0 : i32
    %c0_i32_0 = arith.constant 0 : i32
    %c0_i32_1 = arith.constant 0 : i32
    return %arg0, %c0_i32, %c0_i32_0 : i32, i32, i32
  }
  func.func @transform_2(%arg0: i32, %arg1: i32) -> (i32, i32, i32) {
    %c0_i32 = arith.constant 0 : i32
    %c0_i32_0 = arith.constant 0 : i32
    %c0_i32_1 = arith.constant 0 : i32
    return %arg0, %c0_i32, %c0_i32_0 : i32, i32, i32
  }
  func.func @transform_3(%arg0: i32, %arg1: i32) -> (i32, i32, i32) {
    %c0_i32 = arith.constant 0 : i32
    %c0_i32_0 = arith.constant 0 : i32
    %c0_i32_1 = arith.constant 0 : i32
    return %arg0, %c0_i32, %c0_i32_0 : i32, i32, i32
  }
  func.func @transform_4(%arg0: i32, %arg1: i32) -> (i32, i32, i32) {
    %c0_i32 = arith.constant 0 : i32
    %c0_i32_0 = arith.constant 0 : i32
    %c0_i32_1 = arith.constant 0 : i32
    return %arg0, %c0_i32, %c0_i32_0 : i32, i32, i32
  }
  func.func @transform_5(%arg0: i32, %arg1: i32) -> (i32, i32, i32) {
    %c0_i32 = arith.constant 0 : i32
    %c0_i32_0 = arith.constant 0 : i32
    return %arg0, %c0_i32, %arg1 : i32, i32, i32
  }
  func.func @transform_6(%arg0: i32, %arg1: i32) -> (i32, i32, i32) {
    %c0_i32 = arith.constant 0 : i32
    %c0_i32_0 = arith.constant 0 : i32
    %c0_i32_1 = arith.constant 0 : i32
    return %arg0, %c0_i32, %c0_i32_0 : i32, i32, i32
  }
  func.func @transform_7(%arg0: i32, %arg1: i32) -> (i32, i32, i32) {
    %c0_i32 = arith.constant 0 : i32
    %c0_i32_0 = arith.constant 0 : i32
    %c0_i32_1 = arith.constant 0 : i32
    return %arg0, %c0_i32, %c0_i32_0 : i32, i32, i32
  }
}

module attributes {stable_mosaic.version = 11 : i64} {
  func.func @_bnrelu_conv_stats_kernel(%arg0: i32, %arg1: i32, %arg2: memref<1x59x512xbf16, #tpu.memory_space<vmem>>, %arg3: memref<1x59x1xf32, #tpu.memory_space<vmem>>, %arg4: memref<1x59x1xf32, #tpu.memory_space<vmem>>, %arg5: memref<1x29x59xbf16, #tpu.memory_space<vmem>>, %arg6: memref<1x29x1xf32, #tpu.memory_space<vmem>>, %arg7: memref<1x29x512xbf16, #tpu.memory_space<vmem>>, %arg8: memref<1x29x1xf32, #tpu.memory_space<vmem>>, %arg9: memref<1x29x1xf32, #tpu.memory_space<vmem>>) attributes {dimension_semantics = [#tpu.dimension_semantics<parallel>, #tpu.dimension_semantics<arbitrary>], iteration_bounds = array<i64: 2, 2>, scalar_prefetch = 0 : i64, scratch_operands = 0 : i64, tpu.core_type = #tpu.core_type<tc>, window_params = [{transform_indices = @transform_0, window_bounds = array<i64: 1, 59, 512>}, {transform_indices = @transform_1, window_bounds = array<i64: 1, 59, 1>}, {transform_indices = @transform_2, window_bounds = array<i64: 1, 59, 1>}, {transform_indices = @transform_3, window_bounds = array<i64: 1, 29, 59>}, {transform_indices = @transform_4, window_bounds = array<i64: 1, 29, 1>}, {transform_indices = @transform_5, window_bounds = array<i64: 1, 29, 512>}, {transform_indices = @transform_6, window_bounds = array<i64: 1, 29, 1>}, {transform_indices = @transform_7, window_bounds = array<i64: 1, 29, 1>}]} {
    %c0 = arith.constant 0 : index
    %c0_0 = arith.constant 0 : index
    %c0_1 = arith.constant 0 : index
    %0 = vector.load %arg2[%c0, %c0_0, %c0_1] : memref<1x59x512xbf16, #tpu.memory_space<vmem>>, vector<1x59x512xbf16>
    %1 = vector.shape_cast %0 : vector<1x59x512xbf16> to vector<59x512xbf16>
    %2 = arith.extf %1 : vector<59x512xbf16> to vector<59x512xf32>
    %c0_2 = arith.constant 0 : index
    %c0_3 = arith.constant 0 : index
    %c0_4 = arith.constant 0 : index
    %3 = vector.load %arg3[%c0_2, %c0_3, %c0_4] : memref<1x59x1xf32, #tpu.memory_space<vmem>>, vector<1x59x1xf32>
    %4 = vector.shape_cast %3 : vector<1x59x1xf32> to vector<59x1xf32>
    %5 = vector.broadcast %4 : vector<59x1xf32> to vector<59x512xf32>
    %6 = arith.mulf %2, %5 : vector<59x512xf32>
    %c0_5 = arith.constant 0 : index
    %c0_6 = arith.constant 0 : index
    %c0_7 = arith.constant 0 : index
    %7 = vector.load %arg4[%c0_5, %c0_6, %c0_7] : memref<1x59x1xf32, #tpu.memory_space<vmem>>, vector<1x59x1xf32>
    %8 = vector.shape_cast %7 : vector<1x59x1xf32> to vector<59x1xf32>
    %9 = vector.broadcast %8 : vector<59x1xf32> to vector<59x512xf32>
    %10 = arith.addf %6, %9 : vector<59x512xf32>
    %cst = arith.constant 0.000000e+00 : f32
    %11 = vector.broadcast %cst : f32 to vector<59x512xf32>
    %12 = arith.maximumf %10, %11 : vector<59x512xf32>
    %13 = arith.truncf %12 : vector<59x512xf32> to vector<59x512xbf16>
    %c0_8 = arith.constant 0 : index
    %c0_9 = arith.constant 0 : index
    %c0_10 = arith.constant 0 : index
    %14 = vector.load %arg5[%c0_8, %c0_9, %c0_10] : memref<1x29x59xbf16, #tpu.memory_space<vmem>>, vector<1x29x59xbf16>
    %15 = vector.shape_cast %14 : vector<1x29x59xbf16> to vector<29x59xbf16>
    %cst_11 = arith.constant dense<0.000000e+00> : vector<29x512xf32>
    %16 = tpu.matmul %15, %13, %cst_11 {dimension_numbers = #tpu.dot_dimension_numbers<[1], [0], [0], [1], [0, 0, 1, 1], [], []>} : vector<29x59xbf16>, vector<59x512xbf16>, vector<29x512xf32> -> vector<29x512xf32>
    %c0_12 = arith.constant 0 : index
    %c0_13 = arith.constant 0 : index
    %c0_14 = arith.constant 0 : index
    %17 = vector.load %arg6[%c0_12, %c0_13, %c0_14] : memref<1x29x1xf32, #tpu.memory_space<vmem>>, vector<1x29x1xf32>
    %18 = vector.shape_cast %17 : vector<1x29x1xf32> to vector<29x1xf32>
    %19 = vector.broadcast %18 : vector<29x1xf32> to vector<29x512xf32>
    %20 = arith.addf %16, %19 : vector<29x512xf32>
    %21 = arith.truncf %20 : vector<29x512xf32> to vector<29x512xbf16>
    %c0_15 = arith.constant 0 : index
    %c0_16 = arith.constant 0 : index
    %c0_17 = arith.constant 0 : index
    %22 = vector.load %arg7[%c0_15, %c0_16, %c0_17] : memref<1x29x512xbf16, #tpu.memory_space<vmem>>, vector<1x29x512xbf16>
    %23 = vector.shape_cast %22 : vector<1x29x512xbf16> to vector<29x512xbf16>
    %24 = vector.shape_cast %21 : vector<29x512xbf16> to vector<1x29x512xbf16>
    tpu.vector_store %arg7[%c0_15, %c0_16, %c0_17], %24 {strides = array<i32>} : memref<1x29x512xbf16, #tpu.memory_space<vmem>>, vector<1x29x512xbf16>,
    %c0_i32 = arith.constant 0 : i32
    %25 = arith.cmpi eq, %arg1, %c0_i32 : i32
    %26 = arith.extui %25 : i1 to i32
    %c0_i32_18 = arith.constant 0 : i32
    %27 = arith.cmpi ne, %26, %c0_i32_18 : i32
    scf.if %27 {
      %cst_33 = arith.constant 0.000000e+00 : f32
      %45 = vector.broadcast %cst_33 : f32 to vector<29x1xf32>
      %c0_34 = arith.constant 0 : index
      %c0_35 = arith.constant 0 : index
      %c0_36 = arith.constant 0 : index
      %46 = vector.load %arg8[%c0_34, %c0_35, %c0_36] : memref<1x29x1xf32, #tpu.memory_space<vmem>>, vector<1x29x1xf32>
      %47 = vector.shape_cast %46 : vector<1x29x1xf32> to vector<29x1xf32>
      %48 = vector.shape_cast %45 : vector<29x1xf32> to vector<1x29x1xf32>
      tpu.vector_store %arg8[%c0_34, %c0_35, %c0_36], %48 {strides = array<i32>} : memref<1x29x1xf32, #tpu.memory_space<vmem>>, vector<1x29x1xf32>,
      %cst_37 = arith.constant 0.000000e+00 : f32
      %49 = vector.broadcast %cst_37 : f32 to vector<29x1xf32>
      %c0_38 = arith.constant 0 : index
      %c0_39 = arith.constant 0 : index
      %c0_40 = arith.constant 0 : index
      %50 = vector.load %arg9[%c0_38, %c0_39, %c0_40] : memref<1x29x1xf32, #tpu.memory_space<vmem>>, vector<1x29x1xf32>
      %51 = vector.shape_cast %50 : vector<1x29x1xf32> to vector<29x1xf32>
      %52 = vector.shape_cast %49 : vector<29x1xf32> to vector<1x29x1xf32>
      tpu.vector_store %arg9[%c0_38, %c0_39, %c0_40], %52 {strides = array<i32>} : memref<1x29x1xf32, #tpu.memory_space<vmem>>, vector<1x29x1xf32>,
    } else {
    }
    %c0_19 = arith.constant 0 : index
    %c0_20 = arith.constant 0 : index
    %c0_21 = arith.constant 0 : index
    %28 = vector.load %arg8[%c0_19, %c0_20, %c0_21] : memref<1x29x1xf32, #tpu.memory_space<vmem>>, vector<1x29x1xf32>
    %29 = vector.shape_cast %28 : vector<1x29x1xf32> to vector<29x1xf32>
    %cst_22 = arith.constant dense<0.000000e+00> : vector<29xf32>
    %30 = vector.multi_reduction <add>, %20, %cst_22 [1] : vector<29x512xf32> to vector<29xf32>
    %31 = vector.shape_cast %30 : vector<29xf32> to vector<29x1xf32>
    %32 = arith.addf %29, %31 : vector<29x1xf32>
    %c0_23 = arith.constant 0 : index
    %c0_24 = arith.constant 0 : index
    %c0_25 = arith.constant 0 : index
    %33 = vector.load %arg8[%c0_23, %c0_24, %c0_25] : memref<1x29x1xf32, #tpu.memory_space<vmem>>, vector<1x29x1xf32>
    %34 = vector.shape_cast %33 : vector<1x29x1xf32> to vector<29x1xf32>
    %35 = vector.shape_cast %32 : vector<29x1xf32> to vector<1x29x1xf32>
    tpu.vector_store %arg8[%c0_23, %c0_24, %c0_25], %35 {strides = array<i32>} : memref<1x29x1xf32, #tpu.memory_space<vmem>>, vector<1x29x1xf32>,
    %c0_26 = arith.constant 0 : index
    %c0_27 = arith.constant 0 : index
    %c0_28 = arith.constant 0 : index
    %36 = vector.load %arg9[%c0_26, %c0_27, %c0_28] : memref<1x29x1xf32, #tpu.memory_space<vmem>>, vector<1x29x1xf32>
    %37 = vector.shape_cast %36 : vector<1x29x1xf32> to vector<29x1xf32>
    %38 = arith.mulf %20, %20 : vector<29x512xf32>
    %cst_29 = arith.constant dense<0.000000e+00> : vector<29xf32>
    %39 = vector.multi_reduction <add>, %38, %cst_29 [1] : vector<29x512xf32> to vector<29xf32>
    %40 = vector.shape_cast %39 : vector<29xf32> to vector<29x1xf32>
    %41 = arith.addf %37, %40 : vector<29x1xf32>
    %c0_30 = arith.constant 0 : index
    %c0_31 = arith.constant 0 : index
    %c0_32 = arith.constant 0 : index
    %42 = vector.load %arg9[%c0_30, %c0_31, %c0_32] : memref<1x29x1xf32, #tpu.memory_space<vmem>>, vector<1x29x1xf32>
    %43 = vector.shape_cast %42 : vector<1x29x1xf32> to vector<29x1xf32>
    %44 = vector.shape_cast %41 : vector<29x1xf32> to vector<1x29x1xf32>
    tpu.vector_store %arg9[%c0_30, %c0_31, %c0_32], %44 {strides = array<i32>} : memref<1x29x1xf32, #tpu.memory_space<vmem>>, vector<1x29x1xf32>,
    return
  }
  func.func @transform_0(%arg0: i32, %arg1: i32) -> (i32, i32, i32) {
    %c0_i32 = arith.constant 0 : i32
    %c0_i32_0 = arith.constant 0 : i32
    return %arg0, %c0_i32, %arg1 : i32, i32, i32
  }
  func.func @transform_1(%arg0: i32, %arg1: i32) -> (i32, i32, i32) {
    %c0_i32 = arith.constant 0 : i32
    %c0_i32_0 = arith.constant 0 : i32
    %c0_i32_1 = arith.constant 0 : i32
    return %arg0, %c0_i32, %c0_i32_0 : i32, i32, i32
  }
  func.func @transform_2(%arg0: i32, %arg1: i32) -> (i32, i32, i32) {
    %c0_i32 = arith.constant 0 : i32
    %c0_i32_0 = arith.constant 0 : i32
    %c0_i32_1 = arith.constant 0 : i32
    return %arg0, %c0_i32, %c0_i32_0 : i32, i32, i32
  }
  func.func @transform_3(%arg0: i32, %arg1: i32) -> (i32, i32, i32) {
    %c0_i32 = arith.constant 0 : i32
    %c0_i32_0 = arith.constant 0 : i32
    %c0_i32_1 = arith.constant 0 : i32
    return %arg0, %c0_i32, %c0_i32_0 : i32, i32, i32
  }
  func.func @transform_4(%arg0: i32, %arg1: i32) -> (i32, i32, i32) {
    %c0_i32 = arith.constant 0 : i32
    %c0_i32_0 = arith.constant 0 : i32
    %c0_i32_1 = arith.constant 0 : i32
    return %arg0, %c0_i32, %c0_i32_0 : i32, i32, i32
  }
  func.func @transform_5(%arg0: i32, %arg1: i32) -> (i32, i32, i32) {
    %c0_i32 = arith.constant 0 : i32
    %c0_i32_0 = arith.constant 0 : i32
    return %arg0, %c0_i32, %arg1 : i32, i32, i32
  }
  func.func @transform_6(%arg0: i32, %arg1: i32) -> (i32, i32, i32) {
    %c0_i32 = arith.constant 0 : i32
    %c0_i32_0 = arith.constant 0 : i32
    %c0_i32_1 = arith.constant 0 : i32
    return %arg0, %c0_i32, %c0_i32_0 : i32, i32, i32
  }
  func.func @transform_7(%arg0: i32, %arg1: i32) -> (i32, i32, i32) {
    %c0_i32 = arith.constant 0 : i32
    %c0_i32_0 = arith.constant 0 : i32
    %c0_i32_1 = arith.constant 0 : i32
    return %arg0, %c0_i32, %c0_i32_0 : i32, i32, i32
  }
}

module attributes {stable_mosaic.version = 11 : i64} {
  func.func @_final_tanh_kernel(%arg0: i32, %arg1: i32, %arg2: memref<1x29x512xbf16, #tpu.memory_space<vmem>>, %arg3: memref<1x29x1xf32, #tpu.memory_space<vmem>>, %arg4: memref<1x29x1xf32, #tpu.memory_space<vmem>>, %arg5: memref<1x3x29xbf16, #tpu.memory_space<vmem>>, %arg6: memref<1x3x1xf32, #tpu.memory_space<vmem>>, %arg7: memref<3x512xf32, #tpu.memory_space<vmem>>, %arg8: memref<1x3x512xf32, #tpu.memory_space<vmem>>) attributes {dimension_semantics = [#tpu.dimension_semantics<parallel>, #tpu.dimension_semantics<parallel>], iteration_bounds = array<i64: 2, 2>, scalar_prefetch = 0 : i64, scratch_operands = 0 : i64, tpu.core_type = #tpu.core_type<tc>, window_params = [{transform_indices = @transform_0, window_bounds = array<i64: 1, 29, 512>}, {transform_indices = @transform_1, window_bounds = array<i64: 1, 29, 1>}, {transform_indices = @transform_2, window_bounds = array<i64: 1, 29, 1>}, {transform_indices = @transform_3, window_bounds = array<i64: 1, 3, 29>}, {transform_indices = @transform_4, window_bounds = array<i64: 1, 3, 1>}, {transform_indices = @transform_5, window_bounds = array<i64: 3, 512>}, {transform_indices = @transform_6, window_bounds = array<i64: 1, 3, 512>}]} {
    %c0 = arith.constant 0 : index
    %c0_0 = arith.constant 0 : index
    %c0_1 = arith.constant 0 : index
    %0 = vector.load %arg2[%c0, %c0_0, %c0_1] : memref<1x29x512xbf16, #tpu.memory_space<vmem>>, vector<1x29x512xbf16>
    %1 = vector.shape_cast %0 : vector<1x29x512xbf16> to vector<29x512xbf16>
    %2 = arith.extf %1 : vector<29x512xbf16> to vector<29x512xf32>
    %c0_2 = arith.constant 0 : index
    %c0_3 = arith.constant 0 : index
    %c0_4 = arith.constant 0 : index
    %3 = vector.load %arg3[%c0_2, %c0_3, %c0_4] : memref<1x29x1xf32, #tpu.memory_space<vmem>>, vector<1x29x1xf32>
    %4 = vector.shape_cast %3 : vector<1x29x1xf32> to vector<29x1xf32>
    %5 = vector.broadcast %4 : vector<29x1xf32> to vector<29x512xf32>
    %6 = arith.mulf %2, %5 : vector<29x512xf32>
    %c0_5 = arith.constant 0 : index
    %c0_6 = arith.constant 0 : index
    %c0_7 = arith.constant 0 : index
    %7 = vector.load %arg4[%c0_5, %c0_6, %c0_7] : memref<1x29x1xf32, #tpu.memory_space<vmem>>, vector<1x29x1xf32>
    %8 = vector.shape_cast %7 : vector<1x29x1xf32> to vector<29x1xf32>
    %9 = vector.broadcast %8 : vector<29x1xf32> to vector<29x512xf32>
    %10 = arith.addf %6, %9 : vector<29x512xf32>
    %cst = arith.constant 0.000000e+00 : f32
    %11 = vector.broadcast %cst : f32 to vector<29x512xf32>
    %12 = arith.maximumf %10, %11 : vector<29x512xf32>
    %13 = arith.truncf %12 : vector<29x512xf32> to vector<29x512xbf16>
    %c0_8 = arith.constant 0 : index
    %c0_9 = arith.constant 0 : index
    %c0_10 = arith.constant 0 : index
    %14 = vector.load %arg5[%c0_8, %c0_9, %c0_10] : memref<1x3x29xbf16, #tpu.memory_space<vmem>>, vector<1x3x29xbf16>
    %15 = vector.shape_cast %14 : vector<1x3x29xbf16> to vector<3x29xbf16>
    %cst_11 = arith.constant dense<0.000000e+00> : vector<3x512xf32>
    %16 = tpu.matmul %15, %13, %cst_11 {dimension_numbers = #tpu.dot_dimension_numbers<[1], [0], [0], [1], [0, 0, 1, 1], [], []>} : vector<3x29xbf16>, vector<29x512xbf16>, vector<3x512xf32> -> vector<3x512xf32>
    %c0_12 = arith.constant 0 : index
    %c0_13 = arith.constant 0 : index
    %c0_14 = arith.constant 0 : index
    %17 = vector.load %arg6[%c0_12, %c0_13, %c0_14] : memref<1x3x1xf32, #tpu.memory_space<vmem>>, vector<1x3x1xf32>
    %18 = vector.shape_cast %17 : vector<1x3x1xf32> to vector<3x1xf32>
    %19 = vector.broadcast %18 : vector<3x1xf32> to vector<3x512xf32>
    %20 = arith.addf %16, %19 : vector<3x512xf32>
    %21 = math.tanh %20 : vector<3x512xf32>
    %c0_15 = arith.constant 0 : index
    %c0_16 = arith.constant 0 : index
    %22 = vector.load %arg7[%c0_15, %c0_16] : memref<3x512xf32, #tpu.memory_space<vmem>>, vector<3x512xf32>
    %23 = arith.addf %21, %22 : vector<3x512xf32>
    %c0_17 = arith.constant 0 : index
    %c0_18 = arith.constant 0 : index
    %c0_19 = arith.constant 0 : index
    %24 = vector.load %arg8[%c0_17, %c0_18, %c0_19] : memref<1x3x512xf32, #tpu.memory_space<vmem>>, vector<1x3x512xf32>
    %25 = vector.shape_cast %24 : vector<1x3x512xf32> to vector<3x512xf32>
    %26 = vector.shape_cast %23 : vector<3x512xf32> to vector<1x3x512xf32>
    tpu.vector_store %arg8[%c0_17, %c0_18, %c0_19], %26 {strides = array<i32>} : memref<1x3x512xf32, #tpu.memory_space<vmem>>, vector<1x3x512xf32>,
    return
  }
  func.func @transform_0(%arg0: i32, %arg1: i32) -> (i32, i32, i32) {
    %c0_i32 = arith.constant 0 : i32
    %c0_i32_0 = arith.constant 0 : i32
    return %arg0, %c0_i32, %arg1 : i32, i32, i32
  }
  func.func @transform_1(%arg0: i32, %arg1: i32) -> (i32, i32, i32) {
    %c0_i32 = arith.constant 0 : i32
    %c0_i32_0 = arith.constant 0 : i32
    %c0_i32_1 = arith.constant 0 : i32
    return %arg0, %c0_i32, %c0_i32_0 : i32, i32, i32
  }
  func.func @transform_2(%arg0: i32, %arg1: i32) -> (i32, i32, i32) {
    %c0_i32 = arith.constant 0 : i32
    %c0_i32_0 = arith.constant 0 : i32
    %c0_i32_1 = arith.constant 0 : i32
    return %arg0, %c0_i32, %c0_i32_0 : i32, i32, i32
  }
  func.func @transform_3(%arg0: i32, %arg1: i32) -> (i32, i32, i32) {
    %c0_i32 = arith.constant 0 : i32
    %c0_i32_0 = arith.constant 0 : i32
    %c0_i32_1 = arith.constant 0 : i32
    return %arg0, %c0_i32, %c0_i32_0 : i32, i32, i32
  }
  func.func @transform_4(%arg0: i32, %arg1: i32) -> (i32, i32, i32) {
    %c0_i32 = arith.constant 0 : i32
    %c0_i32_0 = arith.constant 0 : i32
    %c0_i32_1 = arith.constant 0 : i32
    return %arg0, %c0_i32, %c0_i32_0 : i32, i32, i32
  }
  func.func @transform_5(%arg0: i32, %arg1: i32) -> (i32, i32) {
    %c0_i32 = arith.constant 0 : i32
    %c0_i32_0 = arith.constant 0 : i32
    return %c0_i32, %arg1 : i32, i32
  }
  func.func @transform_6(%arg0: i32, %arg1: i32) -> (i32, i32, i32) {
    %c0_i32 = arith.constant 0 : i32
    %c0_i32_0 = arith.constant 0 : i32
    return %arg0, %c0_i32, %arg1 : i32, i32, i32
  }
}

</mosaic_0001>

<bundles_post_ra>
// kernel: ae_pointnet_dcg_forward.15
= control target key start
LH: loop header
LB: loop body
LE: loop exit
PB: predicated region body
PF: predicated region fallthrough
CT: control target
= control target key end

     0   :  { %s1198_s24 = smov 0   ;;  %s1200_s25 = smov 0   ;;  %s1457_s0 = inlined_call_operand.vmem [shape: bf16[1,16,2048], index: 0, kind: input, shape index: {}]   ;;  %s1458_s1 = inlined_call_operand.vmem [shape: f32[1,16,1], index: 1, kind: input, shape index: {}]   ;;  %s1459_s2 = inlined_call_operand.vmem [shape: f32[1,16,1], index: 2, kind: input, shape index: {}]   ;;  %s1460_s3 = inlined_call_operand.vmem [shape: bf16[1,32,16], index: 3, kind: input, shape index: {}]   ;;  %s1461_s4 = inlined_call_operand.vmem [shape: f32[1,32,1], index: 4, kind: input, shape index: {}]   ;;  %s1462_s5 = inlined_call_operand.vmem [shape: bf16[1,32,2048], index: 5, kind: output, shape index: {0}]   ;;  %s1463_s6 = inlined_call_operand.vmem [shape: f32[1,32,1], index: 6, kind: output, shape index: {1}]   ;;  %s1464_s7 = inlined_call_operand.vmem [shape: f32[1,32,1], index: 7, kind: output, shape index: {2}]  }
   0x1   :  { %s1202_s26 = smov 0   ;;  %s1204_s27 = smov 0  }
   0x2   :  { %s1206_s28 = smov 0  }
   0x3 LB: > { %s27_s29 = sadd.s32 1, %s1150_s27  ;;  %s1024_s30 = sadd.s32 4294967295, %s1154_s28   ;;  %s1154_s28 = sphi %s1206_s28, %s18_s28   ;;  %s1150_s27 = sphi %s1204_s27, %s1469_s27   ;;  %s1146_s26 = sphi %s1202_s26, %s1468_s26   ;;  %s1142_s25 = sphi %s1200_s25, %s1467_s25   ;;  %s1138_s24 = sphi %s1198_s24, %s1466_s24  }
   0x4   : > { %p28_p0 = scmp.ge.s32.totalorder %s27_s29, 4  ;;  %p46_p1 = scmp.ne.s32.totalorder %s1142_s25, %s1138_s24 }
   0x5   : > { %p47_p2 = scmp.eq.s32.totalorder %s1154_s28, 0  ;;  %p182_p4 = scmp.eq.s32.totalorder %s1024_s30, 3 }
   0x6   : > { %s1471_s29 = smov (%p28_p0, %s27_s29), 0  ;;  %s39_s9 = sadd.s32 1, %s1142_s25 }
   0x7   : > { %p48_p3 = por %p47_p2, %p46_p1  ;;  %s35_s8 = ssub.s32 %s1150_s27, %s1471_s29 }
   0x8   : > { %p37_p5 = scmp.eq.s32.totalorder %s35_s8, 0  ;;  %p1233_p6 = por %p182_p4, %p46_p1 }
   0x9   : > { %p1031_p7 = scmp.ge.s32.totalorder %s1154_s28, 4 }
   0xa   : > { %s1238_s11 = scalar_select %p37_p5, %s1142_s25, %s39_s9  }
   0xb   : > { %288 = sbr.rel (%p1031_p7) target bundleno = 25 (0x19), region = 32 }
  0x12   : > { %291 = sbr.rel (!%p48_p3) target bundleno = 25 (0x19), region = 36  ;;  %s293_s12 = sand.u32 (%p48_p3), 1, %s1142_s25  }
  0x13   : > { %s1060_s13 = sshll.u32 (%p48_p3), %s1150_s27, 4  ;;  %s1032_s14 = sshll.u32 (%p48_p3), %s293_s12, 5 }
  0x14   : > { %s300_s17 = scalar_lea.vmem (%p48_p3), %s1457_s0, %s1060_s13  ;;  %s295_s18 = scalar_lea.vmem (%p48_p3), [#allocation2], %s1032_s14 }
  0x15   : > { %v313_v0 = vld [vmem:[%s300_s17] sm:$0xff] (%p48_p3)  ;;  %v315_v1 = vld [vmem:[%s300_s17 + $0x8] sm:$0xff] (%p48_p3) }
  0x16   : > { %v317_v2 = vld [vmem:[%s300_s17 + $0x40] sm:$0xff] (%p48_p3)  ;;  %314 = vst [vmem:[%s295_s18] sm:$0xff] (%p48_p3), %v313_v0  ;;  %316 = vst [vmem:[%s295_s18 + $0x8] sm:$0xff] (%p48_p3), %v315_v1  ;;  %v319_v3 = vld [vmem:[%s300_s17 + $0x48] sm:$0xff] (%p48_p3) }
  0x17   : > { %318 = vst [vmem:[%s295_s18 + $0x10] sm:$0xff] (%p48_p3), %v317_v2  ;;  %320 = vst [vmem:[%s295_s18 + $0x18] sm:$0xff] (%p48_p3), %v319_v3 }
  0x19 PF: > { %p1035_p8 = scmp.ge.s32.totalorder %s1154_s28, 1  ;;  %p325_p9 = scmp.lt.s32.totalorder %s1154_s28, 5 }
  0x1b   : > { %p326_p10 = pnand %p1035_p8, %p325_p9 }
  0x1c   : > { %v457_v4 = vld [vmem:[%s1459_s2] sm:$0xff] (!%p326_p10)  ;;  %v1156_v6 = vmov (!%p326_p10), 0   ;;  %v458_v7 = vld [vmem:[%s1459_s2 + $0x8] sm:$0xff] (!%p326_p10)  ;;  %v496_v11 = vld [vmem:[%s1461_s4 + $0x18] sm:$0xff] (!%p326_p10)  ;;  %s332_s20 = sand.u32 (!%p326_p10), 1, %s1138_s24   ;;  %vm527_vm0 = vcmask (!%p326_p10), 130048  }
  0x1d   : > { %329 = sbr.rel (%p326_p10) target bundleno = 565 (0x235), region = 59  ;;  %v437_v5 = vld [vmem:[%s1458_s1] sm:$0xff] (!%p326_p10)  ;;  %1113 = vset.pattern.permute.xlu1 (!%p326_p10), %v1156_v6  ;;  %1112 = vset.pattern.permute.xlu0 (!%p326_p10), %v1156_v6  ;;  %v438_v8 = vld [vmem:[%s1458_s1 + $0x8] sm:$0xff] (!%p326_p10)  ;;  %v495_v12 = vld [vmem:[%s1461_s4 + $0x10] sm:$0xff] (!%p326_p10)  ;;  %s1036_s21 = sshll.u32 (!%p326_p10), %s332_s20, 5 }
  0x1e   : > { %461 = vperm.xlu1 (!%p326_p10), %1113, %v457_v4   ;;  %441 = vperm.xlu0 (!%p326_p10), %1112, %v437_v5   ;;  %v494_v9 = vld [vmem:[%s1461_s4 + $0x8] sm:$0xff] (!%p326_p10)  ;;  %v493_v10 = vld [vmem:[%s1461_s4] sm:$0xff] (!%p326_p10)  ;;  %s334_s22 = scalar_lea.vmem (!%p326_p10), [#allocation2], %s1036_s21  ;;  %s1037_s12 = sshll.u32 (!%p326_p10), %s332_s20, 6 }
  0x1f   : > { %566 = vmatprep.mubr.bf16.mxu0 (!%p326_p10), %v1156_v6  ;;  %619 = vmatprep.mubr.bf16.mxu1 (!%p326_p10), %v1156_v6  ;;  %v425_v13 = vld [vmem:[%s334_s22] sm:$0xff] (!%p326_p10)  ;;  %v426_v14 = vld [vmem:[%s334_s22 + $0x8] sm:$0xff] (!%p326_p10)  ;;  %v427_v17 = vld [vmem:[%s334_s22 + $0x10] sm:$0xff] (!%p326_p10)  ;;  %s1303_s24 = scalar_lea.vmem (!%p326_p10), [#allocation3], %s1037_s12  ;;  %p1052_p11 = scmp.ne.s32.totalorder (!%p326_p10), %s1146_s26, 0 }
  0x20   : > { %v429_v15 = vunpack.c.l.bf16 (!%p326_p10), %v425_v13  ;;  %v431_v16 = vunpack.c.l.bf16 (!%p326_p10), %v426_v14  ;;  %v428_v18 = vld [vmem:[%s334_s22 + $0x18] sm:$0xff] (!%p326_p10)  ;;  %v430_v19 = vunpack.c.h.bf16 (!%p326_p10), %v425_v13  ;;  %v432_v20 = vunpack.c.h.bf16 (!%p326_p10), %v426_v14  ;;  %v1114_v57 = vld [vmem:[%s1460_s3] sm:$0xff] (!%p326_p10)   ;;  %v1115_v58 = vld [vmem:[%s1460_s3 + $0x8] sm:$0xff] (!%p326_p10)  }
  0x21   : > { %v433_v23 = vunpack.c.l.bf16 (!%p326_p10), %v427_v17  ;;  %v435_v24 = vunpack.c.l.bf16 (!%p326_p10), %v428_v18  ;;  %v434_v27 = vunpack.c.h.bf16 (!%p326_p10), %v427_v17  ;;  %v436_v29 = vunpack.c.h.bf16 (!%p326_p10), %v428_v18 }
  0x22   : > { %466 = vperm.xlu1 (!%p326_p10), %1113, %v458_v7   ;;  %446 = vperm.xlu0 (!%p326_p10), %1112, %v438_v8  }
  0x24   : > { %vm700_vm1 = vcmask (!%p1052_p11), 7168  }
  0x26   : > { %504 = vperm.xlu1 %1113, %v494_v9   ;;  %499 = vperm.xlu0 %1112, %v493_v10  }
  0x2a   : > { %514 = vperm.xlu1 %1113, %v496_v11   ;;  %509 = vperm.xlu0 %1112, %v495_v12  }
  0x9d   : > { %v462_v21 = vpop.permute.xlu1 %461  ;;  %v442_v22 = vpop.permute.xlu0 %441 }
  0x9e   : > { %v449_v25 = vmul.f32 %v442_v22, %v429_v15  ;;  %v451_v26 = vmul.f32 %v442_v22, %v431_v16  ;;  %v450_v28 = vmul.f32 %v442_v22, %v430_v19  ;;  %v452_v30 = vmul.f32 %v442_v22, %v432_v20 }
  0xa0   : > { %v470_v32 = vadd.f32 %v462_v21, %v450_v28  ;;  %v469_v33 = vadd.f32 %v462_v21, %v449_v25  ;;  %v471_v37 = vadd.f32 %v462_v21, %v451_v26  ;;  %v472_v40 = vadd.f32 %v462_v21, %v452_v30 }
  0xa1   : > { %v447_v31 = vpop.permute.xlu0 %446  ;;  %v467_v38 = vpop.permute.xlu1 %466 }
  0xa2   : > { %v453_v34 = vmul.f32 %v447_v31, %v433_v23  ;;  %v455_v35 = vmul.f32 %v447_v31, %v435_v24  ;;  %v454_v36 = vmul.f32 %v447_v31, %v434_v27  ;;  %v456_v39 = vmul.f32 %v447_v31, %v436_v29 }
  0xa3   : > { %v478_v44 = vmax.f32 %v470_v32, 0.0  ;;  %v477_v46 = vmax.f32 %v469_v33, 0.0  ;;  %v479_v49 = vmax.f32 %v471_v37, 0.0  ;;  %v480_v51 = vmax.f32 %v472_v40, 0.0 }
  0xa4   : > { %v474_v41 = vadd.f32 %v467_v38, %v454_v36  ;;  %v473_v42 = vadd.f32 %v467_v38, %v453_v34  ;;  %v475_v43 = vadd.f32 %v467_v38, %v455_v35  ;;  %v476_v45 = vadd.f32 %v467_v38, %v456_v39 }
  0xa5   : > { %v505_v59 = vpop.permute.xlu1 %504  ;;  %v500_v60 = vpop.permute.xlu0 %499  ;;  %v1157_v39 = vmov (!%p1052_p11), 0.0  }
  0xa6   : > { %v482_v47 = vmax.f32 %v474_v41, 0.0  ;;  %v481_v48 = vmax.f32 %v473_v42, 0.0  ;;  %v483_v50 = vmax.f32 %v475_v43, 0.0  ;;  %v484_v52 = vmax.f32 %v476_v45, 0.0  ;;  %701 = vst.msk [vmem:[%s1463_s6] sm:$0xff] (!%p1052_p11), %vm700_vm1, %v1157_v39  ;;  %702 = vst.msk [vmem:[%s1463_s6 + $0x8] sm:$0xff] (!%p1052_p11), %vm700_vm1, %v1157_v39 }
  0xa7   : > { %703 = vst.msk [vmem:[%s1463_s6 + $0x10] sm:$0xff] (!%p1052_p11), %vm700_vm1, %v1157_v39  ;;  %704 = vst.msk [vmem:[%s1463_s6 + $0x18] sm:$0xff] (!%p1052_p11), %vm700_vm1, %v1157_v39 }
  0xa8   : > { %v486_v53 = vpack.c.bf16 %v482_v47, %v478_v44  ;;  %v485_v54 = vpack.c.bf16 %v481_v48, %v477_v46  ;;  %v487_v55 = vpack.c.bf16 %v483_v50, %v479_v49  ;;  %v488_v56 = vpack.c.bf16 %v484_v52, %v480_v51  ;;  %705 = vst.msk [vmem:[%s1464_s7] sm:$0xff] (!%p1052_p11), %vm700_vm1, %v1157_v39 }
  0xa9   : > { %v515_v16 = vpop.permute.xlu1 %514  ;;  %v510_v18 = vpop.permute.xlu0 %509  ;;  %706 = vst.msk [vmem:[%s1464_s7 + $0x8] sm:$0xff] (!%p1052_p11), %vm700_vm1, %v1157_v39  ;;  %707 = vst.msk [vmem:[%s1464_s7 + $0x10] sm:$0xff] (!%p1052_p11), %vm700_vm1, %v1157_v39 }
  0xaa   : > { %534 = vmatprep.subr.bf16.mxu0 %v486_v53  ;;  %587 = vmatprep.subr.bf16.mxu1 %v488_v56  ;;  %708 = vst.msk [vmem:[%s1464_s7 + $0x18] sm:$0xff] (!%p1052_p11), %vm700_vm1, %v1157_v39 }
  0xab   : > { %535 = vmatpush1.bf16.msra.mxu0 %v485_v54  ;;  %588 = vmatpush1.bf16.msra.mxu1 %v487_v55 }
  0xae   : > { %1040 = vmatmul.mubr.msk.bf16.vlgmr.msra.gmra.mrb[0].mxu0 %vm527_vm0, %v1114_v57  ;;  %1042 = vmatmul.mubr.msk.bf16.vlgmr.msra.gmra.mrb[0].mxu1 %vm527_vm0, %v1114_v57 }
  0xaf   : > { %576 = vmatprep.mubr.bf16.mxu0 %v1156_v6  ;;  %629 = vmatprep.mubr.bf16.mxu1 %v1156_v6 }
  0xb6   : > { %1041 = vmatmul.mubr.msk.bf16.gmra.mrb[4].mxu0 %vm527_vm0, %v1115_v58  ;;  %1043 = vmatmul.mubr.msk.bf16.gmra.mrb[4].mxu1 %vm527_vm0, %v1115_v58 }
 0x181   : > { %v568_v61 = vpop.f32.mrb[0].mxu0  ;;  %v621_v63 = vpop.f32.mrb[0].mxu1 }
 0x182   : > { %v1289_v62 = vadd.f32 %v568_v61, %v500_v60  ;;  %v570_v0 = vpop.f32.mrb[1].mxu0  ;;  %v1291_v1 = vadd.f32 %v621_v63, %v500_v60  ;;  %v623_v3 = vpop.f32.mrb[1].mxu1 }
 0x183   : > { %v1293_v2 = vadd.f32 %v570_v0, %v500_v60  ;;  %v572_v4 = vpop.f32.mrb[2].mxu0  ;;  %v1295_v5 = vadd.f32 %v623_v3, %v500_v60  ;;  %v625_v7 = vpop.f32.mrb[2].mxu1 }
 0x184   : > { %v573_v6 = vadd.f32 %v572_v4, %v505_v59  ;;  %v574_v8 = vpop.f32.mrb[3].mxu0  ;;  %v626_v10 = vadd.f32 %v625_v7, %v505_v59  ;;  %v627_v12 = vpop.f32.mrb[3].mxu1 }
 0x185   : > { %v1061_v9 = vpack.c.bf16 %v1293_v2, %v1289_v62  ;;  %v575_v11 = vadd.f32 %v574_v8, %v505_v59  ;;  %v1062_v13 = vpack.c.bf16 %v1295_v5, %v1291_v1  ;;  %v1301_v14 = vadd.f32 %v627_v12, %v505_v59 }
 0x187   : > { %688 = vst [vmem:[%s1303_s24] sm:$0xff] %v1061_v9  ;;  %v1063_v15 = vpack.c.bf16 %v575_v11, %v573_v6  ;;  %689 = vst [vmem:[%s1303_s24 + $0x8] sm:$0xff] %v1062_v13  ;;  %v1064_v17 = vpack.c.bf16 %v1301_v14, %v626_v10 }
 0x189   : > { %690 = vst [vmem:[%s1303_s24 + $0x10] sm:$0xff] %v1063_v15  ;;  %v578_v19 = vpop.f32.mrb[4].mxu0  ;;  %691 = vst [vmem:[%s1303_s24 + $0x18] sm:$0xff] %v1064_v17  ;;  %v631_v21 = vpop.f32.mrb[4].mxu1 }
 0x18a   : > { %v1310_v20 = vadd.f32 %v578_v19, %v510_v18  ;;  %v580_v22 = vpop.f32.mrb[5].mxu0  ;;  %v1312_v23 = vadd.f32 %v631_v21, %v510_v18  ;;  %v633_v25 = vpop.f32.mrb[5].mxu1 }
 0x18b   : > { %v581_v24 = vadd.f32 %v580_v22, %v510_v18  ;;  %v582_v26 = vpop.f32.mrb[6].mxu0  ;;  %v1314_v27 = vadd.f32 %v633_v25, %v510_v18  ;;  %v635_v29 = vpop.f32.mrb[6].mxu1  ;;  %699 = sbr.rel (%p1052_p11) target bundleno = 402 (0x192), region = 67 }
 0x18c   : > { %v583_v28 = vadd.f32 %v582_v26, %v515_v16  ;;  %v584_v30 = vpop.f32.mrb[7].mxu0  ;;  %v636_v32 = vadd.f32 %v635_v29, %v515_v16  ;;  %v637_v34 = vpop.f32.mrb[7].mxu1 }
 0x18d   : > { %v1065_v31 = vpack.c.bf16 %v581_v24, %v1310_v20  ;;  %v585_v33 = vadd.f32 %v584_v30, %v515_v16  ;;  %v1066_v35 = vpack.c.bf16 %v1314_v27, %v1312_v23  ;;  %v638_v36 = vadd.f32 %v637_v34, %v515_v16 }
 0x18f   : > { %692 = vst [vmem:[%s1303_s24 + $0x20] sm:$0xff] %v1065_v31  ;;  %v1067_v37 = vpack.c.bf16 %v585_v33, %v583_v28  ;;  %693 = vst [vmem:[%s1303_s24 + $0x28] sm:$0xff] %v1066_v35  ;;  %v1068_v38 = vpack.c.bf16 %v638_v36, %v636_v32 }
 0x191   : > { %694 = vst [vmem:[%s1303_s24 + $0x30] sm:$0xff] %v1067_v37  ;;  %695 = vst [vmem:[%s1303_s24 + $0x38] sm:$0xff] %v1068_v38 }
 0x192 PF: > { %v723_v40 = vadd.f32 %v581_v24, %v1310_v20  ;;  %v713_v41 = vadd.f32 %v1293_v2, %v1289_v62  ;;  %v728_v42 = vadd.f32 %v585_v33, %v583_v28  ;;  %v718_v43 = vadd.f32 %v575_v11, %v573_v6  ;;  %v711_v16 = vld [vmem:[%s1463_s6 + $0x10] sm:$0xff]  ;;  %v709_v17 = vld [vmem:[%s1463_s6] sm:$0xff]  ;;  %v712_v22 = vld [vmem:[%s1463_s6 + $0x18] sm:$0xff]  ;;  %s1069_s16 = sshll.u32 (%p1233_p6), %s1146_s26, 4 }
 0x193   : > { %v750_v44 = vmul.f32 %v573_v6, %v573_v6  ;;  %v751_v45 = vmul.f32 %v575_v11, %v575_v11  ;;  %v752_v46 = vmul.f32 %v626_v10, %v626_v10  ;;  %v746_v52 = vmul.f32 %v1289_v62, %v1289_v62  ;;  %v742_v29 = vld [vmem:[%s1464_s7] sm:$0xff]  ;;  %v745_v34 = vld [vmem:[%s1464_s7 + $0x18] sm:$0xff]  ;;  %v744_v35 = vld [vmem:[%s1464_s7 + $0x10] sm:$0xff]  ;;  %s811_s19 = scalar_lea.vmem (%p1233_p6), %s1462_s5, %s1069_s16 }
 0x194   : > { %v724_v47 = vadd.f32 %v723_v40, %v1312_v23  ;;  %v714_v48 = vadd.f32 %v713_v41, %v1291_v1  ;;  %v729_v49 = vadd.f32 %v728_v42, %v636_v32  ;;  %v719_v50 = vadd.f32 %v718_v43, %v626_v10  ;;  %v824_v40 = vld [vmem:[%s1303_s24] sm:$0xff] (%p1233_p6)  ;;  %v826_v41 = vld [vmem:[%s1303_s24 + $0x8] sm:$0xff] (%p1233_p6)  ;;  %v828_v42 = vld [vmem:[%s1303_s24 + $0x10] sm:$0xff] (%p1233_p6) }
 0x195   : > { %v767_v51 = vadd.f32 %v751_v45, %v750_v44  ;;  %v747_v53 = vmul.f32 %v1293_v2, %v1293_v2  ;;  %v748_v54 = vmul.f32 %v1291_v1, %v1291_v1  ;;  %v753_v58 = vmul.f32 %v1301_v14, %v1301_v14  ;;  %v830_v43 = vld [vmem:[%s1303_s24 + $0x18] sm:$0xff] (%p1233_p6)  ;;  %825 = vst [vmem:[%s811_s19] sm:$0xff] (%p1233_p6), %v824_v40 }
 0x196   : > { %v725_v55 = vadd.f32 %v724_v47, %v1314_v27  ;;  %v715_v56 = vadd.f32 %v714_v48, %v1295_v5  ;;  %v730_v57 = vadd.f32 %v729_v49, %v638_v36  ;;  %v720_v59 = vadd.f32 %v719_v50, %v1301_v14  ;;  %v832_v44 = vld [vmem:[%s1303_s24 + $0x20] sm:$0xff] (%p1233_p6)  ;;  %v834_v45 = vld [vmem:[%s1303_s24 + $0x28] sm:$0xff] (%p1233_p6)  ;;  %827 = vst [vmem:[%s811_s19 + $0x8] sm:$0xff] (%p1233_p6), %v826_v41 }
 0x197   : > { %v768_v60 = vadd.f32 %v767_v51, %v752_v46  ;;  %v762_v61 = vadd.f32 %v747_v53, %v746_v52  ;;  %v758_v63 = vmul.f32 %v583_v28, %v583_v28  ;;  %v749_v62 = vmul.f32 %v1295_v5, %v1295_v5  ;;  %v743_v28 = vld [vmem:[%s1464_s7 + $0x8] sm:$0xff]  ;;  %829 = vst [vmem:[%s811_s19 + $0x40] sm:$0xff] (%p1233_p6), %v828_v42 }
 0x198   : > { %726 = vadd.xlane.f32.xlu1 %v725_v55  ;;  %716 = vadd.xlane.f32.xlu0 %v715_v56  ;;  %v759_v0 = vmul.f32 %v585_v33, %v585_v33  ;;  %v760_v1 = vmul.f32 %v636_v32, %v636_v32  ;;  %v754_v3 = vmul.f32 %v1310_v20, %v1310_v20  ;;  %vm737_vm2 = vcmask 7168   ;;  %v836_v46 = vld [vmem:[%s1303_s24 + $0x30] sm:$0xff] (%p1233_p6)  ;;  %v838_v47 = vld [vmem:[%s1303_s24 + $0x38] sm:$0xff] (%p1233_p6) }
 0x199   : > { %v763_v2 = vadd.f32 %v762_v61, %v748_v54  ;;  %v755_v4 = vmul.f32 %v581_v24, %v581_v24  ;;  %v756_v7 = vmul.f32 %v1312_v23, %v1312_v23  ;;  %v769_v8 = vadd.f32 %v768_v60, %v753_v58  ;;  %v710_v23 = vld [vmem:[%s1463_s6 + $0x8] sm:$0xff]  ;;  %831 = vst [vmem:[%s811_s19 + $0x48] sm:$0xff] (%p1233_p6), %v830_v43 }
 0x19a   : > { %v777_v6 = vadd.f32 %v759_v0, %v758_v63  ;;  %v761_v9 = vmul.f32 %v638_v36, %v638_v36  ;;  %v757_v5 = vmul.f32 %v1314_v27, %v1314_v27  ;;  %833 = vst [vmem:[%s811_s19 + $0x80] sm:$0xff] (%p1233_p6), %v832_v44  ;;  %835 = vst [vmem:[%s811_s19 + $0x88] sm:$0xff] (%p1233_p6), %v834_v45 }
 0x19b   : > { %v772_v10 = vadd.f32 %v755_v4, %v754_v3  ;;  %v764_v11 = vadd.f32 %v763_v2, %v749_v62  ;;  %837 = vst [vmem:[%s811_s19 + $0xc0] sm:$0xff] (%p1233_p6), %v836_v46  ;;  %839 = vst [vmem:[%s811_s19 + $0xc8] sm:$0xff] (%p1233_p6), %v838_v47 }
 0x19c   : > { %731 = vadd.xlane.f32.xlu1 %v730_v57  ;;  %721 = vadd.xlane.f32.xlu0 %v720_v59  ;;  %v778_v12 = vadd.f32 %v777_v6, %v760_v1 }
 0x19d   : > { %v773_v13 = vadd.f32 %v772_v10, %v756_v7 }
 0x19e   : > { %v779_v14 = vadd.f32 %v778_v12, %v761_v9 }
 0x19f   : > { %v774_v15 = vadd.f32 %v773_v13, %v757_v5 }
 0x1a0   : > { %770 = vadd.xlane.f32.xlu1 %v769_v8  ;;  %765 = vadd.xlane.f32.xlu0 %v764_v11 }
 0x1a4   : > { %780 = vadd.xlane.f32.xlu1 %v779_v14  ;;  %775 = vadd.xlane.f32.xlu0 %v774_v15 }
 0x225   : > { %v727_v18 = vpop.xlane.xlu1 %726  ;;  %v717_v19 = vpop.xlane.xlu0 %716 }
 0x226   : > { %v735_v20 = vadd.f32 %v727_v18, %v711_v16  ;;  %v733_v21 = vadd.f32 %v717_v19, %v709_v17 }
 0x228   : > { %740 = vst.msk [vmem:[%s1463_s6 + $0x10] sm:$0xff] %vm737_vm2, %v735_v20  ;;  %738 = vst.msk [vmem:[%s1463_s6] sm:$0xff] %vm737_vm2, %v733_v21 }
 0x229   : > { %v732_v24 = vpop.xlane.xlu1 %731  ;;  %v722_v25 = vpop.xlane.xlu0 %721 }
 0x22a   : > { %v736_v26 = vadd.f32 %v732_v24, %v712_v22  ;;  %v734_v27 = vadd.f32 %v722_v25, %v710_v23 }
 0x22c   : > { %741 = vst.msk [vmem:[%s1463_s6 + $0x18] sm:$0xff] %vm737_vm2, %v736_v26  ;;  %739 = vst.msk [vmem:[%s1463_s6 + $0x8] sm:$0xff] %vm737_vm2, %v734_v27 }
 0x22d   : > { %v771_v30 = vpop.xlane.xlu1 %770  ;;  %v766_v31 = vpop.xlane.xlu0 %765 }
 0x22e   : > { %v783_v32 = vadd.f32 %v771_v30, %v743_v28  ;;  %v782_v33 = vadd.f32 %v766_v31, %v742_v29  ;;  %806 = sbr.rel (!%p1233_p6) target bundleno = 565 (0x235), region = 71 }
 0x230   : > { %787 = vst.msk [vmem:[%s1464_s7 + $0x8] sm:$0xff] %vm737_vm2, %v783_v32  ;;  %786 = vst.msk [vmem:[%s1464_s7] sm:$0xff] %vm737_vm2, %v782_v33 }
 0x231   : > { %v781_v36 = vpop.xlane.xlu1 %780  ;;  %v776_v37 = vpop.xlane.xlu0 %775 }
 0x232   : > { %v785_v38 = vadd.f32 %v781_v36, %v745_v34  ;;  %v784_v39 = vadd.f32 %v776_v37, %v744_v35 }
 0x234   : > { %789 = vst.msk [vmem:[%s1464_s7 + $0x18] sm:$0xff] %vm737_vm2, %v785_v38  ;;  %788 = vst.msk [vmem:[%s1464_s7 + $0x10] sm:$0xff] %vm737_vm2, %v784_v39 }
 0x235 PF: > { %s18_s28 = sadd.s32 1, %s1154_s28   ;;  %s1466_s24 = smov %s1142_s25 }
 0x236   : > { %p15_p12 = scmp.ge.s32.totalorder %s18_s28, 6   ;;  %s1467_s25 = smov %s1238_s11 }
 0x237   : > { %s1468_s26 = smov %s1150_s27  ;;  %s1469_s27 = smov %s1471_s29 }
 0x238   :  { %17 = sbr.rel (!%p15_p12) target bundleno = 3 (0x3), region = 161 }

// kernel: ae_pointnet_dcg_forward.14
= control target key start
LH: loop header
LB: loop body
LE: loop exit
PB: predicated region body
PF: predicated region fallthrough
CT: control target
= control target key end

     0   :  { %s854_s18 = smov 0   ;;  %s856_s19 = smov 0   ;;  %s979_s0 = inlined_call_operand.vmem [shape: f32[3,2048], index: 0, kind: input, shape index: {}]   ;;  %s980_s1 = inlined_call_operand.vmem [shape: bf16[1,16,3], index: 1, kind: input, shape index: {}]   ;;  %s981_s2 = inlined_call_operand.vmem [shape: f32[1,16,1], index: 2, kind: input, shape index: {}]   ;;  %s982_s3 = inlined_call_operand.vmem [shape: bf16[1,16,2048], index: 3, kind: output, shape index: {0}]   ;;  %s983_s4 = inlined_call_operand.vmem [shape: f32[1,16,1], index: 4, kind: output, shape index: {1}]   ;;  %s984_s5 = inlined_call_operand.vmem [shape: f32[1,16,1], index: 5, kind: output, shape index: {2}]  }
   0x1   :  { %s858_s20 = smov 0   ;;  %s860_s21 = smov 0  }
   0x2   :  { %s862_s22 = smov 0  }
   0x3 LB: > { %s704_s23 = sadd.s32 4294967295, %s819_s22   ;;  %s25_s24 = sadd.s32 1, %s815_s21  ;;  %s819_s22 = sphi %s862_s22, %s16_s22   ;;  %s815_s21 = sphi %s860_s21, %s989_s21   ;;  %s811_s20 = sphi %s858_s20, %s988_s20   ;;  %s807_s19 = sphi %s856_s19, %s987_s19   ;;  %s803_s18 = sphi %s854_s18, %s986_s18  }
   0x4   : > { %p26_p0 = scmp.ge.s32.totalorder %s25_s24, 4  ;;  %s115_s25 = sadd.s32 1, %s807_s19 }
   0x5   : > { %p125_p1 = scmp.ne.s32.totalorder %s807_s19, %s803_s18  ;;  %p126_p2 = scmp.eq.s32.totalorder %s704_s23, 3 }
   0x6   : > { %s991_s24 = smov (%p26_p0, %s25_s24), 0  ;;  %p710_p4 = scmp.ge.s32.totalorder %s819_s22, 1 }
   0x7   : > { %p886_p3 = por %p126_p2, %p125_p1  ;;  %s111_s27 = ssub.s32 %s815_s21, %s991_s24 }
   0x8   : > { %p227_p5 = scmp.lt.s32.totalorder %s819_s22, 5  ;;  %p113_p6 = scmp.eq.s32.totalorder %s111_s27, 0 }
   0xa   : > { %p228_p7 = pnand %p710_p4, %p227_p5 }
   0xb   : > { %s895_s28 = scalar_select %p113_p6, %s807_s19, %s115_s25  }
   0xc   : > { %231 = sbr.rel (%p228_p7) target bundleno = 410 (0x19a), region = 32  ;;  %s712_s29 = sshll.u32 (!%p228_p7), %s811_s20, 2  ;;  %vm337_vm0 = vcmask (!%p228_p7), 1040384   ;;  %v821_v0 = vmov (!%p228_p7), 0   ;;  %v316_v1 = vld [vmem:[%s981_s2] sm:$0xff] (!%p228_p7)  ;;  %vm338_vm1 = vcmask (!%p228_p7), 1041408  }
   0xd   : > { %p275_p8 = scmp.lt.s32.totalorder (!%p228_p7), %s712_s29, 15  ;;  %385 = vmatprep.mubr.bf16.mxu0 (!%p228_p7), %v821_v0  ;;  %428 = vmatprep.mubr.bf16.mxu1 (!%p228_p7), %v821_v0  ;;  %v822_v2 = vmov (!%p228_p7), 65535   ;;  %v317_v4 = vld [vmem:[%s981_s2 + $0x8] sm:$0xff] (!%p228_p7)  ;;  %v780_v18 = vld [vmem:[%s980_s1] sm:$0xff] (!%p228_p7)   ;;  %vm333_vm2 = vcmask (!%p228_p7), 23552   ;;  %s257_s15 = sand.u32 (!%p228_p7), 1, %s803_s18  }
   0xe   : > { %777 = vset.pattern.permute.xlu0 (!%p228_p7), %v821_v0  ;;  %v339_v3 = vsel (!%p228_p7), %vm337_vm0, 4294967295, %v822_v2  ;;  %s711_s16 = sshll.u32 (!%p228_p7), %s257_s15, 5  ;;  %p721_p9 = scmp.ne.s32.totalorder (!%p228_p7), %s811_s20, 0 }
   0xf   : > { %320 = vperm.xlu0 (!%p228_p7), %777, %v316_v1   ;;  %v340_v6 = vsel (!%p228_p7), %vm338_vm1, %v339_v3, 0  ;;  %s911_s17 = scalar_lea.vmem (!%p228_p7), [#allocation2], %s711_s16 }
  0x13   : > { %s993_s29 = smov (!%p275_p8, %s712_s29), 15  ;;  %325 = vperm.xlu0 %777, %v317_v4   ;;  %vm471_vm3 = vcmask (!%p721_p9), 7168   ;;  %v823_v41 = vmov (!%p721_p9), 0.0  }
  0x14   : > { %s713_s9 = sshll.u32 %s993_s29, 2  ;;  %472 = vst.msk [vmem:[%s983_s4] sm:$0xff] (!%p721_p9), %vm471_vm3, %v823_v41  ;;  %473 = vst.msk [vmem:[%s983_s4 + $0x8] sm:$0xff] (!%p721_p9), %vm471_vm3, %v823_v41 }
  0x15   : > { %s278_s12 = scalar_lea.vmem %s979_s0, %s713_s9  ;;  %474 = vst.msk [vmem:[%s984_s5] sm:$0xff] (!%p721_p9), %vm471_vm3, %v823_v41  ;;  %475 = vst.msk [vmem:[%s984_s5 + $0x8] sm:$0xff] (!%p721_p9), %vm471_vm3, %v823_v41 }
  0x16   : > { %v302_v5 = vld [vmem:[%s278_s12] sm:$0x77]  ;;  %v303_v7 = vld [vmem:[%s278_s12 + $0x8] sm:$0x77] }
  0x17   : > { %v308_v8 = vcombine.high %v302_v5, %v302_v5  ;;  %v309_v9 = vcombine.high %v303_v7, %v303_v7  ;;  %v312_v10 = vpack.c.bf16 %v302_v5, %v302_v5  ;;  %v314_v11 = vpack.c.bf16 %v303_v7, %v303_v7 }
  0x19   : > { %v313_v12 = vpack.c.bf16 %v308_v8, %v308_v8  ;;  %v315_v13 = vpack.c.bf16 %v309_v9, %v309_v9  ;;  %v342_v14 = vand.u32 %v340_v6, %v312_v10  ;;  %v348_v15 = vand.u32 %v340_v6, %v314_v11 }
  0x1b   : > { %v345_v16 = vand.u32 %v340_v6, %v313_v12  ;;  %v351_v17 = vand.u32 %v340_v6, %v315_v13 }
  0x1d   : > { %353 = vmatprep.subr.bf16.mxu0 %v345_v16  ;;  %396 = vmatprep.subr.bf16.mxu1 %v351_v17 }
  0x1e   : > { %354 = vmatpush1.bf16.msra.mxu0 %v342_v14  ;;  %397 = vmatpush1.bf16.msra.mxu1 %v348_v15 }
  0x21   : > { %715 = vmatmul.mubr.msk.bf16.vlgmr.msra.gmra.mrb[0].mxu0 %vm333_vm2, %v780_v18  ;;  %716 = vmatmul.mubr.msk.bf16.vlgmr.msra.gmra.mrb[0].mxu1 %vm333_vm2, %v780_v18 }
  0x8e   : > { %v321_v19 = vpop.permute.xlu0 %320 }
  0x92   : > { %v326_v20 = vpop.permute.xlu0 %325 }
  0xf4   : > { %v387_v21 = vpop.f32.mrb[0].mxu0  ;;  %v430_v22 = vpop.f32.mrb[0].mxu1 }
  0xf5   : > { %v388_v23 = vadd.f32 %v387_v21, %v321_v19  ;;  %v431_v24 = vadd.f32 %v430_v22, %v321_v19  ;;  %v389_v25 = vpop.f32.mrb[1].mxu0  ;;  %v432_v26 = vpop.f32.mrb[1].mxu1 }
  0xf6   : > { %v390_v27 = vadd.f32 %v389_v25, %v321_v19  ;;  %v433_v28 = vadd.f32 %v432_v26, %v321_v19  ;;  %v391_v29 = vpop.f32.mrb[2].mxu0  ;;  %v434_v30 = vpop.f32.mrb[2].mxu1  ;;  %470 = sbr.rel (%p721_p9) target bundleno = 253 (0xfd), region = 36 }
  0xf7   : > { %v392_v31 = vadd.f32 %v391_v29, %v326_v20  ;;  %v435_v32 = vadd.f32 %v434_v30, %v326_v20  ;;  %v393_v33 = vpop.f32.mrb[3].mxu0  ;;  %v436_v34 = vpop.f32.mrb[3].mxu1 }
  0xf8   : > { %v729_v35 = vpack.c.bf16 %v390_v27, %v388_v23  ;;  %v730_v36 = vpack.c.bf16 %v433_v28, %v431_v24  ;;  %v394_v37 = vadd.f32 %v393_v33, %v326_v20  ;;  %v437_v38 = vadd.f32 %v436_v34, %v326_v20 }
  0xfa   : > { %463 = vst [vmem:[%s911_s17] sm:$0xff] %v729_v35  ;;  %464 = vst [vmem:[%s911_s17 + $0x8] sm:$0xff] %v730_v36  ;;  %v731_v39 = vpack.c.bf16 %v394_v37, %v392_v31  ;;  %v732_v40 = vpack.c.bf16 %v437_v38, %v435_v32 }
  0xfc   : > { %465 = vst [vmem:[%s911_s17 + $0x10] sm:$0xff] %v731_v39  ;;  %466 = vst [vmem:[%s911_s17 + $0x18] sm:$0xff] %v732_v40 }
  0xfd PF: > { %v495_v42 = vmul.f32 %v388_v23, %v388_v23  ;;  %v496_v43 = vmul.f32 %v390_v27, %v390_v27  ;;  %v497_v44 = vmul.f32 %v431_v24, %v431_v24  ;;  %v478_v45 = vadd.f32 %v390_v27, %v388_v23  ;;  %v476_v62 = vld [vmem:[%s983_s4] sm:$0xff]  ;;  %v477_v4 = vld [vmem:[%s983_s4 + $0x8] sm:$0xff]  ;;  %s733_s7 = sshll.u32 (%p886_p3), %s811_s20, 4 }
  0xfe   : > { %v499_v46 = vmul.f32 %v392_v31, %v392_v31  ;;  %v500_v47 = vmul.f32 %v394_v37, %v394_v37  ;;  %v501_v48 = vmul.f32 %v435_v32, %v435_v32  ;;  %v498_v49 = vmul.f32 %v433_v28, %v433_v28  ;;  %v493_v63 = vld [vmem:[%s984_s5] sm:$0xff]  ;;  %v494_v5 = vld [vmem:[%s984_s5 + $0x8] sm:$0xff]  ;;  %s538_s10 = scalar_lea.vmem (%p886_p3), %s982_s3, %s733_s7 }
  0xff   : > { %v503_v50 = vadd.f32 %v496_v43, %v495_v42  ;;  %v483_v51 = vadd.f32 %v394_v37, %v392_v31  ;;  %v479_v52 = vadd.f32 %v478_v45, %v431_v24  ;;  %v502_v55 = vmul.f32 %v437_v38, %v437_v38 }
 0x100   : > { %v508_v53 = vadd.f32 %v500_v47, %v499_v46  ;;  %vm490_vm4 = vcmask 7168  }
 0x101   : > { %v504_v54 = vadd.f32 %v503_v50, %v497_v44  ;;  %v484_v56 = vadd.f32 %v483_v51, %v435_v32  ;;  %v480_v57 = vadd.f32 %v479_v52, %v433_v28  ;;  %v551_v10 = vld [vmem:[%s911_s17] sm:$0xff] (%p886_p3)  ;;  %v553_v11 = vld [vmem:[%s911_s17 + $0x8] sm:$0xff] (%p886_p3) }
 0x102   : > { %v509_v58 = vadd.f32 %v508_v53, %v501_v48  ;;  %552 = vst [vmem:[%s538_s10] sm:$0xff] (%p886_p3), %v551_v10  ;;  %554 = vst [vmem:[%s538_s10 + $0x8] sm:$0xff] (%p886_p3), %v553_v11 }
 0x103   : > { %v505_v59 = vadd.f32 %v504_v54, %v498_v49  ;;  %481 = vadd.xlane.f32.xlu0 %v480_v57  ;;  %v485_v60 = vadd.f32 %v484_v56, %v437_v38  ;;  %v555_v12 = vld [vmem:[%s911_s17 + $0x10] sm:$0xff] (%p886_p3)  ;;  %v557_v13 = vld [vmem:[%s911_s17 + $0x18] sm:$0xff] (%p886_p3) }
 0x104   : > { %v510_v61 = vadd.f32 %v509_v58, %v502_v55  ;;  %556 = vst [vmem:[%s538_s10 + $0x40] sm:$0xff] (%p886_p3), %v555_v12  ;;  %558 = vst [vmem:[%s538_s10 + $0x48] sm:$0xff] (%p886_p3), %v557_v13 }
 0x105   : > { %506 = vadd.xlane.f32.xlu1 %v505_v59 }
 0x107   : > { %486 = vadd.xlane.f32.xlu0 %v485_v60 }
 0x109   : > { %511 = vadd.xlane.f32.xlu1 %v510_v61 }
 0x190   : > { %v482_v0 = vpop.xlane.xlu0 %481 }
 0x191   : > { %v488_v2 = vadd.f32 %v482_v0, %v476_v62 }
 0x192   : > { %v507_v1 = vpop.xlane.xlu1 %506 }
 0x193   : > { %v513_v3 = vadd.f32 %v507_v1, %v493_v63  ;;  %491 = vst.msk [vmem:[%s983_s4] sm:$0xff] %vm490_vm4, %v488_v2  ;;  %533 = sbr.rel (!%p886_p3) target bundleno = 410 (0x19a), region = 40 }
 0x194   : > { %v487_v6 = vpop.xlane.xlu0 %486 }
 0x195   : > { %515 = vst.msk [vmem:[%s984_s5] sm:$0xff] %vm490_vm4, %v513_v3  ;;  %v489_v8 = vadd.f32 %v487_v6, %v477_v4 }
 0x196   : > { %v512_v7 = vpop.xlane.xlu1 %511 }
 0x197   : > { %v514_v9 = vadd.f32 %v512_v7, %v494_v5  ;;  %492 = vst.msk [vmem:[%s983_s4 + $0x8] sm:$0xff] %vm490_vm4, %v489_v8 }
 0x199   : > { %516 = vst.msk [vmem:[%s984_s5 + $0x8] sm:$0xff] %vm490_vm4, %v514_v9 }
 0x19a PF: > { %s16_s22 = sadd.s32 1, %s819_s22   ;;  %s986_s18 = smov %s807_s19 }
 0x19b   : > { %p13_p10 = scmp.ge.s32.totalorder %s16_s22, 6   ;;  %s987_s19 = smov %s895_s28 }
 0x19c   : > { %s988_s20 = smov %s815_s21  ;;  %s989_s21 = smov %s991_s24 }
 0x19d   :  { %15 = sbr.rel (!%p13_p10) target bundleno = 3 (0x3), region = 119 }

// kernel: ae_pointnet_dcg_forward.17
= control target key start
LH: loop header
LB: loop body
LE: loop exit
PB: predicated region body
PF: predicated region fallthrough
CT: control target
= control target key end

     0   :  { %s780_s12 = smov 0   ;;  %s782_s13 = smov 0   ;;  %s1059_s0 = inlined_call_operand.vmem [shape: bf16[1,64,2048], index: 0, kind: input, shape index: {}]   ;;  %s1060_s1 = inlined_call_operand.vmem [shape: f32[64,1], index: 1, kind: input, shape index: {}]   ;;  %s1061_s2 = inlined_call_operand.vmem [shape: f32[64,1], index: 2, kind: input, shape index: {}]   ;;  %s1062_s3 = inlined_call_operand.vmem [shape: f32[2,64,1], index: 3, kind: output, shape index: {}]  }
   0x1   :  { %s784_s14 = smov 0   ;;  %s786_s15 = smov 0  }
   0x2   :  { %s788_s16 = smov 0   ;;  %s790_s17 = smov 0  }
   0x3   :  { %s792_s18 = smov 0  }
   0x4 LB: > { %s22_s19 = sadd.s32 1, %s748_s16  ;;  %s25_s20 = sadd.s32 1, %s752_s17  ;;  %s756_s18 = sphi %s792_s18, %s13_s18   ;;  %s752_s17 = sphi %s790_s17, %s1068_s17   ;;  %s748_s16 = sphi %s788_s16, %s1067_s16   ;;  %s744_s15 = sphi %s786_s15, %s1066_s15   ;;  %s740_s14 = sphi %s784_s14, %s1065_s14   ;;  %s736_s13 = sphi %s782_s13, %s1064_s13   ;;  %s732_s12 = sphi %s780_s12, %s1063_s12  }
   0x5   : > { %p23_p0 = scmp.ge.s32.totalorder %s22_s19, 2  ;;  %p43_p1 = scmp.ne.s32.totalorder %s736_s13, %s732_s12 }
   0x6   : > { %p44_p2 = scmp.eq.s32.totalorder %s756_s18, 0  ;;  %s624_s21 = sshll.u32 %s752_s17, 1 }
   0x7   : > { %s1070_s19 = smov (%p23_p0, %s22_s19), 0  ;;  %s1072_s20 = smov (!%p23_p0, %s25_s20), %s752_s17 }
   0x8   : > { %p27_p3 = scmp.ge.s32.totalorder %s1072_s20, 2  ;;  %p45_p4 = por %p44_p2, %p43_p1 }
   0x9   : > { %s30_s22 = sadd.s32 %s748_s16, %s624_s21  ;;  %s36_s26 = sadd.s32 1, %s736_s13 }
   0xa   : > { %s1074_s20 = smov (%p27_p3, %s1072_s20), 0  ;;  %p627_p6 = scmp.ge.s32.totalorder %s756_s18, 4 }
   0xb   : > { %s625_s23 = sshll.u32 %s1074_s20, 1 }
   0xc   : > { %s32_s24 = sadd.s32 %s625_s23, %s1070_s19  ;;  %143 = sbr.rel (%p627_p6) target bundleno = 31 (0x1f), region = 24 }
   0xd   : > { %s33_s25 = ssub.s32 %s30_s22, %s32_s24 }
   0xe   : > { %p34_p5 = scmp.eq.s32.totalorder %s33_s25, 0 }
  0x10   : > { %s831_s27 = scalar_select %p34_p5, %s736_s13, %s36_s26  }
  0x13   : > { %146 = sbr.rel (!%p45_p4) target bundleno = 31 (0x1f), region = 28  ;;  %s148_s28 = sand.u32 (%p45_p4), 1, %s736_s13  }
  0x14   : > { %s640_s29 = sshll.u32 (%p45_p4), %s30_s22, 4  ;;  %s628_s30 = sshll.u32 (%p45_p4), %s148_s28, 7 }
  0x15   : > { %s838_s6 = scalar_lea.vmem (%p45_p4), %s1059_s0, %s640_s29  ;;  %s150_s7 = scalar_lea.vmem (%p45_p4), [#allocation3], %s628_s30 }
  0x16   : > { %v168_v0 = vld [vmem:[%s838_s6] sm:$0xff] (%p45_p4)  ;;  %v170_v1 = vld [vmem:[%s838_s6 + $0x8] sm:$0xff] (%p45_p4) }
  0x17   : > { %v172_v2 = vld [vmem:[%s838_s6 + $0x40] sm:$0xff] (%p45_p4)  ;;  %169 = vst [vmem:[%s150_s7] sm:$0xff] (%p45_p4), %v168_v0  ;;  %171 = vst [vmem:[%s150_s7 + $0x8] sm:$0xff] (%p45_p4), %v170_v1  ;;  %v174_v3 = vld [vmem:[%s838_s6 + $0x48] sm:$0xff] (%p45_p4) }
  0x18   : > { %173 = vst [vmem:[%s150_s7 + $0x10] sm:$0xff] (%p45_p4), %v172_v2  ;;  %v176_v4 = vld [vmem:[%s838_s6 + $0x80] sm:$0xff] (%p45_p4)  ;;  %v178_v5 = vld [vmem:[%s838_s6 + $0x88] sm:$0xff] (%p45_p4)  ;;  %175 = vst [vmem:[%s150_s7 + $0x18] sm:$0xff] (%p45_p4), %v174_v3 }
  0x19   : > { %177 = vst [vmem:[%s150_s7 + $0x20] sm:$0xff] (%p45_p4), %v176_v4  ;;  %179 = vst [vmem:[%s150_s7 + $0x28] sm:$0xff] (%p45_p4), %v178_v5  ;;  %v180_v6 = vld [vmem:[%s838_s6 + $0xc0] sm:$0xff] (%p45_p4)  ;;  %v182_v7 = vld [vmem:[%s838_s6 + $0xc8] sm:$0xff] (%p45_p4) }
  0x1a   : > { %v184_v8 = vld [vmem:[%s838_s6 + $0x100] sm:$0xff]  ;;  %181 = vst [vmem:[%s150_s7 + $0x30] sm:$0xff] %v180_v6  ;;  %183 = vst [vmem:[%s150_s7 + $0x38] sm:$0xff] %v182_v7  ;;  %v186_v9 = vld [vmem:[%s838_s6 + $0x108] sm:$0xff] }
  0x1b   : > { %185 = vst [vmem:[%s150_s7 + $0x40] sm:$0xff] %v184_v8  ;;  %v188_v10 = vld [vmem:[%s838_s6 + $0x140] sm:$0xff]  ;;  %v190_v11 = vld [vmem:[%s838_s6 + $0x148] sm:$0xff]  ;;  %187 = vst [vmem:[%s150_s7 + $0x48] sm:$0xff] %v186_v9 }
  0x1c   : > { %189 = vst [vmem:[%s150_s7 + $0x50] sm:$0xff] %v188_v10  ;;  %191 = vst [vmem:[%s150_s7 + $0x58] sm:$0xff] %v190_v11  ;;  %v192_v12 = vld [vmem:[%s838_s6 + $0x180] sm:$0xff]  ;;  %v194_v13 = vld [vmem:[%s838_s6 + $0x188] sm:$0xff] }
  0x1d   : > { %v196_v14 = vld [vmem:[%s838_s6 + $0x1c0] sm:$0xff]  ;;  %193 = vst [vmem:[%s150_s7 + $0x60] sm:$0xff] %v192_v12  ;;  %195 = vst [vmem:[%s150_s7 + $0x68] sm:$0xff] %v194_v13  ;;  %v198_v15 = vld [vmem:[%s838_s6 + $0x1c8] sm:$0xff] }
  0x1e   : > { %197 = vst [vmem:[%s150_s7 + $0x70] sm:$0xff] %v196_v14  ;;  %199 = vst [vmem:[%s150_s7 + $0x78] sm:$0xff] %v198_v15 }
  0x1f PF: > { %p632_p7 = scmp.ge.s32.totalorder %s756_s18, 1  ;;  %p204_p8 = scmp.lt.s32.totalorder %s756_s18, 5 }
  0x21   : > { %p205_p9 = pnand %p632_p7, %p204_p8 }
  0x22   : > { %s211_s8 = sand.u32 (!%p205_p9), 1, %s732_s12   ;;  %p237_p10 = scmp.lt.s32.totalorder (!%p205_p9), %s744_s15, 1 }
  0x23   : > { %208 = sbr.rel (%p205_p9) target bundleno = 373 (0x175), region = 51  ;;  %s633_s9 = sshll.u32 (!%p205_p9), %s211_s8, 7 }
  0x24   : > { %s866_s23 = scalar_lea.vmem (!%p205_p9), [#allocation3], %s633_s9  ;;  %p636_p11 = scmp.ne.s32.totalorder (!%p205_p9), %s740_s14, 0 }
  0x2a   : > { %s1076_s15 = smov (!%p237_p10, %s744_s15), 1  ;;  %245 = sbr.rel (%p636_p11) target bundleno = 49 (0x31), region = 59 }
  0x2b   : > { %s641_s10 = sshll.u32 %s1076_s15, 6  ;;  %vm246_vm0 = vcmask (!%p636_p11), 7168   ;;  %v758_v16 = vmov (!%p636_p11), -inf  }
  0x2c   : > { %s864_s22 = scalar_lea.vmem %s1062_s3, %s641_s10  ;;  %247 = vst.msk [vmem:[#allocation2] sm:$0xff] (!%p636_p11), %vm246_vm0, %v758_v16  ;;  %248 = vst.msk [vmem:[#allocation2 + $0x8] sm:$0xff] (!%p636_p11), %vm246_vm0, %v758_v16 }
  0x2d   : > { %249 = vst.msk [vmem:[#allocation2 + $0x10] sm:$0xff] (!%p636_p11), %vm246_vm0, %v758_v16  ;;  %250 = vst.msk [vmem:[#allocation2 + $0x18] sm:$0xff] (!%p636_p11), %vm246_vm0, %v758_v16 }
  0x2e   : > { %251 = vst.msk [vmem:[#allocation2 + $0x20] sm:$0xff] (!%p636_p11), %vm246_vm0, %v758_v16  ;;  %252 = vst.msk [vmem:[#allocation2 + $0x28] sm:$0xff] (!%p636_p11), %vm246_vm0, %v758_v16 }
  0x2f   : > { %253 = vst.msk [vmem:[#allocation2 + $0x30] sm:$0xff] (!%p636_p11), %vm246_vm0, %v758_v16  ;;  %254 = vst.msk [vmem:[#allocation2 + $0x38] sm:$0xff] (!%p636_p11), %vm246_vm0, %v758_v16 }
  0x31 PF: > { %v305_v17 = vld [vmem:[%s1060_s1 + $0x10] sm:$0xff]  ;;  %v303_v18 = vld [vmem:[%s1060_s1] sm:$0xff]  ;;  %v759_v19 = vmov 0   ;;  %v306_v20 = vld [vmem:[%s1060_s1 + $0x18] sm:$0xff]  ;;  %vm519_vm1 = vcmask 7168   ;;  %p637_p12 = scmp.ne.s32.totalorder %s740_s14, 1 }
  0x32   : > { %701 = vset.pattern.permute.xlu1 %v759_v19  ;;  %700 = vset.pattern.permute.xlu0 %v759_v19  ;;  %v304_v21 = vld [vmem:[%s1060_s1 + $0x8] sm:$0xff]  ;;  %v307_v23 = vld [vmem:[%s1060_s1 + $0x20] sm:$0xff]  ;;  %v310_v24 = vld [vmem:[%s1060_s1 + $0x38] sm:$0xff] }
  0x33   : > { %323 = vperm.xlu1 %701, %v305_v17   ;;  %313 = vperm.xlu0 %700, %v303_v18   ;;  %v308_v22 = vld [vmem:[%s1060_s1 + $0x28] sm:$0xff]  ;;  %v309_v25 = vld [vmem:[%s1060_s1 + $0x30] sm:$0xff]  ;;  %v383_v27 = vld [vmem:[%s1061_s2] sm:$0xff] }
  0x34   : > { %v384_v26 = vld [vmem:[%s1061_s2 + $0x8] sm:$0xff]  ;;  %v386_v28 = vld [vmem:[%s1061_s2 + $0x18] sm:$0xff]  ;;  %v385_v29 = vld [vmem:[%s1061_s2 + $0x10] sm:$0xff] }
  0x35   : > { %v388_v30 = vld [vmem:[%s1061_s2 + $0x28] sm:$0xff]  ;;  %v387_v31 = vld [vmem:[%s1061_s2 + $0x20] sm:$0xff]  ;;  %v390_v32 = vld [vmem:[%s1061_s2 + $0x38] sm:$0xff] }
  0x36   : > { %v389_v33 = vld [vmem:[%s1061_s2 + $0x30] sm:$0xff]  ;;  %v259_v36 = vld [vmem:[%s866_s23 + $0x20] sm:$0xff]  ;;  %v921_v37 = vld [vmem:[%s866_s23 + $0x28] sm:$0xff] }
  0x37   : > { %328 = vperm.xlu1 %701, %v306_v20   ;;  %318 = vperm.xlu0 %700, %v304_v21   ;;  %v255_v38 = vld [vmem:[%s866_s23] sm:$0xff]  ;;  %v256_v39 = vld [vmem:[%s866_s23 + $0x8] sm:$0xff]  ;;  %v261_v41 = vld [vmem:[%s866_s23 + $0x30] sm:$0xff]  ;;  %v279_v44 = vunpack.c.l.bf16 %v259_v36  ;;  %v280_v45 = vunpack.c.h.bf16 %v259_v36  ;;  %v281_v49 = vunpack.c.l.bf16 %v921_v37  ;;  %v282_v54 = vunpack.c.h.bf16 %v921_v37 }
  0x38   : > { %v929_v42 = vld [vmem:[%s866_s23 + $0x38] sm:$0xff]  ;;  %v257_v46 = vld [vmem:[%s866_s23 + $0x10] sm:$0xff]  ;;  %v271_v50 = vunpack.c.l.bf16 %v255_v38  ;;  %v272_v51 = vunpack.c.h.bf16 %v255_v38  ;;  %v941_v53 = vld [vmem:[%s866_s23 + $0x40] sm:$0xff]  ;;  %v273_v55 = vunpack.c.l.bf16 %v256_v39  ;;  %v283_v56 = vunpack.c.l.bf16 %v261_v41 }
  0x39   : > { %v258_v47 = vld [vmem:[%s866_s23 + $0x18] sm:$0xff]  ;;  %v934_v48 = vld [vmem:[%s866_s23 + $0x50] sm:$0xff]  ;;  %v284_v57 = vunpack.c.h.bf16 %v261_v41  ;;  %v285_v58 = vunpack.c.l.bf16 %v929_v42  ;;  %v946_v59 = vld [vmem:[%s866_s23 + $0x48] sm:$0xff]  ;;  %v275_v60 = vunpack.c.l.bf16 %v257_v46  ;;  %v276_v61 = vunpack.c.h.bf16 %v257_v46 }
  0x3a   : > { %v938_v52 = vld [vmem:[%s866_s23 + $0x58] sm:$0xff]  ;;  %v277_v62 = vunpack.c.l.bf16 %v258_v47  ;;  %v291_v0 = vunpack.c.l.bf16 %v934_v48  ;;  %v952_v2 = vld [vmem:[%s866_s23 + $0x70] sm:$0xff]  ;;  %v292_v3 = vunpack.c.h.bf16 %v934_v48  ;;  %v287_v5 = vunpack.c.l.bf16 %v941_v53  ;;  %v962_v8 = vld [vmem:[%s866_s23 + $0x60] sm:$0xff] }
  0x3b   : > { %338 = vperm.xlu1 %701, %v308_v22   ;;  %333 = vperm.xlu0 %700, %v307_v23   ;;  %v293_v4 = vunpack.c.l.bf16 %v938_v52  ;;  %v288_v6 = vunpack.c.h.bf16 %v941_v53  ;;  %v959_v7 = vld [vmem:[%s866_s23 + $0x78] sm:$0xff]  ;;  %v965_v9 = vld [vmem:[%s866_s23 + $0x68] sm:$0xff]  ;;  %v289_v10 = vunpack.c.l.bf16 %v946_v59  ;;  %v278_v11 = vunpack.c.h.bf16 %v258_v47 }
  0x3c   : > { %v274_v12 = vunpack.c.h.bf16 %v256_v39  ;;  %v290_v13 = vunpack.c.h.bf16 %v946_v59  ;;  %v299_v14 = vunpack.c.l.bf16 %v952_v2  ;;  %v300_v15 = vunpack.c.h.bf16 %v952_v2 }
  0x3d   : > { %v286_v16 = vunpack.c.h.bf16 %v929_v42  ;;  %v294_v17 = vunpack.c.h.bf16 %v938_v52  ;;  %v301_v19 = vunpack.c.l.bf16 %v959_v7  ;;  %v295_v21 = vunpack.c.l.bf16 %v962_v8 }
  0x3e   : > { %v296_v22 = vunpack.c.h.bf16 %v962_v8  ;;  %v297_v23 = vunpack.c.l.bf16 %v965_v9 }
  0x3f   : > { %348 = vperm.xlu1 %701, %v310_v24   ;;  %343 = vperm.xlu0 %700, %v309_v25  }
  0x43   : > { %398 = vperm.xlu1 %701, %v384_v26   ;;  %393 = vperm.xlu0 %700, %v383_v27   ;;  %v298_v27 = vunpack.c.h.bf16 %v965_v9 }
  0x47   : > { %408 = vperm.xlu1 %701, %v386_v28   ;;  %403 = vperm.xlu0 %700, %v385_v29  }
  0x4b   : > { %418 = vperm.xlu1 %701, %v388_v30   ;;  %413 = vperm.xlu0 %700, %v387_v31  }
  0x4f   : > { %428 = vperm.xlu1 %701, %v390_v32   ;;  %423 = vperm.xlu0 %700, %v389_v33  }
  0xb2   : > { %v917_v34 = vpop.permute.xlu1 %323  ;;  %v314_v35 = vpop.permute.xlu0 %313 }
  0xb3   : > { %v359_v24 = vmul.f32 %v917_v34, %v279_v44  ;;  %v360_v25 = vmul.f32 %v917_v34, %v280_v45  ;;  %v361_v26 = vmul.f32 %v917_v34, %v281_v49  ;;  %v351_v28 = vmul.f32 %v314_v35, %v271_v50 }
  0xb4   : > { %v352_v29 = vmul.f32 %v314_v35, %v272_v51  ;;  %v353_v30 = vmul.f32 %v314_v35, %v273_v55  ;;  %v354_v31 = vmul.f32 %v314_v35, %v274_v12  ;;  %v362_v37 = vmul.f32 %v917_v34, %v282_v54 }
  0xb6   : > { %v925_v40 = vpop.permute.xlu1 %328  ;;  %v319_v43 = vpop.permute.xlu0 %318 }
  0xb7   : > { %v363_v32 = vmul.f32 %v925_v40, %v283_v56  ;;  %v355_v33 = vmul.f32 %v319_v43, %v275_v60  ;;  %v356_v36 = vmul.f32 %v319_v43, %v276_v61  ;;  %v364_v38 = vmul.f32 %v925_v40, %v284_v57 }
  0xb8   : > { %v365_v39 = vmul.f32 %v925_v40, %v285_v58  ;;  %v357_v41 = vmul.f32 %v319_v43, %v277_v62  ;;  %v358_v45 = vmul.f32 %v319_v43, %v278_v11  ;;  %v366_v34 = vmul.f32 %v925_v40, %v286_v16 }
  0xba   : > { %v948_v63 = vpop.permute.xlu1 %338  ;;  %v334_v1 = vpop.permute.xlu0 %333 }
  0xbb   : > { %v371_v35 = vmul.f32 %v948_v63, %v291_v0  ;;  %v372_v50 = vmul.f32 %v948_v63, %v292_v3  ;;  %v373_v51 = vmul.f32 %v948_v63, %v293_v4  ;;  %v367_v52 = vmul.f32 %v334_v1, %v287_v5 }
  0xbc   : > { %v368_v53 = vmul.f32 %v334_v1, %v288_v6  ;;  %v369_v56 = vmul.f32 %v334_v1, %v289_v10  ;;  %v370_v60 = vmul.f32 %v334_v1, %v290_v13  ;;  %v374_v10 = vmul.f32 %v948_v63, %v294_v17 }
  0xbe   : > { %v973_v18 = vpop.permute.xlu1 %348  ;;  %v976_v20 = vpop.permute.xlu0 %343 }
  0xbf   : > { %v379_v40 = vmul.f32 %v973_v18, %v299_v14  ;;  %v380_v5 = vmul.f32 %v973_v18, %v300_v15  ;;  %v302_v15 = vunpack.c.h.bf16 %v959_v7  ;;  %v375_v63 = vmul.f32 %v976_v20, %v295_v21 }
  0xc0   : > { %v376_v17 = vmul.f32 %v976_v20, %v296_v22 }
  0xc2   : > { %v399_v42 = vpop.permute.xlu1 %398  ;;  %v394_v44 = vpop.permute.xlu0 %393 }
  0xc3   : > { %v435_v46 = vadd.f32 %v399_v42, %v355_v33  ;;  %v436_v47 = vadd.f32 %v399_v42, %v356_v36  ;;  %v431_v48 = vadd.f32 %v394_v44, %v351_v28  ;;  %v432_v49 = vadd.f32 %v394_v44, %v352_v29 }
  0xc4   : > { %v437_v43 = vadd.f32 %v399_v42, %v357_v41  ;;  %v433_v59 = vadd.f32 %v394_v44, %v353_v30  ;;  %v438_v11 = vadd.f32 %v399_v42, %v358_v45  ;;  %v434_v12 = vadd.f32 %v394_v44, %v354_v31 }
  0xc5   : > { %v476_v54 = vmax.f32 %v435_v46, %v436_v47  ;;  %v471_v55 = vmax.f32 %v431_v48, %v432_v49 }
  0xc6   : > { %v409_v57 = vpop.permute.xlu1 %408  ;;  %v404_v58 = vpop.permute.xlu0 %403 }
  0xc7   : > { %v443_v61 = vadd.f32 %v409_v57, %v363_v32  ;;  %v444_v62 = vadd.f32 %v409_v57, %v364_v38  ;;  %v439_v2 = vadd.f32 %v404_v58, %v359_v24  ;;  %v440_v0 = vadd.f32 %v404_v58, %v360_v25 }
  0xc8   : > { %v477_v3 = vmax.f32 %v476_v54, %v437_v43  ;;  %v472_v4 = vmax.f32 %v471_v55, %v433_v59  ;;  %v441_v1 = vadd.f32 %v404_v58, %v361_v26  ;;  %v442_v31 = vadd.f32 %v404_v58, %v362_v37 }
  0xc9   : > { %v481_v6 = vmax.f32 %v439_v2, %v440_v0  ;;  %v486_v13 = vmax.f32 %v443_v61, %v444_v62  ;;  %v445_v14 = vadd.f32 %v409_v57, %v365_v39  ;;  %v377_v26 = vmul.f32 %v976_v20, %v297_v23  ;;  %v463_v61 = vld [vmem:[#allocation2] sm:$0xff] }
  0xca   : > { %v419_v16 = vpop.permute.xlu1 %418  ;;  %v414_v28 = vpop.permute.xlu0 %413  ;;  %v478_v29 = vmax.f32 %v477_v3, %v438_v11  ;;  %v473_v30 = vmax.f32 %v472_v4, %v434_v12  ;;  %v381_v23 = vmul.f32 %v973_v18, %v301_v19  ;;  %v382_v19 = vmul.f32 %v973_v18, %v302_v15  ;;  %v465_v3 = vld [vmem:[#allocation2 + $0x10] sm:$0xff]  ;;  %v467_v4 = vld [vmem:[#allocation2 + $0x20] sm:$0xff] }
  0xcb   : > { %v451_v32 = vadd.f32 %v419_v16, %v371_v35  ;;  %v452_v24 = vadd.f32 %v419_v16, %v372_v50  ;;  %v447_v25 = vadd.f32 %v414_v28, %v367_v52  ;;  %v448_v33 = vadd.f32 %v414_v28, %v368_v53 }
  0xcc   : > { %479 = vmax.xlane.f32.xlu1 %v478_v29  ;;  %474 = vmax.xlane.f32.xlu0 %v473_v30  ;;  %v482_v36 = vmax.f32 %v481_v6, %v441_v1  ;;  %v449_v44 = vadd.f32 %v414_v28, %v369_v56  ;;  %v487_v39 = vmax.f32 %v486_v13, %v445_v14  ;;  %v468_v29 = vld [vmem:[#allocation2 + $0x28] sm:$0xff] }
  0xcd   : > { %v491_v38 = vmax.f32 %v447_v25, %v448_v33  ;;  %v496_v45 = vmax.f32 %v451_v32, %v452_v24  ;;  %v450_v21 = vadd.f32 %v414_v28, %v370_v60  ;;  %v446_v35 = vadd.f32 %v409_v57, %v366_v34  ;;  %v469_v28 = vld [vmem:[#allocation2 + $0x30] sm:$0xff]  ;;  %v470_v24 = vld [vmem:[#allocation2 + $0x38] sm:$0xff] }
  0xce   : > { %v429_v41 = vpop.permute.xlu1 %428  ;;  %v424_v42 = vpop.permute.xlu0 %423  ;;  %v483_v37 = vmax.f32 %v482_v36, %v442_v31  ;;  %v453_v22 = vadd.f32 %v419_v16, %v373_v51  ;;  %v378_v50 = vmul.f32 %v976_v20, %v298_v27  ;;  %v454_v34 = vadd.f32 %v419_v16, %v374_v10  ;;  %v464_v27 = vld [vmem:[#allocation2 + $0x8] sm:$0xff] }
  0xcf   : > { %v459_v46 = vadd.f32 %v429_v41, %v379_v40  ;;  %v460_v47 = vadd.f32 %v429_v41, %v380_v5  ;;  %v455_v48 = vadd.f32 %v424_v42, %v375_v63  ;;  %v456_v49 = vadd.f32 %v424_v42, %v376_v17  ;;  %v466_v40 = vld [vmem:[#allocation2 + $0x18] sm:$0xff] }
  0xd0   : > { %484 = vmax.xlane.f32.xlu0 %v483_v37  ;;  %v492_v8 = vmax.f32 %v491_v38, %v449_v44  ;;  %v457_v52 = vadd.f32 %v424_v42, %v377_v26  ;;  %v488_v55 = vmax.f32 %v487_v39, %v446_v35  ;;  %v497_v56 = vmax.f32 %v496_v45, %v453_v22 }
  0xd1   : > { %v501_v53 = vmax.f32 %v455_v48, %v456_v49  ;;  %v506_v58 = vmax.f32 %v459_v46, %v460_v47  ;;  %v458_v43 = vadd.f32 %v424_v42, %v378_v50  ;;  %v461_v51 = vadd.f32 %v429_v41, %v381_v23 }
  0xd2   : > { %v493_v54 = vmax.f32 %v492_v8, %v450_v21  ;;  %v498_v7 = vmax.f32 %v497_v56, %v454_v34  ;;  %v462_v9 = vadd.f32 %v429_v41, %v382_v19 }
  0xd3   : > { %v502_v59 = vmax.f32 %v501_v53, %v457_v52  ;;  %v507_v60 = vmax.f32 %v506_v58, %v461_v51 }
  0xd4   : > { %494 = vmax.xlane.f32.xlu1 %v493_v54  ;;  %489 = vmax.xlane.f32.xlu0 %v488_v55 }
  0xd5   : > { %v503_v57 = vmax.f32 %v502_v59, %v458_v43  ;;  %v508_v20 = vmax.f32 %v507_v60, %v462_v9 }
  0xd8   : > { %504 = vmax.xlane.f32.xlu1 %v503_v57  ;;  %499 = vmax.xlane.f32.xlu0 %v498_v7 }
  0xdc   : > { %509 = vmax.xlane.f32.xlu0 %v508_v20 }
 0x159   : > { %v480_v62 = vpop.xlane.xlu1 %479  ;;  %v475_v2 = vpop.xlane.xlu0 %474 }
 0x15a   : > { %v512_v0 = vmax.f32 %v464_v27, %v480_v62  ;;  %v511_v11 = vmax.f32 %v463_v61, %v475_v2 }
 0x15c   : > { %521 = vst.msk [vmem:[#allocation2 + $0x8] sm:$0xff] %vm519_vm1, %v512_v0  ;;  %520 = vst.msk [vmem:[#allocation2] sm:$0xff] %vm519_vm1, %v511_v11 }
 0x15d   : > { %v485_v12 = vpop.xlane.xlu0 %484 }
 0x15e   : > { %v513_v18 = vmax.f32 %v465_v3, %v485_v12 }
 0x160   : > { %522 = vst.msk [vmem:[#allocation2 + $0x10] sm:$0xff] %vm519_vm1, %v513_v18 }
 0x161   : > { %v495_v5 = vpop.xlane.xlu1 %494  ;;  %v490_v6 = vpop.xlane.xlu0 %489 }
 0x162   : > { %v515_v10 = vmax.f32 %v467_v4, %v495_v5  ;;  %v514_v16 = vmax.f32 %v466_v40, %v490_v6 }
 0x163   : > { %v532_v31 = vld [vmem:[#allocation2] sm:$0xff] (!%p637_p12)  ;;  %v533_v36 = vld [vmem:[#allocation2 + $0x8] sm:$0xff] (!%p637_p12) }
 0x164   : > { %524 = vst.msk [vmem:[#allocation2 + $0x20] sm:$0xff] %vm519_vm1, %v515_v10  ;;  %523 = vst.msk [vmem:[#allocation2 + $0x18] sm:$0xff] %vm519_vm1, %v514_v16 }
 0x165   : > { %v505_v30 = vpop.xlane.xlu1 %504  ;;  %v500_v1 = vpop.xlane.xlu0 %499  ;;  %540 = vst.msk [vmem:[%s864_s22] sm:$0xff] (!%p637_p12), %vm519_vm1, %v532_v31  ;;  %541 = vst.msk [vmem:[%s864_s22 + $0x8] sm:$0xff] (!%p637_p12), %vm519_vm1, %v533_v36 }
 0x166   : > { %v517_v13 = vmax.f32 %v469_v28, %v505_v30  ;;  %v516_v32 = vmax.f32 %v468_v29, %v500_v1  ;;  %531 = sbr.rel (%p637_p12) target bundleno = 373 (0x175), region = 63 }
 0x167   : > { %v534_v14 = vld [vmem:[#allocation2 + $0x10] sm:$0xff] (!%p637_p12) }
 0x168   : > { %526 = vst.msk [vmem:[#allocation2 + $0x30] sm:$0xff] %vm519_vm1, %v517_v13  ;;  %525 = vst.msk [vmem:[#allocation2 + $0x28] sm:$0xff] %vm519_vm1, %v516_v32 }
 0x169   : > { %v510_v25 = vpop.xlane.xlu0 %509  ;;  %542 = vst.msk [vmem:[%s864_s22 + $0x10] sm:$0xff] (!%p637_p12), %vm519_vm1, %v534_v14 }
 0x16a   : > { %v518_v33 = vmax.f32 %v470_v24, %v510_v25 }
 0x16b   : > { %v535_v15 = vld [vmem:[#allocation2 + $0x18] sm:$0xff] (!%p637_p12)  ;;  %v536_v63 = vld [vmem:[#allocation2 + $0x20] sm:$0xff] (!%p637_p12) }
 0x16c   : > { %527 = vst.msk [vmem:[#allocation2 + $0x38] sm:$0xff] %vm519_vm1, %v518_v33  ;;  %543 = vst.msk [vmem:[%s864_s22 + $0x18] sm:$0xff] (!%p637_p12), %vm519_vm1, %v535_v15 }
 0x16d   : > { %544 = vst.msk [vmem:[%s864_s22 + $0x20] sm:$0xff] %vm519_vm1, %v536_v63 }
 0x16f   : > { %v537_v17 = vld [vmem:[#allocation2 + $0x28] sm:$0xff]  ;;  %v538_v26 = vld [vmem:[#allocation2 + $0x30] sm:$0xff] }
 0x170   : > { %545 = vst.msk [vmem:[%s864_s22 + $0x28] sm:$0xff] %vm519_vm1, %v537_v17  ;;  %546 = vst.msk [vmem:[%s864_s22 + $0x30] sm:$0xff] %vm519_vm1, %v538_v26 }
 0x173   : > { %v539_v38 = vld [vmem:[#allocation2 + $0x38] sm:$0xff] }
 0x174   : > { %547 = vst.msk [vmem:[%s864_s22 + $0x38] sm:$0xff] %vm519_vm1, %v539_v38 }
 0x175 PF: > { %s13_s18 = sadd.s32 1, %s756_s18   ;;  %s1063_s12 = smov %s736_s13 }
 0x176   : > { %p10_p13 = scmp.ge.s32.totalorder %s13_s18, 6   ;;  %s1064_s13 = smov %s831_s27 }
 0x177   : > { %s1065_s14 = smov %s748_s16  ;;  %s1066_s15 = smov %s752_s17 }
 0x178   : > { %s1067_s16 = smov %s1070_s19  ;;  %s1068_s17 = smov %s1074_s20 }
 0x179   :  { %12 = sbr.rel (!%p10_p13) target bundleno = 4 (0x4), region = 98 }

// kernel: ae_pointnet_dcg_forward.16
= control target key start
LH: loop header
LB: loop body
LE: loop exit
PB: predicated region body
PF: predicated region fallthrough
CT: control target
= control target key end

     0   :  { %s1538_s24 = smov 0   ;;  %s1540_s25 = smov 0   ;;  %s2095_s0 = inlined_call_operand.vmem [shape: bf16[1,32,2048], index: 0, kind: input, shape index: {}]   ;;  %s2096_s1 = inlined_call_operand.vmem [shape: f32[1,32,1], index: 1, kind: input, shape index: {}]   ;;  %s2097_s2 = inlined_call_operand.vmem [shape: f32[1,32,1], index: 2, kind: input, shape index: {}]   ;;  %s2098_s3 = inlined_call_operand.vmem [shape: bf16[1,64,32], index: 3, kind: input, shape index: {}]   ;;  %s2099_s4 = inlined_call_operand.vmem [shape: f32[1,64,1], index: 4, kind: input, shape index: {}]   ;;  %s2100_s5 = inlined_call_operand.vmem [shape: bf16[1,64,2048], index: 5, kind: output, shape index: {0}]   ;;  %s2101_s6 = inlined_call_operand.vmem [shape: f32[1,64,1], index: 6, kind: output, shape index: {1}]   ;;  %s2102_s7 = inlined_call_operand.vmem [shape: f32[1,64,1], index: 7, kind: output, shape index: {2}]  }
   0x1   :  { %s1542_s26 = smov 0   ;;  %s1544_s27 = smov 0  }
   0x2   :  { %s1546_s28 = smov 0  }
   0x3 LB: > { %s27_s29 = sadd.s32 1, %s1490_s27  ;;  %s1340_s30 = sadd.s32 4294967295, %s1494_s28   ;;  %s1494_s28 = sphi %s1546_s28, %s18_s28   ;;  %s1490_s27 = sphi %s1544_s27, %s2107_s27   ;;  %s1486_s26 = sphi %s1542_s26, %s2106_s26   ;;  %s1482_s25 = sphi %s1540_s25, %s2105_s25   ;;  %s1478_s24 = sphi %s1538_s24, %s2104_s24  }
   0x4   : > { %p28_p0 = scmp.ge.s32.totalorder %s27_s29, 4  ;;  %p46_p1 = scmp.ne.s32.totalorder %s1482_s25, %s1478_s24 }
   0x5   : > { %p47_p2 = scmp.eq.s32.totalorder %s1494_s28, 0  ;;  %p182_p4 = scmp.eq.s32.totalorder %s1340_s30, 3 }
   0x6   : > { %s2109_s29 = smov (%p28_p0, %s27_s29), 0  ;;  %s39_s9 = sadd.s32 1, %s1482_s25 }
   0x7   : > { %p48_p3 = por %p47_p2, %p46_p1  ;;  %s35_s8 = ssub.s32 %s1490_s27, %s2109_s29 }
   0x8   : > { %p37_p5 = scmp.eq.s32.totalorder %s35_s8, 0  ;;  %p1573_p6 = por %p182_p4, %p46_p1 }
   0x9   : > { %p1347_p7 = scmp.ge.s32.totalorder %s1494_s28, 4 }
   0xa   : > { %s1578_s11 = scalar_select %p37_p5, %s1482_s25, %s39_s9  }
   0xb   : > { %288 = sbr.rel (%p1347_p7) target bundleno = 26 (0x1a), region = 32 }
  0x12   : > { %291 = sbr.rel (!%p48_p3) target bundleno = 26 (0x1a), region = 36  ;;  %s293_s12 = sand.u32 (%p48_p3), 1, %s1482_s25  }
  0x13   : > { %s1390_s13 = sshll.u32 (%p48_p3), %s1490_s27, 4  ;;  %s1348_s14 = sshll.u32 (%p48_p3), %s293_s12, 6 }
  0x14   : > { %s300_s17 = scalar_lea.vmem (%p48_p3), %s2095_s0, %s1390_s13  ;;  %s295_s18 = scalar_lea.vmem (%p48_p3), [#allocation2], %s1348_s14 }
  0x15   : > { %v313_v0 = vld [vmem:[%s300_s17] sm:$0xff] (%p48_p3)  ;;  %v315_v1 = vld [vmem:[%s300_s17 + $0x8] sm:$0xff] (%p48_p3) }
  0x16   : > { %v317_v2 = vld [vmem:[%s300_s17 + $0x40] sm:$0xff] (%p48_p3)  ;;  %314 = vst [vmem:[%s295_s18] sm:$0xff] (%p48_p3), %v313_v0  ;;  %316 = vst [vmem:[%s295_s18 + $0x8] sm:$0xff] (%p48_p3), %v315_v1  ;;  %v319_v3 = vld [vmem:[%s300_s17 + $0x48] sm:$0xff] (%p48_p3) }
  0x17   : > { %318 = vst [vmem:[%s295_s18 + $0x10] sm:$0xff] (%p48_p3), %v317_v2  ;;  %v321_v4 = vld [vmem:[%s300_s17 + $0x80] sm:$0xff] (%p48_p3)  ;;  %v323_v5 = vld [vmem:[%s300_s17 + $0x88] sm:$0xff] (%p48_p3)  ;;  %320 = vst [vmem:[%s295_s18 + $0x18] sm:$0xff] (%p48_p3), %v319_v3 }
  0x18   : > { %322 = vst [vmem:[%s295_s18 + $0x20] sm:$0xff] (%p48_p3), %v321_v4  ;;  %324 = vst [vmem:[%s295_s18 + $0x28] sm:$0xff] (%p48_p3), %v323_v5  ;;  %v325_v6 = vld [vmem:[%s300_s17 + $0xc0] sm:$0xff] (%p48_p3)  ;;  %v327_v7 = vld [vmem:[%s300_s17 + $0xc8] sm:$0xff] (%p48_p3) }
  0x19   : > { %326 = vst [vmem:[%s295_s18 + $0x30] sm:$0xff] %v325_v6  ;;  %328 = vst [vmem:[%s295_s18 + $0x38] sm:$0xff] %v327_v7 }
  0x1a PF: > { %p1351_p8 = scmp.ge.s32.totalorder %s1494_s28, 1  ;;  %p333_p9 = scmp.lt.s32.totalorder %s1494_s28, 5 }
  0x1c   : > { %p334_p10 = pnand %p1351_p8, %p333_p9 }
  0x1d   : > { %v497_v8 = vld [vmem:[%s2097_s2] sm:$0xff] (!%p334_p10)  ;;  %v1496_v10 = vmov (!%p334_p10), 0   ;;  %v498_v11 = vld [vmem:[%s2097_s2 + $0x8] sm:$0xff] (!%p334_p10)  ;;  %v460_v13 = vld [vmem:[%s2096_s1 + $0x18] sm:$0xff] (!%p334_p10)  ;;  %s340_s21 = sand.u32 (!%p334_p10), 1, %s1478_s24   ;;  %vm637_vm0 = vcmask (!%p334_p10), 261120  }
  0x1e   : > { %337 = sbr.rel (%p334_p10) target bundleno = 605 (0x25d), region = 59  ;;  %v457_v9 = vld [vmem:[%s2096_s1] sm:$0xff] (!%p334_p10)  ;;  %1451 = vset.pattern.permute.xlu1 (!%p334_p10), %v1496_v10  ;;  %1450 = vset.pattern.permute.xlu0 (!%p334_p10), %v1496_v10  ;;  %v458_v12 = vld [vmem:[%s2096_s1 + $0x8] sm:$0xff] (!%p334_p10)  ;;  %v459_v14 = vld [vmem:[%s2096_s1 + $0x10] sm:$0xff] (!%p334_p10)  ;;  %s1352_s22 = sshll.u32 (!%p334_p10), %s340_s21, 6 }
  0x1f   : > { %503 = vperm.xlu1 (!%p334_p10), %1451, %v497_v8   ;;  %463 = vperm.xlu0 (!%p334_p10), %1450, %v457_v9   ;;  %v500_v15 = vld [vmem:[%s2097_s2 + $0x18] sm:$0xff] (!%p334_p10)  ;;  %v499_v16 = vld [vmem:[%s2097_s2 + $0x10] sm:$0xff] (!%p334_p10)  ;;  %v570_v17 = vld [vmem:[%s2099_s4 + $0x8] sm:$0xff] (!%p334_p10)  ;;  %s342_s23 = scalar_lea.vmem (!%p334_p10), [#allocation2], %s1352_s22  ;;  %s1353_s17 = sshll.u32 (!%p334_p10), %s340_s21, 7 }
  0x20   : > { %682 = vmatprep.mubr.bf16.mxu0 (!%p334_p10), %v1496_v10  ;;  %755 = vmatprep.mubr.bf16.mxu1 (!%p334_p10), %v1496_v10  ;;  %v569_v18 = vld [vmem:[%s2099_s4] sm:$0xff] (!%p334_p10)  ;;  %v572_v19 = vld [vmem:[%s2099_s4 + $0x18] sm:$0xff] (!%p334_p10)  ;;  %v571_v20 = vld [vmem:[%s2099_s4 + $0x10] sm:$0xff] (!%p334_p10)  ;;  %s1691_s24 = scalar_lea.vmem (!%p334_p10), [#allocation3], %s1353_s17  ;;  %p1382_p11 = scmp.ne.s32.totalorder (!%p334_p10), %s1486_s26, 0 }
  0x21   : > { %v574_v21 = vld [vmem:[%s2099_s4 + $0x28] sm:$0xff] (!%p334_p10)  ;;  %v573_v22 = vld [vmem:[%s2099_s4 + $0x20] sm:$0xff] (!%p334_p10)  ;;  %v576_v23 = vld [vmem:[%s2099_s4 + $0x38] sm:$0xff] (!%p334_p10) }
  0x22   : > { %v575_v24 = vld [vmem:[%s2099_s4 + $0x30] sm:$0xff] (!%p334_p10)  ;;  %v433_v25 = vld [vmem:[%s342_s23] sm:$0xff] (!%p334_p10)  ;;  %v434_v26 = vld [vmem:[%s342_s23 + $0x8] sm:$0xff] (!%p334_p10) }
  0x23   : > { %508 = vperm.xlu1 (!%p334_p10), %1451, %v498_v11   ;;  %468 = vperm.xlu0 (!%p334_p10), %1450, %v458_v12   ;;  %v441_v27 = vunpack.c.l.bf16 (!%p334_p10), %v433_v25  ;;  %v443_v28 = vunpack.c.l.bf16 (!%p334_p10), %v434_v26  ;;  %v435_v29 = vld [vmem:[%s342_s23 + $0x10] sm:$0xff] (!%p334_p10)  ;;  %v436_v30 = vld [vmem:[%s342_s23 + $0x18] sm:$0xff] (!%p334_p10)  ;;  %v442_v31 = vunpack.c.h.bf16 (!%p334_p10), %v433_v25  ;;  %v444_v32 = vunpack.c.h.bf16 (!%p334_p10), %v434_v26  ;;  %v437_v48 = vld [vmem:[%s342_s23 + $0x20] sm:$0xff] (!%p334_p10) }
  0x24   : > { %v445_v35 = vunpack.c.l.bf16 (!%p334_p10), %v435_v29  ;;  %v447_v36 = vunpack.c.l.bf16 (!%p334_p10), %v436_v30  ;;  %v446_v37 = vunpack.c.h.bf16 (!%p334_p10), %v435_v29  ;;  %v439_v40 = vld [vmem:[%s342_s23 + $0x30] sm:$0xff] (!%p334_p10)  ;;  %v448_v43 = vunpack.c.h.bf16 (!%p334_p10), %v436_v30  ;;  %v440_v44 = vld [vmem:[%s342_s23 + $0x38] sm:$0xff] (!%p334_p10)  ;;  %v438_v54 = vld [vmem:[%s342_s23 + $0x28] sm:$0xff] (!%p334_p10) }
  0x25   : > { %v453_v47 = vunpack.c.l.bf16 %v439_v40  ;;  %v454_v57 = vunpack.c.h.bf16 %v439_v40  ;;  %v455_v58 = vunpack.c.l.bf16 %v440_v44  ;;  %v456_v59 = vunpack.c.h.bf16 %v440_v44 }
  0x26   : > { %v449_v61 = vunpack.c.l.bf16 %v437_v48  ;;  %v450_v3 = vunpack.c.h.bf16 %v437_v48  ;;  %v451_v4 = vunpack.c.l.bf16 %v438_v54  ;;  %v452_v5 = vunpack.c.h.bf16 %v438_v54 }
  0x27   : > { %478 = vperm.xlu1 %1451, %v460_v13   ;;  %473 = vperm.xlu0 %1450, %v459_v14   ;;  %vm912_vm1 = vcmask (!%p1382_p11), 7168  }
  0x2b   : > { %518 = vperm.xlu1 %1451, %v500_v15   ;;  %513 = vperm.xlu0 %1450, %v499_v16  }
  0x2f   : > { %584 = vperm.xlu1 %1451, %v570_v17   ;;  %579 = vperm.xlu0 %1450, %v569_v18  }
  0x33   : > { %594 = vperm.xlu1 %1451, %v572_v19   ;;  %589 = vperm.xlu0 %1450, %v571_v20  }
  0x37   : > { %604 = vperm.xlu1 %1451, %v574_v21   ;;  %599 = vperm.xlu0 %1450, %v573_v22  }
  0x3b   : > { %614 = vperm.xlu1 %1451, %v576_v23   ;;  %609 = vperm.xlu0 %1450, %v575_v24  }
  0x9e   : > { %v504_v33 = vpop.permute.xlu1 %503  ;;  %v464_v34 = vpop.permute.xlu0 %463 }
  0x9f   : > { %v481_v38 = vmul.f32 %v464_v34, %v441_v27  ;;  %v483_v39 = vmul.f32 %v464_v34, %v443_v28  ;;  %v482_v41 = vmul.f32 %v464_v34, %v442_v31  ;;  %v484_v42 = vmul.f32 %v464_v34, %v444_v32 }
  0xa1   : > { %v522_v49 = vadd.f32 %v504_v33, %v482_v41  ;;  %v524_v50 = vadd.f32 %v504_v33, %v484_v42  ;;  %v521_v51 = vadd.f32 %v504_v33, %v481_v38  ;;  %v523_v56 = vadd.f32 %v504_v33, %v483_v39 }
  0xa2   : > { %v509_v45 = vpop.permute.xlu1 %508  ;;  %v469_v46 = vpop.permute.xlu0 %468 }
  0xa3   : > { %v485_v52 = vmul.f32 %v469_v46, %v445_v35  ;;  %v487_v53 = vmul.f32 %v469_v46, %v447_v36  ;;  %v486_v55 = vmul.f32 %v469_v46, %v446_v37  ;;  %v488_v60 = vmul.f32 %v469_v46, %v448_v43 }
  0xa4   : > { %v538_v7 = vmax.f32 %v522_v49, 0.0  ;;  %v540_v8 = vmax.f32 %v524_v50, 0.0  ;;  %v537_v9 = vmax.f32 %v521_v51, 0.0  ;;  %v539_v11 = vmax.f32 %v523_v56, 0.0  ;;  %v1452_v50 = vld [vmem:[%s2098_s3] sm:$0xff]   ;;  %v1453_v51 = vld [vmem:[%s2098_s3 + $0x8] sm:$0xff]  }
  0xa5   : > { %v526_v62 = vadd.f32 %v509_v45, %v486_v55  ;;  %v525_v63 = vadd.f32 %v509_v45, %v485_v52  ;;  %v527_v0 = vadd.f32 %v509_v45, %v487_v53  ;;  %v528_v6 = vadd.f32 %v509_v45, %v488_v60  ;;  %v1454_v52 = vld [vmem:[%s2098_s3 + $0x10] sm:$0xff]   ;;  %v1455_v53 = vld [vmem:[%s2098_s3 + $0x18] sm:$0xff]  }
  0xa6   : > { %v479_v1 = vpop.permute.xlu1 %478  ;;  %v474_v2 = vpop.permute.xlu0 %473 }
  0xa7   : > { %v493_v12 = vmul.f32 %v479_v1, %v453_v47  ;;  %v494_v13 = vmul.f32 %v479_v1, %v454_v57  ;;  %v495_v14 = vmul.f32 %v479_v1, %v455_v58  ;;  %v496_v15 = vmul.f32 %v479_v1, %v456_v59 }
  0xa8   : > { %v542_v16 = vmax.f32 %v526_v62, 0.0  ;;  %v544_v17 = vmax.f32 %v528_v6, 0.0  ;;  %v541_v18 = vmax.f32 %v525_v63, 0.0  ;;  %v543_v19 = vmax.f32 %v527_v0, 0.0 }
  0xa9   : > { %v489_v20 = vmul.f32 %v474_v2, %v449_v61  ;;  %v490_v21 = vmul.f32 %v474_v2, %v450_v3  ;;  %v491_v22 = vmul.f32 %v474_v2, %v451_v4  ;;  %v492_v23 = vmul.f32 %v474_v2, %v452_v5 }
  0xaa   : > { %v519_v24 = vpop.permute.xlu1 %518  ;;  %v514_v25 = vpop.permute.xlu0 %513  ;;  %v554_v34 = vpack.c.bf16 %v542_v16, %v538_v7  ;;  %v556_v35 = vpack.c.bf16 %v544_v17, %v540_v8  ;;  %v553_v36 = vpack.c.bf16 %v541_v18, %v537_v9  ;;  %v555_v37 = vpack.c.bf16 %v543_v19, %v539_v11 }
  0xab   : > { %v533_v26 = vadd.f32 %v519_v24, %v493_v12  ;;  %v534_v27 = vadd.f32 %v519_v24, %v494_v13  ;;  %v535_v28 = vadd.f32 %v519_v24, %v495_v14  ;;  %v536_v29 = vadd.f32 %v519_v24, %v496_v15 }
  0xac   : > { %v529_v30 = vadd.f32 %v514_v25, %v489_v20  ;;  %v530_v31 = vadd.f32 %v514_v25, %v490_v21  ;;  %v531_v32 = vadd.f32 %v514_v25, %v491_v22  ;;  %v532_v33 = vadd.f32 %v514_v25, %v492_v23  ;;  %650 = vmatprep.subr.bf16.mxu0 %v554_v34 }
  0xad   : > { %v550_v39 = vmax.f32 %v534_v27, 0.0  ;;  %v552_v41 = vmax.f32 %v536_v29, 0.0  ;;  %723 = vmatprep.subr.bf16.mxu1 %v556_v35  ;;  %v549_v43 = vmax.f32 %v533_v26, 0.0  ;;  %v551_v45 = vmax.f32 %v535_v28, 0.0  ;;  %651 = vmatpush1.bf16.msra.mxu0 %v553_v36 }
  0xae   : > { %v546_v38 = vmax.f32 %v530_v31, 0.0  ;;  %v548_v40 = vmax.f32 %v532_v33, 0.0  ;;  %v545_v42 = vmax.f32 %v529_v30, 0.0  ;;  %v547_v44 = vmax.f32 %v531_v32, 0.0  ;;  %724 = vmatpush1.bf16.msra.mxu1 %v555_v37  ;;  %v585_v54 = vpop.permute.xlu1 %584  ;;  %v580_v55 = vpop.permute.xlu0 %579 }
  0xb0   : > { %v558_v46 = vpack.c.bf16 %v550_v39, %v546_v38  ;;  %v560_v47 = vpack.c.bf16 %v552_v41, %v548_v40  ;;  %v557_v48 = vpack.c.bf16 %v549_v43, %v545_v42  ;;  %v559_v49 = vpack.c.bf16 %v551_v45, %v547_v44 }
  0xb2   : > { %652 = vmatprep.subr.bf16.mxu0 %v558_v46  ;;  %725 = vmatprep.subr.bf16.mxu1 %v560_v47  ;;  %v595_v12 = vpop.permute.xlu1 %594  ;;  %v590_v13 = vpop.permute.xlu0 %589 }
  0xb3   : > { %653 = vmatpush1.bf16.msra.mxu0 %v557_v48  ;;  %726 = vmatpush1.bf16.msra.mxu1 %v559_v49 }
  0xb6   : > { %1358 = vmatmul.mubr.msk.bf16.vlgmr.msra.gmra.mrb[0].mxu0 %vm637_vm0, %v1452_v50  ;;  %1362 = vmatmul.mubr.msk.bf16.vlgmr.msra.gmra.mrb[0].mxu1 %vm637_vm0, %v1452_v50  ;;  %v605_v34 = vpop.permute.xlu1 %604  ;;  %v600_v35 = vpop.permute.xlu0 %599 }
  0xb7   : > { %692 = vmatprep.mubr.bf16.mxu0 %v1496_v10  ;;  %765 = vmatprep.mubr.bf16.mxu1 %v1496_v10 }
  0xbe   : > { %1359 = vmatmul.mubr.msk.bf16.gmra.mrb[4].mxu0 %vm637_vm0, %v1453_v51  ;;  %1363 = vmatmul.mubr.msk.bf16.gmra.mrb[4].mxu1 %vm637_vm0, %v1453_v51 }
  0xbf   : > { %702 = vmatprep.mubr.bf16.mxu0 %v1496_v10  ;;  %775 = vmatprep.mubr.bf16.mxu1 %v1496_v10 }
  0xc6   : > { %1360 = vmatmul.mubr.msk.bf16.gmra.mrb[8].mxu0 %vm637_vm0, %v1454_v52  ;;  %1364 = vmatmul.mubr.msk.bf16.gmra.mrb[8].mxu1 %vm637_vm0, %v1454_v52 }
  0xc7   : > { %712 = vmatprep.mubr.bf16.mxu0 %v1496_v10  ;;  %785 = vmatprep.mubr.bf16.mxu1 %v1496_v10 }
  0xce   : > { %1361 = vmatmul.mubr.msk.bf16.gmra.mrb[12].mxu0 %vm637_vm0, %v1455_v53  ;;  %1365 = vmatmul.mubr.msk.bf16.gmra.mrb[12].mxu1 %vm637_vm0, %v1455_v53 }
 0x189   : > { %v684_v56 = vpop.f32.mrb[0].mxu0  ;;  %v757_v57 = vpop.f32.mrb[0].mxu1 }
 0x18a   : > { %v1671_v58 = vadd.f32 %v684_v56, %v580_v55  ;;  %v1673_v59 = vadd.f32 %v757_v57, %v580_v55  ;;  %v686_v60 = vpop.f32.mrb[1].mxu0  ;;  %v759_v10 = vpop.f32.mrb[1].mxu1 }
 0x18b   : > { %v1675_v61 = vadd.f32 %v686_v60, %v580_v55  ;;  %v1677_v62 = vadd.f32 %v759_v10, %v580_v55  ;;  %v688_v63 = vpop.f32.mrb[2].mxu0  ;;  %v761_v0 = vpop.f32.mrb[2].mxu1 }
 0x18c   : > { %v1679_v1 = vadd.f32 %v688_v63, %v585_v54  ;;  %v1681_v2 = vadd.f32 %v761_v0, %v585_v54  ;;  %v690_v3 = vpop.f32.mrb[3].mxu0  ;;  %v763_v4 = vpop.f32.mrb[3].mxu1 }
 0x18d   : > { %v1391_v5 = vpack.c.bf16 %v1675_v61, %v1671_v58  ;;  %v1392_v6 = vpack.c.bf16 %v1677_v62, %v1673_v59  ;;  %v1687_v7 = vadd.f32 %v690_v3, %v585_v54  ;;  %v1689_v8 = vadd.f32 %v763_v4, %v585_v54  ;;  %v615_v56 = vpop.permute.xlu1 %614  ;;  %v610_v57 = vpop.permute.xlu0 %609 }
 0x18f   : > { %892 = vst [vmem:[%s1691_s24] sm:$0xff] %v1391_v5  ;;  %893 = vst [vmem:[%s1691_s24 + $0x8] sm:$0xff] %v1392_v6  ;;  %v1393_v9 = vpack.c.bf16 %v1687_v7, %v1679_v1  ;;  %v1394_v11 = vpack.c.bf16 %v1689_v8, %v1681_v2 }
 0x191   : > { %894 = vst [vmem:[%s1691_s24 + $0x10] sm:$0xff] %v1393_v9  ;;  %895 = vst [vmem:[%s1691_s24 + $0x18] sm:$0xff] %v1394_v11  ;;  %v694_v14 = vpop.f32.mrb[4].mxu0  ;;  %v767_v15 = vpop.f32.mrb[4].mxu1 }
 0x192   : > { %v1701_v16 = vadd.f32 %v694_v14, %v590_v13  ;;  %v1703_v17 = vadd.f32 %v767_v15, %v590_v13  ;;  %v696_v18 = vpop.f32.mrb[5].mxu0  ;;  %v769_v19 = vpop.f32.mrb[5].mxu1 }
 0x193   : > { %v1705_v20 = vadd.f32 %v696_v18, %v590_v13  ;;  %v1707_v21 = vadd.f32 %v769_v19, %v590_v13  ;;  %v698_v22 = vpop.f32.mrb[6].mxu0  ;;  %v771_v23 = vpop.f32.mrb[6].mxu1 }
 0x194   : > { %v1709_v24 = vadd.f32 %v698_v22, %v595_v12  ;;  %v1711_v25 = vadd.f32 %v771_v23, %v595_v12  ;;  %v700_v26 = vpop.f32.mrb[7].mxu0  ;;  %v773_v27 = vpop.f32.mrb[7].mxu1 }
 0x195   : > { %v1395_v28 = vpack.c.bf16 %v1705_v20, %v1701_v16  ;;  %v1396_v29 = vpack.c.bf16 %v1707_v21, %v1703_v17  ;;  %v1717_v30 = vadd.f32 %v700_v26, %v595_v12  ;;  %v1719_v31 = vadd.f32 %v773_v27, %v595_v12 }
 0x197   : > { %896 = vst [vmem:[%s1691_s24 + $0x20] sm:$0xff] %v1395_v28  ;;  %897 = vst [vmem:[%s1691_s24 + $0x28] sm:$0xff] %v1396_v29  ;;  %v1397_v32 = vpack.c.bf16 %v1717_v30, %v1709_v24  ;;  %v1398_v33 = vpack.c.bf16 %v1719_v31, %v1711_v25  ;;  %v1497_v28 = vmov (!%p1382_p11), 0.0  }
 0x198   : > { %913 = vst.msk [vmem:[%s2101_s6] sm:$0xff] (!%p1382_p11), %vm912_vm1, %v1497_v28  ;;  %914 = vst.msk [vmem:[%s2101_s6 + $0x8] sm:$0xff] (!%p1382_p11), %vm912_vm1, %v1497_v28 }
 0x199   : > { %898 = vst [vmem:[%s1691_s24 + $0x30] sm:$0xff] %v1397_v32  ;;  %899 = vst [vmem:[%s1691_s24 + $0x38] sm:$0xff] %v1398_v33  ;;  %v704_v36 = vpop.f32.mrb[8].mxu0  ;;  %v777_v37 = vpop.f32.mrb[8].mxu1 }
 0x19a   : > { %v1729_v38 = vadd.f32 %v704_v36, %v600_v35  ;;  %v1731_v39 = vadd.f32 %v777_v37, %v600_v35  ;;  %v706_v40 = vpop.f32.mrb[9].mxu0  ;;  %v779_v41 = vpop.f32.mrb[9].mxu1  ;;  %915 = vst.msk [vmem:[%s2101_s6 + $0x10] sm:$0xff] (!%p1382_p11), %vm912_vm1, %v1497_v28  ;;  %916 = vst.msk [vmem:[%s2101_s6 + $0x18] sm:$0xff] (!%p1382_p11), %vm912_vm1, %v1497_v28 }
 0x19b   : > { %v1733_v42 = vadd.f32 %v706_v40, %v600_v35  ;;  %v1735_v43 = vadd.f32 %v779_v41, %v600_v35  ;;  %v708_v44 = vpop.f32.mrb[10].mxu0  ;;  %v781_v45 = vpop.f32.mrb[10].mxu1  ;;  %917 = vst.msk [vmem:[%s2101_s6 + $0x20] sm:$0xff] (!%p1382_p11), %vm912_vm1, %v1497_v28  ;;  %918 = vst.msk [vmem:[%s2101_s6 + $0x28] sm:$0xff] (!%p1382_p11), %vm912_vm1, %v1497_v28 }
 0x19c   : > { %v1737_v46 = vadd.f32 %v708_v44, %v605_v34  ;;  %v1739_v47 = vadd.f32 %v781_v45, %v605_v34  ;;  %v710_v48 = vpop.f32.mrb[11].mxu0  ;;  %v783_v49 = vpop.f32.mrb[11].mxu1  ;;  %919 = vst.msk [vmem:[%s2101_s6 + $0x30] sm:$0xff] (!%p1382_p11), %vm912_vm1, %v1497_v28  ;;  %920 = vst.msk [vmem:[%s2101_s6 + $0x38] sm:$0xff] (!%p1382_p11), %vm912_vm1, %v1497_v28 }
 0x19d   : > { %v1399_v50 = vpack.c.bf16 %v1733_v42, %v1729_v38  ;;  %v1400_v51 = vpack.c.bf16 %v1735_v43, %v1731_v39  ;;  %v1745_v52 = vadd.f32 %v710_v48, %v605_v34  ;;  %v1747_v53 = vadd.f32 %v783_v49, %v605_v34  ;;  %921 = vst.msk [vmem:[%s2102_s7] sm:$0xff] (!%p1382_p11), %vm912_vm1, %v1497_v28 }
 0x19e   : > { %922 = vst.msk [vmem:[%s2102_s7 + $0x8] sm:$0xff] (!%p1382_p11), %vm912_vm1, %v1497_v28  ;;  %923 = vst.msk [vmem:[%s2102_s7 + $0x10] sm:$0xff] (!%p1382_p11), %vm912_vm1, %v1497_v28 }
 0x19f   : > { %900 = vst [vmem:[%s1691_s24 + $0x40] sm:$0xff] %v1399_v50  ;;  %901 = vst [vmem:[%s1691_s24 + $0x48] sm:$0xff] %v1400_v51  ;;  %v1401_v54 = vpack.c.bf16 %v1745_v52, %v1737_v46  ;;  %v1402_v55 = vpack.c.bf16 %v1747_v53, %v1739_v47 }
 0x1a0   : > { %924 = vst.msk [vmem:[%s2102_s7 + $0x18] sm:$0xff] (!%p1382_p11), %vm912_vm1, %v1497_v28  ;;  %925 = vst.msk [vmem:[%s2102_s7 + $0x20] sm:$0xff] (!%p1382_p11), %vm912_vm1, %v1497_v28 }
 0x1a1   : > { %902 = vst [vmem:[%s1691_s24 + $0x50] sm:$0xff] %v1401_v54  ;;  %903 = vst [vmem:[%s1691_s24 + $0x58] sm:$0xff] %v1402_v55  ;;  %v714_v60 = vpop.f32.mrb[12].mxu0  ;;  %v787_v10 = vpop.f32.mrb[12].mxu1 }
 0x1a2   : > { %v1757_v63 = vadd.f32 %v714_v60, %v610_v57  ;;  %v1759_v0 = vadd.f32 %v787_v10, %v610_v57  ;;  %v716_v3 = vpop.f32.mrb[13].mxu0  ;;  %v789_v4 = vpop.f32.mrb[13].mxu1  ;;  %926 = vst.msk [vmem:[%s2102_s7 + $0x28] sm:$0xff] (!%p1382_p11), %vm912_vm1, %v1497_v28  ;;  %927 = vst.msk [vmem:[%s2102_s7 + $0x30] sm:$0xff] (!%p1382_p11), %vm912_vm1, %v1497_v28 }
 0x1a3   : > { %v1761_v5 = vadd.f32 %v716_v3, %v610_v57  ;;  %v1763_v6 = vadd.f32 %v789_v4, %v610_v57  ;;  %v718_v9 = vpop.f32.mrb[14].mxu0  ;;  %v791_v11 = vpop.f32.mrb[14].mxu1  ;;  %911 = sbr.rel (%p1382_p11) target bundleno = 426 (0x1aa), region = 67  ;;  %928 = vst.msk [vmem:[%s2102_s7 + $0x38] sm:$0xff] (!%p1382_p11), %vm912_vm1, %v1497_v28 }
 0x1a4   : > { %v1765_v12 = vadd.f32 %v718_v9, %v615_v56  ;;  %v1767_v13 = vadd.f32 %v791_v11, %v615_v56  ;;  %v720_v14 = vpop.f32.mrb[15].mxu0  ;;  %v793_v15 = vpop.f32.mrb[15].mxu1 }
 0x1a5   : > { %v1403_v18 = vpack.c.bf16 %v1761_v5, %v1757_v63  ;;  %v1404_v19 = vpack.c.bf16 %v1763_v6, %v1759_v0  ;;  %v1773_v22 = vadd.f32 %v720_v14, %v615_v56  ;;  %v1775_v23 = vadd.f32 %v793_v15, %v615_v56 }
 0x1a7   : > { %904 = vst [vmem:[%s1691_s24 + $0x60] sm:$0xff] %v1403_v18  ;;  %905 = vst [vmem:[%s1691_s24 + $0x68] sm:$0xff] %v1404_v19  ;;  %v1405_v26 = vpack.c.bf16 %v1773_v22, %v1765_v12  ;;  %v1406_v27 = vpack.c.bf16 %v1775_v23, %v1767_v13 }
 0x1a9   : > { %906 = vst [vmem:[%s1691_s24 + $0x70] sm:$0xff] %v1405_v26  ;;  %907 = vst [vmem:[%s1691_s24 + $0x78] sm:$0xff] %v1406_v27 }
 0x1aa PF: > { %v947_v29 = vadd.f32 %v1705_v20, %v1701_v16  ;;  %v937_v32 = vadd.f32 %v1675_v61, %v1671_v58  ;;  %v952_v33 = vadd.f32 %v1717_v30, %v1709_v24  ;;  %v942_v34 = vadd.f32 %v1687_v7, %v1679_v1  ;;  %s1407_s30 = sshll.u32 (%p1573_p6), %s1486_s26, 4 }
 0x1ab   : > { %v962_v35 = vadd.f32 %v1745_v52, %v1737_v46  ;;  %v957_v36 = vadd.f32 %v1733_v42, %v1729_v38  ;;  %v972_v49 = vadd.f32 %v1773_v22, %v1765_v12  ;;  %v967_v55 = vadd.f32 %v1761_v5, %v1757_v63  ;;  %s1111_s12 = scalar_lea.vmem (%p1573_p6), %s2100_s5, %s1407_s30 }
 0x1ac   : > { %v948_v37 = vadd.f32 %v947_v29, %v1703_v17  ;;  %v938_v40 = vadd.f32 %v937_v32, %v1673_v59  ;;  %v953_v41 = vadd.f32 %v952_v33, %v1711_v25  ;;  %v943_v44 = vadd.f32 %v942_v34, %v1681_v2 }
 0x1ad   : > { %v963_v51 = vadd.f32 %v962_v35, %v1739_v47  ;;  %v958_v54 = vadd.f32 %v957_v36, %v1731_v39  ;;  %v1006_v57 = vmul.f32 %v1679_v1, %v1679_v1  ;;  %v1007_v60 = vmul.f32 %v1687_v7, %v1687_v7 }
 0x1ae   : > { %v949_v45 = vadd.f32 %v948_v37, %v1707_v21  ;;  %v939_v48 = vadd.f32 %v938_v40, %v1677_v62  ;;  %v954_v50 = vadd.f32 %v953_v41, %v1719_v31  ;;  %v944_v56 = vadd.f32 %v943_v44, %v1689_v8 }
 0x1af   : > { %v1008_v10 = vmul.f32 %v1681_v2, %v1681_v2  ;;  %v1002_v3 = vmul.f32 %v1671_v58, %v1671_v58  ;;  %v1003_v4 = vmul.f32 %v1675_v61, %v1675_v61  ;;  %v1039_v9 = vadd.f32 %v1007_v60, %v1006_v57 }
 0x1b0   : > { %950 = vadd.xlane.f32.xlu1 %v949_v45  ;;  %940 = vadd.xlane.f32.xlu0 %v939_v48  ;;  %v1004_v11 = vmul.f32 %v1673_v59, %v1673_v59  ;;  %v1014_v14 = vmul.f32 %v1709_v24, %v1709_v24  ;;  %v1015_v1 = vmul.f32 %v1717_v30, %v1717_v30  ;;  %vm985_vm2 = vcmask 7168  }
 0x1b1   : > { %v973_v7 = vadd.f32 %v972_v49, %v1767_v13  ;;  %v968_v2 = vadd.f32 %v967_v55, %v1759_v0  ;;  %v1034_v15 = vadd.f32 %v1003_v4, %v1002_v3  ;;  %v1010_v58 = vmul.f32 %v1701_v16, %v1701_v16  ;;  %v932_v4 = vld [vmem:[%s2101_s6 + $0x18] sm:$0xff] }
 0x1b2   : > { %v964_v61 = vadd.f32 %v963_v51, %v1747_v53  ;;  %v959_v59 = vadd.f32 %v958_v54, %v1735_v43  ;;  %v1011_v24 = vmul.f32 %v1705_v20, %v1705_v20  ;;  %v1009_v30 = vmul.f32 %v1689_v8, %v1689_v8 }
 0x1b3   : > { %v1040_v18 = vadd.f32 %v1039_v9, %v1008_v10  ;;  %v1005_v19 = vmul.f32 %v1677_v62, %v1677_v62  ;;  %v1016_v26 = vmul.f32 %v1711_v25, %v1711_v25  ;;  %v1035_v16 = vadd.f32 %v1034_v15, %v1004_v11  ;;  %v930_v9 = vld [vmem:[%s2101_s6 + $0x8] sm:$0xff]  ;;  %v933_v15 = vld [vmem:[%s2101_s6 + $0x20] sm:$0xff] }
 0x1b4   : > { %955 = vadd.xlane.f32.xlu1 %v954_v50  ;;  %945 = vadd.xlane.f32.xlu0 %v944_v56  ;;  %v1049_v27 = vadd.f32 %v1015_v1, %v1014_v14  ;;  %v1012_v28 = vmul.f32 %v1703_v17, %v1703_v17  ;;  %v1044_v29 = vadd.f32 %v1011_v24, %v1010_v58 }
 0x1b5   : > { %v1022_v32 = vmul.f32 %v1737_v46, %v1737_v46  ;;  %v1023_v20 = vmul.f32 %v1745_v52, %v1745_v52  ;;  %v974_v8 = vadd.f32 %v973_v7, %v1775_v23  ;;  %v969_v62 = vadd.f32 %v968_v2, %v1763_v6  ;;  %v934_v2 = vld [vmem:[%s2101_s6 + $0x28] sm:$0xff] }
 0x1b6   : > { %v1018_v25 = vmul.f32 %v1729_v38, %v1729_v38  ;;  %v1041_v33 = vadd.f32 %v1040_v18, %v1009_v30  ;;  %v1017_v17 = vmul.f32 %v1719_v31, %v1719_v31  ;;  %v1013_v34 = vmul.f32 %v1707_v21, %v1707_v21  ;;  %v936_v30 = vld [vmem:[%s2101_s6 + $0x38] sm:$0xff]  ;;  %v935_v18 = vld [vmem:[%s2101_s6 + $0x30] sm:$0xff] }
 0x1b7   : > { %v1019_v46 = vmul.f32 %v1733_v42, %v1733_v42  ;;  %v1036_v52 = vadd.f32 %v1035_v16, %v1005_v19  ;;  %v1050_v35 = vadd.f32 %v1049_v27, %v1016_v26  ;;  %v1045_v36 = vadd.f32 %v1044_v29, %v1012_v28  ;;  %v995_v28 = vld [vmem:[%s2102_s7 + $0x8] sm:$0xff]  ;;  %v994_v29 = vld [vmem:[%s2102_s7] sm:$0xff] }
 0x1b8   : > { %965 = vadd.xlane.f32.xlu1 %v964_v61  ;;  %960 = vadd.xlane.f32.xlu0 %v959_v59  ;;  %v1024_v37 = vmul.f32 %v1739_v47, %v1739_v47  ;;  %v1059_v40 = vadd.f32 %v1023_v20, %v1022_v32  ;;  %v1020_v38 = vmul.f32 %v1731_v39, %v1731_v39 }
 0x1b9   : > { %v1030_v41 = vmul.f32 %v1765_v12, %v1765_v12  ;;  %v1031_v31 = vmul.f32 %v1773_v22, %v1773_v22  ;;  %v1054_v21 = vadd.f32 %v1019_v46, %v1018_v25  ;;  %v1026_v42 = vmul.f32 %v1757_v63, %v1757_v63  ;;  %v997_v25 = vld [vmem:[%s2102_s7 + $0x18] sm:$0xff] }
 0x1ba   : > { %v1027_v44 = vmul.f32 %v1761_v5, %v1761_v5  ;;  %v1051_v47 = vadd.f32 %v1050_v35, %v1017_v17  ;;  %v1025_v45 = vmul.f32 %v1747_v53, %v1747_v53  ;;  %v1021_v39 = vmul.f32 %v1735_v43, %v1735_v43  ;;  %v999_v35 = vld [vmem:[%s2102_s7 + $0x28] sm:$0xff] }
 0x1bb   : > { %v1046_v12 = vadd.f32 %v1045_v36, %v1013_v34  ;;  %v1060_v48 = vadd.f32 %v1059_v40, %v1024_v37  ;;  %v1032_v22 = vmul.f32 %v1767_v13, %v1767_v13  ;;  %v1069_v49 = vadd.f32 %v1031_v31, %v1030_v41  ;;  %v998_v36 = vld [vmem:[%s2102_s7 + $0x20] sm:$0xff]  ;;  %v1001_v31 = vld [vmem:[%s2102_s7 + $0x38] sm:$0xff] }
 0x1bc   : > { %975 = vadd.xlane.f32.xlu1 %v974_v8  ;;  %970 = vadd.xlane.f32.xlu0 %v969_v62  ;;  %v1055_v50 = vadd.f32 %v1054_v21, %v1020_v38  ;;  %v1028_v63 = vmul.f32 %v1759_v0, %v1759_v0  ;;  %v1064_v5 = vadd.f32 %v1027_v44, %v1026_v42  ;;  %v931_v0 = vld [vmem:[%s2101_s6 + $0x10] sm:$0xff] }
 0x1bd   : > { %v1061_v51 = vadd.f32 %v1060_v48, %v1025_v45  ;;  %v1033_v53 = vmul.f32 %v1775_v23, %v1775_v23  ;;  %v1029_v43 = vmul.f32 %v1763_v6, %v1763_v6  ;;  %v1070_v55 = vadd.f32 %v1069_v49, %v1032_v22  ;;  %v929_v23 = vld [vmem:[%s2101_s6] sm:$0xff]  ;;  %v1000_v21 = vld [vmem:[%s2102_s7 + $0x30] sm:$0xff]  ;;  %v1130_v22 = vld [vmem:[%s1691_s24 + $0x18] sm:$0xff] (%p1573_p6) }
 0x1be   : > { %v1056_v54 = vadd.f32 %v1055_v50, %v1021_v39  ;;  %v1065_v13 = vadd.f32 %v1064_v5, %v1028_v63  ;;  %v1124_v39 = vld [vmem:[%s1691_s24] sm:$0xff] (%p1573_p6)  ;;  %v1128_v48 = vld [vmem:[%s1691_s24 + $0x10] sm:$0xff] (%p1573_p6)  ;;  %v1134_v50 = vld [vmem:[%s1691_s24 + $0x28] sm:$0xff] (%p1573_p6)  ;;  %1131 = vst [vmem:[%s1111_s12 + $0x48] sm:$0xff] (%p1573_p6), %v1130_v22 }
 0x1bf   : > { %v1071_v56 = vadd.f32 %v1070_v55, %v1033_v53  ;;  %v1132_v49 = vld [vmem:[%s1691_s24 + $0x20] sm:$0xff] (%p1573_p6)  ;;  %1125 = vst [vmem:[%s1111_s12] sm:$0xff] (%p1573_p6), %v1124_v39  ;;  %1129 = vst [vmem:[%s1111_s12 + $0x40] sm:$0xff] (%p1573_p6), %v1128_v48  ;;  %v1136_v63 = vld [vmem:[%s1691_s24 + $0x30] sm:$0xff] (%p1573_p6) }
 0x1c0   : > { %1042 = vadd.xlane.f32.xlu1 %v1041_v33  ;;  %1037 = vadd.xlane.f32.xlu0 %v1036_v52  ;;  %v1066_v57 = vadd.f32 %v1065_v13, %v1029_v43  ;;  %v996_v33 = vld [vmem:[%s2102_s7 + $0x10] sm:$0xff]  ;;  %1133 = vst [vmem:[%s1111_s12 + $0x80] sm:$0xff] (%p1573_p6), %v1132_v49  ;;  %1135 = vst [vmem:[%s1111_s12 + $0x88] sm:$0xff] (%p1573_p6), %v1134_v50  ;;  %v1138_v5 = vld [vmem:[%s1691_s24 + $0x38] sm:$0xff] (%p1573_p6) }
 0x1c1   : > { %1137 = vst [vmem:[%s1111_s12 + $0xc0] sm:$0xff] (%p1573_p6), %v1136_v63  ;;  %1139 = vst [vmem:[%s1111_s12 + $0xc8] sm:$0xff] (%p1573_p6), %v1138_v5  ;;  %v1142_v53 = vld [vmem:[%s1691_s24 + $0x48] sm:$0xff] (%p1573_p6)  ;;  %v1144_v43 = vld [vmem:[%s1691_s24 + $0x50] sm:$0xff] (%p1573_p6) }
 0x1c2   : > { %1143 = vst [vmem:[%s1111_s12 + $0x108] sm:$0xff] (%p1573_p6), %v1142_v53  ;;  %1145 = vst [vmem:[%s1111_s12 + $0x140] sm:$0xff] (%p1573_p6), %v1144_v43  ;;  %v1148_v55 = vld [vmem:[%s1691_s24 + $0x60] sm:$0xff] (%p1573_p6)  ;;  %v1150_v13 = vld [vmem:[%s1691_s24 + $0x68] sm:$0xff] (%p1573_p6) }
 0x1c3   : > { %1149 = vst [vmem:[%s1111_s12 + $0x180] sm:$0xff] (%p1573_p6), %v1148_v55  ;;  %1151 = vst [vmem:[%s1111_s12 + $0x188] sm:$0xff] (%p1573_p6), %v1150_v13 }
 0x1c4   : > { %1052 = vadd.xlane.f32.xlu1 %v1051_v47  ;;  %1047 = vadd.xlane.f32.xlu0 %v1046_v12  ;;  %v1126_v12 = vld [vmem:[%s1691_s24 + $0x8] sm:$0xff] (%p1573_p6) }
 0x1c5   : > { %1127 = vst [vmem:[%s1111_s12 + $0x8] sm:$0xff] (%p1573_p6), %v1126_v12 }
 0x1c8   : > { %1062 = vadd.xlane.f32.xlu1 %v1061_v51  ;;  %1057 = vadd.xlane.f32.xlu0 %v1056_v54  ;;  %v1140_v51 = vld [vmem:[%s1691_s24 + $0x40] sm:$0xff] (%p1573_p6)  ;;  %v1146_v54 = vld [vmem:[%s1691_s24 + $0x58] sm:$0xff] (%p1573_p6) }
 0x1c9   : > { %1141 = vst [vmem:[%s1111_s12 + $0x100] sm:$0xff] (%p1573_p6), %v1140_v51  ;;  %1147 = vst [vmem:[%s1111_s12 + $0x148] sm:$0xff] (%p1573_p6), %v1146_v54 }
 0x1cc   : > { %1072 = vadd.xlane.f32.xlu1 %v1071_v56  ;;  %1067 = vadd.xlane.f32.xlu0 %v1066_v57  ;;  %v1152_v56 = vld [vmem:[%s1691_s24 + $0x70] sm:$0xff] (%p1573_p6)  ;;  %v1154_v57 = vld [vmem:[%s1691_s24 + $0x78] sm:$0xff] (%p1573_p6) }
 0x1cd   : > { %1153 = vst [vmem:[%s1111_s12 + $0x1c0] sm:$0xff] (%p1573_p6), %v1152_v56  ;;  %1155 = vst [vmem:[%s1111_s12 + $0x1c8] sm:$0xff] (%p1573_p6), %v1154_v57 }
 0x23d   : > { %v951_v6 = vpop.xlane.xlu1 %950  ;;  %v941_v60 = vpop.xlane.xlu0 %940 }
 0x23e   : > { %v979_v10 = vadd.f32 %v951_v6, %v931_v0  ;;  %v977_v3 = vadd.f32 %v941_v60, %v929_v23 }
 0x240   : > { %988 = vst.msk [vmem:[%s2101_s6 + $0x10] sm:$0xff] %vm985_vm2, %v979_v10  ;;  %986 = vst.msk [vmem:[%s2101_s6] sm:$0xff] %vm985_vm2, %v977_v3 }
 0x241   : > { %v956_v11 = vpop.xlane.xlu1 %955  ;;  %v946_v14 = vpop.xlane.xlu0 %945 }
 0x242   : > { %v980_v1 = vadd.f32 %v956_v11, %v932_v4  ;;  %v978_v7 = vadd.f32 %v946_v14, %v930_v9 }
 0x244   : > { %989 = vst.msk [vmem:[%s2101_s6 + $0x18] sm:$0xff] %vm985_vm2, %v980_v1  ;;  %987 = vst.msk [vmem:[%s2101_s6 + $0x8] sm:$0xff] %vm985_vm2, %v978_v7 }
 0x245   : > { %v966_v58 = vpop.xlane.xlu1 %965  ;;  %v961_v61 = vpop.xlane.xlu0 %960 }
 0x246   : > { %v982_v59 = vadd.f32 %v966_v58, %v934_v2  ;;  %v981_v24 = vadd.f32 %v961_v61, %v933_v15 }
 0x248   : > { %991 = vst.msk [vmem:[%s2101_s6 + $0x28] sm:$0xff] %vm985_vm2, %v982_v59  ;;  %990 = vst.msk [vmem:[%s2101_s6 + $0x20] sm:$0xff] %vm985_vm2, %v981_v24 }
 0x249   : > { %v976_v19 = vpop.xlane.xlu1 %975  ;;  %v971_v26 = vpop.xlane.xlu0 %970 }
 0x24a   : > { %v984_v16 = vadd.f32 %v976_v19, %v936_v30  ;;  %v983_v27 = vadd.f32 %v971_v26, %v935_v18 }
 0x24c   : > { %993 = vst.msk [vmem:[%s2101_s6 + $0x38] sm:$0xff] %vm985_vm2, %v984_v16  ;;  %992 = vst.msk [vmem:[%s2101_s6 + $0x30] sm:$0xff] %vm985_vm2, %v983_v27 }
 0x24d   : > { %v1043_v32 = vpop.xlane.xlu1 %1042  ;;  %v1038_v20 = vpop.xlane.xlu0 %1037 }
 0x24e   : > { %v1075_v8 = vadd.f32 %v1043_v32, %v995_v28  ;;  %v1074_v62 = vadd.f32 %v1038_v20, %v994_v29 }
 0x250   : > { %1083 = vst.msk [vmem:[%s2102_s7 + $0x8] sm:$0xff] %vm985_vm2, %v1075_v8  ;;  %1082 = vst.msk [vmem:[%s2102_s7] sm:$0xff] %vm985_vm2, %v1074_v62 }
 0x251   : > { %v1053_v17 = vpop.xlane.xlu1 %1052  ;;  %v1048_v34 = vpop.xlane.xlu0 %1047 }
 0x252   : > { %v1077_v46 = vadd.f32 %v1053_v17, %v997_v25  ;;  %v1076_v52 = vadd.f32 %v1048_v34, %v996_v33 }
 0x254   : > { %1085 = vst.msk [vmem:[%s2102_s7 + $0x18] sm:$0xff] %vm985_vm2, %v1077_v46  ;;  %1084 = vst.msk [vmem:[%s2102_s7 + $0x10] sm:$0xff] %vm985_vm2, %v1076_v52 }
 0x255   : > { %v1063_v37 = vpop.xlane.xlu1 %1062  ;;  %v1058_v40 = vpop.xlane.xlu0 %1057 }
 0x256   : > { %v1079_v38 = vadd.f32 %v1063_v37, %v999_v35  ;;  %v1078_v41 = vadd.f32 %v1058_v40, %v998_v36  ;;  %1106 = sbr.rel (!%p1573_p6) target bundleno = 605 (0x25d), region = 71 }
 0x258   : > { %1087 = vst.msk [vmem:[%s2102_s7 + $0x28] sm:$0xff] %vm985_vm2, %v1079_v38  ;;  %1086 = vst.msk [vmem:[%s2102_s7 + $0x20] sm:$0xff] %vm985_vm2, %v1078_v41 }
 0x259   : > { %v1073_v42 = vpop.xlane.xlu1 %1072  ;;  %v1068_v44 = vpop.xlane.xlu0 %1067 }
 0x25a   : > { %v1081_v47 = vadd.f32 %v1073_v42, %v1001_v31  ;;  %v1080_v45 = vadd.f32 %v1068_v44, %v1000_v21 }
 0x25c   : > { %1089 = vst.msk [vmem:[%s2102_s7 + $0x38] sm:$0xff] %vm985_vm2, %v1081_v47  ;;  %1088 = vst.msk [vmem:[%s2102_s7 + $0x30] sm:$0xff] %vm985_vm2, %v1080_v45 }
 0x25d PF: > { %s18_s28 = sadd.s32 1, %s1494_s28   ;;  %s2104_s24 = smov %s1482_s25 }
 0x25e   : > { %p15_p12 = scmp.ge.s32.totalorder %s18_s28, 6   ;;  %s2105_s25 = smov %s1578_s11 }
 0x25f   : > { %s2106_s26 = smov %s1490_s27  ;;  %s2107_s27 = smov %s2109_s29 }
 0x260   :  { %17 = sbr.rel (!%p15_p12) target bundleno = 3 (0x3), region = 161 }

// kernel: ae_pointnet_dcg_forward.18
= control target key start
LH: loop header
LB: loop body
LE: loop exit
PB: predicated region body
PF: predicated region fallthrough
CT: control target
= control target key end

     0   :  { %v299_v3 = vmov 0   ;;  %vm71_vm0 = vcmask 523264   ;;  %vm127_vm1 = vcmask 15360   ;;  %s446_s0 = inlined_call_operand.vmem [shape: f32[64,2], index: 0, kind: input, shape index: {}]   ;;  %s447_s1 = inlined_call_operand.vmem [shape: bf16[32,64], index: 1, kind: input, shape index: {}]   ;;  %s448_s2 = inlined_call_operand.vmem [shape: f32[32,1], index: 2, kind: input, shape index: {}]   ;;  %s449_s3 = inlined_call_operand.vmem [shape: f32[32,1], index: 3, kind: input, shape index: {}]   ;;  %s450_s4 = inlined_call_operand.vmem [shape: f32[32,1], index: 4, kind: input, shape index: {}]   ;;  %s451_s5 = inlined_call_operand.vmem [shape: f32[32,2], index: 5, kind: output, shape index: {}]  }
   0x1   :  { %v21_v0 = vld [vmem:[%s446_s0] sm:$0xff]  ;;  %v22_v1 = vld [vmem:[%s446_s0 + $0x8] sm:$0xff]  ;;  %v23_v2 = vld [vmem:[%s446_s0 + $0x10] sm:$0xff]  ;;  %287 = vset.pattern.permute.xlu0 %v299_v3  ;;  %288 = vset.pattern.permute.xlu1 %v299_v3 }
   0x2   :  { %v33_v4 = vpack.c.bf16 %v22_v1, %v21_v0  ;;  %v24_v5 = vld [vmem:[%s446_s0 + $0x18] sm:$0xff]  ;;  %v25_v7 = vld [vmem:[%s446_s0 + $0x20] sm:$0xff]  ;;  %v26_v8 = vld [vmem:[%s446_s0 + $0x28] sm:$0xff] }
   0x3   :  { %v34_v6 = vpack.c.bf16 %v24_v5, %v23_v2  ;;  %v289_v9 = vld [vmem:[%s447_s1] sm:$0xff]   ;;  %v35_v11 = vpack.c.bf16 %v26_v8, %v25_v7  ;;  %v39_v12 = vld [vmem:[%s448_s2 + $0x10] sm:$0xff]  ;;  %v28_v14 = vld [vmem:[%s446_s0 + $0x38] sm:$0xff] }
   0x4   :  { %274 = vmatprep.subr.bf16.mxu0 %v33_v4  ;;  %v37_v10 = vld [vmem:[%s448_s2] sm:$0xff]  ;;  %282 = vmatprep.mubr.msk.bf16.mxu0 %vm71_vm0, %v289_v9  ;;  %v27_v13 = vld [vmem:[%s446_s0 + $0x30] sm:$0xff]  ;;  %v38_v15 = vld [vmem:[%s448_s2 + $0x8] sm:$0xff] }
   0x5   :  { %275 = vmatpush3.bf16.msra.mxu0 %v33_v4  ;;  %43 = vperm.xlu0 %287, %v37_v10   ;;  %v40_v16 = vld [vmem:[%s448_s2 + $0x18] sm:$0xff]  ;;  %v36_v17 = vpack.c.bf16 %v28_v14, %v27_v13  ;;  %v290_v18 = vld [vmem:[%s447_s1 + $0x8] sm:$0xff]   ;;  %v178_v13 = vld [vmem:[%s449_s3 + $0x10] sm:$0xff] }
   0x6   :  { %276 = vmatprep.subr.bf16.mxu0 %v34_v6  ;;  %53 = vperm.xlu1 %288, %v39_v12  }
   0x9   :  { %277 = vmatpush3.bf16.msra.mxu0 %v34_v6  ;;  %48 = vperm.xlu0 %287, %v38_v15   ;;  %v177_v15 = vld [vmem:[%s449_s3 + $0x8] sm:$0xff] }
   0xa   :  { %278 = vmatprep.subr.bf16.mxu0 %v35_v11  ;;  %58 = vperm.xlu1 %288, %v40_v16  }
   0xd   :  { %279 = vmatpush3.bf16.msra.mxu0 %v35_v11  ;;  %v176_v11 = vld [vmem:[%s449_s3] sm:$0xff] }
   0xe   :  { %280 = vmatprep.subr.bf16.mxu0 %v36_v17 }
  0x11   :  { %281 = vmatpush3.bf16.msra.mxu0 %v36_v17 }
  0x14   :  { %283 = vmatmul.mubr.msk.bf16.vlgmr.msra.gmra.mrb[0].mxu0 %vm71_vm0, %v290_v18 }
  0x84   :  { %v44_v19 = vpop.permute.xlu0 %43 }
  0x85   :  { %v54_v20 = vpop.permute.xlu1 %53 }
  0x88   :  { %v49_v26 = vpop.permute.xlu0 %48 }
  0x89   :  { %v59_v29 = vpop.permute.xlu1 %58 }
  0xe7   :  { %v284_v21 = vpop.f32.mrb[0].mxu0 }
  0xe8   :  { %v374_v22 = vadd.f32 %v284_v21, %v54_v20  ;;  %v112_v23 = vpop.f32.mrb[1].mxu0  ;;  %v192_v21 = vld [vmem:[%s450_s4] sm:$0xff] }
  0xe9   :  { %v376_v24 = vadd.f32 %v112_v23, %v44_v19  ;;  %v285_v25 = vpop.f32.mrb[2].mxu0 }
  0xea   :  { %v115_v27 = vpop.f32.mrb[3].mxu0  ;;  %v134_v28 = vsel %vm127_vm1, %v374_v22, 0.0  ;;  %v386_v33 = vadd.f32 %v285_v25, %v59_v29  ;;  %v146_v36 = vmul.f32 %v374_v22, %v374_v22 }
  0xeb   :  { %v380_v30 = vadd.f32 %v115_v27, %v49_v26  ;;  %135 = vadd.xlane.f32.xlu0 %v134_v28  ;;  %v144_v32 = vmul.f32 %v376_v24, %v376_v24  ;;  %v128_v34 = vsel %vm127_vm1, %v376_v24, 0.0  ;;  %v179_v26 = vld [vmem:[%s449_s3 + $0x18] sm:$0xff]  ;;  %v194_v28 = vld [vmem:[%s450_s4 + $0x10] sm:$0xff] }
  0xec   :  { %v137_v37 = vsel %vm127_vm1, %v386_v33, 0.0  ;;  %v154_v39 = vsel %vm127_vm1, %v146_v36, 0.0  ;;  %v147_v41 = vmul.f32 %v386_v33, %v386_v33 }
  0xed   :  { %v131_v31 = vsel %vm127_vm1, %v380_v30, 0.0  ;;  %v148_v35 = vsel %vm127_vm1, %v144_v32, 0.0  ;;  %v145_v38 = vmul.f32 %v380_v30, %v380_v30 }
  0xee   :  { %132 = vadd.xlane.f32.xlu1 %v131_v31  ;;  %v157_v42 = vsel %vm127_vm1, %v147_v41, 0.0 }
  0xef   :  { %129 = vadd.xlane.f32.xlu0 %v128_v34  ;;  %v151_v40 = vsel %vm127_vm1, %v145_v38, 0.0  ;;  %v193_v34 = vld [vmem:[%s450_s4 + $0x8] sm:$0xff] }
  0xf2   :  { %149 = vadd.xlane.f32.xlu1 %v148_v35 }
  0xf3   :  { %138 = vadd.xlane.f32.xlu0 %v137_v37  ;;  %v195_v37 = vld [vmem:[%s450_s4 + $0x18] sm:$0xff] }
  0xf6   :  { %155 = vadd.xlane.f32.xlu1 %v154_v39 }
  0xf7   :  { %152 = vadd.xlane.f32.xlu0 %v151_v40 }
  0xfb   :  { %158 = vadd.xlane.f32.xlu0 %v157_v42 }
 0x178   :  { %v136_v43 = vpop.xlane.xlu0 %135 }
 0x179   :  { %v142_v49 = vmul.f32 0.5, %v136_v43 }
 0x17b   :  { %v133_v44 = vpop.xlane.xlu1 %132  ;;  %v166_v55 = vmul.f32 %v142_v49, %v142_v49 }
 0x17c   :  { %v130_v45 = vpop.xlane.xlu0 %129  ;;  %v141_v52 = vmul.f32 0.5, %v133_v44 }
 0x17d   :  { %v140_v46 = vmul.f32 0.5, %v130_v45 }
 0x17e   :  { %v165_v59 = vmul.f32 %v141_v52, %v141_v52 }
 0x17f   :  { %v164_v47 = vmul.f32 %v140_v46, %v140_v46  ;;  %v150_v48 = vpop.xlane.xlu1 %149 }
 0x180   :  { %v160_v50 = vmul.f32 0.5, %v150_v48  ;;  %v139_v51 = vpop.xlane.xlu0 %138 }
 0x181   :  { %v143_v60 = vmul.f32 0.5, %v139_v51 }
 0x182   :  { %v168_v53 = vsub.f32 %v160_v50, %v164_v47 }
 0x183   :  { %v156_v54 = vpop.xlane.xlu1 %155  ;;  %v167_v3 = vmul.f32 %v143_v60, %v143_v60 }
 0x184   :  { %v172_v56 = vmax.f32 %v168_v53, 0.0  ;;  %v162_v57 = vmul.f32 0.5, %v156_v54  ;;  %v153_v58 = vpop.xlane.xlu0 %152 }
 0x185   :  { %v161_v61 = vmul.f32 0.5, %v153_v58 }
 0x186   :  { %v180_v62 = vadd.f32 1e-05, %v172_v56  ;;  %v170_v63 = vsub.f32 %v162_v57, %v166_v55 }
 0x187   :  { %v169_v0 = vsub.f32 %v161_v61, %v165_v59 }
 0x188   :  { %291 = vrsqrt.f32 %v180_v62  ;;  %v174_v1 = vmax.f32 %v170_v63, 0.0  ;;  %v159_v2 = vpop.xlane.xlu0 %158 }
 0x189   :  { %v173_v4 = vmax.f32 %v169_v0, 0.0  ;;  %v163_v5 = vmul.f32 0.5, %v159_v2 }
 0x18a   :  { %v182_v6 = vadd.f32 1e-05, %v174_v1 }
 0x18b   :  { %v181_v7 = vadd.f32 1e-05, %v173_v4  ;;  %v171_v8 = vsub.f32 %v163_v5, %v167_v3 }
 0x18c   :  { %293 = vrsqrt.f32 %v182_v6 }
 0x18d   :  { %295 = vrsqrt.f32 %v181_v7  ;;  %v175_v9 = vmax.f32 %v171_v8, 0.0 }
 0x18f   :  { %v183_v10 = vadd.f32 1e-05, %v175_v9 }
 0x191   :  { %297 = vrsqrt.f32 %v183_v10 }
 0x192   :  { %v292_v12 = vpop.eup %291 }
 0x193   :  { %v188_v14 = vmul.f32 %v292_v12, %v176_v11 }
 0x195   :  { %v196_v20 = vmul.f32 %v188_v14, %v140_v46 }
 0x196   :  { %v294_v16 = vpop.eup %293 }
 0x197   :  { %v296_v17 = vpop.eup %295  ;;  %v190_v18 = vmul.f32 %v294_v16, %v178_v13  ;;  %v200_v25 = vsub.f32 %v192_v21, %v196_v20 }
 0x198   :  { %v189_v19 = vmul.f32 %v296_v17, %v177_v15 }
 0x199   :  { %216 = vperm.xlu1 %288, %v190_v18   ;;  %v198_v27 = vmul.f32 %v190_v18, %v142_v49 }
 0x19a   :  { %211 = vperm.xlu0 %287, %v189_v19   ;;  %v197_v31 = vmul.f32 %v189_v19, %v141_v52 }
 0x19b   :  { %v298_v23 = vpop.eup %297  ;;  %v202_v32 = vsub.f32 %v194_v28, %v198_v27 }
 0x19c   :  { %v191_v29 = vmul.f32 %v298_v23, %v179_v26  ;;  %v201_v35 = vsub.f32 %v193_v34, %v197_v31 }
 0x19d   :  { %206 = vperm.xlu1 %288, %v188_v14  }
 0x19e   :  { %230 = vperm.xlu0 %287, %v200_v25   ;;  %v199_v36 = vmul.f32 %v191_v29, %v143_v60 }
 0x1a0   :  { %v203_v38 = vsub.f32 %v195_v37, %v199_v36 }
 0x1a1   :  { %221 = vperm.xlu1 %288, %v191_v29  }
 0x1a2   :  { %240 = vperm.xlu0 %287, %v202_v32  }
 0x1a5   :  { %235 = vperm.xlu1 %288, %v201_v35  }
 0x1a9   :  { %245 = vperm.xlu1 %288, %v203_v38  }
 0x218   :  { %v217_v39 = vpop.permute.xlu1 %216 }
 0x219   :  { %v212_v40 = vpop.permute.xlu0 %211  ;;  %v226_v45 = vmul.f32 %v217_v39, %v374_v22 }
 0x21a   :  { %v225_v50 = vmul.f32 %v212_v40, %v380_v30 }
 0x21c   :  { %v207_v41 = vpop.permute.xlu1 %206 }
 0x21d   :  { %v224_v42 = vmul.f32 %v207_v41, %v376_v24  ;;  %v231_v43 = vpop.permute.xlu0 %230 }
 0x21f   :  { %v248_v44 = vadd.f32 %v231_v43, %v224_v42 }
 0x220   :  { %v222_v46 = vpop.permute.xlu1 %221 }
 0x221   :  { %v252_v47 = vmax.f32 %v248_v44, 0.0  ;;  %v241_v48 = vpop.permute.xlu0 %240  ;;  %v227_v22 = vmul.f32 %v222_v46, %v386_v33 }
 0x222   :  { %v250_v49 = vadd.f32 %v241_v48, %v226_v45 }
 0x223   :  { %256 = vst.msk [vmem:[%s451_s5] sm:$0xff] %vm127_vm1, %v252_v47 }
 0x224   :  { %v254_v51 = vmax.f32 %v250_v49, 0.0  ;;  %v236_v52 = vpop.permute.xlu1 %235 }
 0x225   :  { %v249_v53 = vadd.f32 %v236_v52, %v225_v50 }
 0x226   :  { %258 = vst.msk [vmem:[%s451_s5 + $0x10] sm:$0xff] %vm127_vm1, %v254_v51 }
 0x227   :  { %v253_v24 = vmax.f32 %v249_v53, 0.0 }
 0x228   :  { %v246_v54 = vpop.permute.xlu1 %245 }
 0x229   :  { %257 = vst.msk [vmem:[%s451_s5 + $0x8] sm:$0xff] %vm127_vm1, %v253_v24  ;;  %v251_v30 = vadd.f32 %v246_v54, %v227_v22 }
 0x22b   :  { %v255_v55 = vmax.f32 %v251_v30, 0.0 }
 0x22d   :  { %259 = vst.msk [vmem:[%s451_s5 + $0x18] sm:$0xff] %vm127_vm1, %v255_v55 }

// kernel: ae_pointnet_dcg_forward.19
= control target key start
LH: loop header
LB: loop body
LE: loop exit
PB: predicated region body
PF: predicated region fallthrough
CT: control target
= control target key end

     0   :  { %s1436_s24 = smov 0   ;;  %s1438_s25 = smov 0   ;;  %s1644_s0 = inlined_call_operand.vmem [shape: f32[2,2,512], index: 0, kind: input, shape index: {}]   ;;  %s1645_s1 = inlined_call_operand.vmem [shape: bf16[2,512], index: 1, kind: input, shape index: {}]   ;;  %s1646_s2 = inlined_call_operand.vmem [shape: bf16[2,34,2], index: 2, kind: input, shape index: {}]   ;;  %s1647_s3 = inlined_call_operand.vmem [shape: bf16[2,34,2], index: 3, kind: input, shape index: {}]   ;;  %s1648_s4 = inlined_call_operand.vmem [shape: f32[2,34,1], index: 4, kind: input, shape index: {}]   ;;  %s1649_s5 = inlined_call_operand.vmem [shape: bf16[2,34,512], index: 5, kind: output, shape index: {0}]   ;;  %s1650_s6 = inlined_call_operand.vmem [shape: f32[2,34,1], index: 6, kind: output, shape index: {1}]   ;;  %s1651_s7 = inlined_call_operand.vmem [shape: f32[2,34,1], index: 7, kind: output, shape index: {2}]  }
   0x1   :  { %s1440_s26 = smov 0  }
   0x2 LB: > { %s30_s27 = sadd.s32 1, %s1386_s25  ;;  %p1257_p0 = scmp.ge.s32.totalorder %s1390_s26, 1  ;;  %s1390_s26 = sphi %s1440_s26, %s18_s26   ;;  %s1386_s25 = sphi %s1438_s25, %s1653_s25   ;;  %s1382_s24 = sphi %s1436_s24, %s1652_s24  }
   0x3   : > { %p32_p1 = scmp.ge.s32.totalorder %s30_s27, 2  ;;  %p303_p2 = scmp.lt.s32.totalorder %s1390_s26, 3 }
   0x5   : > { %s1655_s27 = smov (%p32_p1, %s30_s27), 0  ;;  %p304_p3 = pnand %p1257_p0, %p303_p2 }
   0x6   : > { %p373_p4 = scmp.lt.s32.totalorder (!%p304_p3), %s1382_s24, 1  ;;  %v434_v0 = vlaneseq (!%p304_p3)  ;;  %v1392_v1 = vmov (!%p304_p3), 1983009808   ;;  %v1393_v4 = vmov (!%p304_p3), 1966171168   ;;  %v1394_v7 = vmov (!%p304_p3), 0  }
   0x7   : > { %307 = sbr.rel (%p304_p3) target bundleno = 432 (0x1b0), region = 40  ;;  %v432_v2 = vunpack.c.l.s4 (!%p304_p3), %v1392_v1  ;;  %v1269_v3 = vld.sshfl [vmem:[%s1645_s1] sm:$0x33 pattern:$0x75316420] (!%p304_p3)  ;;  %v484_v5 = vunpack.c.l.s4 (!%p304_p3), %v1393_v4  ;;  %554 = vmatprep.mubr.bf16.mxu0 (!%p304_p3), %v1394_v7  ;;  %615 = vmatprep.mubr.bf16.mxu1 (!%p304_p3), %v1394_v7  ;;  %vm509_vm0 = vcmask (!%p304_p3), 1040384  }
   0x8   : > { %v435_v6 = vshrl.u32 (!%p304_p3), %v434_v0, 7  ;;  %v482_v9 = vcombine.high (!%p304_p3), %v1269_v3, %v1269_v3  ;;  %1359 = vset.pattern.permute.xlu0 (!%p304_p3), %v1394_v7  ;;  %1360 = vset.pattern.permute.xlu1 (!%p304_p3), %v1394_v7  ;;  %vm499_vm1 = vcmask (!%p304_p3), 15360   ;;  %vm928_vm2 = vcmask (!%p304_p3), 7168  }
   0x9   : > { %v433_v8 = vunpack.c.0.s8 (!%p304_p3), %v432_v2  ;;  %v485_v10 = vunpack.c.0.s8 (!%p304_p3), %v484_v5  ;;  %v1395_v42 = vmov (!%p304_p3), 0.0   ;;  %vm965_vm3 = vcmask (!%p304_p3), 1041408  }
   0xa   : > { %vm933_vm4 = vcmask (!%p304_p3), 1024  }
   0xb   : > { %v436_v11 = vsub.s32 (!%p304_p3), %v433_v8, %v435_v6  ;;  %v488_v12 = vsub.s32 (!%p304_p3), %v485_v10, %v435_v6 }
   0xd   : > { %v496_v16 = vrot.slane (!%p304_p3), %v482_v9, %v488_v12  ;;  %v489_v17 = vrot.slane (!%p304_p3), %v1269_v3, %v488_v12 }
   0xe   : > { %s1657_s24 = smov (!%p373_p4, %s1382_s24), 1 }
   0xf   : > { %s1301_s30 = sshll.u32 %s1657_s24, 3  ;;  %s1328_s11 = smul.u32 20, %s1657_s24  ;;  %1270 = vmatprep.subr.msk.bf16.mxu0 %vm509_vm0, %v496_v16  ;;  %v511_v19 = vsel %vm509_vm0, %v489_v17, 0  ;;  %v498_v20 = vcombine.high %v496_v16, %v496_v16  ;;  %v497_v21 = vcombine.high %v489_v17, %v489_v17 }
  0x10   : > { %s380_s10 = scalar_lea.vmem %s1644_s0, %s1301_s30  ;;  %s1474_s15 = smul.u32 40, %s1657_s24  ;;  %523 = vmatpush1.bf16.msra.mxu0 %v511_v19 }
  0x11   : > { %v423_v13 = vld [vmem:[%s380_s10] sm:$0xff]  ;;  %s1471_s14 = scalar_lea.vmem %s1647_s3, %s1328_s11  ;;  %s1482_s18 = scalar_lea.vmem %s1646_s2, %s1328_s11  ;;  %1274 = vmatprep.subr.msk.bf16.mxu1 %vm509_vm0, %v498_v20  ;;  %v517_v25 = vsel %vm509_vm0, %v497_v21, 0 }
  0x12   : > { %v430_v14 = vcombine.high %v423_v13, %v423_v13  ;;  %v437_v15 = vrot.slane %v423_v13, %v436_v11  ;;  %v1362_v22 = vld [vmem:[%s1471_s14] sm:$0xff]   ;;  %s401_s21 = scalar_lea.vmem %s1648_s4, %s1474_s15  ;;  %584 = vmatpush1.bf16.msra.mxu1 %v517_v25  ;;  %v1363_v34 = vld [vmem:[%s1471_s14 + $0x8] sm:$0xff]   ;;  %v1364_v38 = vld [vmem:[%s1471_s14 + $0x10] ss:$0 sps:$4 sm:$0x11]   ;;  %s1525_s28 = scalar_lea.vmem %s1650_s6, %s1474_s15 }
  0x13   : > { %1271 = vmatmul.mubr.msk.bf16.vlgmr.msra.gmra.mrb[0].mxu0 %vm499_vm1, %v1362_v22  ;;  %v804_v32 = vld [vmem:[%s401_s21 + $0x20] sm:$0x3]  ;;  %v801_v33 = vld [vmem:[%s401_s21 + $0x8] sm:$0xff]  ;;  %v802_v36 = vld [vmem:[%s401_s21 + $0x10] sm:$0xff]  ;;  %s1531_s8 = scalar_lea.vmem %s1651_s7, %s1474_s15  ;;  %929 = vst.msk [vmem:[%s1525_s28] sm:$0xff] %vm928_vm2, %v1395_v42  ;;  %s1330_s9 = smul.u32 80, %s1657_s24 }
  0x14   : > { %v444_v18 = vrot.slane %v430_v14, %v436_v11  ;;  %v445_v23 = vcombine.high %v437_v15, %v437_v15  ;;  %v451_v24 = vpack.c.bf16 %v437_v15, %v437_v15  ;;  %564 = vmatprep.mubr.bf16.mxu0 %v1394_v7  ;;  %827 = vperm.xlu0 %1359, %v804_v32   ;;  %v800_v35 = vld [vmem:[%s401_s21] sm:$0xff]  ;;  %v803_v37 = vld [vmem:[%s401_s21 + $0x18] sm:$0xff]  ;;  %v1366_v40 = vld [vmem:[%s1482_s18 + $0x8] sm:$0xff]  }
  0x15   : > { %1275 = vmatmul.mubr.msk.bf16.vlgmr.msra.gmra.mrb[0].mxu1 %vm499_vm1, %v1362_v22  ;;  %812 = vperm.xlu1 %1360, %v801_v33   ;;  %v1365_v39 = vld [vmem:[%s1482_s18] sm:$0xff]   ;;  %v1367_v41 = vld [vmem:[%s1482_s18 + $0x10] ss:$0 sps:$4 sm:$0x11]   ;;  %930 = vst.msk [vmem:[%s1525_s28 + $0x8] sm:$0xff] %vm928_vm2, %v1395_v42  ;;  %931 = vst.msk [vmem:[%s1525_s28 + $0x10] sm:$0xff] %vm928_vm2, %v1395_v42  ;;  %s1571_s12 = scalar_lea.vmem %s1649_s5, %s1330_s9 }
  0x16   : > { %v446_v26 = vcombine.high %v444_v18, %v444_v18  ;;  %v453_v27 = vpack.c.bf16 %v444_v18, %v444_v18  ;;  %v452_v28 = vpack.c.bf16 %v445_v23, %v445_v23  ;;  %v667_v29 = vsel %vm509_vm0, %v451_v24, 0  ;;  %625 = vmatprep.mubr.bf16.mxu1 %v1394_v7  ;;  %932 = vst.msk [vmem:[%s1525_s28 + $0x18] sm:$0xff] %vm928_vm2, %v1395_v42 }
  0x17   : > { %935 = vst.msk [vmem:[%s1531_s8] sm:$0xff] %vm928_vm2, %v1395_v42  ;;  %936 = vst.msk [vmem:[%s1531_s8 + $0x8] sm:$0xff] %vm928_vm2, %v1395_v42 }
  0x18   : > { %v454_v30 = vpack.c.bf16 %v446_v26, %v446_v26  ;;  %1281 = vmatprep.subr.msk.bf16.mxu0 %vm509_vm0, %v452_v28  ;;  %v673_v31 = vsel %vm509_vm0, %v453_v27, 0  ;;  %807 = vperm.xlu0 %1359, %v800_v35   ;;  %937 = vst.msk [vmem:[%s1531_s8 + $0x10] sm:$0xff] %vm928_vm2, %v1395_v42  ;;  %938 = vst.msk [vmem:[%s1531_s8 + $0x18] sm:$0xff] %vm928_vm2, %v1395_v42 }
  0x19   : > { %679 = vmatpush1.bf16.msra.mxu0 %v667_v29  ;;  %817 = vperm.xlu1 %1360, %v802_v36   ;;  %934 = vst.msk [vmem:[%s1525_s28 + $0x20] sm:$0x3] %vm933_vm4, %v1395_v42  ;;  %939 = vst.msk [vmem:[%s1531_s8 + $0x20] sm:$0x3] %vm933_vm4, %v1395_v42 }
  0x1a   : > { %1285 = vmatprep.subr.msk.bf16.mxu1 %vm509_vm0, %v454_v30 }
  0x1b   : > { %740 = vmatpush1.bf16.msra.mxu1 %v673_v31  ;;  %1272 = vmatmul.mubr.msk.bf16.gmra.mrb[4].mxu0 %vm499_vm1, %v1363_v34 }
  0x1c   : > { %574 = vmatprep.mubr.bf16.mxu0 %v1394_v7  ;;  %822 = vperm.xlu0 %1359, %v803_v37  }
  0x1d   : > { %1276 = vmatmul.mubr.msk.bf16.gmra.mrb[4].mxu1 %vm499_vm1, %v1363_v34 }
  0x1e   : > { %635 = vmatprep.mubr.bf16.mxu1 %v1394_v7 }
  0x23   : > { %1273 = vmatmul.mubr.msk.bf16.gmra.mrb[8].mxu0 %vm499_vm1, %v1364_v38 }
  0x24   : > { %710 = vmatprep.mubr.bf16.mxu0 %v1394_v7 }
  0x25   : > { %1277 = vmatmul.mubr.msk.bf16.gmra.mrb[8].mxu1 %vm499_vm1, %v1364_v38 }
  0x26   : > { %771 = vmatprep.mubr.bf16.mxu1 %v1394_v7 }
  0x2b   : > { %1282 = vmatmul.mubr.msk.bf16.vlgmr.msra.gmra.mrb[0].mxu0 %vm499_vm1, %v1365_v39 }
  0x2c   : > { %720 = vmatprep.mubr.bf16.mxu0 %v1394_v7 }
  0x2d   : > { %1286 = vmatmul.mubr.msk.bf16.vlgmr.msra.gmra.mrb[0].mxu1 %vm499_vm1, %v1365_v39 }
  0x2e   : > { %781 = vmatprep.mubr.bf16.mxu1 %v1394_v7 }
  0x33   : > { %1283 = vmatmul.mubr.msk.bf16.gmra.mrb[4].mxu0 %vm499_vm1, %v1366_v40 }
  0x34   : > { %730 = vmatprep.mubr.bf16.mxu0 %v1394_v7 }
  0x35   : > { %1287 = vmatmul.mubr.msk.bf16.gmra.mrb[4].mxu1 %vm499_vm1, %v1366_v40 }
  0x36   : > { %791 = vmatprep.mubr.bf16.mxu1 %v1394_v7 }
  0x3b   : > { %1284 = vmatmul.mubr.msk.bf16.gmra.mrb[12].mxu0 %vm499_vm1, %v1367_v41 }
  0x3d   : > { %1288 = vmatmul.mubr.msk.bf16.gmra.mrb[12].mxu1 %vm499_vm1, %v1367_v41 }
  0x93   : > { %v1559_v44 = vpop.permute.xlu0 %827 }
  0x94   : > { %v813_v54 = vpop.permute.xlu1 %812 }
  0x97   : > { %v808_v52 = vpop.permute.xlu0 %807 }
  0x98   : > { %v818_v15 = vpop.permute.xlu1 %817 }
  0x9b   : > { %v823_v23 = vpop.permute.xlu0 %822 }
  0xf6   : > { %v1557_v43 = vpop.f32.mrb[8].mxu0 }
  0xf7   : > { %v1561_v45 = vpop.f32.mrb[9].mxu0 }
  0xf8   : > { %v580_v46 = vpop.f32.mrb[10].mxu0  ;;  %v1563_v47 = vpop.f32.mrb[8].mxu1 }
  0xf9   : > { %v581_v48 = vpop.f32.mrb[11].mxu0  ;;  %v1565_v49 = vpop.f32.mrb[9].mxu1 }
  0xfa   : > { %v641_v50 = vpop.f32.mrb[10].mxu1 }
  0xfb   : > { %v642_v51 = vpop.f32.mrb[11].mxu1 }
  0xfe   : > { %v712_v53 = vpop.f32.mrb[0].mxu0 }
  0xff   : > { %v830_v55 = vadd.f32 %v808_v52, %v712_v53  ;;  %v714_v56 = vpop.f32.mrb[1].mxu0 }
 0x100   : > { %v831_v57 = vadd.f32 %v808_v52, %v714_v56  ;;  %v716_v58 = vpop.f32.mrb[2].mxu0  ;;  %v773_v59 = vpop.f32.mrb[0].mxu1 }
 0x101   : > { %v992_v60 = vmul.f32 %v830_v55, %v830_v55  ;;  %v834_v61 = vadd.f32 %v813_v54, %v716_v58  ;;  %v832_v62 = vadd.f32 %v808_v52, %v773_v59  ;;  %v718_v63 = vpop.f32.mrb[3].mxu0  ;;  %v775_v0 = vpop.f32.mrb[1].mxu1 }
 0x102   : > { %v1302_v1 = vpack.c.bf16 %v831_v57, %v830_v55  ;;  %v945_v2 = vadd.f32 %v831_v57, %v830_v55  ;;  %v993_v3 = vmul.f32 %v831_v57, %v831_v57  ;;  %v835_v4 = vadd.f32 %v813_v54, %v718_v63  ;;  %v777_v5 = vpop.f32.mrb[2].mxu1 }
 0x103   : > { %v996_v6 = vmul.f32 %v834_v61, %v834_v61  ;;  %v994_v7 = vmul.f32 %v832_v62, %v832_v62  ;;  %v833_v8 = vadd.f32 %v808_v52, %v775_v0  ;;  %v836_v9 = vadd.f32 %v813_v54, %v777_v5  ;;  %v779_v10 = vpop.f32.mrb[3].mxu1 }
 0x104   : > { %914 = vst [vmem:[%s1571_s12] sm:$0xff] %v1302_v1  ;;  %v1304_v11 = vpack.c.bf16 %v835_v4, %v834_v61  ;;  %v950_v12 = vadd.f32 %v835_v4, %v834_v61  ;;  %v997_v13 = vmul.f32 %v835_v4, %v835_v4  ;;  %v837_v14 = vadd.f32 %v813_v54, %v779_v10 }
 0x105   : > { %v1303_v16 = vpack.c.bf16 %v833_v8, %v832_v62  ;;  %v998_v17 = vmul.f32 %v836_v9, %v836_v9  ;;  %v946_v18 = vadd.f32 %v945_v2, %v832_v62  ;;  %v1012_v22 = vadd.f32 %v993_v3, %v992_v60 }
 0x106   : > { %916 = vst [vmem:[%s1571_s12 + $0x10] sm:$0xff] %v1304_v11  ;;  %v1305_v19 = vpack.c.bf16 %v837_v14, %v836_v9  ;;  %v722_v20 = vpop.f32.mrb[4].mxu0  ;;  %v951_v21 = vadd.f32 %v950_v12, %v836_v9  ;;  %v1017_v27 = vadd.f32 %v997_v13, %v996_v6  ;;  %v995_v32 = vmul.f32 %v833_v8, %v833_v8 }
 0x107   : > { %915 = vst [vmem:[%s1571_s12 + $0x8] sm:$0xff] %v1303_v16  ;;  %v838_v24 = vadd.f32 %v818_v15, %v722_v20  ;;  %v724_v25 = vpop.f32.mrb[5].mxu0  ;;  %v947_v26 = vadd.f32 %v946_v18, %v833_v8  ;;  %v1013_v33 = vadd.f32 %v1012_v22, %v994_v7  ;;  %v999_v38 = vmul.f32 %v837_v14, %v837_v14 }
 0x108   : > { %917 = vst [vmem:[%s1571_s12 + $0x18] sm:$0xff] %v1305_v19  ;;  %v839_v28 = vadd.f32 %v818_v15, %v724_v25  ;;  %v726_v29 = vpop.f32.mrb[6].mxu0  ;;  %v783_v30 = vpop.f32.mrb[4].mxu1  ;;  %v952_v31 = vadd.f32 %v951_v21, %v837_v14  ;;  %v1018_v39 = vadd.f32 %v1017_v27, %v998_v17 }
 0x109   : > { %v842_v34 = vadd.f32 %v823_v23, %v726_v29  ;;  %948 = vadd.xlane.f32.xlu1 %v947_v26  ;;  %v840_v35 = vadd.f32 %v818_v15, %v783_v30  ;;  %v728_v36 = vpop.f32.mrb[7].mxu0  ;;  %v785_v37 = vpop.f32.mrb[5].mxu1  ;;  %v1000_v40 = vmul.f32 %v838_v24, %v838_v24  ;;  %v1014_v62 = vadd.f32 %v1013_v33, %v995_v32 }
 0x10a   : > { %v1306_v41 = vpack.c.bf16 %v839_v28, %v838_v24  ;;  %v955_v46 = vadd.f32 %v839_v28, %v838_v24  ;;  %v843_v48 = vadd.f32 %v823_v23, %v728_v36  ;;  %953 = vadd.xlane.f32.xlu0 %v952_v31  ;;  %v787_v50 = vpop.f32.mrb[6].mxu1  ;;  %v1001_v51 = vmul.f32 %v839_v28, %v839_v28 }
 0x10b   : > { %v1004_v52 = vmul.f32 %v842_v34, %v842_v34  ;;  %v841_v53 = vadd.f32 %v818_v15, %v785_v37  ;;  %v844_v54 = vadd.f32 %v823_v23, %v787_v50  ;;  %v789_v55 = vpop.f32.mrb[7].mxu1  ;;  %v1002_v60 = vmul.f32 %v840_v35, %v840_v35 }
 0x10c   : > { %918 = vst [vmem:[%s1571_s12 + $0x20] sm:$0xff] %v1306_v41  ;;  %v1308_v56 = vpack.c.bf16 %v843_v48, %v842_v34  ;;  %v960_v57 = vadd.f32 %v843_v48, %v842_v34  ;;  %v1005_v58 = vmul.f32 %v843_v48, %v843_v48  ;;  %v845_v59 = vadd.f32 %v823_v23, %v789_v55 }
 0x10d   : > { %v1307_v61 = vpack.c.bf16 %v841_v53, %v840_v35  ;;  %v1019_v63 = vadd.f32 %v1018_v39, %v999_v38  ;;  %v1006_v0 = vmul.f32 %v844_v54, %v844_v54  ;;  %v956_v3 = vadd.f32 %v955_v46, %v840_v35  ;;  %1015 = vadd.xlane.f32.xlu1 %v1014_v62  ;;  %v942_v62 = vld [vmem:[%s1525_s28 + $0x10] sm:$0xff] }
 0x10e   : > { %920 = vst [vmem:[%s1571_s12 + $0x30] sm:$0xff] %v1308_v56  ;;  %v1309_v1 = vpack.c.bf16 %v845_v59, %v844_v54  ;;  %v732_v2 = vpop.f32.mrb[12].mxu0  ;;  %v961_v4 = vadd.f32 %v960_v57, %v844_v54  ;;  %v1022_v7 = vadd.f32 %v1001_v51, %v1000_v40  ;;  %v1027_v13 = vadd.f32 %v1005_v58, %v1004_v52  ;;  %v940_v51 = vld [vmem:[%s1525_s28] sm:$0xff]  ;;  %v941_v52 = vld [vmem:[%s1525_s28 + $0x8] sm:$0xff] }
 0x10f   : > { %919 = vst [vmem:[%s1571_s12 + $0x28] sm:$0xff] %v1307_v61  ;;  %v733_v5 = vadd.f32 %v732_v2, %v1557_v43  ;;  %1020 = vadd.xlane.f32.xlu0 %v1019_v63  ;;  %v734_v6 = vpop.f32.mrb[13].mxu0  ;;  %v957_v11 = vadd.f32 %v956_v3, %v841_v53  ;;  %v1003_v18 = vmul.f32 %v841_v53, %v841_v53  ;;  %v987_v57 = vld [vmem:[%s1531_s8] sm:$0xff]  ;;  %v988_v58 = vld [vmem:[%s1531_s8 + $0x8] sm:$0xff]  ;;  %v943_v63 = vld [vmem:[%s1525_s28 + $0x18] sm:$0xff] }
 0x110   : > { %921 = vst [vmem:[%s1571_s12 + $0x38] sm:$0xff] %v1309_v1  ;;  %v735_v8 = vadd.f32 %v734_v6, %v1561_v45  ;;  %v736_v9 = vpop.f32.mrb[14].mxu0  ;;  %v793_v10 = vpop.f32.mrb[12].mxu1  ;;  %v962_v12 = vadd.f32 %v961_v4, %v845_v59  ;;  %v1023_v43 = vadd.f32 %v1022_v7, %v1002_v60  ;;  %v1007_v22 = vmul.f32 %v845_v59, %v845_v59  ;;  %v989_v4 = vld [vmem:[%s1531_s8 + $0x10] sm:$0xff]  ;;  %v944_v7 = vld [vmem:[%s1525_s28 + $0x20] sm:$0x3] }
 0x111   : > { %v846_v14 = vadd.f32 %v1559_v44, %v733_v5  ;;  %v794_v15 = vadd.f32 %v793_v10, %v1563_v47  ;;  %v737_v16 = vpop.f32.mrb[15].mxu0  ;;  %v795_v17 = vpop.f32.mrb[13].mxu1  ;;  %v1028_v45 = vadd.f32 %v1027_v13, %v1006_v0  ;;  %v991_v9 = vld [vmem:[%s1531_s8 + $0x20] sm:$0x3] }
 0x112   : > { %v847_v19 = vadd.f32 %v1559_v44, %v735_v8  ;;  %v796_v20 = vadd.f32 %v795_v17, %v1565_v49  ;;  %v797_v21 = vpop.f32.mrb[14].mxu1  ;;  %963 = vadd.xlane.f32.xlu1 %v962_v12  ;;  %v1024_v26 = vadd.f32 %v1023_v43, %v1003_v18  ;;  %v990_v12 = vld [vmem:[%s1531_s8 + $0x18] sm:$0xff] }
 0x113   : > { %v1008_v23 = vmul.f32 %v846_v14, %v846_v14  ;;  %v848_v24 = vadd.f32 %v1559_v44, %v794_v15  ;;  %958 = vadd.xlane.f32.xlu0 %v957_v11  ;;  %v798_v25 = vpop.f32.mrb[15].mxu1  ;;  %v966_v47 = vsel %vm965_vm3, %v846_v14, 0.0  ;;  %v1029_v39 = vadd.f32 %v1028_v45, %v1007_v22 }
 0x114   : > { %v1310_v27 = vpack.c.bf16 %v847_v19, %v846_v14  ;;  %v1009_v28 = vmul.f32 %v847_v19, %v847_v19  ;;  %v849_v29 = vadd.f32 %v1559_v44, %v796_v20  ;;  %v967_v49 = vsel %vm965_vm3, %v847_v19, 0.0 }
 0x115   : > { %v968_v30 = vadd.f32 %v967_v49, %v966_v47  ;;  %v969_v31 = vsel %vm965_vm3, %v848_v24, 0.0  ;;  %v1010_v32 = vmul.f32 %v848_v24, %v848_v24  ;;  %v1032_v33 = vsel %vm965_vm3, %v1008_v23, 0.0 }
 0x116   : > { %922 = vst [vmem:[%s1571_s12 + $0x40] sm:$0x11] %v1310_v27  ;;  %v1311_v34 = vpack.c.bf16 %v849_v29, %v848_v24  ;;  %v1011_v35 = vmul.f32 %v849_v29, %v849_v29  ;;  %v1033_v36 = vsel %vm965_vm3, %v1009_v28, 0.0  ;;  %1025 = vadd.xlane.f32.xlu1 %v1024_v26  ;;  %v971_v40 = vsel %vm965_vm3, %v849_v29, 0.0 }
 0x117   : > { %v970_v37 = vadd.f32 %v969_v31, %v968_v30  ;;  %v1034_v38 = vadd.f32 %v1033_v36, %v1032_v33  ;;  %v1035_v44 = vsel %vm965_vm3, %v1010_v32, 0.0 }
 0x118   : > { %923 = vst [vmem:[%s1571_s12 + $0x48] sm:$0x11] %v1311_v34  ;;  %v1037_v48 = vsel %vm965_vm3, %v1011_v35, 0.0 }
 0x119   : > { %v972_v41 = vadd.f32 %v971_v40, %v970_v37  ;;  %v1036_v46 = vadd.f32 %v1035_v44, %v1034_v38 }
 0x11b   : > { %973 = vadd.xlane.f32.xlu0 %v972_v41  ;;  %v1038_v50 = vadd.f32 %v1037_v48, %v1036_v46 }
 0x11d   : > { %1039 = vadd.xlane.f32.xlu1 %v1038_v50 }
 0x11f   : > { %1030 = vadd.xlane.f32.xlu0 %v1029_v39 }
 0x196   : > { %v949_v53 = vpop.xlane.xlu1 %948 }
 0x197   : > { %v975_v54 = vadd.f32 %v949_v53, %v940_v51  ;;  %v954_v55 = vpop.xlane.xlu0 %953 }
 0x198   : > { %v976_v56 = vadd.f32 %v954_v55, %v941_v52 }
 0x199   : > { %981 = vst.msk [vmem:[%s1525_s28] sm:$0xff] %vm928_vm2, %v975_v54 }
 0x19a   : > { %982 = vst.msk [vmem:[%s1525_s28 + $0x8] sm:$0xff] %vm928_vm2, %v976_v56  ;;  %v1016_v59 = vpop.xlane.xlu1 %1015 }
 0x19b   : > { %v1041_v60 = vadd.f32 %v1016_v59, %v987_v57 }
 0x19c   : > { %v1021_v42 = vpop.xlane.xlu0 %1020 }
 0x19d   : > { %v1042_v61 = vadd.f32 %v1021_v42, %v988_v58  ;;  %1046 = vst.msk [vmem:[%s1531_s8] sm:$0xff] %vm928_vm2, %v1041_v60 }
 0x19f   : > { %1047 = vst.msk [vmem:[%s1531_s8 + $0x8] sm:$0xff] %vm928_vm2, %v1042_v61  ;;  %v964_v1 = vpop.xlane.xlu1 %963 }
 0x1a0   : > { %v959_v0 = vpop.xlane.xlu0 %958  ;;  %v978_v3 = vadd.f32 %v964_v1, %v943_v63 }
 0x1a1   : > { %v977_v2 = vadd.f32 %v959_v0, %v942_v62 }
 0x1a2   : > { %984 = vst.msk [vmem:[%s1525_s28 + $0x18] sm:$0xff] %vm928_vm2, %v978_v3 }
 0x1a3   : > { %983 = vst.msk [vmem:[%s1525_s28 + $0x10] sm:$0xff] %vm928_vm2, %v977_v2  ;;  %v1026_v5 = vpop.xlane.xlu1 %1025 }
 0x1a4   : > { %v1043_v6 = vadd.f32 %v1026_v5, %v989_v4 }
 0x1a6   : > { %1048 = vst.msk [vmem:[%s1531_s8 + $0x10] sm:$0xff] %vm928_vm2, %v1043_v6 }
 0x1a8   : > { %v974_v8 = vpop.xlane.xlu0 %973 }
 0x1a9   : > { %v979_v10 = vadd.f32 %v974_v8, %v944_v7 }
 0x1aa   : > { %v1040_v11 = vpop.xlane.xlu1 %1039 }
 0x1ab   : > { %986 = vst.msk [vmem:[%s1525_s28 + $0x20] sm:$0x3] %vm933_vm4, %v979_v10  ;;  %v1045_v13 = vadd.f32 %v1040_v11, %v991_v9 }
 0x1ac   : > { %v1031_v14 = vpop.xlane.xlu0 %1030 }
 0x1ad   : > { %1050 = vst.msk [vmem:[%s1531_s8 + $0x20] sm:$0x3] %vm933_vm4, %v1045_v13  ;;  %v1044_v15 = vadd.f32 %v1031_v14, %v990_v12 }
 0x1af   : > { %1049 = vst.msk [vmem:[%s1531_s8 + $0x18] sm:$0xff] %vm928_vm2, %v1044_v15 }
 0x1b0 PF: > { %s18_s26 = sadd.s32 1, %s1390_s26   ;;  %s1652_s24 = smov %s1386_s25 }
 0x1b1   : > { %p15_p5 = scmp.ge.s32.totalorder %s18_s26, 4   ;;  %s1653_s25 = smov %s1655_s27 }
 0x1b3   :  { %17 = sbr.rel (!%p15_p5) target bundleno = 2 (0x2), region = 110 }

// kernel: ae_pointnet_dcg_forward.21
= control target key start
LH: loop header
LB: loop body
LE: loop exit
PB: predicated region body
PF: predicated region fallthrough
CT: control target
= control target key end

     0   :  { %s982_s24 = smov 0   ;;  %s984_s25 = smov 0   ;;  %s1054_s0 = inlined_call_operand.vmem [shape: bf16[2,17,512], index: 0, kind: input, shape index: {}]   ;;  %s1055_s1 = inlined_call_operand.vmem [shape: f32[2,17,1], index: 1, kind: input, shape index: {}]   ;;  %s1056_s2 = inlined_call_operand.vmem [shape: f32[2,17,1], index: 2, kind: input, shape index: {}]   ;;  %s1057_s3 = inlined_call_operand.vmem [shape: bf16[2,8,17], index: 3, kind: input, shape index: {}]   ;;  %s1058_s4 = inlined_call_operand.vmem [shape: f32[2,8,1], index: 4, kind: input, shape index: {}]   ;;  %s1059_s5 = inlined_call_operand.vmem [shape: bf16[2,8,512], index: 5, kind: output, shape index: {0}]   ;;  %s1060_s6 = inlined_call_operand.vmem [shape: f32[2,8,1], index: 6, kind: output, shape index: {1}]   ;;  %s1061_s7 = inlined_call_operand.vmem [shape: f32[2,8,1], index: 7, kind: output, shape index: {2}]  }
   0x1   :  { %s986_s26 = smov 0  }
   0x2 LB: > { %s30_s27 = sadd.s32 1, %s934_s25  ;;  %p867_p0 = scmp.ge.s32.totalorder %s938_s26, 1  ;;  %s938_s26 = sphi %s986_s26, %s18_s26   ;;  %s934_s25 = sphi %s984_s25, %s1063_s25   ;;  %s930_s24 = sphi %s982_s24, %s1062_s24  }
   0x3   : > { %p32_p1 = scmp.ge.s32.totalorder %s30_s27, 2  ;;  %p301_p2 = scmp.lt.s32.totalorder %s938_s26, 3 }
   0x5   : > { %s1065_s27 = smov (%p32_p1, %s30_s27), 0  ;;  %p302_p3 = pnand %p867_p0, %p301_p2 }
   0x6   : > { %p368_p4 = scmp.lt.s32.totalorder (!%p302_p3), %s930_s24, 1  ;;  %v940_v0 = vmov (!%p302_p3), 0   ;;  %vm523_vm0 = vcmask (!%p302_p3), 1040384   ;;  %vm519_vm1 = vcmask (!%p302_p3), 138240   ;;  %vm642_vm2 = vcmask (!%p302_p3), 7168  }
   0x7   : > { %305 = sbr.rel (%p302_p3) target bundleno = 538 (0x21a), region = 40  ;;  %915 = vset.pattern.permute.xlu1 (!%p302_p3), %v940_v0  ;;  %914 = vset.pattern.permute.xlu0 (!%p302_p3), %v940_v0  ;;  %v525_v34 = vsel (!%p302_p3), %vm523_vm0, 65535, %v940_v0 }
   0x8   : > { %570 = vmatprep.mubr.bf16.mxu0 (!%p302_p3), %v940_v0  ;;  %611 = vmatprep.mubr.bf16.mxu1 (!%p302_p3), %v940_v0 }
   0xe   : > { %s1067_s24 = smov (!%p368_p4, %s930_s24), 1 }
   0xf   : > { %s887_s28 = smul.u32 24, %s1067_s24  ;;  %s1010_s12 = sshll.u32 %s1067_s24, 3 }
  0x10   : > { %s394_s15 = scalar_lea.vmem %s1058_s4, %s1010_s12  ;;  %s886_s16 = smul.u32 48, %s1067_s24 }
  0x11   : > { %s381_s8 = scalar_lea.vmem %s1055_s1, %s887_s28  ;;  %s386_s11 = scalar_lea.vmem %s1056_s2, %s887_s28  ;;  %v513_v7 = vld [vmem:[%s394_s15] sm:$0xff] }
  0x12   : > { %v434_v1 = vld [vmem:[%s381_s8 + $0x10] sm:$0x1]  ;;  %v432_v2 = vld [vmem:[%s381_s8] sm:$0xff]  ;;  %v433_v4 = vld [vmem:[%s381_s8 + $0x8] sm:$0xff]  ;;  %s375_s19 = scalar_lea.vmem %s1054_s0, %s886_s16  ;;  %s871_s20 = sshll.u32 %s1067_s24, 2 }
  0x13   : > { %447 = vperm.xlu1 %915, %v434_v1   ;;  %437 = vperm.xlu0 %914, %v432_v2   ;;  %v462_v3 = vld [vmem:[%s386_s11] sm:$0xff]  ;;  %v464_v5 = vld [vmem:[%s386_s11 + $0x10] sm:$0x1]  ;;  %v463_v6 = vld [vmem:[%s386_s11 + $0x8] sm:$0xff]  ;;  %s390_s23 = scalar_lea.vmem %s1057_s3, %s871_s20  ;;  %s1028_s30 = scalar_lea.vmem %s1060_s6, %s1010_s12 }
  0x14   : > { %v414_v8 = vld [vmem:[%s375_s19] sm:$0xff]  ;;  %v415_v9 = vld [vmem:[%s375_s19 + $0x8] sm:$0xff]  ;;  %v416_v12 = vld [vmem:[%s375_s19 + $0x10] sm:$0xff]  ;;  %s883_s8 = sshll.u32 %s1067_s24, 4  ;;  %s412_s14 = scalar_lea.vmem %s1061_s7, %s1010_s12 }
  0x15   : > { %v418_v10 = vld [vmem:[%s375_s19 + $0x20] sm:$0x11]  ;;  %v419_v11 = vld [vmem:[%s375_s19 + $0x28] sm:$0x11]  ;;  %v421_v13 = vunpack.c.h.bf16 %v414_v8  ;;  %v420_v16 = vunpack.c.l.bf16 %v414_v8  ;;  %v422_v17 = vunpack.c.l.bf16 %v415_v9  ;;  %v417_v18 = vld [vmem:[%s375_s19 + $0x18] sm:$0xff]  ;;  %v423_v19 = vunpack.c.h.bf16 %v415_v9  ;;  %s403_s11 = scalar_lea.vmem %s1059_s5, %s883_s8 }
  0x16   : > { %v428_v20 = vunpack.c.l.bf16 %v418_v10  ;;  %v429_v21 = vunpack.c.h.bf16 %v418_v10  ;;  %v430_v22 = vunpack.c.l.bf16 %v419_v11  ;;  %v431_v23 = vunpack.c.h.bf16 %v419_v11 }
  0x17   : > { %467 = vperm.xlu1 %915, %v462_v3   ;;  %442 = vperm.xlu0 %914, %v433_v4   ;;  %v424_v24 = vunpack.c.l.bf16 %v416_v12  ;;  %v426_v25 = vunpack.c.l.bf16 %v417_v18  ;;  %v425_v26 = vunpack.c.h.bf16 %v416_v12  ;;  %v427_v28 = vunpack.c.h.bf16 %v417_v18 }
  0x18   : > { %v941_v18 = vmov 0.0  }
  0x19   : > { %643 = vst.msk [vmem:[%s1028_s30] sm:$0xff] %vm642_vm2, %v941_v18  ;;  %644 = vst.msk [vmem:[%s412_s14] sm:$0xff] %vm642_vm2, %v941_v18 }
  0x1b   : > { %477 = vperm.xlu1 %915, %v464_v5   ;;  %472 = vperm.xlu0 %914, %v463_v6  }
  0x1f   : > { %516 = vperm.xlu0 %914, %v513_v7  }
  0x92   : > { %v448_v14 = vpop.permute.xlu1 %447  ;;  %v438_v15 = vpop.permute.xlu0 %437 }
  0x93   : > { %v451_v27 = vmul.f32 %v438_v15, %v421_v13  ;;  %v450_v29 = vmul.f32 %v438_v15, %v420_v16  ;;  %v452_v30 = vmul.f32 %v438_v15, %v422_v17  ;;  %v453_v33 = vmul.f32 %v438_v15, %v423_v19  ;;  %v512_v17 = vld [vmem:[%s390_s23] sm:$0xf] }
  0x94   : > { %v458_v35 = vmul.f32 %v448_v14, %v428_v20  ;;  %v459_v36 = vmul.f32 %v448_v14, %v429_v21  ;;  %v460_v37 = vmul.f32 %v448_v14, %v430_v22  ;;  %v461_v39 = vmul.f32 %v448_v14, %v431_v23 }
  0x96   : > { %v468_v31 = vpop.permute.xlu1 %467  ;;  %v443_v32 = vpop.permute.xlu0 %442 }
  0x97   : > { %v481_v38 = vadd.f32 %v468_v31, %v451_v27  ;;  %v483_v40 = vadd.f32 %v468_v31, %v453_v33  ;;  %v480_v41 = vadd.f32 %v468_v31, %v450_v29  ;;  %v482_v42 = vadd.f32 %v468_v31, %v452_v30 }
  0x98   : > { %v454_v43 = vmul.f32 %v443_v32, %v424_v24  ;;  %v456_v44 = vmul.f32 %v443_v32, %v426_v25  ;;  %v455_v45 = vmul.f32 %v443_v32, %v425_v26  ;;  %v457_v46 = vmul.f32 %v443_v32, %v427_v28 }
  0x99   : > { %v493_v49 = vmax.f32 %v481_v38, 0.0  ;;  %v495_v50 = vmax.f32 %v483_v40, 0.0  ;;  %v492_v51 = vmax.f32 %v480_v41, 0.0  ;;  %v494_v52 = vmax.f32 %v482_v42, 0.0 }
  0x9a   : > { %v478_v47 = vpop.permute.xlu1 %477  ;;  %v473_v48 = vpop.permute.xlu0 %472 }
  0x9b   : > { %v488_v53 = vadd.f32 %v478_v47, %v458_v35  ;;  %v489_v54 = vadd.f32 %v478_v47, %v459_v36  ;;  %v490_v55 = vadd.f32 %v478_v47, %v460_v37  ;;  %v491_v56 = vadd.f32 %v478_v47, %v461_v39 }
  0x9c   : > { %v485_v57 = vadd.f32 %v473_v48, %v455_v45  ;;  %v487_v58 = vadd.f32 %v473_v48, %v457_v46  ;;  %v484_v59 = vadd.f32 %v473_v48, %v454_v43  ;;  %v486_v60 = vadd.f32 %v473_v48, %v456_v44  ;;  %v645_v44 = vld [vmem:[%s1028_s30] sm:$0xff] }
  0x9d   : > { %v500_v61 = vmax.f32 %v488_v53, 0.0  ;;  %v501_v62 = vmax.f32 %v489_v54, 0.0  ;;  %v502_v63 = vmax.f32 %v490_v55, 0.0  ;;  %v503_v0 = vmax.f32 %v491_v56, 0.0  ;;  %v654_v46 = vld [vmem:[%s412_s14] sm:$0xff] }
  0x9e   : > { %v497_v1 = vmax.f32 %v485_v57, 0.0  ;;  %v499_v2 = vmax.f32 %v487_v58, 0.0  ;;  %v496_v3 = vmax.f32 %v484_v59, 0.0  ;;  %v498_v4 = vmax.f32 %v486_v60, 0.0  ;;  %v517_v19 = vpop.permute.xlu0 %516 }
  0x9f   : > { %v509_v5 = vpack.c.bf16 %v501_v62, %v501_v62  ;;  %v511_v6 = vpack.c.bf16 %v503_v0, %v503_v0  ;;  %v508_v13 = vpack.c.bf16 %v500_v61, %v500_v61  ;;  %v510_v14 = vpack.c.bf16 %v502_v63, %v502_v63 }
  0xa0   : > { %v505_v7 = vpack.c.bf16 %v497_v1, %v493_v49  ;;  %v507_v8 = vpack.c.bf16 %v499_v2, %v495_v50  ;;  %v504_v9 = vpack.c.bf16 %v496_v3, %v492_v51  ;;  %v506_v10 = vpack.c.bf16 %v498_v4, %v494_v52 }
  0xa1   : > { %v530_v11 = vand.u32 %v525_v34, %v509_v5  ;;  %v536_v12 = vand.u32 %v525_v34, %v511_v6  ;;  %v527_v15 = vand.u32 %v525_v34, %v508_v13  ;;  %v533_v16 = vand.u32 %v525_v34, %v510_v14 }
  0xa2   : > { %538 = vmatprep.subr.bf16.mxu0 %v505_v7  ;;  %579 = vmatprep.subr.bf16.mxu1 %v507_v8 }
  0xa3   : > { %539 = vmatpush1.bf16.msra.mxu0 %v504_v9  ;;  %580 = vmatpush1.bf16.msra.mxu1 %v506_v10 }
  0xa4   : > { %540 = vmatprep.subr.bf16.mxu0 %v530_v11  ;;  %581 = vmatprep.subr.bf16.mxu1 %v536_v12 }
  0xa7   : > { %541 = vmatpush1.bf16.msra.mxu0 %v527_v15  ;;  %582 = vmatpush1.bf16.msra.mxu1 %v533_v16 }
  0xaa   : > { %877 = vmatmul.mubr.msk.bf16.vlgmr.msra.gmra.mrb[0].mxu0 %vm519_vm1, %v512_v17  ;;  %878 = vmatmul.mubr.msk.bf16.vlgmr.msra.gmra.mrb[0].mxu1 %vm519_vm1, %v512_v17 }
 0x17d   : > { %v572_v20 = vpop.f32.mrb[0].mxu0  ;;  %v613_v21 = vpop.f32.mrb[0].mxu1 }
 0x17e   : > { %v573_v22 = vadd.f32 %v572_v20, %v517_v19  ;;  %v614_v23 = vadd.f32 %v613_v21, %v517_v19  ;;  %v574_v24 = vpop.f32.mrb[1].mxu0  ;;  %v615_v25 = vpop.f32.mrb[1].mxu1 }
 0x17f   : > { %v575_v26 = vadd.f32 %v574_v24, %v517_v19  ;;  %v616_v27 = vadd.f32 %v615_v25, %v517_v19  ;;  %v576_v28 = vpop.f32.mrb[2].mxu0  ;;  %v617_v29 = vpop.f32.mrb[2].mxu1 }
 0x180   : > { %v655_v30 = vmul.f32 %v573_v22, %v573_v22  ;;  %v577_v31 = vpop.f32.mrb[3].mxu0  ;;  %v618_v32 = vpop.f32.mrb[3].mxu1  ;;  %v657_v37 = vmul.f32 %v614_v23, %v614_v23 }
 0x181   : > { %v884_v33 = vpack.c.bf16 %v575_v26, %v573_v22  ;;  %v646_v34 = vadd.f32 %v575_v26, %v573_v22  ;;  %v656_v35 = vmul.f32 %v575_v26, %v575_v26  ;;  %v885_v36 = vpack.c.bf16 %v616_v27, %v614_v23 }
 0x182   : > { %v658_v41 = vmul.f32 %v616_v27, %v616_v27 }
 0x183   : > { %636 = vst [vmem:[%s403_s11] sm:$0xff] %v884_v33  ;;  %637 = vst [vmem:[%s403_s11 + $0x8] sm:$0xff] %v885_v36  ;;  %v647_v38 = vadd.f32 %v646_v34, %v614_v23  ;;  %v659_v39 = vadd.f32 %v656_v35, %v655_v30 }
 0x185   : > { %v648_v40 = vadd.f32 %v647_v38, %v616_v27  ;;  %v660_v42 = vadd.f32 %v659_v39, %v657_v37 }
 0x187   : > { %649 = vadd.xlane.f32.xlu1 %v648_v40  ;;  %v661_v43 = vadd.f32 %v660_v42, %v658_v41 }
 0x189   : > { %662 = vadd.xlane.f32.xlu0 %v661_v43 }
 0x214   : > { %v650_v45 = vpop.xlane.xlu1 %649 }
 0x215   : > { %v651_v47 = vadd.f32 %v650_v45, %v645_v44 }
 0x216   : > { %v663_v48 = vpop.xlane.xlu0 %662 }
 0x217   : > { %653 = vst.msk [vmem:[%s1028_s30] sm:$0xff] %vm642_vm2, %v651_v47  ;;  %v664_v49 = vadd.f32 %v663_v48, %v654_v46 }
 0x219   : > { %665 = vst.msk [vmem:[%s412_s14] sm:$0xff] %vm642_vm2, %v664_v49 }
 0x21a PF: > { %s18_s26 = sadd.s32 1, %s938_s26   ;;  %s1062_s24 = smov %s934_s25 }
 0x21b   : > { %p15_p5 = scmp.ge.s32.totalorder %s18_s26, 4   ;;  %s1063_s25 = smov %s1065_s27 }
 0x21d   :  { %17 = sbr.rel (!%p15_p5) target bundleno = 2 (0x2), region = 110 }

// kernel: ae_pointnet_dcg_forward.20
= control target key start
LH: loop header
LB: loop body
LE: loop exit
PB: predicated region body
PF: predicated region fallthrough
CT: control target
= control target key end

     0   :  { %s1213_s24 = smov 0   ;;  %s1215_s25 = smov 0   ;;  %s1386_s0 = inlined_call_operand.vmem [shape: bf16[2,34,512], index: 0, kind: input, shape index: {}]   ;;  %s1387_s1 = inlined_call_operand.vmem [shape: f32[2,34,1], index: 1, kind: input, shape index: {}]   ;;  %s1388_s2 = inlined_call_operand.vmem [shape: f32[2,34,1], index: 2, kind: input, shape index: {}]   ;;  %s1389_s3 = inlined_call_operand.vmem [shape: bf16[2,17,34], index: 3, kind: input, shape index: {}]   ;;  %s1390_s4 = inlined_call_operand.vmem [shape: f32[2,17,1], index: 4, kind: input, shape index: {}]   ;;  %s1391_s5 = inlined_call_operand.vmem [shape: bf16[2,17,512], index: 5, kind: output, shape index: {0}]   ;;  %s1392_s6 = inlined_call_operand.vmem [shape: f32[2,17,1], index: 6, kind: output, shape index: {1}]   ;;  %s1393_s7 = inlined_call_operand.vmem [shape: f32[2,17,1], index: 7, kind: output, shape index: {2}]  }
   0x1   :  { %s1217_s26 = smov 0  }
   0x2 LB: > { %s30_s27 = sadd.s32 1, %s1165_s25  ;;  %p1081_p0 = scmp.ge.s32.totalorder %s1169_s26, 1  ;;  %s1169_s26 = sphi %s1217_s26, %s18_s26   ;;  %s1165_s25 = sphi %s1215_s25, %s1399_s25   ;;  %s1161_s24 = sphi %s1213_s24, %s1398_s24  }
   0x3   : > { %p32_p1 = scmp.ge.s32.totalorder %s30_s27, 2  ;;  %p303_p2 = scmp.lt.s32.totalorder %s1169_s26, 3 }
   0x5   : > { %s1401_s27 = smov (%p32_p1, %s30_s27), 0  ;;  %p304_p3 = pnand %p1081_p0, %p303_p2 }
   0x6   : > { %p374_p4 = scmp.lt.s32.totalorder (!%p304_p3), %s1161_s24, 1  ;;  %v1171_v0 = vmov (!%p304_p3), 0   ;;  %vm622_vm0 = vcmask (!%p304_p3), 1040384   ;;  %vm615_vm1 = vcmask (!%p304_p3), 277504   ;;  %vm798_vm2 = vcmask (!%p304_p3), 7168  }
   0x7   : > { %307 = sbr.rel (%p304_p3) target bundleno = 555 (0x22b), region = 40  ;;  %1144 = vset.pattern.permute.xlu1 (!%p304_p3), %v1171_v0  ;;  %1143 = vset.pattern.permute.xlu0 (!%p304_p3), %v1171_v0  ;;  %vm782_vm3 = vsmask.f32 (!%p304_p3), 256  ;;  %vm784_vm4 = vcmask (!%p304_p3), 1044484   ;;  %vm785_vm5 = vsmask.f32 (!%p304_p3), 4352 }
   0x8   : > { %667 = vmatprep.mubr.bf16.mxu0 (!%p304_p3), %v1171_v0  ;;  %718 = vmatprep.mubr.bf16.mxu1 (!%p304_p3), %v1171_v0  ;;  %vm1315_vm6 = vmand (!%p304_p3), %vm622_vm0, %vm782_vm3  ;;  %vm801_vm9 = vcmask (!%p304_p3), 0  }
   0x9   : > { %vm1321_vm7 = vmand (!%p304_p3), %vm784_vm4, %vm785_vm5 }
   0xa   : > { %vm787_vm8 = vmor (!%p304_p3), %vm1321_vm7, %vm1315_vm6 }
   0xe   : > { %s1403_s24 = smov (!%p374_p4, %s1161_s24), 1 }
   0xf   : > { %s1113_s28 = smul.u32 40, %s1403_s24 }
  0x10   : > { %s1245_s12 = smul.u32 24, %s1403_s24 }
  0x11   : > { %s392_s8 = scalar_lea.vmem %s1388_s2, %s1113_s28  ;;  %s387_s11 = scalar_lea.vmem %s1387_s1, %s1113_s28 }
  0x12   : > { %v504_v1 = vld [vmem:[%s392_s8] sm:$0xff]  ;;  %v505_v3 = vld [vmem:[%s392_s8 + $0x8] sm:$0xff]  ;;  %v457_v5 = vld [vmem:[%s387_s11 + $0x18] sm:$0xff]  ;;  %s402_s15 = scalar_lea.vmem %s1390_s4, %s1245_s12  ;;  %s1114_s16 = smul.u32 12, %s1403_s24 }
  0x13   : > { %v454_v2 = vld [vmem:[%s387_s11] sm:$0xff]  ;;  %511 = vperm.xlu1 %1144, %v504_v1   ;;  %v455_v4 = vld [vmem:[%s387_s11 + $0x8] sm:$0xff]  ;;  %v456_v6 = vld [vmem:[%s387_s11 + $0x10] sm:$0xff]  ;;  %s1112_s20 = smul.u32 80, %s1403_s24  ;;  %s1285_s30 = scalar_lea.vmem %s1392_s6, %s1245_s12 }
  0x14   : > { %461 = vperm.xlu0 %1143, %v454_v2   ;;  %v507_v7 = vld [vmem:[%s392_s8 + $0x18] sm:$0xff]  ;;  %v506_v8 = vld [vmem:[%s392_s8 + $0x10] sm:$0xff]  ;;  %v508_v9 = vld [vmem:[%s392_s8 + $0x20] sm:$0x3]  ;;  %s1255_s19 = scalar_lea.vmem %s1389_s3, %s1114_s16  ;;  %s1291_s10 = scalar_lea.vmem %s1393_s7, %s1245_s12 }
  0x15   : > { %v458_v10 = vld [vmem:[%s387_s11 + $0x20] sm:$0x3]  ;;  %v591_v12 = vld [vmem:[%s402_s15 + $0x10] sm:$0x1]  ;;  %v590_v13 = vld [vmem:[%s402_s15 + $0x8] sm:$0xff]  ;;  %s1261_s23 = scalar_lea.vmem %s1386_s0, %s1112_s20  ;;  %s1116_s11 = smul.u32 48, %s1403_s24 }
  0x16   : > { %v589_v11 = vld [vmem:[%s402_s15] sm:$0xff]  ;;  %v425_v15 = vld [vmem:[%s1261_s23 + $0x8] sm:$0xff]  ;;  %v426_v18 = vld [vmem:[%s1261_s23 + $0x10] sm:$0xff] }
  0x17   : > { %516 = vperm.xlu1 %1144, %v505_v3   ;;  %v424_v14 = vld [vmem:[%s1261_s23] sm:$0xff]  ;;  %v436_v17 = vunpack.c.l.bf16 %v425_v15  ;;  %v427_v19 = vld [vmem:[%s1261_s23 + $0x18] sm:$0xff]  ;;  %v437_v21 = vunpack.c.h.bf16 %v425_v15  ;;  %v438_v24 = vunpack.c.l.bf16 %v426_v18  ;;  %v430_v26 = vld [vmem:[%s1261_s23 + $0x30] sm:$0xff]  ;;  %v439_v28 = vunpack.c.h.bf16 %v426_v18  ;;  %s1309_s14 = scalar_lea.vmem %s1391_s5, %s1116_s11 }
  0x18   : > { %466 = vperm.xlu0 %1143, %v455_v4   ;;  %v434_v16 = vunpack.c.l.bf16 %v424_v14  ;;  %v435_v20 = vunpack.c.h.bf16 %v424_v14  ;;  %v440_v25 = vunpack.c.l.bf16 %v427_v19  ;;  %v431_v27 = vld [vmem:[%s1261_s23 + $0x38] sm:$0xff]  ;;  %v428_v31 = vld [vmem:[%s1261_s23 + $0x20] sm:$0xff]  ;;  %v441_v34 = vunpack.c.h.bf16 %v427_v19  ;;  %v429_v39 = vld [vmem:[%s1261_s23 + $0x28] sm:$0xff] }
  0x19   : > { %v446_v35 = vunpack.c.l.bf16 %v430_v26  ;;  %v447_v36 = vunpack.c.h.bf16 %v430_v26  ;;  %v448_v37 = vunpack.c.l.bf16 %v431_v27  ;;  %v449_v38 = vunpack.c.h.bf16 %v431_v27  ;;  %v432_v46 = vld [vmem:[%s1261_s23 + $0x40] sm:$0x11]  ;;  %v433_v51 = vld [vmem:[%s1261_s23 + $0x48] sm:$0x11] }
  0x1a   : > { %v442_v42 = vunpack.c.l.bf16 %v428_v31  ;;  %v443_v52 = vunpack.c.h.bf16 %v428_v31  ;;  %v444_v53 = vunpack.c.l.bf16 %v429_v39  ;;  %v445_v54 = vunpack.c.h.bf16 %v429_v39 }
  0x1b   : > { %476 = vperm.xlu1 %1144, %v457_v5   ;;  %v450_v59 = vunpack.c.l.bf16 %v432_v46  ;;  %v451_v63 = vunpack.c.h.bf16 %v432_v46  ;;  %v452_v1 = vunpack.c.l.bf16 %v433_v51  ;;  %v453_v2 = vunpack.c.h.bf16 %v433_v51 }
  0x1c   : > { %471 = vperm.xlu0 %1143, %v456_v6  }
  0x1f   : > { %526 = vperm.xlu1 %1144, %v507_v7  }
  0x20   : > { %521 = vperm.xlu0 %1143, %v506_v8  }
  0x23   : > { %531 = vperm.xlu1 %1144, %v508_v9  }
  0x24   : > { %481 = vperm.xlu0 %1143, %v458_v10  }
  0x27   : > { %594 = vperm.xlu1 %1144, %v589_v11  }
  0x28   : > { %604 = vperm.xlu0 %1143, %v591_v12  }
  0x2c   : > { %599 = vperm.xlu0 %1143, %v590_v13  }
  0x92   : > { %v512_v22 = vpop.permute.xlu1 %511 }
  0x93   : > { %v462_v23 = vpop.permute.xlu0 %461 }
  0x94   : > { %v484_v29 = vmul.f32 %v462_v23, %v434_v16  ;;  %v486_v30 = vmul.f32 %v462_v23, %v436_v17  ;;  %v485_v32 = vmul.f32 %v462_v23, %v435_v20  ;;  %v487_v33 = vmul.f32 %v462_v23, %v437_v21 }
  0x96   : > { %v517_v40 = vpop.permute.xlu1 %516  ;;  %v535_v43 = vadd.f32 %v512_v22, %v485_v32  ;;  %v537_v44 = vadd.f32 %v512_v22, %v487_v33  ;;  %v534_v45 = vadd.f32 %v512_v22, %v484_v29  ;;  %v536_v50 = vadd.f32 %v512_v22, %v486_v30 }
  0x97   : > { %v467_v41 = vpop.permute.xlu0 %466 }
  0x98   : > { %v488_v47 = vmul.f32 %v467_v41, %v438_v24  ;;  %v490_v48 = vmul.f32 %v467_v41, %v440_v25  ;;  %v489_v49 = vmul.f32 %v467_v41, %v439_v28  ;;  %v491_v55 = vmul.f32 %v467_v41, %v441_v34 }
  0x99   : > { %v555_v3 = vmax.f32 %v535_v43, 0.0  ;;  %v557_v4 = vmax.f32 %v537_v44, 0.0  ;;  %v554_v5 = vmax.f32 %v534_v45, 0.0  ;;  %v556_v6 = vmax.f32 %v536_v50, 0.0 }
  0x9a   : > { %v539_v56 = vadd.f32 %v517_v40, %v489_v49  ;;  %v538_v57 = vadd.f32 %v517_v40, %v488_v47  ;;  %v540_v58 = vadd.f32 %v517_v40, %v490_v48  ;;  %v477_v60 = vpop.permute.xlu1 %476  ;;  %v541_v62 = vadd.f32 %v517_v40, %v491_v55 }
  0x9b   : > { %v472_v61 = vpop.permute.xlu0 %471  ;;  %v496_v7 = vmul.f32 %v477_v60, %v446_v35  ;;  %v497_v8 = vmul.f32 %v477_v60, %v447_v36  ;;  %v498_v9 = vmul.f32 %v477_v60, %v448_v37  ;;  %v499_v10 = vmul.f32 %v477_v60, %v449_v38 }
  0x9c   : > { %v559_v11 = vmax.f32 %v539_v56, 0.0  ;;  %v561_v12 = vmax.f32 %v541_v62, 0.0  ;;  %v558_v13 = vmax.f32 %v538_v57, 0.0  ;;  %v560_v14 = vmax.f32 %v540_v58, 0.0 }
  0x9d   : > { %v492_v15 = vmul.f32 %v472_v61, %v442_v42  ;;  %v493_v16 = vmul.f32 %v472_v61, %v443_v52  ;;  %v494_v17 = vmul.f32 %v472_v61, %v444_v53  ;;  %v495_v18 = vmul.f32 %v472_v61, %v445_v54 }
  0x9e   : > { %v527_v19 = vpop.permute.xlu1 %526  ;;  %v575_v29 = vpack.c.bf16 %v559_v11, %v555_v3  ;;  %v577_v30 = vpack.c.bf16 %v561_v12, %v557_v4  ;;  %v574_v31 = vpack.c.bf16 %v558_v13, %v554_v5  ;;  %v576_v32 = vpack.c.bf16 %v560_v14, %v556_v6  ;;  %v1146_v3 = vld [vmem:[%s1255_s19 + $0x8] ss:$0 sps:$4 sm:$0x11]  }
  0x9f   : > { %v522_v20 = vpop.permute.xlu0 %521  ;;  %v546_v21 = vadd.f32 %v527_v19, %v496_v7  ;;  %v547_v22 = vadd.f32 %v527_v19, %v497_v8  ;;  %v548_v23 = vadd.f32 %v527_v19, %v498_v9  ;;  %v549_v24 = vadd.f32 %v527_v19, %v499_v10 }
  0xa0   : > { %v542_v25 = vadd.f32 %v522_v20, %v492_v15  ;;  %v543_v26 = vadd.f32 %v522_v20, %v493_v16  ;;  %v544_v27 = vadd.f32 %v522_v20, %v494_v17  ;;  %v545_v28 = vadd.f32 %v522_v20, %v495_v18  ;;  %635 = vmatprep.subr.bf16.mxu0 %v575_v29 }
  0xa1   : > { %v567_v35 = vmax.f32 %v547_v22, 0.0  ;;  %v569_v37 = vmax.f32 %v549_v24, 0.0  ;;  %686 = vmatprep.subr.bf16.mxu1 %v577_v30  ;;  %636 = vmatpush1.bf16.msra.mxu0 %v574_v31  ;;  %v566_v46 = vmax.f32 %v546_v21, 0.0  ;;  %v568_v49 = vmax.f32 %v548_v23, 0.0 }
  0xa2   : > { %v563_v34 = vmax.f32 %v543_v26, 0.0  ;;  %v565_v36 = vmax.f32 %v545_v28, 0.0  ;;  %v562_v41 = vmax.f32 %v542_v25, 0.0  ;;  %687 = vmatpush1.bf16.msra.mxu1 %v576_v32  ;;  %v532_v42 = vpop.permute.xlu1 %531  ;;  %v564_v48 = vmax.f32 %v544_v27, 0.0 }
  0xa3   : > { %v482_v33 = vpop.permute.xlu0 %481  ;;  %v1172_v4 = vmov 0.0  }
  0xa4   : > { %v500_v38 = vmul.f32 %v482_v33, %v450_v59  ;;  %v501_v39 = vmul.f32 %v482_v33, %v451_v63  ;;  %v502_v40 = vmul.f32 %v482_v33, %v452_v1  ;;  %v503_v43 = vmul.f32 %v482_v33, %v453_v2  ;;  %v1145_v1 = vld [vmem:[%s1255_s19] sm:$0xff]   ;;  %799 = vst.msk [vmem:[%s1285_s30] sm:$0xff] %vm798_vm2, %v1172_v4 }
  0xa5   : > { %v579_v44 = vpack.c.bf16 %v567_v35, %v563_v34  ;;  %v581_v45 = vpack.c.bf16 %v569_v37, %v565_v36  ;;  %v578_v52 = vpack.c.bf16 %v566_v46, %v562_v41  ;;  %v580_v54 = vpack.c.bf16 %v568_v49, %v564_v48  ;;  %800 = vst.msk [vmem:[%s1285_s30 + $0x8] sm:$0xff] %vm798_vm2, %v1172_v4 }
  0xa6   : > { %v551_v47 = vadd.f32 %v532_v42, %v501_v39  ;;  %v550_v50 = vadd.f32 %v532_v42, %v500_v38  ;;  %v553_v51 = vadd.f32 %v532_v42, %v503_v43  ;;  %v552_v53 = vadd.f32 %v532_v42, %v502_v40  ;;  %803 = vst.msk [vmem:[%s1291_s10] sm:$0xff] %vm798_vm2, %v1172_v4  ;;  %v595_v5 = vpop.permute.xlu1 %594 }
  0xa7   : > { %637 = vmatprep.subr.bf16.mxu0 %v579_v44  ;;  %688 = vmatprep.subr.bf16.mxu1 %v581_v45  ;;  %804 = vst.msk [vmem:[%s1291_s10 + $0x8] sm:$0xff] %vm798_vm2, %v1172_v4 }
  0xa8   : > { %v571_v55 = vmax.f32 %v551_v47, 0.0  ;;  %v570_v56 = vmax.f32 %v550_v50, 0.0  ;;  %638 = vmatpush1.bf16.msra.mxu0 %v578_v52  ;;  %v573_v57 = vmax.f32 %v553_v51, 0.0  ;;  %v572_v58 = vmax.f32 %v552_v53, 0.0  ;;  %689 = vmatpush1.bf16.msra.mxu1 %v580_v54  ;;  %v788_v54 = vld [vmem:[%s1309_s14 + $0x20] sm:$0x11] }
  0xa9   : > { %802 = vst.msk [vmem:[%s1285_s30 + $0x10] sm:$0x1] %vm801_vm9, %v1172_v4  ;;  %805 = vst.msk [vmem:[%s1291_s10 + $0x10] sm:$0x1] %vm801_vm9, %v1172_v4 }
  0xaa   : > { %v583_v59 = vpack.c.bf16 %v571_v55, %v571_v55  ;;  %v582_v60 = vpack.c.bf16 %v570_v56, %v570_v56  ;;  %v585_v61 = vpack.c.bf16 %v573_v57, %v573_v57  ;;  %v584_v62 = vpack.c.bf16 %v572_v58, %v572_v58 }
  0xac   : > { %1092 = vmatprep.subr.msk.bf16.mxu0 %vm622_vm0, %v583_v59  ;;  %v624_v63 = vsel %vm622_vm0, %v582_v60, 0  ;;  %1095 = vmatprep.subr.msk.bf16.mxu1 %vm622_vm0, %v585_v61  ;;  %v630_v2 = vsel %vm622_vm0, %v584_v62, 0 }
  0xad   : > { %640 = vmatpush1.bf16.msra.mxu0 %v624_v63  ;;  %691 = vmatpush1.bf16.msra.mxu1 %v630_v2  ;;  %v791_v63 = vld [vmem:[%s1309_s14 + $0x28] sm:$0x11] }
  0xae   : > { %v837_v35 = vld [vmem:[%s1291_s10 + $0x8] sm:$0xff] }
  0xb0   : > { %1093 = vmatmul.mubr.msk.bf16.vlgmr.msra.gmra.mrb[0].mxu0 %vm615_vm1, %v1145_v1  ;;  %1096 = vmatmul.mubr.msk.bf16.vlgmr.msra.gmra.mrb[0].mxu1 %vm615_vm1, %v1145_v1  ;;  %v808_v4 = vld [vmem:[%s1285_s30 + $0x10] sm:$0x1] }
  0xb1   : > { %677 = vmatprep.mubr.bf16.mxu0 %v1171_v0  ;;  %728 = vmatprep.mubr.bf16.mxu1 %v1171_v0  ;;  %v605_v0 = vpop.permute.xlu0 %604 }
  0xb5   : > { %v600_v6 = vpop.permute.xlu0 %599 }
  0xb8   : > { %1094 = vmatmul.mubr.msk.bf16.gmra.mrb[4].mxu0 %vm615_vm1, %v1146_v3  ;;  %1097 = vmatmul.mubr.msk.bf16.gmra.mrb[4].mxu1 %vm615_vm1, %v1146_v3 }
 0x183   : > { %v669_v7 = vpop.f32.mrb[0].mxu0  ;;  %v720_v9 = vpop.f32.mrb[0].mxu1 }
 0x184   : > { %v670_v8 = vadd.f32 %v669_v7, %v595_v5  ;;  %v671_v10 = vpop.f32.mrb[1].mxu0  ;;  %v721_v11 = vadd.f32 %v720_v9, %v595_v5  ;;  %v722_v13 = vpop.f32.mrb[1].mxu1 }
 0x185   : > { %v672_v12 = vadd.f32 %v671_v10, %v595_v5  ;;  %v673_v14 = vpop.f32.mrb[2].mxu0  ;;  %v723_v16 = vadd.f32 %v722_v13, %v595_v5  ;;  %v724_v18 = vpop.f32.mrb[2].mxu1 }
 0x186   : > { %v839_v15 = vmul.f32 %v670_v8, %v670_v8  ;;  %v674_v17 = vadd.f32 %v673_v14, %v600_v6  ;;  %v675_v19 = vpop.f32.mrb[3].mxu0  ;;  %v726_v23 = vpop.f32.mrb[3].mxu1  ;;  %v725_v26 = vadd.f32 %v724_v18, %v600_v6  ;;  %v841_v28 = vmul.f32 %v721_v11, %v721_v11 }
 0x187   : > { %v1106_v20 = vpack.c.bf16 %v672_v12, %v670_v8  ;;  %v809_v21 = vadd.f32 %v672_v12, %v670_v8  ;;  %v840_v22 = vmul.f32 %v672_v12, %v672_v12  ;;  %v1107_v24 = vpack.c.bf16 %v723_v16, %v721_v11 }
 0x188   : > { %v843_v25 = vmul.f32 %v674_v17, %v674_v17  ;;  %v676_v27 = vadd.f32 %v675_v19, %v600_v6  ;;  %v727_v29 = vadd.f32 %v726_v23, %v600_v6  ;;  %v842_v40 = vmul.f32 %v723_v16, %v723_v16 }
 0x189   : > { %777 = vst [vmem:[%s1309_s14] sm:$0xff] %v1106_v20  ;;  %v810_v30 = vadd.f32 %v809_v21, %v721_v11  ;;  %v851_v31 = vadd.f32 %v840_v22, %v839_v15  ;;  %778 = vst [vmem:[%s1309_s14 + $0x8] sm:$0xff] %v1107_v24  ;;  %v845_v2 = vmul.f32 %v725_v26, %v725_v26  ;;  %v806_v22 = vld [vmem:[%s1285_s30] sm:$0xff] }
 0x18a   : > { %v1108_v32 = vpack.c.bf16 %v676_v27, %v674_v17  ;;  %v814_v33 = vadd.f32 %v676_v27, %v674_v17  ;;  %v844_v34 = vmul.f32 %v676_v27, %v676_v27  ;;  %v1109_v36 = vpack.c.bf16 %v727_v29, %v725_v26 }
 0x18b   : > { %v679_v37 = vpop.f32.mrb[4].mxu0  ;;  %v811_v39 = vadd.f32 %v810_v30, %v723_v16  ;;  %v852_v41 = vadd.f32 %v851_v31, %v841_v28  ;;  %v730_v43 = vpop.f32.mrb[4].mxu1  ;;  %v846_v15 = vmul.f32 %v727_v29, %v727_v29 }
 0x18c   : > { %779 = vst [vmem:[%s1309_s14 + $0x10] sm:$0xff] %v1108_v32  ;;  %v680_v42 = vadd.f32 %v679_v37, %v605_v0  ;;  %v681_v44 = vpop.f32.mrb[5].mxu0  ;;  %v815_v45 = vadd.f32 %v814_v33, %v725_v26  ;;  %v856_v46 = vadd.f32 %v844_v34, %v843_v25  ;;  %780 = vst [vmem:[%s1309_s14 + $0x18] sm:$0xff] %v1109_v36  ;;  %v732_v49 = vpop.f32.mrb[5].mxu1  ;;  %v807_v25 = vld [vmem:[%s1285_s30 + $0x8] sm:$0xff]  ;;  %v836_v26 = vld [vmem:[%s1291_s10] sm:$0xff] }
 0x18d   : > { %v731_v47 = vadd.f32 %v730_v43, %v605_v0  ;;  %v682_v48 = vadd.f32 %v681_v44, %v605_v0  ;;  %v683_v50 = vpop.f32.mrb[6].mxu0  ;;  %812 = vadd.xlane.f32.xlu1 %v811_v39  ;;  %v853_v51 = vadd.f32 %v852_v41, %v842_v40  ;;  %v733_v55 = vadd.f32 %v732_v49, %v605_v0  ;;  %v734_v56 = vpop.f32.mrb[6].mxu1  ;;  %v838_v32 = vld [vmem:[%s1291_s10 + $0x10] sm:$0x1] }
 0x18e   : > { %v819_v52 = vsel %vm622_vm0, %v680_v42, 0.0  ;;  %v847_v53 = vmul.f32 %v680_v42, %v680_v42  ;;  %v684_v57 = vpop.f32.mrb[7].mxu0  ;;  %v816_v58 = vadd.f32 %v815_v45, %v727_v29  ;;  %v735_v1 = vpop.f32.mrb[7].mxu1  ;;  %v857_v16 = vadd.f32 %v856_v46, %v845_v2 }
 0x18f   : > { %v849_v59 = vmul.f32 %v731_v47, %v731_v47  ;;  %v1110_v60 = vpack.c.bf16 %v682_v48, %v680_v42  ;;  %v820_v61 = vsel %vm622_vm0, %v682_v48, 0.0  ;;  %v848_v62 = vmul.f32 %v682_v48, %v682_v48 }
 0x190   : > { %v1111_v3 = vpack.c.bf16 %v733_v55, %v731_v47  ;;  %817 = vadd.xlane.f32.xlu0 %v816_v58  ;;  %v821_v5 = vadd.f32 %v820_v61, %v819_v52  ;;  %v822_v6 = vsel %vm622_vm0, %v731_v47, 0.0  ;;  %v850_v7 = vmul.f32 %v733_v55, %v733_v55 }
 0x191   : > { %v789_v0 = vsel %vm787_vm8, %v1110_v60, %v788_v54  ;;  %854 = vadd.xlane.f32.xlu1 %v853_v51  ;;  %v861_v8 = vsel %vm622_vm0, %v847_v53, 0.0  ;;  %v862_v9 = vsel %vm622_vm0, %v848_v62, 0.0  ;;  %v824_v13 = vsel %vm622_vm0, %v733_v55, 0.0 }
 0x192   : > { %790 = vst [vmem:[%s1309_s14 + $0x20] sm:$0x11] %v789_v0  ;;  %v792_v10 = vsel %vm787_vm8, %v1111_v3, %v791_v63  ;;  %v823_v11 = vadd.f32 %v822_v6, %v821_v5  ;;  %v863_v12 = vadd.f32 %v862_v9, %v861_v8  ;;  %v864_v14 = vsel %vm622_vm0, %v849_v59, 0.0 }
 0x193   : > { %793 = vst [vmem:[%s1309_s14 + $0x28] sm:$0x11] %v792_v10  ;;  %v866_v19 = vsel %vm622_vm0, %v850_v7, 0.0  ;;  %v858_v20 = vadd.f32 %v857_v16, %v846_v15 }
 0x194   : > { %v825_v17 = vadd.f32 %v824_v13, %v823_v11  ;;  %v865_v18 = vadd.f32 %v864_v14, %v863_v12 }
 0x196   : > { %826 = vadd.xlane.f32.xlu0 %v825_v17  ;;  %v867_v21 = vadd.f32 %v866_v19, %v865_v18 }
 0x198   : > { %868 = vadd.xlane.f32.xlu1 %v867_v21 }
 0x19a   : > { %859 = vadd.xlane.f32.xlu0 %v858_v20 }
 0x21a   : > { %v813_v23 = vpop.xlane.xlu1 %812 }
 0x21b   : > { %v828_v24 = vadd.f32 %v813_v23, %v806_v22 }
 0x21d   : > { %832 = vst.msk [vmem:[%s1285_s30] sm:$0xff] %vm798_vm2, %v828_v24  ;;  %v818_v27 = vpop.xlane.xlu0 %817 }
 0x21e   : > { %v829_v28 = vadd.f32 %v818_v27, %v807_v25  ;;  %v855_v29 = vpop.xlane.xlu1 %854 }
 0x21f   : > { %v870_v30 = vadd.f32 %v855_v29, %v836_v26 }
 0x220   : > { %833 = vst.msk [vmem:[%s1285_s30 + $0x8] sm:$0xff] %vm798_vm2, %v829_v28 }
 0x221   : > { %873 = vst.msk [vmem:[%s1291_s10] sm:$0xff] %vm798_vm2, %v870_v30 }
 0x223   : > { %v827_v31 = vpop.xlane.xlu0 %826 }
 0x224   : > { %v830_v33 = vadd.f32 %v827_v31, %v808_v4 }
 0x225   : > { %v869_v34 = vpop.xlane.xlu1 %868 }
 0x226   : > { %835 = vst.msk [vmem:[%s1285_s30 + $0x10] sm:$0x1] %vm801_vm9, %v830_v33  ;;  %v872_v36 = vadd.f32 %v869_v34, %v838_v32 }
 0x227   : > { %v860_v37 = vpop.xlane.xlu0 %859 }
 0x228   : > { %875 = vst.msk [vmem:[%s1291_s10 + $0x10] sm:$0x1] %vm801_vm9, %v872_v36  ;;  %v871_v38 = vadd.f32 %v860_v37, %v837_v35 }
 0x22a   : > { %874 = vst.msk [vmem:[%s1291_s10 + $0x8] sm:$0xff] %vm798_vm2, %v871_v38 }
 0x22b PF: > { %s18_s26 = sadd.s32 1, %s1169_s26   ;;  %s1398_s24 = smov %s1165_s25 }
 0x22c   : > { %p15_p5 = scmp.ge.s32.totalorder %s18_s26, 4   ;;  %s1399_s25 = smov %s1401_s27 }
 0x22e   :  { %17 = sbr.rel (!%p15_p5) target bundleno = 2 (0x2), region = 110 }

// kernel: ae_pointnet_dcg_forward.22
= control target key start
LH: loop header
LB: loop body
LE: loop exit
PB: predicated region body
PF: predicated region fallthrough
CT: control target
= control target key end

     0   :  { %s733_s18 = smov 0   ;;  %s735_s19 = smov 0   ;;  %s788_s0 = inlined_call_operand.vmem [shape: bf16[2,8,512], index: 0, kind: input, shape index: {}]   ;;  %s789_s1 = inlined_call_operand.vmem [shape: f32[2,8,1], index: 1, kind: input, shape index: {}]   ;;  %s790_s2 = inlined_call_operand.vmem [shape: f32[2,8,1], index: 2, kind: input, shape index: {}]   ;;  %s791_s3 = inlined_call_operand.vmem [shape: bf16[2,3,8], index: 3, kind: input, shape index: {}]   ;;  %s792_s4 = inlined_call_operand.vmem [shape: f32[2,3,1], index: 4, kind: input, shape index: {}]   ;;  %s793_s5 = inlined_call_operand.vmem [shape: f32[2,3,512], index: 5, kind: output, shape index: {}]  }
   0x1   :  { %s737_s20 = smov 0  }
   0x2 LB: > { %s27_s21 = sadd.s32 1, %s696_s19  ;;  %p626_p0 = scmp.ge.s32.totalorder %s700_s20, 1  ;;  %s700_s20 = sphi %s737_s20, %s15_s20   ;;  %s696_s19 = sphi %s735_s19, %s795_s19   ;;  %s692_s18 = sphi %s733_s18, %s794_s18  }
   0x3   : > { %p29_p1 = scmp.ge.s32.totalorder %s27_s21, 2  ;;  %p244_p2 = scmp.lt.s32.totalorder %s700_s20, 3 }
   0x5   : > { %s797_s21 = smov (%p29_p1, %s27_s21), 0  ;;  %p245_p3 = pnand %p626_p0, %p244_p2 }
   0x6   : > { %p297_p4 = scmp.lt.s32.totalorder (!%p245_p3), %s692_s18, 1  ;;  %v702_v0 = vmov (!%p245_p3), 0   ;;  %vm378_vm0 = vcmask (!%p245_p3), 1043456   ;;  %vm374_vm1 = vcmask (!%p245_p3), 64512  }
   0x7   : > { %248 = sbr.rel (%p245_p3) target bundleno = 391 (0x187), region = 40  ;;  %668 = vset.pattern.permute.xlu0 (!%p245_p3), %v702_v0  ;;  %423 = vmatprep.mubr.bf16.mxu0 (!%p245_p3), %v702_v0 }
   0x8   : > { %464 = vmatprep.mubr.bf16.mxu1 (!%p245_p3), %v702_v0  ;;  %669 = vset.pattern.permute.xlu1 (!%p245_p3), %v702_v0 }
   0xe   : > { %s799_s18 = smov (!%p297_p4, %s692_s18), 1 }
   0xf   : > { %s629_s22 = sshll.u32 %s799_s18, 3  ;;  %s632_s29 = sshll.u32 %s799_s18, 2 }
  0x10   : > { %s309_s25 = scalar_lea.vmem %s789_s1, %s629_s22  ;;  %s313_s28 = scalar_lea.vmem %s790_s2, %s629_s22 }
  0x11   : > { %v339_v1 = vld [vmem:[%s309_s25] sm:$0xff]  ;;  %s321_s7 = scalar_lea.vmem %s792_s4, %s632_s29  ;;  %s641_s8 = sshll.u32 %s799_s18, 4 }
  0x12   : > { %342 = vperm.xlu0 %668, %v339_v1   ;;  %v349_v2 = vld [vmem:[%s313_s28] sm:$0xff]  ;;  %s304_s11 = scalar_lea.vmem %s788_s0, %s641_s8  ;;  %s631_s12 = sshll.u32 %s799_s18, 1 }
  0x13   : > { %v368_v3 = vld [vmem:[%s321_s7] sm:$0x7]  ;;  %v334_v5 = vld [vmem:[%s304_s11 + $0x8] sm:$0xff]  ;;  %s317_s15 = scalar_lea.vmem %s791_s3, %s631_s12  ;;  %s330_s22 = scalar_lea.vmem %s793_s5, %s641_s8 }
  0x14   : > { %371 = vperm.xlu1 %669, %v368_v3   ;;  %v333_v4 = vld [vmem:[%s304_s11] sm:$0xff]  ;;  %v338_v7 = vunpack.c.h.bf16 %v334_v5  ;;  %v337_v9 = vunpack.c.l.bf16 %v334_v5 }
  0x15   : > { %v336_v6 = vunpack.c.h.bf16 %v333_v4  ;;  %v335_v8 = vunpack.c.l.bf16 %v333_v4  ;;  %v367_v30 = vld [vmem:[%s317_s15] sm:$0x3] }
  0x16   : > { %352 = vperm.xlu0 %668, %v349_v2  }
  0x91   : > { %v343_v10 = vpop.permute.xlu0 %342 }
  0x92   : > { %v346_v11 = vmul.f32 %v343_v10, %v336_v6  ;;  %v348_v12 = vmul.f32 %v343_v10, %v338_v7  ;;  %v345_v13 = vmul.f32 %v343_v10, %v335_v8  ;;  %v347_v14 = vmul.f32 %v343_v10, %v337_v9 }
  0x93   : > { %v372_v31 = vpop.permute.xlu1 %371 }
  0x95   : > { %v353_v15 = vpop.permute.xlu0 %352 }
  0x96   : > { %v356_v16 = vadd.f32 %v353_v15, %v346_v11  ;;  %v358_v17 = vadd.f32 %v353_v15, %v348_v12  ;;  %v355_v18 = vadd.f32 %v353_v15, %v345_v13  ;;  %v357_v19 = vadd.f32 %v353_v15, %v347_v14 }
  0x98   : > { %v360_v20 = vmax.f32 %v356_v16, 0.0  ;;  %v362_v21 = vmax.f32 %v358_v17, 0.0  ;;  %v359_v22 = vmax.f32 %v355_v18, 0.0  ;;  %v361_v23 = vmax.f32 %v357_v19, 0.0 }
  0x9a   : > { %v364_v24 = vpack.c.bf16 %v360_v20, %v360_v20  ;;  %v366_v25 = vpack.c.bf16 %v362_v21, %v362_v21  ;;  %v363_v26 = vpack.c.bf16 %v359_v22, %v359_v22  ;;  %v365_v27 = vpack.c.bf16 %v361_v23, %v361_v23 }
  0x9c   : > { %635 = vmatprep.subr.msk.bf16.mxu0 %vm378_vm0, %v364_v24  ;;  %637 = vmatprep.subr.msk.bf16.mxu1 %vm378_vm0, %v366_v25  ;;  %v380_v28 = vsel %vm378_vm0, %v363_v26, 0  ;;  %v386_v29 = vsel %vm378_vm0, %v365_v27, 0 }
  0x9d   : > { %392 = vmatpush1.bf16.msra.mxu0 %v380_v28  ;;  %433 = vmatpush1.bf16.msra.mxu1 %v386_v29 }
  0xa0   : > { %636 = vmatmul.mubr.msk.bf16.vlgmr.msra.gmra.mrb[0].mxu0 %vm374_vm1, %v367_v30  ;;  %638 = vmatmul.mubr.msk.bf16.vlgmr.msra.gmra.mrb[0].mxu1 %vm374_vm1, %v367_v30 }
 0x173   : > { %v425_v32 = vpop.f32.mrb[0].mxu0  ;;  %v466_v33 = vpop.f32.mrb[0].mxu1 }
 0x174   : > { %v426_v34 = vadd.f32 %v425_v32, %v372_v31  ;;  %v467_v35 = vadd.f32 %v466_v33, %v372_v31  ;;  %v427_v36 = vpop.f32.mrb[1].mxu0  ;;  %v468_v37 = vpop.f32.mrb[1].mxu1 }
 0x175   : > { %v428_v38 = vadd.f32 %v427_v36, %v372_v31  ;;  %v469_v39 = vadd.f32 %v468_v37, %v372_v31  ;;  %v429_v40 = vpop.f32.mrb[2].mxu0  ;;  %v470_v41 = vpop.f32.mrb[2].mxu1 }
 0x176   : > { %670 = vtanh.f32 %v426_v34  ;;  %v430_v42 = vpop.f32.mrb[3].mxu0  ;;  %v471_v43 = vpop.f32.mrb[3].mxu1 }
 0x177   : > { %672 = vtanh.f32 %v467_v35 }
 0x178   : > { %674 = vtanh.f32 %v428_v38 }
 0x179   : > { %676 = vtanh.f32 %v469_v39 }
 0x180   : > { %v671_v44 = vpop.eup %670 }
 0x181   : > { %v673_v45 = vpop.eup %672 }
 0x182   : > { %v675_v46 = vpop.eup %674 }
 0x183   : > { %v677_v47 = vpop.eup %676  ;;  %v481_v48 = vcombine.low %v671_v44, %v675_v46 }
 0x184   : > { %v482_v49 = vcombine.low %v673_v45, %v677_v47 }
 0x185   : > { %485 = vst [vmem:[%s330_s22] sm:$0x77] %v481_v48 }
 0x186   : > { %486 = vst [vmem:[%s330_s22 + $0x8] sm:$0x77] %v482_v49 }
 0x187 PF: > { %s15_s20 = sadd.s32 1, %s700_s20   ;;  %s794_s18 = smov %s696_s19 }
 0x188   : > { %p12_p5 = scmp.ge.s32.totalorder %s15_s20, 4   ;;  %s795_s19 = smov %s797_s21 }
 0x18a   :  { %14 = sbr.rel (!%p12_p5) target bundleno = 2 (0x2), region = 82 }

// kernel: ae_pointnet_dcg_forward.23
= control target key start
LH: loop header
LB: loop body
LE: loop exit
PB: predicated region body
PF: predicated region fallthrough
CT: control target
= control target key end

     0   :  { %s1069_s12 = smov 0   ;;  %s1071_s13 = smov 0   ;;  %s1266_s0 = inlined_call_operand.vmem [shape: f32[3,1024], index: 0, kind: input, shape index: {}]   ;;  %s1267_s1 = inlined_call_operand.vmem [shape: bf16[84,3], index: 1, kind: input, shape index: {}]   ;;  %s1268_s2 = inlined_call_operand.vmem [shape: f32[84,1], index: 2, kind: input, shape index: {}]   ;;  %s1269_s3 = inlined_call_operand.vmem [shape: bf16[84,1024], index: 3, kind: output, shape index: {}]  }
   0x1   :  { %s1073_s14 = smov 0  }
   0x2 LB: > { %s1082_s15 = sadd.s32 4294967295, %s1045_s14   ;;  %s1084_s16 = sadd.s32 1, %s1045_s14   ;;  %s1045_s14 = sphi %s1073_s14, %s1273_s14   ;;  %s1041_s13 = sphi %s1071_s13, %s1272_s13   ;;  %s1037_s12 = sphi %s1069_s12, %s1271_s12  }
   0x3   : > { %s85_s17 = ssub.s32 %s1045_s14, %s1084_s16  ;;  %s88_s18 = sadd.s32 1, %s1041_s13 }
   0x4   : > { %p86_p0 = scmp.eq.s32.totalorder %s85_s17, 0  ;;  %p98_p1 = scmp.ne.s32.totalorder %s1041_s13, %s1037_s12 }
   0x5   : > { %p99_p2 = scmp.eq.s32.totalorder %s1082_s15, 1  ;;  %p828_p3 = scmp.ge.s32.totalorder %s1045_s14, 1 }
   0x6   : > { %s1092_s19 = scalar_select %p86_p0, %s1041_s13, %s88_s18  }
   0x7   : > { %p1094_p4 = por %p99_p2, %p98_p1  ;;  %p138_p5 = scmp.lt.s32.totalorder %s1045_s14, 3 }
   0x9   : > { %p139_p6 = pnand %p828_p3, %p138_p5 }
   0xa   : > { %s829_s21 = sshll.u32 (!%p139_p6), %s1082_s15, 2  ;;  %vm305_vm0 = vcmask (!%p139_p6), 1040384   ;;  %v1047_v0 = vmov (!%p139_p6), 0   ;;  %vm306_vm1 = vcmask (!%p139_p6), 1041408   ;;  %v1048_v1 = vmov (!%p139_p6), 65535   ;;  %v192_v6 = vld [vmem:[%s1268_s2] sm:$0xff] (!%p139_p6) }
   0xb   : > { %142 = sbr.rel (%p139_p6) target bundleno = 314 (0x13a), region = 32  ;;  %p162_p7 = scmp.lt.s32.totalorder (!%p139_p6), %s829_s21, 7  ;;  %353 = vmatprep.mubr.bf16.mxu0 (!%p139_p6), %v1047_v0  ;;  %444 = vmatprep.mubr.bf16.mxu1 (!%p139_p6), %v1047_v0  ;;  %v307_v2 = vsel (!%p139_p6), %vm305_vm0, 4294967295, %v1048_v1  ;;  %v194_v11 = vld [vmem:[%s1268_s2 + $0x10] sm:$0xff] (!%p139_p6)  ;;  %v193_v12 = vld [vmem:[%s1268_s2 + $0x8] sm:$0xff] (!%p139_p6)  ;;  %v195_v15 = vld [vmem:[%s1268_s2 + $0x18] sm:$0xff] (!%p139_p6) }
   0xc   : > { %925 = vset.pattern.permute.xlu0 (!%p139_p6), %v1047_v0  ;;  %926 = vset.pattern.permute.xlu1 (!%p139_p6), %v1047_v0  ;;  %v308_v4 = vsel (!%p139_p6), %vm306_vm1, %v307_v2, 0  ;;  %v196_v20 = vld [vmem:[%s1268_s2 + $0x20] sm:$0xff] (!%p139_p6)  ;;  %v197_v22 = vld [vmem:[%s1268_s2 + $0x28] sm:$0xff] (!%p139_p6)  ;;  %vm286_vm2 = vcmask (!%p139_p6), 23552   ;;  %v198_v23 = vld [vmem:[%s1268_s2 + $0x30] sm:$0xff] (!%p139_p6)  ;;  %s158_s14 = sand.u32 (!%p139_p6), 1, %s1037_s12  }
   0xd   : > { %205 = vperm.xlu0 (!%p139_p6), %925, %v192_v6   ;;  %215 = vperm.xlu1 (!%p139_p6), %926, %v194_v11   ;;  %v929_v21 = vld [vmem:[%s1267_s1] sm:$0xff] (!%p139_p6)   ;;  %v199_v24 = vld [vmem:[%s1268_s2 + $0x38] sm:$0xff] (!%p139_p6)  ;;  %v930_v26 = vld [vmem:[%s1267_s1 + $0x8] sm:$0xff] (!%p139_p6)   ;;  %s898_s17 = smul.u32 (!%p139_p6), 176, %s158_s14 }
   0xe   : > { %v200_v25 = vld [vmem:[%s1268_s2 + $0x40] sm:$0xff] (!%p139_p6)  ;;  %v201_v27 = vld [vmem:[%s1268_s2 + $0x48] sm:$0xff] (!%p139_p6)  ;;  %v202_v28 = vld [vmem:[%s1268_s2 + $0x50] sm:$0xf] (!%p139_p6) }
   0xf   : > { %v931_v29 = vld [vmem:[%s1267_s1 + $0x10] sm:$0xff] (!%p139_p6)   ;;  %v932_v30 = vld [vmem:[%s1267_s1 + $0x18] sm:$0xff] (!%p139_p6)   ;;  %v933_v31 = vld [vmem:[%s1267_s1 + $0x20] sm:$0xff] (!%p139_p6)   ;;  %s1180_s12 = scalar_lea.vmem (!%p139_p6), [#allocation2], %s898_s17 }
  0x10   : > { %v934_v32 = vld [vmem:[%s1267_s1 + $0x28] ss:$0 sps:$4 sm:$0x33] (!%p139_p6)  }
  0x11   : > { %210 = vperm.xlu0 (!%p139_p6), %925, %v193_v12   ;;  %220 = vperm.xlu1 (!%p139_p6), %926, %v195_v15  }
  0x12   : > { %s1275_s21 = smov (!%p162_p7, %s829_s21), 7  ;;  %s897_s18 = sshll.u32 (%p1094_p4), %s1082_s15, 4 }
  0x13   : > { %s830_s22 = sshll.u32 %s1275_s21, 2  ;;  %s1213_s23 = scalar_lea.vmem (%p1094_p4), %s1269_s3, %s897_s18 }
  0x14   : > { %s165_s25 = scalar_lea.vmem %s1266_s0, %s830_s22 }
  0x15   : > { %v169_v3 = vld [vmem:[%s165_s25] sm:$0x77]  ;;  %v170_v5 = vld [vmem:[%s165_s25 + $0x8] sm:$0x77]  ;;  %225 = vperm.xlu0 %925, %v196_v20   ;;  %230 = vperm.xlu1 %926, %v197_v22  }
  0x16   : > { %v184_v7 = vcombine.high %v169_v3, %v169_v3  ;;  %v185_v8 = vcombine.high %v170_v5, %v170_v5  ;;  %v188_v9 = vpack.c.bf16 %v169_v3, %v169_v3  ;;  %v190_v10 = vpack.c.bf16 %v170_v5, %v170_v5 }
  0x18   : > { %v189_v13 = vpack.c.bf16 %v184_v7, %v184_v7  ;;  %v191_v14 = vpack.c.bf16 %v185_v8, %v185_v8  ;;  %v310_v16 = vand.u32 %v308_v4, %v188_v9  ;;  %v316_v17 = vand.u32 %v308_v4, %v190_v10 }
  0x19   : > { %235 = vperm.xlu0 %925, %v198_v23   ;;  %240 = vperm.xlu1 %926, %v199_v24  }
  0x1a   : > { %v313_v18 = vand.u32 %v308_v4, %v189_v13  ;;  %v319_v19 = vand.u32 %v308_v4, %v191_v14 }
  0x1c   : > { %321 = vmatprep.subr.bf16.mxu0 %v313_v18  ;;  %412 = vmatprep.subr.bf16.mxu1 %v319_v19 }
  0x1d   : > { %322 = vmatpush1.bf16.msra.mxu0 %v310_v16  ;;  %413 = vmatpush1.bf16.msra.mxu1 %v316_v17 }
  0x1e   : > { %245 = vperm.xlu0 %925, %v200_v25   ;;  %250 = vperm.xlu1 %926, %v201_v27  }
  0x20   : > { %837 = vmatmul.mubr.msk.bf16.vlgmr.msra.gmra.mrb[0].mxu0 %vm286_vm2, %v929_v21  ;;  %843 = vmatmul.mubr.msk.bf16.vlgmr.msra.gmra.mrb[0].mxu1 %vm286_vm2, %v929_v21 }
  0x21   : > { %363 = vmatprep.mubr.bf16.mxu0 %v1047_v0  ;;  %454 = vmatprep.mubr.bf16.mxu1 %v1047_v0 }
  0x22   : > { %255 = vperm.xlu0 %925, %v202_v28  }
  0x28   : > { %838 = vmatmul.mubr.msk.bf16.gmra.mrb[4].mxu0 %vm286_vm2, %v930_v26  ;;  %844 = vmatmul.mubr.msk.bf16.gmra.mrb[4].mxu1 %vm286_vm2, %v930_v26 }
  0x29   : > { %373 = vmatprep.mubr.bf16.mxu0 %v1047_v0  ;;  %464 = vmatprep.mubr.bf16.mxu1 %v1047_v0 }
  0x30   : > { %839 = vmatmul.mubr.msk.bf16.gmra.mrb[8].mxu0 %vm286_vm2, %v931_v29  ;;  %845 = vmatmul.mubr.msk.bf16.gmra.mrb[8].mxu1 %vm286_vm2, %v931_v29 }
  0x31   : > { %383 = vmatprep.mubr.bf16.mxu0 %v1047_v0  ;;  %474 = vmatprep.mubr.bf16.mxu1 %v1047_v0 }
  0x38   : > { %840 = vmatmul.mubr.msk.bf16.gmra.mrb[12].mxu0 %vm286_vm2, %v932_v30  ;;  %846 = vmatmul.mubr.msk.bf16.gmra.mrb[12].mxu1 %vm286_vm2, %v932_v30 }
  0x39   : > { %393 = vmatprep.mubr.bf16.mxu0 %v1047_v0  ;;  %484 = vmatprep.mubr.bf16.mxu1 %v1047_v0 }
  0x40   : > { %841 = vmatmul.mubr.msk.bf16.gmra.mrb[16].mxu0 %vm286_vm2, %v933_v31  ;;  %847 = vmatmul.mubr.msk.bf16.gmra.mrb[16].mxu1 %vm286_vm2, %v933_v31 }
  0x41   : > { %403 = vmatprep.mubr.bf16.mxu0 %v1047_v0  ;;  %494 = vmatprep.mubr.bf16.mxu1 %v1047_v0 }
  0x48   : > { %842 = vmatmul.mubr.msk.bf16.gmra.mrb[20].mxu0 %vm286_vm2, %v934_v32  ;;  %848 = vmatmul.mubr.msk.bf16.gmra.mrb[20].mxu1 %vm286_vm2, %v934_v32 }
  0x8c   : > { %v206_v33 = vpop.permute.xlu0 %205  ;;  %v216_v35 = vpop.permute.xlu1 %215 }
  0x90   : > { %v211_v34 = vpop.permute.xlu0 %210  ;;  %v221_v52 = vpop.permute.xlu1 %220 }
  0x94   : > { %v226_v8 = vpop.permute.xlu0 %225  ;;  %v231_v9 = vpop.permute.xlu1 %230 }
  0xf3   : > { %v355_v36 = vpop.f32.mrb[0].mxu0  ;;  %v446_v37 = vpop.f32.mrb[0].mxu1 }
  0xf4   : > { %v356_v38 = vadd.f32 %v355_v36, %v206_v33  ;;  %v447_v39 = vadd.f32 %v446_v37, %v206_v33  ;;  %v357_v40 = vpop.f32.mrb[1].mxu0  ;;  %v448_v41 = vpop.f32.mrb[1].mxu1 }
  0xf5   : > { %v358_v42 = vadd.f32 %v357_v40, %v206_v33  ;;  %v449_v43 = vadd.f32 %v448_v41, %v206_v33  ;;  %v359_v44 = vpop.f32.mrb[2].mxu0  ;;  %v450_v45 = vpop.f32.mrb[2].mxu1 }
  0xf6   : > { %935 = vtanh.f32 %v356_v38  ;;  %v360_v46 = vadd.f32 %v359_v44, %v211_v34  ;;  %v361_v47 = vpop.f32.mrb[3].mxu0  ;;  %v452_v48 = vpop.f32.mrb[3].mxu1  ;;  %v451_v49 = vadd.f32 %v450_v45, %v211_v34 }
  0xf7   : > { %937 = vtanh.f32 %v447_v39  ;;  %v362_v50 = vadd.f32 %v361_v47, %v211_v34  ;;  %v453_v51 = vadd.f32 %v452_v48, %v211_v34  ;;  %v236_v38 = vpop.permute.xlu0 %235  ;;  %v241_v39 = vpop.permute.xlu1 %240 }
  0xf8   : > { %939 = vtanh.f32 %v358_v42 }
  0xf9   : > { %941 = vtanh.f32 %v449_v43 }
  0xfa   : > { %943 = vtanh.f32 %v360_v46 }
  0xfb   : > { %945 = vtanh.f32 %v451_v49  ;;  %v365_v53 = vpop.f32.mrb[4].mxu0  ;;  %v456_v54 = vpop.f32.mrb[4].mxu1 }
  0xfc   : > { %947 = vtanh.f32 %v362_v50  ;;  %v366_v55 = vadd.f32 %v365_v53, %v216_v35  ;;  %v457_v56 = vadd.f32 %v456_v54, %v216_v35  ;;  %v367_v57 = vpop.f32.mrb[5].mxu0  ;;  %v458_v58 = vpop.f32.mrb[5].mxu1 }
  0xfd   : > { %949 = vtanh.f32 %v453_v51  ;;  %v368_v59 = vadd.f32 %v367_v57, %v216_v35  ;;  %v459_v60 = vadd.f32 %v458_v58, %v216_v35  ;;  %v369_v61 = vpop.f32.mrb[6].mxu0  ;;  %v460_v62 = vpop.f32.mrb[6].mxu1 }
  0xfe   : > { %951 = vtanh.f32 %v366_v55  ;;  %v370_v63 = vadd.f32 %v369_v61, %v221_v52  ;;  %v371_v0 = vpop.f32.mrb[7].mxu0  ;;  %v462_v1 = vpop.f32.mrb[7].mxu1  ;;  %v461_v2 = vadd.f32 %v460_v62, %v221_v52 }
  0xff   : > { %953 = vtanh.f32 %v457_v56  ;;  %v372_v4 = vadd.f32 %v371_v0, %v221_v52  ;;  %v463_v6 = vadd.f32 %v462_v1, %v221_v52 }
 0x100   : > { %v936_v3 = vpop.eup %935  ;;  %955 = vtanh.f32 %v368_v59 }
 0x101   : > { %v938_v5 = vpop.eup %937  ;;  %957 = vtanh.f32 %v459_v60 }
 0x102   : > { %v940_v7 = vpop.eup %939  ;;  %959 = vtanh.f32 %v370_v63 }
 0x103   : > { %v942_v10 = vpop.eup %941  ;;  %v875_v11 = vpack.c.bf16 %v940_v7, %v936_v3  ;;  %961 = vtanh.f32 %v461_v2  ;;  %v375_v12 = vpop.f32.mrb[8].mxu0 }
 0x104   : > { %v466_v13 = vpop.f32.mrb[8].mxu1  ;;  %v944_v14 = vpop.eup %943  ;;  %v876_v15 = vpack.c.bf16 %v942_v10, %v938_v5  ;;  %963 = vtanh.f32 %v372_v4  ;;  %v376_v16 = vadd.f32 %v375_v12, %v226_v8 }
 0x105   : > { %v467_v17 = vadd.f32 %v466_v13, %v226_v8  ;;  %v377_v18 = vpop.f32.mrb[9].mxu0  ;;  %v468_v19 = vpop.f32.mrb[9].mxu1  ;;  %683 = vst [vmem:[%s1180_s12] sm:$0xff] %v875_v11  ;;  %965 = vtanh.f32 %v463_v6 }
 0x106   : > { %v946_v20 = vpop.eup %945  ;;  %v378_v21 = vadd.f32 %v377_v18, %v226_v8  ;;  %v469_v22 = vadd.f32 %v468_v19, %v226_v8  ;;  %v379_v23 = vpop.f32.mrb[10].mxu0  ;;  %684 = vst [vmem:[%s1180_s12 + $0x8] sm:$0xff] %v876_v15  ;;  %967 = vtanh.f32 %v376_v16 }
 0x107   : > { %v470_v24 = vpop.f32.mrb[10].mxu1  ;;  %v948_v25 = vpop.eup %947  ;;  %v380_v26 = vadd.f32 %v379_v23, %v231_v9  ;;  %969 = vtanh.f32 %v467_v17 }
 0x108   : > { %v381_v27 = vpop.f32.mrb[11].mxu0  ;;  %v472_v28 = vpop.f32.mrb[11].mxu1  ;;  %v877_v30 = vpack.c.bf16 %v948_v25, %v944_v14  ;;  %v471_v31 = vadd.f32 %v470_v24, %v231_v9  ;;  %971 = vtanh.f32 %v378_v21 }
 0x109   : > { %v950_v29 = vpop.eup %949  ;;  %v382_v34 = vadd.f32 %v381_v27, %v231_v9  ;;  %973 = vtanh.f32 %v469_v22  ;;  %v473_v36 = vadd.f32 %v472_v28, %v231_v9  ;;  %v246_v4 = vpop.permute.xlu0 %245 }
 0x10a   : > { %v952_v32 = vpop.eup %951  ;;  %v878_v33 = vpack.c.bf16 %v950_v29, %v946_v20  ;;  %685 = vst [vmem:[%s1180_s12 + $0x10] sm:$0xff] %v877_v30  ;;  %975 = vtanh.f32 %v380_v26  ;;  %v251_v5 = vpop.permute.xlu1 %250 }
 0x10b   : > { %v954_v35 = vpop.eup %953  ;;  %977 = vtanh.f32 %v471_v31  ;;  %v385_v42 = vpop.f32.mrb[12].mxu0 }
 0x10c   : > { %v956_v37 = vpop.eup %955  ;;  %686 = vst [vmem:[%s1180_s12 + $0x18] sm:$0xff] %v878_v33  ;;  %v476_v43 = vpop.f32.mrb[12].mxu1  ;;  %979 = vtanh.f32 %v382_v34  ;;  %v386_v46 = vadd.f32 %v385_v42, %v236_v38 }
 0x10d   : > { %v958_v40 = vpop.eup %957  ;;  %v879_v41 = vpack.c.bf16 %v956_v37, %v952_v32  ;;  %v477_v47 = vadd.f32 %v476_v43, %v236_v38  ;;  %v387_v48 = vpop.f32.mrb[13].mxu0  ;;  %981 = vtanh.f32 %v473_v36 }
 0x10e   : > { %v960_v44 = vpop.eup %959  ;;  %v880_v45 = vpack.c.bf16 %v958_v40, %v954_v35  ;;  %v478_v49 = vpop.f32.mrb[13].mxu1  ;;  %v388_v51 = vadd.f32 %v387_v48, %v236_v38  ;;  %983 = vtanh.f32 %v386_v46 }
 0x10f   : > { %v962_v50 = vpop.eup %961  ;;  %687 = vst [vmem:[%s1180_s12 + $0x20] sm:$0xff] %v879_v41  ;;  %v479_v52 = vadd.f32 %v478_v49, %v236_v38  ;;  %v389_v53 = vpop.f32.mrb[14].mxu0  ;;  %985 = vtanh.f32 %v477_v47 }
 0x110   : > { %v480_v54 = vpop.f32.mrb[14].mxu1  ;;  %v964_v55 = vpop.eup %963  ;;  %688 = vst [vmem:[%s1180_s12 + $0x28] sm:$0xff] %v880_v45  ;;  %v390_v56 = vadd.f32 %v389_v53, %v241_v39  ;;  %987 = vtanh.f32 %v388_v51 }
 0x111   : > { %v391_v57 = vpop.f32.mrb[15].mxu0  ;;  %v482_v58 = vpop.f32.mrb[15].mxu1  ;;  %v881_v60 = vpack.c.bf16 %v964_v55, %v960_v44  ;;  %v481_v61 = vadd.f32 %v480_v54, %v241_v39  ;;  %989 = vtanh.f32 %v479_v52 }
 0x112   : > { %v966_v59 = vpop.eup %965  ;;  %v392_v0 = vadd.f32 %v391_v57, %v241_v39  ;;  %v483_v2 = vadd.f32 %v482_v58, %v241_v39  ;;  %991 = vtanh.f32 %v390_v56  ;;  %v256_v34 = vpop.permute.xlu0 %255 }
 0x113   : > { %v968_v62 = vpop.eup %967  ;;  %v882_v63 = vpack.c.bf16 %v966_v59, %v962_v50  ;;  %689 = vst [vmem:[%s1180_s12 + $0x30] sm:$0xff] %v881_v60  ;;  %993 = vtanh.f32 %v481_v61  ;;  %v395_v8 = vpop.f32.mrb[16].mxu0 }
 0x114   : > { %v970_v1 = vpop.eup %969  ;;  %v486_v9 = vpop.f32.mrb[16].mxu1  ;;  %995 = vtanh.f32 %v392_v0  ;;  %v396_v12 = vadd.f32 %v395_v8, %v246_v4 }
 0x115   : > { %v972_v3 = vpop.eup %971  ;;  %690 = vst [vmem:[%s1180_s12 + $0x38] sm:$0xff] %v882_v63  ;;  %v487_v13 = vadd.f32 %v486_v9, %v246_v4  ;;  %v397_v14 = vpop.f32.mrb[17].mxu0  ;;  %997 = vtanh.f32 %v483_v2 }
 0x116   : > { %v974_v6 = vpop.eup %973  ;;  %v883_v7 = vpack.c.bf16 %v972_v3, %v968_v62  ;;  %v488_v15 = vpop.f32.mrb[17].mxu1  ;;  %v398_v17 = vadd.f32 %v397_v14, %v246_v4  ;;  %999 = vtanh.f32 %v396_v12  ;;  %v731_v12 = vld [vmem:[%s1180_s12 + $0x10] sm:$0xff] (%p1094_p4)  ;;  %v735_v14 = vld [vmem:[%s1180_s12 + $0x20] sm:$0xff] (%p1094_p4) }
 0x117   : > { %v976_v10 = vpop.eup %975  ;;  %v884_v11 = vpack.c.bf16 %v974_v6, %v970_v1  ;;  %v489_v18 = vadd.f32 %v488_v15, %v246_v4  ;;  %v399_v19 = vpop.f32.mrb[18].mxu0  ;;  %1001 = vtanh.f32 %v487_v13  ;;  %v733_v13 = vld [vmem:[%s1180_s12 + $0x18] sm:$0xff] (%p1094_p4)  ;;  %v737_v15 = vld [vmem:[%s1180_s12 + $0x28] sm:$0xff] (%p1094_p4)  ;;  %732 = vst [vmem:[%s1213_s23 + $0x20] sm:$0xff] (%p1094_p4), %v731_v12  ;;  %736 = vst [vmem:[%s1213_s23 + $0x40] sm:$0xff] (%p1094_p4), %v735_v14 }
 0x118   : > { %v978_v16 = vpop.eup %977  ;;  %691 = vst [vmem:[%s1180_s12 + $0x40] sm:$0xff] %v883_v7  ;;  %v490_v20 = vpop.f32.mrb[18].mxu1  ;;  %v400_v22 = vadd.f32 %v399_v19, %v251_v5  ;;  %1003 = vtanh.f32 %v398_v17  ;;  %734 = vst [vmem:[%s1213_s23 + $0x28] sm:$0xff] (%p1094_p4), %v733_v13 }
 0x119   : > { %v980_v21 = vpop.eup %979  ;;  %692 = vst [vmem:[%s1180_s12 + $0x48] sm:$0xff] %v884_v11  ;;  %v401_v23 = vpop.f32.mrb[19].mxu0  ;;  %v491_v27 = vadd.f32 %v490_v20, %v251_v5  ;;  %1005 = vtanh.f32 %v489_v18  ;;  %v729_v11 = vld [vmem:[%s1180_s12 + $0x8] sm:$0xff] (%p1094_p4)  ;;  %738 = vst [vmem:[%s1213_s23 + $0x48] sm:$0xff] (%p1094_p4), %v737_v15 }
 0x11a   : > { %v492_v24 = vpop.f32.mrb[19].mxu1  ;;  %v982_v25 = vpop.eup %981  ;;  %v885_v26 = vpack.c.bf16 %v980_v21, %v976_v10  ;;  %v402_v30 = vadd.f32 %v401_v23, %v251_v5  ;;  %1007 = vtanh.f32 %v400_v22  ;;  %v727_v10 = vld [vmem:[%s1180_s12] sm:$0xff] (%p1094_p4)  ;;  %730 = vst [vmem:[%s1213_s23 + $0x8] sm:$0xff] (%p1094_p4), %v729_v11 }
 0x11b   : > { %v984_v28 = vpop.eup %983  ;;  %v886_v29 = vpack.c.bf16 %v982_v25, %v978_v16  ;;  %v493_v32 = vadd.f32 %v492_v24, %v251_v5  ;;  %1009 = vtanh.f32 %v491_v27  ;;  %v405_v37 = vpop.f32.mrb[20].mxu0  ;;  %728 = vst [vmem:[%s1213_s23] sm:$0xff] (%p1094_p4), %v727_v10  ;;  %v739_v16 = vld [vmem:[%s1180_s12 + $0x30] sm:$0xff] (%p1094_p4) }
 0x11c   : > { %v986_v31 = vpop.eup %985  ;;  %693 = vst [vmem:[%s1180_s12 + $0x50] sm:$0xff] %v885_v26  ;;  %v496_v38 = vpop.f32.mrb[20].mxu1  ;;  %1011 = vtanh.f32 %v402_v30  ;;  %v406_v41 = vadd.f32 %v405_v37, %v256_v34  ;;  %v741_v17 = vld [vmem:[%s1180_s12 + $0x38] sm:$0xff] (%p1094_p4)  ;;  %740 = vst [vmem:[%s1213_s23 + $0x60] sm:$0xff] (%p1094_p4), %v739_v16 }
 0x11d   : > { %v988_v33 = vpop.eup %987  ;;  %694 = vst [vmem:[%s1180_s12 + $0x58] sm:$0xff] %v886_v29  ;;  %v497_v42 = vadd.f32 %v496_v38, %v256_v34  ;;  %v407_v43 = vpop.f32.mrb[21].mxu0  ;;  %1013 = vtanh.f32 %v493_v32  ;;  %742 = vst [vmem:[%s1213_s23 + $0x68] sm:$0xff] (%p1094_p4), %v741_v17 }
 0x11e   : > { %v990_v35 = vpop.eup %989  ;;  %v887_v36 = vpack.c.bf16 %v988_v33, %v984_v28  ;;  %v498_v44 = vpop.f32.mrb[21].mxu1  ;;  %v408_v46 = vadd.f32 %v407_v43, %v256_v34  ;;  %1015 = vtanh.f32 %v406_v41 }
 0x11f   : > { %v992_v39 = vpop.eup %991  ;;  %v888_v40 = vpack.c.bf16 %v990_v35, %v986_v31  ;;  %v499_v47 = vadd.f32 %v498_v44, %v256_v34  ;;  %v409_v48 = vpop.f32.mrb[22].mxu0  ;;  %1017 = vtanh.f32 %v497_v42  ;;  %v743_v18 = vld [vmem:[%s1180_s12 + $0x40] sm:$0xff] (%p1094_p4) }
 0x120   : > { %v994_v45 = vpop.eup %993  ;;  %695 = vst [vmem:[%s1180_s12 + $0x60] sm:$0xff] %v887_v36  ;;  %v500_v49 = vpop.f32.mrb[22].mxu1  ;;  %1019 = vtanh.f32 %v408_v46  ;;  %744 = vst [vmem:[%s1213_s23 + $0x80] sm:$0xff] (%p1094_p4), %v743_v18  ;;  %v745_v19 = vld [vmem:[%s1180_s12 + $0x48] sm:$0xff] (%p1094_p4) }
 0x121   : > { %v996_v50 = vpop.eup %995  ;;  %696 = vst [vmem:[%s1180_s12 + $0x68] sm:$0xff] %v888_v40  ;;  %v410_v51 = vpop.f32.mrb[23].mxu0  ;;  %1021 = vtanh.f32 %v499_v47  ;;  %746 = vst [vmem:[%s1213_s23 + $0x88] sm:$0xff] (%p1094_p4), %v745_v19 }
 0x122   : > { %v501_v52 = vpop.f32.mrb[23].mxu1  ;;  %v998_v53 = vpop.eup %997  ;;  %v889_v54 = vpack.c.bf16 %v996_v50, %v992_v39 }
 0x123   : > { %v1000_v55 = vpop.eup %999  ;;  %v890_v56 = vpack.c.bf16 %v998_v53, %v994_v45  ;;  %v747_v20 = vld [vmem:[%s1180_s12 + $0x50] sm:$0xff] (%p1094_p4) }
 0x124   : > { %v1002_v57 = vpop.eup %1001  ;;  %697 = vst [vmem:[%s1180_s12 + $0x70] sm:$0xff] %v889_v54  ;;  %v749_v21 = vld [vmem:[%s1180_s12 + $0x58] sm:$0xff] (%p1094_p4)  ;;  %748 = vst [vmem:[%s1213_s23 + $0xa0] sm:$0xff] (%p1094_p4), %v747_v20 }
 0x125   : > { %v1004_v58 = vpop.eup %1003  ;;  %698 = vst [vmem:[%s1180_s12 + $0x78] sm:$0xff] %v890_v56  ;;  %750 = vst [vmem:[%s1213_s23 + $0xa8] sm:$0xff] (%p1094_p4), %v749_v21 }
 0x126   : > { %v1006_v59 = vpop.eup %1005  ;;  %v891_v60 = vpack.c.bf16 %v1004_v58, %v1000_v55 }
 0x127   : > { %v1008_v61 = vpop.eup %1007  ;;  %v892_v62 = vpack.c.bf16 %v1006_v59, %v1002_v57  ;;  %v751_v22 = vld [vmem:[%s1180_s12 + $0x60] sm:$0xff] (%p1094_p4) }
 0x128   : > { %v1010_v63 = vpop.eup %1009  ;;  %699 = vst [vmem:[%s1180_s12 + $0x80] sm:$0xff] %v891_v60  ;;  %v753_v23 = vld [vmem:[%s1180_s12 + $0x68] sm:$0xff] (%p1094_p4)  ;;  %752 = vst [vmem:[%s1213_s23 + $0xc0] sm:$0xff] (%p1094_p4), %v751_v22 }
 0x129   : > { %v1012_v0 = vpop.eup %1011  ;;  %700 = vst [vmem:[%s1180_s12 + $0x88] sm:$0xff] %v892_v62  ;;  %754 = vst [vmem:[%s1213_s23 + $0xc8] sm:$0xff] (%p1094_p4), %v753_v23 }
 0x12a   : > { %v1014_v1 = vpop.eup %1013  ;;  %v893_v2 = vpack.c.bf16 %v1012_v0, %v1008_v61 }
 0x12b   : > { %v1016_v3 = vpop.eup %1015  ;;  %v894_v4 = vpack.c.bf16 %v1014_v1, %v1010_v63  ;;  %711 = sbr.rel (!%p1094_p4) target bundleno = 314 (0x13a), region = 36  ;;  %v755_v24 = vld [vmem:[%s1180_s12 + $0x70] sm:$0xff] (%p1094_p4) }
 0x12c   : > { %v1018_v5 = vpop.eup %1017  ;;  %701 = vst [vmem:[%s1180_s12 + $0x90] sm:$0xff] %v893_v2  ;;  %756 = vst [vmem:[%s1213_s23 + $0xe0] sm:$0xff] (%p1094_p4), %v755_v24  ;;  %v757_v25 = vld [vmem:[%s1180_s12 + $0x78] sm:$0xff] (%p1094_p4) }
 0x12d   : > { %v1020_v6 = vpop.eup %1019  ;;  %702 = vst [vmem:[%s1180_s12 + $0x98] sm:$0xff] %v894_v4  ;;  %758 = vst [vmem:[%s1213_s23 + $0xe8] sm:$0xff] (%p1094_p4), %v757_v25 }
 0x12e   : > { %v1022_v7 = vpop.eup %1021  ;;  %v895_v8 = vpack.c.bf16 %v1020_v6, %v1016_v3 }
 0x12f   : > { %v896_v9 = vpack.c.bf16 %v1022_v7, %v1018_v5  ;;  %v759_v26 = vld [vmem:[%s1180_s12 + $0x80] sm:$0xff] (%p1094_p4) }
 0x130   : > { %703 = vst [vmem:[%s1180_s12 + $0xa0] sm:$0x33] %v895_v8  ;;  %v761_v27 = vld [vmem:[%s1180_s12 + $0x88] sm:$0xff] (%p1094_p4)  ;;  %760 = vst [vmem:[%s1213_s23 + $0x100] sm:$0xff] (%p1094_p4), %v759_v26 }
 0x131   : > { %704 = vst [vmem:[%s1180_s12 + $0xa8] sm:$0x33] %v896_v9  ;;  %762 = vst [vmem:[%s1213_s23 + $0x108] sm:$0xff] (%p1094_p4), %v761_v27 }
 0x133   : > { %v763_v28 = vld [vmem:[%s1180_s12 + $0x90] sm:$0xff] }
 0x134   : > { %v765_v29 = vld [vmem:[%s1180_s12 + $0x98] sm:$0xff]  ;;  %764 = vst [vmem:[%s1213_s23 + $0x120] sm:$0xff] %v763_v28 }
 0x135   : > { %766 = vst [vmem:[%s1213_s23 + $0x128] sm:$0xff] %v765_v29 }
 0x137   : > { %v767_v30 = vld [vmem:[%s1180_s12 + $0xa0] sm:$0xff] }
 0x138   : > { %768 = vst [vmem:[%s1213_s23 + $0x140] sm:$0xff] %v767_v30  ;;  %v769_v31 = vld [vmem:[%s1180_s12 + $0xa8] sm:$0xff] }
 0x139   : > { %770 = vst [vmem:[%s1213_s23 + $0x148] sm:$0xff] %v769_v31 }
 0x13a PF: > { %p10_p8 = scmp.ge.s32.totalorder %s1084_s16, 4   ;;  %s1271_s12 = smov %s1041_s13 }
 0x13b   : > { %s1272_s13 = smov %s1092_s19  ;;  %s1273_s14 = smov %s1084_s16 }
 0x13c   :  { %12 = sbr.rel (!%p10_p8) target bundleno = 2 (0x2), region = 85 }

// kernel: ae_pointnet_dcg_forward.27
= control target key start
LH: loop header
LB: loop body
LE: loop exit
PB: predicated region body
PF: predicated region fallthrough
CT: control target
= control target key end

     0   :  { %s1017_s21 = smov 0   ;;  %s1019_s22 = smov 0   ;;  %s1135_s0 = inlined_call_operand.vmem [shape: bf16[2,29,1024], index: 0, kind: input, shape index: {}]   ;;  %s1136_s1 = inlined_call_operand.vmem [shape: f32[2,29,1], index: 1, kind: input, shape index: {}]   ;;  %s1137_s2 = inlined_call_operand.vmem [shape: f32[2,29,1], index: 2, kind: input, shape index: {}]   ;;  %s1138_s3 = inlined_call_operand.vmem [shape: bf16[2,3,29], index: 3, kind: input, shape index: {}]   ;;  %s1139_s4 = inlined_call_operand.vmem [shape: f32[2,3,1], index: 4, kind: input, shape index: {}]   ;;  %s1140_s5 = inlined_call_operand.vmem [shape: f32[3,1024], index: 5, kind: input, shape index: {}]   ;;  %s1141_s6 = inlined_call_operand.vmem [shape: f32[2,3,1024], index: 6, kind: output, shape index: {}]  }
   0x1   :  { %s1021_s23 = smov 0   ;;  %s1023_s24 = smov 0  }
   0x2   :  { %s1025_s25 = smov 0   ;;  %s1027_s26 = smov 0  }
   0x3   :  { %s1029_s27 = smov 0  }
   0x4 LB: > { %s25_s28 = sadd.s32 1, %s970_s25  ;;  %s28_s29 = sadd.s32 1, %s974_s26  ;;  %s978_s27 = sphi %s1029_s27, %s16_s27   ;;  %s974_s26 = sphi %s1027_s26, %s1147_s26   ;;  %s970_s25 = sphi %s1025_s25, %s1146_s25   ;;  %s966_s24 = sphi %s1023_s24, %s1145_s24   ;;  %s962_s23 = sphi %s1021_s23, %s1144_s23   ;;  %s958_s22 = sphi %s1019_s22, %s1143_s22   ;;  %s954_s21 = sphi %s1017_s21, %s1142_s21  }
   0x5   : > { %p26_p0 = scmp.ge.s32.totalorder %s25_s28, 2  ;;  %p44_p1 = scmp.ne.s32.totalorder %s958_s22, %s954_s21 }
   0x6   : > { %p45_p2 = scmp.eq.s32.totalorder %s978_s27, 0  ;;  %s37_s9 = sadd.s32 1, %s958_s22 }
   0x7   : > { %s1149_s28 = smov (%p26_p0, %s25_s28), 0  ;;  %s1151_s29 = smov (!%p26_p0, %s28_s29), %s974_s26 }
   0x8   : > { %p46_p3 = por %p45_p2, %p44_p1  ;;  %p30_p4 = scmp.ge.s32.totalorder %s1151_s29, 2 }
   0x9   : > { %s33_s30 = ssub.s32 %s970_s25, %s1149_s28  ;;  %p830_p6 = scmp.ge.s32.totalorder %s978_s27, 4 }
   0xa   : > { %s1153_s29 = smov (%p30_p4, %s1151_s29), 0 }
   0xb   : > { %s32_s7 = ssub.s32 %s974_s26, %s1153_s29  ;;  %228 = sbr.rel (%p830_p6) target bundleno = 29 (0x1d), region = 16 }
   0xc   : > { %s34_s8 = sor.u32 %s33_s30, %s32_s7 }
   0xd   : > { %p35_p5 = scmp.eq.s32.totalorder %s34_s8, 0 }
   0xf   : > { %s1068_s10 = scalar_select %p35_p5, %s958_s22, %s37_s9  }
  0x12   : > { %231 = sbr.rel (!%p46_p3) target bundleno = 29 (0x1d), region = 20  ;;  %s233_s11 = sand.u32 (%p46_p3), 1, %s958_s22  }
  0x13   : > { %s832_s12 = sshll.u32 (%p46_p3), %s970_s25, 2  ;;  %s831_s13 = sshll.u32 (%p46_p3), %s233_s11, 6 }
  0x14   : > { %s833_s14 = sshll.u32 (%p46_p3), %s974_s26, 5  ;;  %s235_s20 = scalar_lea.vmem (%p46_p3), [#allocation2], %s831_s13 }
  0x15   : > { %s238_s15 = sadd.s32 (%p46_p3), %s833_s14, %s832_s12 }
  0x16   : > { %s834_s16 = sshll.u32 (%p46_p3), %s238_s15, 2 }
  0x17   : > { %s240_s19 = scalar_lea.vmem (%p46_p3), %s1135_s0, %s834_s16 }
  0x18   : > { %v253_v0 = vld [vmem:[%s240_s19] sm:$0xff] (%p46_p3)  ;;  %v255_v1 = vld [vmem:[%s240_s19 + $0x8] sm:$0xff] (%p46_p3) }
  0x19   : > { %v257_v2 = vld [vmem:[%s240_s19 + $0x20] sm:$0xff]  ;;  %254 = vst [vmem:[%s235_s20] sm:$0xff] %v253_v0  ;;  %256 = vst [vmem:[%s235_s20 + $0x8] sm:$0xff] %v255_v1  ;;  %v259_v3 = vld [vmem:[%s240_s19 + $0x28] sm:$0xff] }
  0x1a   : > { %258 = vst [vmem:[%s235_s20 + $0x10] sm:$0xff] %v257_v2  ;;  %v261_v4 = vld [vmem:[%s240_s19 + $0x40] sm:$0xff]  ;;  %v263_v5 = vld [vmem:[%s240_s19 + $0x48] sm:$0xff]  ;;  %260 = vst [vmem:[%s235_s20 + $0x18] sm:$0xff] %v259_v3 }
  0x1b   : > { %262 = vst [vmem:[%s235_s20 + $0x20] sm:$0xff] %v261_v4  ;;  %264 = vst [vmem:[%s235_s20 + $0x28] sm:$0xff] %v263_v5  ;;  %v265_v6 = vld [vmem:[%s240_s19 + $0x60] sm:$0xff]  ;;  %v267_v7 = vld [vmem:[%s240_s19 + $0x68] sm:$0xff] }
  0x1c   : > { %266 = vst [vmem:[%s235_s20 + $0x30] sm:$0xff] %v265_v6  ;;  %268 = vst [vmem:[%s235_s20 + $0x38] sm:$0xff] %v267_v7 }
  0x1d PF: > { %p835_p7 = scmp.ge.s32.totalorder %s978_s27, 1  ;;  %p312_p8 = scmp.lt.s32.totalorder %s978_s27, 5 }
  0x1f   : > { %p313_p9 = pnand %p835_p7, %p312_p8 }
  0x20   : > { %p376_p10 = scmp.lt.s32.totalorder (!%p313_p9), %s966_s24, 1  ;;  %v980_v8 = vmov (!%p313_p9), 0   ;;  %s319_s18 = sand.u32 (!%p313_p9), 1, %s954_s21   ;;  %vm550_vm0 = vcmask (!%p313_p9), 1045504   ;;  %vm551_vm1 = vcmask (!%p313_p9), 1046528   ;;  %v981_v33 = vmov (!%p313_p9), 65535  }
  0x21   : > { %316 = sbr.rel (%p313_p9) target bundleno = 431 (0x1af), region = 63  ;;  %913 = vset.pattern.permute.xlu1 (!%p313_p9), %v980_v8  ;;  %912 = vset.pattern.permute.xlu0 (!%p313_p9), %v980_v8  ;;  %s836_s19 = sshll.u32 (!%p313_p9), %s319_s18, 6  ;;  %v552_v34 = vsel (!%p313_p9), %vm550_vm0, 4294967295, %v981_v33  ;;  %vm546_vm2 = vcmask (!%p313_p9), 236544  }
  0x22   : > { %598 = vmatprep.mubr.bf16.mxu0 (!%p313_p9), %v980_v8  ;;  %639 = vmatprep.mubr.bf16.mxu1 (!%p313_p9), %v980_v8  ;;  %s321_s20 = scalar_lea.vmem (!%p313_p9), [#allocation2], %s836_s19  ;;  %v1096_v48 = vsel (!%p313_p9), %vm551_vm1, %v552_v34, 0 }
  0x23   : > { %v415_v18 = vld [vmem:[%s321_s20 + $0x20] sm:$0xff] (!%p313_p9)  ;;  %v416_v19 = vld [vmem:[%s321_s20 + $0x28] sm:$0xff] (!%p313_p9)  ;;  %v413_v22 = vld [vmem:[%s321_s20 + $0x10] sm:$0xff] (!%p313_p9) }
  0x24   : > { %v411_v20 = vld [vmem:[%s321_s20] sm:$0xff] (!%p313_p9)  ;;  %v412_v21 = vld [vmem:[%s321_s20 + $0x8] sm:$0xff] (!%p313_p9)  ;;  %v427_v24 = vunpack.c.l.bf16 (!%p313_p9), %v415_v18  ;;  %v428_v25 = vunpack.c.h.bf16 (!%p313_p9), %v415_v18  ;;  %v429_v26 = vunpack.c.l.bf16 (!%p313_p9), %v416_v19  ;;  %v414_v28 = vld [vmem:[%s321_s20 + $0x18] sm:$0xff] (!%p313_p9)  ;;  %v430_v30 = vunpack.c.h.bf16 (!%p313_p9), %v416_v19 }
  0x25   : > { %v417_v29 = vld [vmem:[%s321_s20 + $0x30] sm:$0x77] (!%p313_p9)  ;;  %v419_v31 = vunpack.c.l.bf16 (!%p313_p9), %v411_v20  ;;  %v418_v32 = vld [vmem:[%s321_s20 + $0x38] sm:$0x77] (!%p313_p9)  ;;  %v421_v35 = vunpack.c.l.bf16 (!%p313_p9), %v412_v21  ;;  %v423_v36 = vunpack.c.l.bf16 (!%p313_p9), %v413_v22  ;;  %v420_v37 = vunpack.c.h.bf16 (!%p313_p9), %v411_v20 }
  0x26   : > { %v422_v38 = vunpack.c.h.bf16 (!%p313_p9), %v412_v21  ;;  %v425_v39 = vunpack.c.l.bf16 (!%p313_p9), %v414_v28  ;;  %v431_v40 = vunpack.c.l.bf16 (!%p313_p9), %v417_v29  ;;  %v424_v41 = vunpack.c.h.bf16 (!%p313_p9), %v413_v22 }
  0x27   : > { %v426_v42 = vunpack.c.h.bf16 (!%p313_p9), %v414_v28  ;;  %v432_v45 = vunpack.c.h.bf16 (!%p313_p9), %v417_v29  ;;  %v433_v46 = vunpack.c.l.bf16 (!%p313_p9), %v418_v32  ;;  %v434_v47 = vunpack.c.h.bf16 (!%p313_p9), %v418_v32 }
  0x28   : > { %s1155_s24 = smov (!%p376_p10, %s966_s24), 1 }
  0x29   : > { %s852_s30 = sshll.u32 %s1155_s24, 5  ;;  %s842_s14 = sshll.u32 %s1155_s24, 2 }
  0x2a   : > { %s380_s9 = scalar_lea.vmem %s1136_s1, %s852_s30  ;;  %s385_s13 = scalar_lea.vmem %s1137_s2, %s852_s30 }
  0x2b   : > { %v437_v9 = vld [vmem:[%s380_s9 + $0x10] sm:$0xff]  ;;  %v435_v10 = vld [vmem:[%s380_s9] sm:$0xff]  ;;  %v438_v11 = vld [vmem:[%s380_s9 + $0x18] sm:$0x1f]  ;;  %s393_s17 = scalar_lea.vmem %s1139_s4, %s842_s14  ;;  %s841_s21 = sshll.u32 %s1155_s24, 1 }
  0x2c   : > { %451 = vperm.xlu1 %913, %v437_v9   ;;  %441 = vperm.xlu0 %912, %v435_v10   ;;  %v436_v12 = vld [vmem:[%s380_s9 + $0x8] sm:$0xff]  ;;  %v475_v14 = vld [vmem:[%s385_s13] sm:$0xff]  ;;  %v478_v15 = vld [vmem:[%s385_s13 + $0x18] sm:$0x1f]  ;;  %s389_s8 = scalar_lea.vmem %s1138_s3, %s841_s21  ;;  %s843_s9 = sshll.u32 %s962_s23, 2 }
  0x2d   : > { %v476_v13 = vld [vmem:[%s385_s13 + $0x8] sm:$0xff]  ;;  %v477_v16 = vld [vmem:[%s385_s13 + $0x10] sm:$0xff]  ;;  %v540_v17 = vld [vmem:[%s393_s17] sm:$0x7]  ;;  %p395_p11 = scmp.lt.s32.totalorder %s843_s9, 7  ;;  %s846_s14 = sshll.u32 %s1155_s24, 3 }
  0x2f   : > { %s1157_s9 = smov (!%p395_p11, %s843_s9), 7 }
  0x30   : > { %456 = vperm.xlu1 %913, %v438_v11   ;;  %446 = vperm.xlu0 %912, %v436_v12   ;;  %s844_s11 = sshll.u32 %s1157_s9, 2  ;;  %s406_s15 = sadd.s32 %s846_s14, %s1157_s9 }
  0x31   : > { %s398_s13 = scalar_lea.vmem %s1140_s5, %s844_s11  ;;  %s847_s16 = sshll.u32 %s406_s15, 2 }
  0x32   : > { %s408_s19 = scalar_lea.vmem %s1141_s6, %s847_s16 }
  0x34   : > { %486 = vperm.xlu1 %913, %v476_v13   ;;  %481 = vperm.xlu0 %912, %v475_v14  }
  0x38   : > { %496 = vperm.xlu1 %913, %v478_v15   ;;  %491 = vperm.xlu0 %912, %v477_v16  }
  0x3c   : > { %543 = vperm.xlu0 %912, %v540_v17  }
  0xab   : > { %v452_v23 = vpop.permute.xlu1 %451  ;;  %v442_v27 = vpop.permute.xlu0 %441 }
  0xac   : > { %v467_v49 = vmul.f32 %v452_v23, %v427_v24  ;;  %v468_v50 = vmul.f32 %v452_v23, %v428_v25  ;;  %v469_v51 = vmul.f32 %v452_v23, %v429_v26  ;;  %v470_v52 = vmul.f32 %v452_v23, %v430_v30 }
  0xad   : > { %v459_v53 = vmul.f32 %v442_v27, %v419_v31  ;;  %v461_v54 = vmul.f32 %v442_v27, %v421_v35  ;;  %v460_v55 = vmul.f32 %v442_v27, %v420_v37  ;;  %v462_v56 = vmul.f32 %v442_v27, %v422_v38 }
  0xaf   : > { %v457_v43 = vpop.permute.xlu1 %456  ;;  %v447_v44 = vpop.permute.xlu0 %446 }
  0xb0   : > { %v463_v57 = vmul.f32 %v447_v44, %v423_v36  ;;  %v465_v58 = vmul.f32 %v447_v44, %v425_v39  ;;  %v464_v59 = vmul.f32 %v447_v44, %v424_v41  ;;  %v466_v60 = vmul.f32 %v447_v44, %v426_v42 }
  0xb1   : > { %v471_v63 = vmul.f32 %v457_v43, %v431_v40  ;;  %v472_v0 = vmul.f32 %v457_v43, %v432_v45  ;;  %v473_v1 = vmul.f32 %v457_v43, %v433_v46  ;;  %v474_v2 = vmul.f32 %v457_v43, %v434_v47 }
  0xb3   : > { %v487_v61 = vpop.permute.xlu1 %486  ;;  %v482_v62 = vpop.permute.xlu0 %481 }
  0xb4   : > { %v500_v3 = vadd.f32 %v482_v62, %v460_v55  ;;  %v504_v4 = vadd.f32 %v487_v61, %v464_v59  ;;  %v502_v5 = vadd.f32 %v482_v62, %v462_v56  ;;  %v506_v6 = vadd.f32 %v487_v61, %v466_v60 }
  0xb5   : > { %v499_v7 = vadd.f32 %v482_v62, %v459_v53  ;;  %v503_v8 = vadd.f32 %v487_v61, %v463_v57  ;;  %v501_v9 = vadd.f32 %v482_v62, %v461_v54  ;;  %v505_v10 = vadd.f32 %v487_v61, %v465_v58 }
  0xb6   : > { %v516_v11 = vmax.f32 %v500_v3, 0.0  ;;  %v520_v12 = vmax.f32 %v504_v4, 0.0  ;;  %v518_v13 = vmax.f32 %v502_v5, 0.0  ;;  %v522_v14 = vmax.f32 %v506_v6, 0.0 }
  0xb7   : > { %v497_v15 = vpop.permute.xlu1 %496  ;;  %v492_v16 = vpop.permute.xlu0 %491  ;;  %v515_v17 = vmax.f32 %v499_v7, 0.0  ;;  %v519_v18 = vmax.f32 %v503_v8, 0.0  ;;  %v517_v19 = vmax.f32 %v501_v9, 0.0  ;;  %v521_v20 = vmax.f32 %v505_v10, 0.0 }
  0xb8   : > { %v511_v21 = vadd.f32 %v497_v15, %v471_v63  ;;  %v512_v22 = vadd.f32 %v497_v15, %v472_v0  ;;  %v513_v23 = vadd.f32 %v497_v15, %v473_v1  ;;  %v514_v24 = vadd.f32 %v497_v15, %v474_v2  ;;  %v652_v63 = vld [vmem:[%s398_s13] sm:$0x77]  ;;  %v653_v0 = vld [vmem:[%s398_s13 + $0x8] sm:$0x77] }
  0xb9   : > { %v507_v25 = vadd.f32 %v492_v16, %v467_v49  ;;  %v508_v26 = vadd.f32 %v492_v16, %v468_v50  ;;  %v509_v27 = vadd.f32 %v492_v16, %v469_v51  ;;  %v510_v28 = vadd.f32 %v492_v16, %v470_v52  ;;  %v539_v50 = vld [vmem:[%s389_s8] sm:$0x3] }
  0xba   : > { %v527_v29 = vmax.f32 %v511_v21, 0.0  ;;  %v528_v30 = vmax.f32 %v512_v22, 0.0  ;;  %v529_v31 = vmax.f32 %v513_v23, 0.0  ;;  %v530_v32 = vmax.f32 %v514_v24, 0.0 }
  0xbb   : > { %v523_v33 = vmax.f32 %v507_v25, 0.0  ;;  %v524_v34 = vmax.f32 %v508_v26, 0.0  ;;  %v525_v35 = vmax.f32 %v509_v27, 0.0  ;;  %v526_v36 = vmax.f32 %v510_v28, 0.0  ;;  %v544_v51 = vpop.permute.xlu0 %543 }
  0xbc   : > { %v532_v37 = vpack.c.bf16 %v520_v12, %v516_v11  ;;  %v534_v38 = vpack.c.bf16 %v522_v14, %v518_v13  ;;  %v531_v39 = vpack.c.bf16 %v519_v18, %v515_v17  ;;  %v533_v40 = vpack.c.bf16 %v521_v20, %v517_v19 }
  0xbd   : > { %v536_v41 = vpack.c.bf16 %v528_v30, %v524_v34  ;;  %v538_v42 = vpack.c.bf16 %v530_v32, %v526_v36  ;;  %v535_v43 = vpack.c.bf16 %v527_v29, %v523_v33  ;;  %v537_v44 = vpack.c.bf16 %v529_v31, %v525_v35 }
  0xbe   : > { %566 = vmatprep.subr.bf16.mxu0 %v532_v37  ;;  %607 = vmatprep.subr.bf16.mxu1 %v534_v38  ;;  %v656_v1 = vcombine.high %v652_v63, %v652_v63  ;;  %v657_v3 = vcombine.high %v653_v0, %v653_v0 }
  0xbf   : > { %567 = vmatpush1.bf16.msra.mxu0 %v531_v39  ;;  %608 = vmatpush1.bf16.msra.mxu1 %v533_v40  ;;  %v558_v45 = vand.u32 %v1096_v48, %v536_v41  ;;  %v564_v46 = vand.u32 %v1096_v48, %v538_v42  ;;  %v555_v47 = vand.u32 %v1096_v48, %v535_v43 }
  0xc0   : > { %v561_v49 = vand.u32 %v1096_v48, %v537_v44 }
  0xc1   : > { %568 = vmatprep.subr.bf16.mxu0 %v558_v45  ;;  %609 = vmatprep.subr.bf16.mxu1 %v564_v46 }
  0xc3   : > { %569 = vmatpush1.bf16.msra.mxu0 %v555_v47  ;;  %610 = vmatpush1.bf16.msra.mxu1 %v561_v49 }
  0xc6   : > { %848 = vmatmul.mubr.msk.bf16.vlgmr.msra.gmra.mrb[0].mxu0 %vm546_vm2, %v539_v50  ;;  %849 = vmatmul.mubr.msk.bf16.vlgmr.msra.gmra.mrb[0].mxu1 %vm546_vm2, %v539_v50 }
 0x199   : > { %v600_v52 = vpop.f32.mrb[0].mxu0  ;;  %v641_v53 = vpop.f32.mrb[0].mxu1 }
 0x19a   : > { %v601_v54 = vadd.f32 %v600_v52, %v544_v51  ;;  %v642_v48 = vadd.f32 %v641_v53, %v544_v51  ;;  %v602_v55 = vpop.f32.mrb[1].mxu0  ;;  %v643_v56 = vpop.f32.mrb[1].mxu1 }
 0x19b   : > { %v603_v57 = vadd.f32 %v602_v55, %v544_v51  ;;  %v644_v58 = vadd.f32 %v643_v56, %v544_v51  ;;  %v604_v59 = vpop.f32.mrb[2].mxu0  ;;  %v645_v60 = vpop.f32.mrb[2].mxu1 }
 0x19c   : > { %916 = vtanh.f32 %v601_v54  ;;  %v605_v61 = vpop.f32.mrb[3].mxu0  ;;  %v646_v62 = vpop.f32.mrb[3].mxu1 }
 0x19d   : > { %918 = vtanh.f32 %v642_v48 }
 0x19e   : > { %920 = vtanh.f32 %v603_v57 }
 0x19f   : > { %922 = vtanh.f32 %v644_v58 }
 0x1a6   : > { %v917_v2 = vpop.eup %916 }
 0x1a7   : > { %v919_v4 = vpop.eup %918  ;;  %v660_v5 = vadd.f32 %v917_v2, %v652_v63 }
 0x1a8   : > { %v921_v6 = vpop.eup %920  ;;  %v662_v7 = vadd.f32 %v919_v4, %v653_v0 }
 0x1a9   : > { %v923_v8 = vpop.eup %922  ;;  %v661_v9 = vadd.f32 %v921_v6, %v656_v1 }
 0x1aa   : > { %v663_v10 = vadd.f32 %v923_v8, %v657_v3 }
 0x1ab   : > { %v668_v11 = vcombine.low %v660_v5, %v661_v9 }
 0x1ac   : > { %v669_v12 = vcombine.low %v662_v7, %v663_v10 }
 0x1ad   : > { %672 = vst [vmem:[%s408_s19] sm:$0x77] %v668_v11 }
 0x1ae   : > { %673 = vst [vmem:[%s408_s19 + $0x8] sm:$0x77] %v669_v12 }
 0x1af PF: > { %s16_s27 = sadd.s32 1, %s978_s27   ;;  %s1142_s21 = smov %s958_s22 }
 0x1b0   : > { %p13_p12 = scmp.ge.s32.totalorder %s16_s27, 6   ;;  %s1143_s22 = smov %s1068_s10 }
 0x1b1   : > { %s1144_s23 = smov %s970_s25  ;;  %s1145_s24 = smov %s974_s26 }
 0x1b2   : > { %s1146_s25 = smov %s1149_s28  ;;  %s1147_s26 = smov %s1153_s29 }
 0x1b3   :  { %15 = sbr.rel (!%p13_p12) target bundleno = 4 (0x4), region = 117 }

// kernel: ae_pointnet_dcg_forward.24
= control target key start
LH: loop header
LB: loop body
LE: loop exit
PB: predicated region body
PF: predicated region fallthrough
CT: control target
= control target key end

     0   :  { %s3680_s0 = inlined_call_operand.vmem [shape: bf16[87,1024], index: 0, kind: input, shape index: {}]   ;;  %s3681_s1 = inlined_call_operand.vmem [shape: bf16[2,1024], index: 1, kind: input, shape index: {}]   ;;  %s3682_s2 = inlined_call_operand.vmem [shape: bf16[2,119,87], index: 2, kind: input, shape index: {}]   ;;  %s3683_s3 = inlined_call_operand.vmem [shape: bf16[2,119,2], index: 3, kind: input, shape index: {}]   ;;  %s3684_s4 = inlined_call_operand.vmem [shape: f32[2,119,1], index: 4, kind: input, shape index: {}]   ;;  %s3685_s5 = inlined_call_operand.vmem [shape: bf16[2,119,1024], index: 5, kind: output, shape index: {0}]   ;;  %s3686_s6 = inlined_call_operand.vmem [shape: f32[2,119,1], index: 6, kind: output, shape index: {1}]   ;;  %s3687_s7 = inlined_call_operand.vmem [shape: f32[2,119,1], index: 7, kind: output, shape index: {2}]  }
   0x1   :  { %3717 = sst [smem:[#allocation23_spill]] %s3680_s0 }
   0x2   :  { %s2694_s24 = smov 0   ;;  %s2696_s25 = smov 0  }
   0x3   :  { %s2698_s26 = smov 0   ;;  %s2700_s27 = smov 0  }
   0x4   :  { %s2702_s28 = smov 0   ;;  %s2704_s29 = smov 0  }
   0x5   :  { %s2706_s30 = smov 0   ;;  %s2708_s8 = smov 0  }
   0x6   :  { %s2710_s9 = smov 0  }
   0x7 LB: > { %s2234_s10 = sadd.s32 4294967295, %s2648_s9   ;;  %s27_s11 = sadd.s32 1, %s2640_s30  ;;  %s2648_s9 = sphi %s2710_s9, %s18_s9   ;;  %s2644_s8 = sphi %s2708_s8, %s3772_s8   ;;  %s2640_s30 = sphi %s2706_s30, %s3771_s30   ;;  %s2636_s29 = sphi %s2704_s29, %s3770_s29   ;;  %s2632_s28 = sphi %s2702_s28, %s3769_s28   ;;  %s2628_s27 = sphi %s2700_s27, %s3768_s27   ;;  %s2624_s26 = sphi %s2698_s26, %s3767_s26   ;;  %s2620_s25 = sphi %s2696_s25, %s3766_s25   ;;  %s2616_s24 = sphi %s2694_s24, %s3765_s24  }
   0x8   : > { %p28_p0 = scmp.ge.s32.totalorder %s27_s11, 2  ;;  %s30_s12 = sadd.s32 1, %s2644_s8 }
   0x9   : > { %s37_s13 = sadd.s32 1, %s2628_s27  ;;  %p44_p1 = scmp.ne.s32.totalorder %s2628_s27, %s2624_s26 }
   0xa   : > { %s3774_s11 = smov (%p28_p0, %s27_s11), 0  ;;  %s3776_s12 = smov (!%p28_p0, %s30_s12), %s2644_s8 }
   0xb   : > { %3718 = sst [smem:[#allocation4_spill]] %s3774_s11  ;;  %s34_s14 = ssub.s32 %s2640_s30, %s3774_s11 }
   0xc   : > { %p45_p2 = scmp.eq.s32.totalorder %s2648_s9, 0  ;;  %p32_p3 = scmp.ge.s32.totalorder %s3776_s12, 2 }
   0xd   : > { %p35_p4 = scmp.eq.s32.totalorder %s34_s14, 0  ;;  %s169_s15 = sadd.s32 1, %s2620_s25 }
   0xe   : > { %p46_p5 = por %p45_p2, %p44_p1  ;;  %s3778_s12 = smov (%p32_p3, %s3776_s12), 0 }
   0xf   : > { %3719 = sst [smem:[#allocation5_spill]] %s3778_s12  ;;  %s164_s17 = ssub.s32 %s2644_s8, %s3778_s12 }
  0x10   : > { %s2755_s16 = scalar_select %p35_p4, %s2628_s27, %s37_s13  }
  0x11   : > { %p179_p6 = scmp.ne.s32.totalorder %s2620_s25, %s2616_s24  ;;  %s166_s18 = sor.u32 %s164_s17, %s34_s14 }
  0x12   : > { %p180_p7 = scmp.eq.s32.totalorder %s2234_s10, 3  ;;  %p167_p8 = scmp.eq.s32.totalorder %s166_s18, 0 }
  0x13   : > { %p2237_p10 = scmp.ge.s32.totalorder %s2648_s9, 4 }
  0x14   : > { %p2761_p9 = por %p180_p7, %p179_p6 }
  0x15   : > { %s2766_s20 = scalar_select %p167_p8, %s2620_s25, %s169_s15  }
  0x16   : > { %254 = sbr.rel (%p2237_p10) target bundleno = 50 (0x32), region = 16 }
  0x1d   : > { %257 = sbr.rel (!%p46_p5) target bundleno = 50 (0x32), region = 20  ;;  %s259_s21 = sand.u32 (%p46_p5), 1, %s2628_s27  }
  0x1e   : > { %s2357_s22 = sshll.u32 (%p46_p5), %s2640_s30, 4  ;;  %s2444_s23 = smul.u32 (%p46_p5), 176, %s259_s21 }
  0x1f   : > { %s3721_s0 = sld [smem:[#allocation23_spill]] (%p46_p5) }
  0x20   : > { %s2782_s12 = scalar_lea.vmem (%p46_p5), [#allocation2], %s2444_s23 }
  0x25   : > { %s2774_s10 = scalar_lea.vmem %s3721_s0, %s2357_s22 }
  0x26   : > { %v277_v0 = vld [vmem:[%s2774_s10] sm:$0xff]  ;;  %v279_v1 = vld [vmem:[%s2774_s10 + $0x8] sm:$0xff] }
  0x27   : > { %v281_v2 = vld [vmem:[%s2774_s10 + $0x20] sm:$0xff]  ;;  %v283_v3 = vld [vmem:[%s2774_s10 + $0x28] sm:$0xff]  ;;  %278 = vst [vmem:[%s2782_s12] sm:$0xff] %v277_v0  ;;  %280 = vst [vmem:[%s2782_s12 + $0x8] sm:$0xff] %v279_v1 }
  0x28   : > { %v285_v4 = vld [vmem:[%s2774_s10 + $0x40] sm:$0xff]  ;;  %v287_v5 = vld [vmem:[%s2774_s10 + $0x48] sm:$0xff]  ;;  %282 = vst [vmem:[%s2782_s12 + $0x10] sm:$0xff] %v281_v2  ;;  %284 = vst [vmem:[%s2782_s12 + $0x18] sm:$0xff] %v283_v3 }
  0x29   : > { %286 = vst [vmem:[%s2782_s12 + $0x20] sm:$0xff] %v285_v4  ;;  %288 = vst [vmem:[%s2782_s12 + $0x28] sm:$0xff] %v287_v5  ;;  %v289_v6 = vld [vmem:[%s2774_s10 + $0x60] sm:$0xff]  ;;  %v291_v7 = vld [vmem:[%s2774_s10 + $0x68] sm:$0xff] }
  0x2a   : > { %v293_v8 = vld [vmem:[%s2774_s10 + $0x80] sm:$0xff]  ;;  %290 = vst [vmem:[%s2782_s12 + $0x30] sm:$0xff] %v289_v6  ;;  %292 = vst [vmem:[%s2782_s12 + $0x38] sm:$0xff] %v291_v7  ;;  %v295_v9 = vld [vmem:[%s2774_s10 + $0x88] sm:$0xff] }
  0x2b   : > { %294 = vst [vmem:[%s2782_s12 + $0x40] sm:$0xff] %v293_v8  ;;  %v297_v10 = vld [vmem:[%s2774_s10 + $0xa0] sm:$0xff]  ;;  %v299_v11 = vld [vmem:[%s2774_s10 + $0xa8] sm:$0xff]  ;;  %296 = vst [vmem:[%s2782_s12 + $0x48] sm:$0xff] %v295_v9 }
  0x2c   : > { %298 = vst [vmem:[%s2782_s12 + $0x50] sm:$0xff] %v297_v10  ;;  %300 = vst [vmem:[%s2782_s12 + $0x58] sm:$0xff] %v299_v11  ;;  %v301_v12 = vld [vmem:[%s2774_s10 + $0xc0] sm:$0xff]  ;;  %v303_v13 = vld [vmem:[%s2774_s10 + $0xc8] sm:$0xff] }
  0x2d   : > { %v305_v14 = vld [vmem:[%s2774_s10 + $0xe0] sm:$0xff]  ;;  %302 = vst [vmem:[%s2782_s12 + $0x60] sm:$0xff] %v301_v12  ;;  %304 = vst [vmem:[%s2782_s12 + $0x68] sm:$0xff] %v303_v13  ;;  %v307_v15 = vld [vmem:[%s2774_s10 + $0xe8] sm:$0xff] }
  0x2e   : > { %306 = vst [vmem:[%s2782_s12 + $0x70] sm:$0xff] %v305_v14  ;;  %v309_v16 = vld [vmem:[%s2774_s10 + $0x100] sm:$0xff]  ;;  %v311_v17 = vld [vmem:[%s2774_s10 + $0x108] sm:$0xff]  ;;  %308 = vst [vmem:[%s2782_s12 + $0x78] sm:$0xff] %v307_v15 }
  0x2f   : > { %310 = vst [vmem:[%s2782_s12 + $0x80] sm:$0xff] %v309_v16  ;;  %312 = vst [vmem:[%s2782_s12 + $0x88] sm:$0xff] %v311_v17  ;;  %v313_v18 = vld [vmem:[%s2774_s10 + $0x120] sm:$0xff]  ;;  %v315_v19 = vld [vmem:[%s2774_s10 + $0x128] sm:$0xff] }
  0x30   : > { %v317_v20 = vld [vmem:[%s2774_s10 + $0x140] sm:$0xff]  ;;  %314 = vst [vmem:[%s2782_s12 + $0x90] sm:$0xff] %v313_v18  ;;  %316 = vst [vmem:[%s2782_s12 + $0x98] sm:$0xff] %v315_v19  ;;  %v319_v21 = vld [vmem:[%s2774_s10 + $0x148] sm:$0xff] }
  0x31   : > { %318 = vst [vmem:[%s2782_s12 + $0xa0] sm:$0xff] %v317_v20  ;;  %320 = vst [vmem:[%s2782_s12 + $0xa8] sm:$0xff] %v319_v21 }
  0x32 PF: > { %p2240_p11 = scmp.ge.s32.totalorder %s2648_s9, 1  ;;  %p357_p12 = scmp.lt.s32.totalorder %s2648_s9, 5 }
  0x34   : > { %p358_p13 = pnand %p2240_p11, %p357_p12 }
  0x36   : > { %361 = sbr.rel (%p358_p13) target bundleno = 638 (0x27e), region = 59 }
  0x3d   : > { %s2825_s14 = sshll.u32 %s2632_s28, 2  ;;  %v559_v22 = vlaneseq  ;;  %p429_p0 = scmp.lt.s32.totalorder %s2636_s29, 1  ;;  %v2650_v23 = vmov 1966171168   ;;  %v2651_v25 = vmov 0   ;;  %vm597_vm0 = vcmask 1040384  }
  0x3e   : > { %p425_p1 = scmp.lt.s32.totalorder %s2825_s14, 7  ;;  %v557_v24 = vunpack.c.l.s4 %v2650_v23  ;;  %642 = vmatprep.mubr.bf16.mxu0 %v2651_v25  ;;  %753 = vmatprep.mubr.bf16.mxu1 %v2651_v25  ;;  %s364_s15 = sand.u32 1, %s2624_s26   ;;  %vm572_vm1 = vcmask 15360   ;;  %vm1005_vm2 = vcmask 1042432   ;;  %vm1006_vm3 = vcmask 1043456  }
  0x3f   : > { %v560_v26 = vshrl.u32 %v559_v22, 7  ;;  %s2833_s17 = scalar_select %p429_p0, %s2636_s29, 1  ;;  %2526 = vset.pattern.permute.xlu0 %v2651_v25  ;;  %2527 = vset.pattern.permute.xlu1 %v2651_v25  ;;  %v2652_v56 = vmov 65535   ;;  %vm980_vm4 = vcmask 711680   ;;  %vm1606_vm5 = vsmask.f32 3328 }
  0x40   : > { %s426_s18 = scalar_select %p425_p1, %s2825_s14, 7  ;;  %v558_v27 = vunpack.c.0.s8 %v557_v24  ;;  %v1007_v57 = vsel %vm1005_vm2, 4294967295, %v2652_v56  ;;  %vm1608_vm6 = vcmask 1047556   ;;  %vm1609_vm7 = vsmask.f32 7424  ;;  %vm3208_vm8 = vmand %vm1006_vm3, %vm1606_vm5 }
  0x41   : > { %s2447_s21 = smul.u32 60, %s2833_s17  ;;  %v1008_v62 = vsel %vm1006_vm3, %v1007_v57, 0  ;;  %vm3213_vm9 = vmand %vm1608_vm6, %vm1609_vm7  ;;  %p2352_p2 = scmp.ne.s32.totalorder %s2632_s28, 0 }
  0x42   : > { %s427_s13 = scalar_lea.vmem %s3681_s1, %s426_s18  ;;  %v561_v28 = vsub.s32 %v558_v27, %v560_v26  ;;  %s2445_s10 = smul.u32 176, %s364_s15  ;;  %vm1611_vm10 = vmor %vm3213_vm9, %vm3208_vm8  ;;  %vm1622_vm11 = vcmask (!%p2352_p2), 7168   ;;  %vm1637_vm12 = vcmask (!%p2352_p2), 6144  }
  0x43   : > { %v2255_v29 = vld.sshfl [vmem:[%s427_s13] sm:$0x33 pattern:$0x75316420]  ;;  %s2847_s0 = scalar_lea.vmem %s3683_s3, %s2447_s21  ;;  %s2854_s15 = smul.u32 120, %s2833_s17 }
  0x44   : > { %v555_v30 = vcombine.high %v2255_v29, %v2255_v29  ;;  %v562_v31 = vrot.slane %v2255_v29, %v561_v28  ;;  %s2849_s11 = scalar_lea.vmem [#allocation2], %s2445_s10  ;;  %v2528_v36 = vld [vmem:[%s2847_s0] sm:$0xff]   ;;  %v2535_v46 = vld [vmem:[%s2847_s0 + $0x8] sm:$0xff]   ;;  %v2542_v54 = vld [vmem:[%s2847_s0 + $0x10] sm:$0xff]   ;;  %s2903_s22 = scalar_lea.vmem %s3682_s2, %s2447_s21 }
  0x45   : > { %v2531_v35 = vld [vmem:[%s2849_s11 + $0x4] ss:$16 sps:$4 sm:$0xff]   ;;  %v2534_v39 = vld [vmem:[%s2849_s11 + $0xc] ss:$16 sps:$4 sm:$0xff]   ;;  %s2864_s23 = scalar_lea.vmem %s3686_s6, %s2854_s15  ;;  %v2529_v40 = vld [vmem:[%s2849_s11] ss:$16 sps:$4 sm:$0xff]   ;;  %s2871_s26 = scalar_lea.vmem %s3687_s7, %s2854_s15 }
  0x46   : > { %v569_v32 = vrot.slane %v555_v30, %v561_v28  ;;  %v599_v33 = vsel %vm597_vm0, %v562_v31, 0  ;;  %v570_v34 = vcombine.high %v562_v31, %v562_v31  ;;  %v2538_v41 = vld [vmem:[%s2849_s11 + $0x24] ss:$16 sps:$4 sm:$0xff]   ;;  %v2532_v42 = vld [vmem:[%s2849_s11 + $0x8] ss:$16 sps:$4 sm:$0xff]   ;;  %s2918_s13 = scalar_lea.vmem %s3684_s4, %s2854_s15 }
  0x47   : > { %v2541_v43 = vld [vmem:[%s2849_s11 + $0x2c] ss:$16 sps:$4 sm:$0xff]   ;;  %v2536_v44 = vld [vmem:[%s2849_s11 + $0x20] ss:$16 sps:$4 sm:$0xff]   ;;  %v2546_v45 = vld [vmem:[%s2849_s11 + $0x44] ss:$16 sps:$4 sm:$0xff]  }
  0x48   : > { %2256 = vmatprep.subr.msk.bf16.mxu0 %vm597_vm0, %v569_v32  ;;  %v571_v37 = vcombine.high %v569_v32, %v569_v32  ;;  %v605_v38 = vsel %vm597_vm0, %v570_v34, 0  ;;  %v2539_v47 = vld [vmem:[%s2849_s11 + $0x28] ss:$16 sps:$4 sm:$0xff]   ;;  %v2549_v48 = vld [vmem:[%s2849_s11 + $0x4c] ss:$16 sps:$4 sm:$0xff]   ;;  %v476_v61 = vld [vmem:[%s2849_s11 + $0xa0] sm:$0xff] }
  0x49   : > { %611 = vmatpush1.bf16.msra.mxu0 %v599_v33  ;;  %v2544_v49 = vld [vmem:[%s2849_s11 + $0x40] ss:$16 sps:$4 sm:$0xff]   ;;  %v2553_v50 = vld [vmem:[%s2849_s11 + $0x64] ss:$16 sps:$4 sm:$0xff]   ;;  %v2547_v51 = vld [vmem:[%s2849_s11 + $0x48] ss:$16 sps:$4 sm:$0xff]   ;;  %v2302_v0 = vcombine.low %v476_v61, %v476_v61  ;;  %v2303_v1 = vcombine.high %v476_v61, %v476_v61 }
  0x4a   : > { %2265 = vmatprep.subr.msk.bf16.mxu1 %vm597_vm0, %v571_v37  ;;  %1021 = vmatprep.subr.bf16.mxu0 %v2531_v35  ;;  %v2556_v52 = vld [vmem:[%s2849_s11 + $0x6c] ss:$16 sps:$4 sm:$0xff]   ;;  %v2551_v53 = vld [vmem:[%s2849_s11 + $0x60] ss:$16 sps:$4 sm:$0xff]   ;;  %v2560_v55 = vld [vmem:[%s2849_s11 + $0x84] ss:$16 sps:$4 sm:$0xff]  }
  0x4b   : > { %722 = vmatpush1.bf16.msra.mxu1 %v605_v38  ;;  %v2554_v58 = vld [vmem:[%s2849_s11 + $0x68] ss:$16 sps:$4 sm:$0xff]   ;;  %v2558_v59 = vld [vmem:[%s2849_s11 + $0x80] ss:$16 sps:$4 sm:$0xff]   ;;  %v2563_v60 = vld [vmem:[%s2849_s11 + $0x8c] ss:$16 sps:$4 sm:$0xff]   ;;  %v1013_v5 = vand.u32 %v2303_v1, %v1008_v62  ;;  %v1010_v7 = vand.u32 %v2302_v0, %v1008_v62 }
  0x4c   : > { %2257 = vmatmul.mubr.msk.bf16.vlgmr.msra.gmra.mrb[0].mxu0 %vm572_vm1, %v2528_v36  ;;  %1132 = vmatprep.subr.bf16.mxu1 %v2534_v39  ;;  %v477_v63 = vld [vmem:[%s2849_s11 + $0xa8] sm:$0xff]  ;;  %v1257_v10 = vld [vmem:[%s2918_s13 + $0x70] sm:$0x7f]  ;;  %v1243_v12 = vld [vmem:[%s2918_s13] sm:$0xff] }
  0x4d   : > { %1022 = vmatpush1.bf16.msra.mxu0 %v2529_v40  ;;  %652 = vmatprep.mubr.bf16.mxu0 %v2651_v25  ;;  %v2305_v2 = vcombine.high %v477_v63, %v477_v63  ;;  %v2561_v3 = vld [vmem:[%s2849_s11 + $0x88] ss:$16 sps:$4 sm:$0xff]   ;;  %v2304_v4 = vcombine.low %v477_v63, %v477_v63  ;;  %v1245_v13 = vld [vmem:[%s2918_s13 + $0x10] sm:$0xff]  ;;  %v2550_v15 = vld [vmem:[%s2847_s0 + $0x20] sm:$0xff]  }
  0x4e   : > { %2266 = vmatmul.mubr.msk.bf16.vlgmr.msra.gmra.mrb[0].mxu1 %vm572_vm1, %v2528_v36  ;;  %1023 = vmatprep.subr.bf16.mxu0 %v2538_v41  ;;  %v2543_v9 = vld [vmem:[%s2847_s0 + $0x18] sm:$0xff]   ;;  %v1244_v11 = vld [vmem:[%s2918_s13 + $0x8] sm:$0xff]  ;;  %v1247_v16 = vld [vmem:[%s2918_s13 + $0x20] sm:$0xff] }
  0x4f   : > { %1133 = vmatpush1.bf16.msra.mxu1 %v2532_v42  ;;  %763 = vmatprep.mubr.bf16.mxu1 %v2651_v25  ;;  %v1019_v6 = vand.u32 %v2305_v2, %v1008_v62  ;;  %v1016_v8 = vand.u32 %v2304_v4, %v1008_v62  ;;  %v1246_v14 = vld [vmem:[%s2918_s13 + $0x18] sm:$0xff]  ;;  %v1248_v17 = vld [vmem:[%s2918_s13 + $0x28] sm:$0xff]  ;;  %v1249_v18 = vld [vmem:[%s2918_s13 + $0x30] sm:$0xff] }
  0x50   : > { %1134 = vmatprep.subr.bf16.mxu1 %v2541_v43  ;;  %1330 = vperm.xlu0 %2526, %v1257_v10   ;;  %v1250_v19 = vld [vmem:[%s2918_s13 + $0x38] sm:$0xff]  ;;  %v2557_v20 = vld [vmem:[%s2847_s0 + $0x28] sm:$0xff]   ;;  %v1251_v21 = vld [vmem:[%s2918_s13 + $0x40] sm:$0xff] }
  0x51   : > { %1024 = vmatpush1.bf16.msra.mxu0 %v2536_v44  ;;  %1265 = vperm.xlu1 %2527, %v1244_v11   ;;  %v1252_v22 = vld [vmem:[%s2918_s13 + $0x48] sm:$0xff]  ;;  %v1253_v23 = vld [vmem:[%s2918_s13 + $0x50] sm:$0xff]  ;;  %v1254_v24 = vld [vmem:[%s2918_s13 + $0x58] sm:$0xff] }
  0x52   : > { %1025 = vmatprep.subr.bf16.mxu0 %v2546_v45  ;;  %v2564_v26 = vld [vmem:[%s2847_s0 + $0x30] sm:$0xff]   ;;  %v1255_v27 = vld [vmem:[%s2918_s13 + $0x60] sm:$0xff]  ;;  %v1256_v28 = vld [vmem:[%s2918_s13 + $0x68] sm:$0xff] }
  0x53   : > { %1135 = vmatpush1.bf16.msra.mxu1 %v2539_v47  ;;  %v2565_v29 = vld [vmem:[%s2847_s0 + $0x38] ss:$0 sps:$4 sm:$0xff]   ;;  %v2570_v30 = vld [vmem:[%s2903_s22] sm:$0xff]   ;;  %v2571_v31 = vld [vmem:[%s2903_s22 + $0x8] sm:$0xff]   ;;  %s406_s0 = sand.u32 1, %s2616_s24  }
  0x54   : > { %2258 = vmatmul.mubr.msk.bf16.gmra.mrb[4].mxu0 %vm572_vm1, %v2535_v46  ;;  %1136 = vmatprep.subr.bf16.mxu1 %v2549_v48  ;;  %v2572_v32 = vld [vmem:[%s2903_s22 + $0x10] sm:$0xff]   ;;  %v2573_v33 = vld [vmem:[%s2903_s22 + $0x18] sm:$0xff]   ;;  %v2574_v34 = vld [vmem:[%s2903_s22 + $0x20] sm:$0xff]   ;;  %s2446_s11 = smul.u32 240, %s406_s0 }
  0x55   : > { %662 = vmatprep.mubr.bf16.mxu0 %v2651_v25  ;;  %1026 = vmatpush1.bf16.msra.mxu0 %v2544_v49  ;;  %v2575_v35 = vld [vmem:[%s2903_s22 + $0x28] sm:$0xff]   ;;  %v2576_v36 = vld [vmem:[%s2903_s22 + $0x30] sm:$0xff]   ;;  %v2577_v37 = vld [vmem:[%s2903_s22 + $0x38] ss:$0 sps:$4 sm:$0xff]  }
  0x56   : > { %2267 = vmatmul.mubr.msk.bf16.gmra.mrb[4].mxu1 %vm572_vm1, %v2535_v46  ;;  %1027 = vmatprep.subr.bf16.mxu0 %v2553_v50  ;;  %s3026_s24 = scalar_lea.vmem [#allocation3], %s2446_s11 }
  0x57   : > { %773 = vmatprep.mubr.bf16.mxu1 %v2651_v25  ;;  %1137 = vmatpush1.bf16.msra.mxu1 %v2547_v51 }
  0x58   : > { %1138 = vmatprep.subr.bf16.mxu1 %v2556_v52  ;;  %1260 = vperm.xlu0 %2526, %v1243_v12  }
  0x59   : > { %1028 = vmatpush1.bf16.msra.mxu0 %v2551_v53  ;;  %1270 = vperm.xlu1 %2527, %v1245_v13  }
  0x5a   : > { %1029 = vmatprep.subr.bf16.mxu0 %v2560_v55 }
  0x5b   : > { %1139 = vmatpush1.bf16.msra.mxu1 %v2554_v58 }
  0x5c   : > { %2259 = vmatmul.mubr.msk.bf16.gmra.mrb[8].mxu0 %vm572_vm1, %v2542_v54  ;;  %1140 = vmatprep.subr.bf16.mxu1 %v2563_v60 }
  0x5d   : > { %672 = vmatprep.mubr.bf16.mxu0 %v2651_v25  ;;  %1030 = vmatpush1.bf16.msra.mxu0 %v2558_v59 }
  0x5e   : > { %2268 = vmatmul.mubr.msk.bf16.gmra.mrb[8].mxu1 %vm572_vm1, %v2542_v54  ;;  %1031 = vmatprep.subr.bf16.mxu0 %v1013_v5 }
  0x5f   : > { %783 = vmatprep.mubr.bf16.mxu1 %v2651_v25  ;;  %1141 = vmatpush1.bf16.msra.mxu1 %v2561_v3 }
  0x60   : > { %1142 = vmatprep.subr.bf16.mxu1 %v1019_v6  ;;  %1275 = vperm.xlu0 %2526, %v1246_v14  }
  0x61   : > { %1032 = vmatpush1.bf16.msra.mxu0 %v1010_v7  ;;  %1280 = vperm.xlu1 %2527, %v1247_v16  }
  0x63   : > { %1143 = vmatpush1.bf16.msra.mxu1 %v1016_v8 }
  0x64   : > { %2260 = vmatmul.mubr.msk.bf16.gmra.mrb[12].mxu0 %vm572_vm1, %v2543_v9  ;;  %1285 = vperm.xlu0 %2526, %v1248_v17  }
  0x65   : > { %682 = vmatprep.mubr.bf16.mxu0 %v2651_v25  ;;  %1290 = vperm.xlu1 %2527, %v1249_v18  }
  0x66   : > { %2269 = vmatmul.mubr.msk.bf16.gmra.mrb[12].mxu1 %vm572_vm1, %v2543_v9 }
  0x67   : > { %793 = vmatprep.mubr.bf16.mxu1 %v2651_v25 }
  0x68   : > { %1295 = vperm.xlu0 %2526, %v1250_v19  }
  0x69   : > { %1300 = vperm.xlu1 %2527, %v1251_v21  }
  0x6c   : > { %2261 = vmatmul.mubr.msk.bf16.gmra.mrb[16].mxu0 %vm572_vm1, %v2550_v15  ;;  %1305 = vperm.xlu0 %2526, %v1252_v22  }
  0x6d   : > { %692 = vmatprep.mubr.bf16.mxu0 %v2651_v25  ;;  %1310 = vperm.xlu1 %2527, %v1253_v23  }
  0x6e   : > { %2270 = vmatmul.mubr.msk.bf16.gmra.mrb[16].mxu1 %vm572_vm1, %v2550_v15 }
  0x6f   : > { %803 = vmatprep.mubr.bf16.mxu1 %v2651_v25 }
  0x70   : > { %1315 = vperm.xlu0 %2526, %v1254_v24  }
  0x71   : > { %1320 = vperm.xlu1 %2527, %v1255_v27  }
  0x74   : > { %2262 = vmatmul.mubr.msk.bf16.gmra.mrb[20].mxu0 %vm572_vm1, %v2557_v20  ;;  %1325 = vperm.xlu0 %2526, %v1256_v28  }
  0x75   : > { %702 = vmatprep.mubr.bf16.mxu0 %v2651_v25 }
  0x76   : > { %2271 = vmatmul.mubr.msk.bf16.gmra.mrb[20].mxu1 %vm572_vm1, %v2557_v20 }
  0x77   : > { %813 = vmatprep.mubr.bf16.mxu1 %v2651_v25 }
  0x7c   : > { %2263 = vmatmul.mubr.msk.bf16.gmra.mrb[24].mxu0 %vm572_vm1, %v2564_v26 }
  0x7d   : > { %712 = vmatprep.mubr.bf16.mxu0 %v2651_v25 }
  0x7e   : > { %2272 = vmatmul.mubr.msk.bf16.gmra.mrb[24].mxu1 %vm572_vm1, %v2564_v26 }
  0x7f   : > { %823 = vmatprep.mubr.bf16.mxu1 %v2651_v25 }
  0x84   : > { %2264 = vmatmul.mubr.msk.bf16.gmra.mrb[28].mxu0 %vm572_vm1, %v2565_v29 }
  0x85   : > { %1053 = vmatprep.mubr.bf16.mxu0 %v2651_v25 }
  0x86   : > { %2273 = vmatmul.mubr.msk.bf16.gmra.mrb[28].mxu1 %vm572_vm1, %v2565_v29 }
  0x87   : > { %1164 = vmatprep.mubr.bf16.mxu1 %v2651_v25 }
  0x8c   : > { %2306 = vmatmul.mubr.msk.bf16.vlgmr.msra.gmra.mrb[0].mxu0 %vm980_vm4, %v2570_v30 }
  0x8d   : > { %1063 = vmatprep.mubr.bf16.mxu0 %v2651_v25 }
  0x8e   : > { %2314 = vmatmul.mubr.msk.bf16.vlgmr.msra.gmra.mrb[0].mxu1 %vm980_vm4, %v2570_v30 }
  0x8f   : > { %1174 = vmatprep.mubr.bf16.mxu1 %v2651_v25 }
  0x94   : > { %2307 = vmatmul.mubr.msk.bf16.gmra.mrb[4].mxu0 %vm980_vm4, %v2571_v31 }
  0x95   : > { %1073 = vmatprep.mubr.bf16.mxu0 %v2651_v25 }
  0x96   : > { %2315 = vmatmul.mubr.msk.bf16.gmra.mrb[4].mxu1 %vm980_vm4, %v2571_v31 }
  0x97   : > { %1184 = vmatprep.mubr.bf16.mxu1 %v2651_v25 }
  0x9c   : > { %2308 = vmatmul.mubr.msk.bf16.gmra.mrb[8].mxu0 %vm980_vm4, %v2572_v32 }
  0x9d   : > { %1083 = vmatprep.mubr.bf16.mxu0 %v2651_v25 }
  0x9e   : > { %2316 = vmatmul.mubr.msk.bf16.gmra.mrb[8].mxu1 %vm980_vm4, %v2572_v32 }
  0x9f   : > { %1194 = vmatprep.mubr.bf16.mxu1 %v2651_v25 }
  0xa4   : > { %2309 = vmatmul.mubr.msk.bf16.gmra.mrb[12].mxu0 %vm980_vm4, %v2573_v33 }
  0xa5   : > { %1093 = vmatprep.mubr.bf16.mxu0 %v2651_v25 }
  0xa6   : > { %2317 = vmatmul.mubr.msk.bf16.gmra.mrb[12].mxu1 %vm980_vm4, %v2573_v33 }
  0xa7   : > { %1204 = vmatprep.mubr.bf16.mxu1 %v2651_v25 }
  0xac   : > { %2310 = vmatmul.mubr.msk.bf16.gmra.mrb[16].mxu0 %vm980_vm4, %v2574_v34 }
  0xad   : > { %1103 = vmatprep.mubr.bf16.mxu0 %v2651_v25 }
  0xae   : > { %2318 = vmatmul.mubr.msk.bf16.gmra.mrb[16].mxu1 %vm980_vm4, %v2574_v34 }
  0xaf   : > { %1214 = vmatprep.mubr.bf16.mxu1 %v2651_v25 }
  0xb4   : > { %2311 = vmatmul.mubr.msk.bf16.gmra.mrb[20].mxu0 %vm980_vm4, %v2575_v35 }
  0xb5   : > { %1113 = vmatprep.mubr.bf16.mxu0 %v2651_v25 }
  0xb6   : > { %2319 = vmatmul.mubr.msk.bf16.gmra.mrb[20].mxu1 %vm980_vm4, %v2575_v35 }
  0xb7   : > { %1224 = vmatprep.mubr.bf16.mxu1 %v2651_v25 }
  0xbc   : > { %2312 = vmatmul.mubr.msk.bf16.gmra.mrb[24].mxu0 %vm980_vm4, %v2576_v36 }
  0xbd   : > { %1123 = vmatprep.mubr.bf16.mxu0 %v2651_v25 }
  0xbe   : > { %2320 = vmatmul.mubr.msk.bf16.gmra.mrb[24].mxu1 %vm980_vm4, %v2576_v36 }
  0xbf   : > { %1234 = vmatprep.mubr.bf16.mxu1 %v2651_v25 }
  0xc4   : > { %2313 = vmatmul.mubr.msk.bf16.gmra.mrb[32].mxu0 %vm980_vm4, %v2577_v37 }
  0xc6   : > { %2321 = vmatmul.mubr.msk.bf16.gmra.mrb[32].mxu1 %vm980_vm4, %v2577_v37 }
  0xcf   : > { %v3001_v39 = vpop.permute.xlu0 %1330 }
  0xd0   : > { %v1266_v48 = vpop.permute.xlu1 %1265 }
  0xd7   : > { %v1261_v46 = vpop.permute.xlu0 %1260 }
  0xd8   : > { %v1271_v3 = vpop.permute.xlu1 %1270 }
  0xdf   : > { %v1276_v6 = vpop.permute.xlu0 %1275 }
  0xe0   : > { %v1281_v26 = vpop.permute.xlu1 %1280 }
  0xe3   : > { %v1286_v29 = vpop.permute.xlu0 %1285 }
 0x157   : > { %v2999_v38 = vpop.f32.mrb[28].mxu0 }
 0x158   : > { %v3003_v40 = vpop.f32.mrb[29].mxu0 }
 0x159   : > { %v718_v41 = vpop.f32.mrb[30].mxu0  ;;  %v3005_v42 = vpop.f32.mrb[28].mxu1 }
 0x15a   : > { %v719_v43 = vpop.f32.mrb[31].mxu0  ;;  %v3007_v44 = vpop.f32.mrb[29].mxu1 }
 0x15b   : > { %v829_v45 = vpop.f32.mrb[30].mxu1 }
 0x15c   : > { %v830_v25 = vpop.f32.mrb[31].mxu1 }
 0x15f   : > { %v1055_v47 = vpop.f32.mrb[0].mxu0 }
 0x160   : > { %v3010_v49 = vadd.f32 %v1261_v46, %v1055_v47  ;;  %v1057_v50 = vpop.f32.mrb[1].mxu0 }
 0x161   : > { %v3012_v51 = vadd.f32 %v1261_v46, %v1057_v50  ;;  %v1059_v52 = vpop.f32.mrb[2].mxu0  ;;  %v1166_v53 = vpop.f32.mrb[0].mxu1 }
 0x162   : > { %v3014_v54 = vadd.f32 %v1266_v48, %v1059_v52  ;;  %v3016_v55 = vadd.f32 %v1261_v46, %v1166_v53  ;;  %v1061_v56 = vpop.f32.mrb[3].mxu0  ;;  %v1168_v57 = vpop.f32.mrb[1].mxu1 }
 0x163   : > { %v2358_v58 = vpack.c.bf16 %v3012_v51, %v3010_v49  ;;  %v3020_v59 = vadd.f32 %v1266_v48, %v1061_v56  ;;  %v3022_v60 = vadd.f32 %v1261_v46, %v1168_v57  ;;  %v1170_v61 = vpop.f32.mrb[2].mxu1  ;;  %v1291_v56 = vpop.permute.xlu1 %1290 }
 0x164   : > { %v3024_v62 = vadd.f32 %v1266_v48, %v1170_v61  ;;  %v1172_v63 = vpop.f32.mrb[3].mxu1  ;;  %v1296_v61 = vpop.permute.xlu0 %1295 }
 0x165   : > { %1577 = vst [vmem:[%s3026_s24] sm:$0xff] %v2358_v58  ;;  %v2360_v0 = vpack.c.bf16 %v3020_v59, %v3014_v54  ;;  %v2359_v1 = vpack.c.bf16 %v3022_v60, %v3016_v55  ;;  %v3033_v2 = vadd.f32 %v1266_v48, %v1172_v63 }
 0x167   : > { %1579 = vst [vmem:[%s3026_s24 + $0x10] sm:$0xff] %v2360_v0  ;;  %1578 = vst [vmem:[%s3026_s24 + $0x8] sm:$0xff] %v2359_v1  ;;  %v2361_v4 = vpack.c.bf16 %v3033_v2, %v3024_v62  ;;  %v1065_v5 = vpop.f32.mrb[4].mxu0 }
 0x168   : > { %v3039_v7 = vadd.f32 %v1271_v3, %v1065_v5  ;;  %v1067_v8 = vpop.f32.mrb[5].mxu0 }
 0x169   : > { %1580 = vst [vmem:[%s3026_s24 + $0x18] sm:$0xff] %v2361_v4  ;;  %v3042_v9 = vadd.f32 %v1271_v3, %v1067_v8  ;;  %v1069_v10 = vpop.f32.mrb[6].mxu0  ;;  %v1176_v11 = vpop.f32.mrb[4].mxu1 }
 0x16a   : > { %v3044_v12 = vadd.f32 %v1276_v6, %v1069_v10  ;;  %v3046_v13 = vadd.f32 %v1271_v3, %v1176_v11  ;;  %v1071_v14 = vpop.f32.mrb[7].mxu0  ;;  %v1178_v15 = vpop.f32.mrb[5].mxu1 }
 0x16b   : > { %v2362_v16 = vpack.c.bf16 %v3042_v9, %v3039_v7  ;;  %v3050_v17 = vadd.f32 %v1276_v6, %v1071_v14  ;;  %v3052_v18 = vadd.f32 %v1271_v3, %v1178_v15  ;;  %v1180_v19 = vpop.f32.mrb[6].mxu1 }
 0x16c   : > { %v3054_v20 = vadd.f32 %v1276_v6, %v1180_v19  ;;  %v1182_v21 = vpop.f32.mrb[7].mxu1 }
 0x16d   : > { %1581 = vst [vmem:[%s3026_s24 + $0x20] sm:$0xff] %v2362_v16  ;;  %v2364_v22 = vpack.c.bf16 %v3050_v17, %v3044_v12  ;;  %v2363_v23 = vpack.c.bf16 %v3052_v18, %v3046_v13  ;;  %v3061_v24 = vadd.f32 %v1276_v6, %v1182_v21 }
 0x16f   : > { %1583 = vst [vmem:[%s3026_s24 + $0x30] sm:$0xff] %v2364_v22  ;;  %1582 = vst [vmem:[%s3026_s24 + $0x28] sm:$0xff] %v2363_v23  ;;  %v2365_v27 = vpack.c.bf16 %v3061_v24, %v3054_v20  ;;  %v1075_v28 = vpop.f32.mrb[8].mxu0 }
 0x170   : > { %v3067_v30 = vadd.f32 %v1281_v26, %v1075_v28  ;;  %v1077_v31 = vpop.f32.mrb[9].mxu0  ;;  %v1301_v28 = vpop.permute.xlu1 %1300 }
 0x171   : > { %1584 = vst [vmem:[%s3026_s24 + $0x38] sm:$0xff] %v2365_v27  ;;  %v3070_v32 = vadd.f32 %v1281_v26, %v1077_v31  ;;  %v1079_v33 = vpop.f32.mrb[10].mxu0  ;;  %v1186_v34 = vpop.f32.mrb[8].mxu1 }
 0x172   : > { %v3072_v35 = vadd.f32 %v1286_v29, %v1079_v33  ;;  %v3074_v36 = vadd.f32 %v1281_v26, %v1186_v34  ;;  %v1081_v37 = vpop.f32.mrb[11].mxu0  ;;  %v1188_v41 = vpop.f32.mrb[9].mxu1 }
 0x173   : > { %v2366_v43 = vpack.c.bf16 %v3070_v32, %v3067_v30  ;;  %v3078_v45 = vadd.f32 %v1286_v29, %v1081_v37  ;;  %v3080_v25 = vadd.f32 %v1281_v26, %v1188_v41  ;;  %v1190_v46 = vpop.f32.mrb[10].mxu1  ;;  %v1306_v31 = vpop.permute.xlu0 %1305 }
 0x174   : > { %v3082_v47 = vadd.f32 %v1286_v29, %v1190_v46  ;;  %v1192_v48 = vpop.f32.mrb[11].mxu1 }
 0x175   : > { %3722 = vst [vmem:[#allocation6_spill] sm:$0xff] %v3078_v45  ;;  %1585 = vst [vmem:[%s3026_s24 + $0x40] sm:$0xff] %v2366_v43  ;;  %v2368_v50 = vpack.c.bf16 %v3078_v45, %v3072_v35  ;;  %v2367_v52 = vpack.c.bf16 %v3080_v25, %v3074_v36  ;;  %v3089_v53 = vadd.f32 %v1286_v29, %v1192_v48 }
 0x177   : > { %1587 = vst [vmem:[%s3026_s24 + $0x50] sm:$0xff] %v2368_v50  ;;  %1586 = vst [vmem:[%s3026_s24 + $0x48] sm:$0xff] %v2367_v52  ;;  %v2369_v57 = vpack.c.bf16 %v3089_v53, %v3082_v47  ;;  %v1085_v58 = vpop.f32.mrb[12].mxu0 }
 0x178   : > { %v3095_v63 = vadd.f32 %v1291_v56, %v1085_v58  ;;  %v1087_v0 = vpop.f32.mrb[13].mxu0 }
 0x179   : > { %1588 = vst [vmem:[%s3026_s24 + $0x58] sm:$0xff] %v2369_v57  ;;  %v3098_v1 = vadd.f32 %v1291_v56, %v1087_v0  ;;  %v1089_v3 = vpop.f32.mrb[14].mxu0  ;;  %v1196_v4 = vpop.f32.mrb[12].mxu1 }
 0x17a   : > { %v3100_v5 = vadd.f32 %v1296_v61, %v1089_v3  ;;  %v3102_v6 = vadd.f32 %v1291_v56, %v1196_v4  ;;  %v1091_v8 = vpop.f32.mrb[15].mxu0  ;;  %v1198_v10 = vpop.f32.mrb[13].mxu1 }
 0x17b   : > { %v2370_v11 = vpack.c.bf16 %v3098_v1, %v3095_v63  ;;  %v3106_v14 = vadd.f32 %v1296_v61, %v1091_v8  ;;  %v3108_v15 = vadd.f32 %v1291_v56, %v1198_v10  ;;  %v1200_v16 = vpop.f32.mrb[14].mxu1 }
 0x17c   : > { %v3110_v19 = vadd.f32 %v1296_v61, %v1200_v16  ;;  %v1202_v21 = vpop.f32.mrb[15].mxu1 }
 0x17d   : > { %1589 = vst [vmem:[%s3026_s24 + $0x60] sm:$0xff] %v2370_v11  ;;  %v2372_v22 = vpack.c.bf16 %v3106_v14, %v3100_v5  ;;  %v2371_v23 = vpack.c.bf16 %v3108_v15, %v3102_v6  ;;  %v3117_v26 = vadd.f32 %v1296_v61, %v1202_v21  ;;  %v1311_v11 = vpop.permute.xlu1 %1310 }
 0x17f   : > { %3723 = vst [vmem:[#allocation7_spill] sm:$0xff] %v3117_v26  ;;  %1591 = vst [vmem:[%s3026_s24 + $0x70] sm:$0xff] %v2372_v22  ;;  %v2373_v27 = vpack.c.bf16 %v3117_v26, %v3110_v19  ;;  %v1095_v29 = vpop.f32.mrb[16].mxu0  ;;  %v1316_v22 = vpop.permute.xlu0 %1315 }
 0x180   : > { %1590 = vst [vmem:[%s3026_s24 + $0x68] sm:$0xff] %v2371_v23  ;;  %v3123_v33 = vadd.f32 %v1301_v28, %v1095_v29  ;;  %v1097_v34 = vpop.f32.mrb[17].mxu0 }
 0x181   : > { %1592 = vst [vmem:[%s3026_s24 + $0x78] sm:$0xff] %v2373_v27  ;;  %v3126_v37 = vadd.f32 %v1301_v28, %v1097_v34  ;;  %v1099_v41 = vpop.f32.mrb[18].mxu0  ;;  %v1206_v43 = vpop.f32.mrb[16].mxu1 }
 0x182   : > { %v3128_v46 = vadd.f32 %v1306_v31, %v1099_v41  ;;  %v3130_v48 = vadd.f32 %v1301_v28, %v1206_v43  ;;  %v1101_v50 = vpop.f32.mrb[19].mxu0  ;;  %v1208_v52 = vpop.f32.mrb[17].mxu1 }
 0x183   : > { %v2374_v56 = vpack.c.bf16 %v3126_v37, %v3123_v33  ;;  %v3134_v57 = vadd.f32 %v1306_v31, %v1101_v50  ;;  %v3136_v58 = vadd.f32 %v1301_v28, %v1208_v52  ;;  %v1210_v61 = vpop.f32.mrb[18].mxu1 }
 0x184   : > { %v3138_v0 = vadd.f32 %v1306_v31, %v1210_v61  ;;  %v1212_v3 = vpop.f32.mrb[19].mxu1 }
 0x185   : > { %3724 = vst [vmem:[#allocation8_spill] sm:$0xff] %v3136_v58  ;;  %1593 = vst [vmem:[%s3026_s24 + $0x80] sm:$0xff] %v2374_v56  ;;  %v2376_v4 = vpack.c.bf16 %v3134_v57, %v3128_v46  ;;  %v2375_v8 = vpack.c.bf16 %v3136_v58, %v3130_v48  ;;  %v3145_v10 = vadd.f32 %v1306_v31, %v1212_v3 }
 0x187   : > { %3725 = vst [vmem:[#allocation9_spill] sm:$0xff] %v3145_v10  ;;  %1595 = vst [vmem:[%s3026_s24 + $0x90] sm:$0xff] %v2376_v4  ;;  %v2377_v16 = vpack.c.bf16 %v3145_v10, %v3138_v0  ;;  %v1105_v21 = vpop.f32.mrb[20].mxu0 }
 0x188   : > { %1594 = vst [vmem:[%s3026_s24 + $0x88] sm:$0xff] %v2375_v8  ;;  %v3151_v23 = vadd.f32 %v1311_v11, %v1105_v21  ;;  %v1107_v27 = vpop.f32.mrb[21].mxu0 }
 0x189   : > { %1596 = vst [vmem:[%s3026_s24 + $0x98] sm:$0xff] %v2377_v16  ;;  %v3154_v28 = vadd.f32 %v1311_v11, %v1107_v27  ;;  %v1109_v29 = vpop.f32.mrb[22].mxu0  ;;  %v1216_v34 = vpop.f32.mrb[20].mxu1 }
 0x18a   : > { %v3156_v31 = vadd.f32 %v1316_v22, %v1109_v29  ;;  %v3158_v41 = vadd.f32 %v1311_v11, %v1216_v34  ;;  %v1111_v43 = vpop.f32.mrb[23].mxu0  ;;  %v1218_v50 = vpop.f32.mrb[21].mxu1 }
 0x18b   : > { %v2378_v52 = vpack.c.bf16 %v3154_v28, %v3151_v23  ;;  %v3162_v56 = vadd.f32 %v1316_v22, %v1111_v43  ;;  %v3164_v61 = vadd.f32 %v1311_v11, %v1218_v50  ;;  %v1220_v3 = vpop.f32.mrb[22].mxu1  ;;  %v1321_v29 = vpop.permute.xlu1 %1320 }
 0x18c   : > { %3726 = vst [vmem:[#allocation10_spill] sm:$0xff] %v3158_v41  ;;  %v3166_v4 = vadd.f32 %v1316_v22, %v1220_v3  ;;  %v1222_v8 = vpop.f32.mrb[23].mxu1  ;;  %v1326_v43 = vpop.permute.xlu0 %1325 }
 0x18d   : > { %3727 = vst [vmem:[#allocation11_spill] sm:$0xff] %v3162_v56  ;;  %3728 = vst [vmem:[#allocation12_spill] sm:$0xff] %v3164_v61  ;;  %v2380_v16 = vpack.c.bf16 %v3162_v56, %v3156_v31  ;;  %v2379_v21 = vpack.c.bf16 %v3164_v61, %v3158_v41  ;;  %v3173_v27 = vadd.f32 %v1316_v22, %v1222_v8 }
 0x18e   : > { %3729 = vst [vmem:[#allocation13_spill] sm:$0xff] %v3166_v4  ;;  %1597 = vst [vmem:[%s3026_s24 + $0xa0] sm:$0xff] %v2378_v52 }
 0x18f   : > { %3730 = vst [vmem:[#allocation14_spill] sm:$0xff] %v3173_v27  ;;  %1599 = vst [vmem:[%s3026_s24 + $0xb0] sm:$0xff] %v2380_v16  ;;  %v2381_v11 = vpack.c.bf16 %v3173_v27, %v3166_v4  ;;  %v1115_v34 = vpop.f32.mrb[24].mxu0 }
 0x190   : > { %1598 = vst [vmem:[%s3026_s24 + $0xa8] sm:$0xff] %v2379_v21  ;;  %v3179_v50 = vadd.f32 %v1321_v29, %v1115_v34  ;;  %v1117_v3 = vpop.f32.mrb[25].mxu0 }
 0x191   : > { %1600 = vst [vmem:[%s3026_s24 + $0xb8] sm:$0xff] %v2381_v11  ;;  %v3182_v52 = vadd.f32 %v1321_v29, %v1117_v3  ;;  %v1119_v58 = vpop.f32.mrb[26].mxu0  ;;  %v1226_v10 = vpop.f32.mrb[24].mxu1 }
 0x192   : > { %v3184_v61 = vadd.f32 %v1326_v43, %v1119_v58  ;;  %v3186_v22 = vadd.f32 %v1321_v29, %v1226_v10  ;;  %v1121_v8 = vpop.f32.mrb[27].mxu0  ;;  %v1228_v16 = vpop.f32.mrb[25].mxu1 }
 0x193   : > { %v2382_v21 = vpack.c.bf16 %v3182_v52, %v3179_v50  ;;  %v3190_v34 = vadd.f32 %v1326_v43, %v1121_v8  ;;  %v3192_v27 = vadd.f32 %v1321_v29, %v1228_v16  ;;  %v1230_v11 = vpop.f32.mrb[26].mxu1 }
 0x194   : > { %3731 = vst [vmem:[#allocation15_spill] sm:$0xff] %v3184_v61  ;;  %3732 = vst [vmem:[#allocation16_spill] sm:$0xff] %v3186_v22  ;;  %v3194_v3 = vadd.f32 %v1326_v43, %v1230_v11  ;;  %v1232_v41 = vpop.f32.mrb[27].mxu1 }
 0x195   : > { %3733 = vst [vmem:[#allocation17_spill] sm:$0xff] %v3190_v34  ;;  %3734 = vst [vmem:[#allocation18_spill] sm:$0xff] %v3192_v27  ;;  %v2384_v58 = vpack.c.bf16 %v3190_v34, %v3184_v61  ;;  %v2383_v10 = vpack.c.bf16 %v3192_v27, %v3186_v22  ;;  %v3201_v4 = vadd.f32 %v1326_v43, %v1232_v41 }
 0x196   : > { %3735 = vst [vmem:[#allocation19_spill] sm:$0xff] %v3194_v3  ;;  %1601 = vst [vmem:[%s3026_s24 + $0xc0] sm:$0xff] %v2382_v21 }
 0x197   : > { %3736 = vst [vmem:[#allocation20_spill] sm:$0xff] %v3201_v4  ;;  %1603 = vst [vmem:[%s3026_s24 + $0xd0] sm:$0xff] %v2384_v58  ;;  %v2385_v29 = vpack.c.bf16 %v3201_v4, %v3194_v3  ;;  %v1125_v8 = vpop.f32.mrb[32].mxu0 }
 0x198   : > { %1602 = vst [vmem:[%s3026_s24 + $0xc8] sm:$0xff] %v2383_v10  ;;  %v1126_v21 = vadd.f32 %v1125_v8, %v2999_v38  ;;  %v1127_v11 = vpop.f32.mrb[33].mxu0 }
 0x199   : > { %1604 = vst [vmem:[%s3026_s24 + $0xd8] sm:$0xff] %v2385_v29  ;;  %v1128_v43 = vadd.f32 %v1127_v11, %v3003_v40  ;;  %v1129_v58 = vpop.f32.mrb[34].mxu0  ;;  %v1236_v10 = vpop.f32.mrb[32].mxu1  ;;  %v1612_v40 = vld [vmem:[%s3026_s24 + $0xe0] sm:$0xff] }
 0x19a   : > { %v3220_v27 = vadd.f32 %v3001_v39, %v1126_v21  ;;  %v1237_v4 = vadd.f32 %v1236_v10, %v3005_v42  ;;  %v1130_v22 = vpop.f32.mrb[35].mxu0  ;;  %v1238_v38 = vpop.f32.mrb[33].mxu1 }
 0x19b   : > { %v3224_v8 = vadd.f32 %v3001_v39, %v1128_v43  ;;  %v1239_v3 = vadd.f32 %v1238_v38, %v3007_v44  ;;  %v1240_v29 = vpop.f32.mrb[34].mxu1  ;;  %v1615_v43 = vld [vmem:[%s3026_s24 + $0xe8] sm:$0xff] }
 0x19c   : > { %3741 = vst [vmem:[#allocation21_spill] sm:$0xff] %v3220_v27  ;;  %v3233_v21 = vadd.f32 %v3001_v39, %v1237_v4  ;;  %v1241_v11 = vpop.f32.mrb[35].mxu1  ;;  %1621 = sbr.rel (%p2352_p2) target bundleno = 430 (0x1ae), region = 67 }
 0x19d   : > { %3742 = vst [vmem:[#allocation22_spill] sm:$0xff] %v3224_v8  ;;  %v2386_v42 = vpack.c.bf16 %v3224_v8, %v3220_v27  ;;  %v3238_v22 = vadd.f32 %v3001_v39, %v1239_v3  ;;  %v2653_v39 = vmov (!%p2352_p2), 0.0  }
 0x19e   : > { %1623 = vst.msk [vmem:[%s2864_s23] sm:$0xff] (!%p2352_p2), %vm1622_vm11, %v2653_v39  ;;  %1624 = vst.msk [vmem:[%s2864_s23 + $0x8] sm:$0xff] (!%p2352_p2), %vm1622_vm11, %v2653_v39 }
 0x19f   : > { %v1613_v58 = vsel %vm1611_vm10, %v2386_v42, %v1612_v40  ;;  %v2387_v44 = vpack.c.bf16 %v3238_v22, %v3233_v21  ;;  %1625 = vst.msk [vmem:[%s2864_s23 + $0x10] sm:$0xff] (!%p2352_p2), %vm1622_vm11, %v2653_v39  ;;  %1626 = vst.msk [vmem:[%s2864_s23 + $0x18] sm:$0xff] (!%p2352_p2), %vm1622_vm11, %v2653_v39 }
 0x1a0   : > { %1614 = vst [vmem:[%s3026_s24 + $0xe0] sm:$0xff] %v1613_v58  ;;  %1627 = vst.msk [vmem:[%s2864_s23 + $0x20] sm:$0xff] (!%p2352_p2), %vm1622_vm11, %v2653_v39 }
 0x1a1   : > { %v1616_v16 = vsel %vm1611_vm10, %v2387_v44, %v1615_v43  ;;  %1628 = vst.msk [vmem:[%s2864_s23 + $0x28] sm:$0xff] (!%p2352_p2), %vm1622_vm11, %v2653_v39  ;;  %1629 = vst.msk [vmem:[%s2864_s23 + $0x30] sm:$0xff] (!%p2352_p2), %vm1622_vm11, %v2653_v39 }
 0x1a2   : > { %1617 = vst [vmem:[%s3026_s24 + $0xe8] sm:$0xff] %v1616_v16  ;;  %1630 = vst.msk [vmem:[%s2864_s23 + $0x38] sm:$0xff] (!%p2352_p2), %vm1622_vm11, %v2653_v39 }
 0x1a3   : > { %1631 = vst.msk [vmem:[%s2864_s23 + $0x40] sm:$0xff] %vm1622_vm11, %v2653_v39  ;;  %1632 = vst.msk [vmem:[%s2864_s23 + $0x48] sm:$0xff] %vm1622_vm11, %v2653_v39 }
 0x1a4   : > { %1633 = vst.msk [vmem:[%s2864_s23 + $0x50] sm:$0xff] %vm1622_vm11, %v2653_v39  ;;  %1634 = vst.msk [vmem:[%s2864_s23 + $0x58] sm:$0xff] %vm1622_vm11, %v2653_v39 }
 0x1a5   : > { %1635 = vst.msk [vmem:[%s2864_s23 + $0x60] sm:$0xff] %vm1622_vm11, %v2653_v39  ;;  %1636 = vst.msk [vmem:[%s2864_s23 + $0x68] sm:$0xff] %vm1622_vm11, %v2653_v39 }
 0x1a6   : > { %1639 = vst.msk [vmem:[%s2871_s26] sm:$0xff] %vm1622_vm11, %v2653_v39  ;;  %1640 = vst.msk [vmem:[%s2871_s26 + $0x8] sm:$0xff] %vm1622_vm11, %v2653_v39 }
 0x1a7   : > { %1641 = vst.msk [vmem:[%s2871_s26 + $0x10] sm:$0xff] %vm1622_vm11, %v2653_v39  ;;  %1642 = vst.msk [vmem:[%s2871_s26 + $0x18] sm:$0xff] %vm1622_vm11, %v2653_v39 }
 0x1a8   : > { %1643 = vst.msk [vmem:[%s2871_s26 + $0x20] sm:$0xff] %vm1622_vm11, %v2653_v39  ;;  %1644 = vst.msk [vmem:[%s2871_s26 + $0x28] sm:$0xff] %vm1622_vm11, %v2653_v39 }
 0x1a9   : > { %1645 = vst.msk [vmem:[%s2871_s26 + $0x30] sm:$0xff] %vm1622_vm11, %v2653_v39  ;;  %1646 = vst.msk [vmem:[%s2871_s26 + $0x38] sm:$0xff] %vm1622_vm11, %v2653_v39 }
 0x1aa   : > { %1647 = vst.msk [vmem:[%s2871_s26 + $0x40] sm:$0xff] %vm1622_vm11, %v2653_v39  ;;  %1648 = vst.msk [vmem:[%s2871_s26 + $0x48] sm:$0xff] %vm1622_vm11, %v2653_v39 }
 0x1ab   : > { %1649 = vst.msk [vmem:[%s2871_s26 + $0x50] sm:$0xff] %vm1622_vm11, %v2653_v39  ;;  %1650 = vst.msk [vmem:[%s2871_s26 + $0x58] sm:$0xff] %vm1622_vm11, %v2653_v39 }
 0x1ac   : > { %1651 = vst.msk [vmem:[%s2871_s26 + $0x60] sm:$0xff] %vm1622_vm11, %v2653_v39  ;;  %1652 = vst.msk [vmem:[%s2871_s26 + $0x68] sm:$0xff] %vm1622_vm11, %v2653_v39 }
 0x1ad   : > { %1638 = vst.msk [vmem:[%s2864_s23 + $0x70] sm:$0x7f] %vm1637_vm12, %v2653_v39  ;;  %1653 = vst.msk [vmem:[%s2871_s26 + $0x70] sm:$0x7f] %vm1637_vm12, %v2653_v39 }
 0x1ae PF: > { %v1679_v4 = vadd.f32 %v3042_v9, %v3039_v7  ;;  %v1669_v3 = vadd.f32 %v3012_v51, %v3010_v49  ;;  %v1684_v41 = vadd.f32 %v3050_v17, %v3044_v12  ;;  %v1674_v10 = vadd.f32 %v3020_v59, %v3014_v54  ;;  %s2449_s28 = smul.u32 (%p2761_p9), 120, %s2636_s29 }
 0x1af   : > { %v1694_v38 = vadd.f32 %v3078_v45, %v3072_v35  ;;  %v1689_v29 = vadd.f32 %v3070_v32, %v3067_v30  ;;  %v1704_v39 = vadd.f32 %v3106_v14, %v3100_v5  ;;  %v1699_v45 = vadd.f32 %v3098_v1, %v3095_v63 }
 0x1b0   : > { %v1680_v40 = vadd.f32 %v1679_v4, %v3046_v13  ;;  %v1670_v11 = vadd.f32 %v1669_v3, %v3016_v55  ;;  %v1685_v42 = vadd.f32 %v1684_v41, %v3054_v20  ;;  %v1675_v43 = vadd.f32 %v1674_v10, %v3024_v62  ;;  %s1984_s19 = sadd.s32 (%p2761_p9), %s2449_s28, %s2825_s14 }
 0x1b1   : > { %v1695_v16 = vadd.f32 %v1694_v38, %v3082_v47  ;;  %v1690_v41 = vadd.f32 %v1689_v29, %v3074_v36  ;;  %v1700_v38 = vadd.f32 %v1699_v45, %v3102_v6  ;;  %vm1739_vm13 = vcmask 1046528   ;;  %s2354_s15 = sshll.u32 (%p2761_p9), %s1984_s19, 2 }
 0x1b2   : > { %v1681_v58 = vadd.f32 %v1680_v40, %v3052_v18  ;;  %v1671_v44 = vadd.f32 %v1670_v11, %v3022_v60  ;;  %v1686_v4 = vadd.f32 %v1685_v42, %v3061_v24  ;;  %v1676_v3 = vadd.f32 %v1675_v43, %v3033_v2  ;;  %s3603_s29 = scalar_lea.vmem (%p2761_p9), %s3685_s5, %s2354_s15 }
 0x1b3   : > { %v1696_v10 = vadd.f32 %v1695_v16, %v3089_v53  ;;  %v1705_v40 = vadd.f32 %v1704_v39, %v3110_v19  ;;  %v1691_v11 = vadd.f32 %v1690_v41, %v3080_v25  ;;  %v1709_v42 = vadd.f32 %v3126_v37, %v3123_v33  ;;  %v3743_v41 = vld [vmem:[#allocation13_spill] sm:$0xff] }
 0x1b4   : > { %1682 = vadd.xlane.f32.xlu1 %v1681_v58  ;;  %1672 = vadd.xlane.f32.xlu0 %v1671_v44  ;;  %v1714_v58 = vadd.f32 %v3134_v57, %v3128_v46  ;;  %v1701_v29 = vadd.f32 %v1700_v38, %v3108_v15  ;;  %v1724_v44 = vadd.f32 %v3162_v56, %v3156_v31  ;;  %v3746_v56 = vld [vmem:[#allocation10_spill] sm:$0xff]  ;;  %vm1764_vm14 = vcmask 7168  }
 0x1b5   : > { %v1706_v43 = vadd.f32 %v1705_v40, %v3117_v26  ;;  %v1710_v16 = vadd.f32 %v1709_v42, %v3130_v48  ;;  %v1719_v39 = vadd.f32 %v3154_v28, %v3151_v23  ;;  %v1729_v38 = vadd.f32 %v3182_v52, %v3179_v50  ;;  %v3745_v42 = vld [vmem:[#allocation8_spill] sm:$0xff] }
 0x1b6   : > { %v1715_v45 = vadd.f32 %v1714_v58, %v3138_v0  ;;  %v1725_v40 = vadd.f32 %v1724_v44, %v3743_v41  ;;  %v1741_v44 = vsel %vm1739_vm13, %v3224_v8, 0.0  ;;  %v3748_v41 = vld [vmem:[#allocation16_spill] sm:$0xff]  ;;  %v1801_v8 = vmul.f32 %v3020_v59, %v3020_v59 }
 0x1b7   : > { %v1711_v26 = vadd.f32 %v1710_v16, %v3745_v42  ;;  %v1812_v59 = vmul.f32 %v3067_v30, %v3067_v30  ;;  %vm1779_vm15 = vcmask 6144  }
 0x1b8   : > { %1687 = vadd.xlane.f32.xlu1 %v1686_v4  ;;  %1677 = vadd.xlane.f32.xlu0 %v1676_v3  ;;  %v1796_v4 = vmul.f32 %v3010_v49, %v3010_v49  ;;  %v1797_v3 = vmul.f32 %v3012_v51, %v3012_v51  ;;  %v1720_v49 = vadd.f32 %v1719_v39, %v3746_v56  ;;  %v1740_v51 = vsel %vm1739_vm13, %v3220_v27, 0.0 }
 0x1b9   : > { %v1730_v39 = vadd.f32 %v1729_v38, %v3748_v41  ;;  %v1806_v38 = vmul.f32 %v3046_v13, %v3046_v13  ;;  %v3751_v13 = vld [vmem:[#allocation20_spill] sm:$0xff] }
 0x1bc   : > { %1697 = vadd.xlane.f32.xlu1 %v1696_v10  ;;  %1692 = vadd.xlane.f32.xlu0 %v1691_v11  ;;  %v1734_v10 = vadd.f32 %v3190_v34, %v3184_v61  ;;  %v3744_v11 = vld [vmem:[#allocation9_spill] sm:$0xff]  ;;  %v1798_v34 = vmul.f32 %v3016_v55, %v3016_v55  ;;  %v1856_v61 = vadd.f32 %v1797_v3, %v1796_v4  ;;  %v3749_v55 = vld [vmem:[#allocation14_spill] sm:$0xff]  ;;  %v3750_v3 = vld [vmem:[#allocation12_spill] sm:$0xff] }
 0x1bd   : > { %v1716_v58 = vadd.f32 %v1715_v45, %v3744_v11  ;;  %v3747_v45 = vld [vmem:[#allocation19_spill] sm:$0xff]  ;;  %v1800_v11 = vmul.f32 %v3014_v54, %v3014_v54  ;;  %v1726_v4 = vadd.f32 %v1725_v40, %v3749_v55  ;;  %v1721_v27 = vadd.f32 %v1720_v49, %v3750_v3 }
 0x1be   : > { %v1735_v16 = vadd.f32 %v1734_v10, %v3747_v45  ;;  %v1743_v10 = vsel %vm1739_vm13, %v3233_v21, 0.0  ;;  %v1857_v54 = vadd.f32 %v1856_v61, %v1798_v34  ;;  %v1802_v40 = vmul.f32 %v3024_v62, %v3024_v62  ;;  %v3752_v34 = vld [vmem:[#allocation18_spill] sm:$0xff] }
 0x1bf   : > { %v1809_v49 = vmul.f32 %v3050_v17, %v3050_v17  ;;  %v1807_v62 = vmul.f32 %v3052_v18, %v3052_v18 }
 0x1c0   : > { %1707 = vadd.xlane.f32.xlu1 %v1706_v43  ;;  %1702 = vadd.xlane.f32.xlu0 %v1701_v29  ;;  %v1804_v43 = vmul.f32 %v3039_v7, %v3039_v7  ;;  %v1805_v29 = vmul.f32 %v3042_v9, %v3042_v9  ;;  %v1742_v7 = vadd.f32 %v1741_v44, %v1740_v51 }
 0x1c1   : > { %v1799_v9 = vmul.f32 %v3022_v60, %v3022_v60  ;;  %v1808_v60 = vmul.f32 %v3044_v12, %v3044_v12  ;;  %v1736_v61 = vadd.f32 %v1735_v16, %v3751_v13  ;;  %v1731_v51 = vadd.f32 %v1730_v39, %v3752_v34  ;;  %v3753_v39 = vld [vmem:[#allocation6_spill] sm:$0xff] }
 0x1c2   : > { %v1866_v45 = vadd.f32 %v1805_v29, %v1804_v43  ;;  %v1744_v30 = vadd.f32 %v1743_v10, %v1742_v7  ;;  %v1821_v12 = vmul.f32 %v3098_v1, %v3098_v1  ;;  %v1803_v43 = vmul.f32 %v3033_v2, %v3033_v2 }
 0x1c3   : > { %v1858_v17 = vadd.f32 %v1857_v54, %v1799_v9  ;;  %v1810_v16 = vmul.f32 %v3054_v20, %v3054_v20  ;;  %v1871_v18 = vadd.f32 %v1809_v49, %v1808_v60  ;;  %v1816_v1 = vmul.f32 %v3072_v35, %v3072_v35 }
 0x1c4   : > { %1717 = vadd.xlane.f32.xlu1 %v1716_v58  ;;  %1712 = vadd.xlane.f32.xlu0 %v1711_v26  ;;  %v1813_v26 = vmul.f32 %v3070_v32, %v3070_v32  ;;  %v1861_v58 = vadd.f32 %v1801_v8, %v1800_v11  ;;  %v1745_v32 = vsel %vm1739_vm13, %v3238_v22, 0.0  ;;  %v1820_v8 = vmul.f32 %v3095_v63, %v3095_v63 }
 0x1c5   : > { %v1867_v11 = vadd.f32 %v1866_v45, %v1806_v38  ;;  %v1746_v63 = vadd.f32 %v1745_v32, %v1744_v30  ;;  %v1817_v45 = vmul.f32 %v3753_v39, %v3753_v39  ;;  %v1828_v2 = vmul.f32 %v3123_v33, %v3123_v33 }
 0x1c6   : > { %v1876_v44 = vadd.f32 %v1813_v26, %v1812_v59  ;;  %v1862_v29 = vadd.f32 %v1861_v58, %v1802_v40  ;;  %v1829_v20 = vmul.f32 %v3126_v37, %v3126_v37  ;;  %v1815_v9 = vmul.f32 %v3080_v25, %v3080_v25 }
 0x1c7   : > { %v1868_v7 = vadd.f32 %v1867_v11, %v1807_v62  ;;  %v1811_v35 = vmul.f32 %v3061_v24, %v3061_v24  ;;  %v1872_v54 = vadd.f32 %v1871_v18, %v1810_v16  ;;  %v1881_v59 = vadd.f32 %v1817_v45, %v1816_v1  ;;  %v3758_v16 = vld [vmem:[#allocation9_spill] sm:$0xff] }
 0x1c8   : > { %1727 = vadd.xlane.f32.xlu1 %v1726_v4  ;;  %1722 = vadd.xlane.f32.xlu0 %v1721_v27  ;;  %v1814_v27 = vmul.f32 %v3074_v36, %v3074_v36  ;;  %v1822_v36 = vmul.f32 %v3102_v6, %v3102_v6  ;;  %v1886_v4 = vadd.f32 %v1821_v12, %v1820_v8  ;;  %v3754_v12 = vld [vmem:[#allocation11_spill] sm:$0xff]  ;;  %v3759_v45 = vld [vmem:[#allocation13_spill] sm:$0xff] }
 0x1c9   : > { %v1863_v38 = vadd.f32 %v1862_v29, %v1803_v43  ;;  %v1818_v6 = vmul.f32 %v3082_v47, %v3082_v47  ;;  %v1824_v33 = vmul.f32 %v3100_v5, %v3100_v5  ;;  %v1825_v37 = vmul.f32 %v3106_v14, %v3106_v14 }
 0x1ca   : > { %v1877_v10 = vadd.f32 %v1876_v44, %v1814_v27  ;;  %v1823_v25 = vmul.f32 %v3108_v15, %v3108_v15  ;;  %v1887_v26 = vadd.f32 %v1886_v4, %v1822_v36  ;;  %v1830_v24 = vmul.f32 %v3130_v48, %v3130_v48 }
 0x1cb   : > { %v1896_v40 = vadd.f32 %v1829_v20, %v1828_v2  ;;  %v1836_v47 = vmul.f32 %v3151_v23, %v3151_v23  ;;  %v1837_v58 = vmul.f32 %v3154_v28, %v3154_v28  ;;  %v1832_v5 = vmul.f32 %v3128_v46, %v3128_v46  ;;  %v3760_v2 = vld [vmem:[#allocation15_spill] sm:$0xff] }
 0x1cc   : > { %1737 = vadd.xlane.f32.xlu1 %v1736_v61  ;;  %1732 = vadd.xlane.f32.xlu0 %v1731_v51  ;;  %v1833_v14 = vmul.f32 %v3134_v57, %v3134_v57  ;;  %v1878_v60 = vadd.f32 %v1877_v10, %v1815_v9  ;;  %v1873_v49 = vadd.f32 %v1872_v54, %v1811_v35 }
 0x1cd   : > { %v1819_v15 = vmul.f32 %v3089_v53, %v3089_v53  ;;  %v1882_v48 = vadd.f32 %v1881_v59, %v1818_v6  ;;  %v1826_v23 = vmul.f32 %v3110_v19, %v3110_v19  ;;  %v1891_v61 = vadd.f32 %v1825_v37, %v1824_v33 }
 0x1ce   : > { %v1888_v51 = vadd.f32 %v1887_v26, %v1823_v25  ;;  %v1831_v28 = vmul.f32 %v3745_v42, %v3745_v42  ;;  %v1897_v46 = vadd.f32 %v1896_v40, %v1830_v24  ;;  %v1838_v57 = vmul.f32 %v3746_v56, %v3746_v56  ;;  %v3762_v26 = vld [vmem:[#allocation19_spill] sm:$0xff] }
 0x1cf   : > { %v1906_v30 = vadd.f32 %v1837_v58, %v1836_v47  ;;  %v1834_v32 = vmul.f32 %v3138_v0, %v3138_v0  ;;  %v1901_v53 = vadd.f32 %v1833_v14, %v1832_v5  ;;  %v1844_v62 = vmul.f32 %v3179_v50, %v3179_v50  ;;  %v3756_v50 = vld [vmem:[#allocation21_spill] sm:$0xff] }
 0x1d0   : > { %1859 = vadd.xlane.f32.xlu1 %v1858_v17  ;;  %1747 = vadd.xlane.f32.xlu0 %v1746_v63  ;;  %v1845_v19 = vmul.f32 %v3182_v52, %v3182_v52  ;;  %v1840_v8 = vmul.f32 %v3156_v31, %v3156_v31  ;;  %v1841_v42 = vmul.f32 %v3754_v12, %v3754_v12  ;;  %v3755_v17 = vld [vmem:[#allocation7_spill] sm:$0xff]  ;;  %v3757_v52 = vld [vmem:[#allocation22_spill] sm:$0xff] }
 0x1d1   : > { %v1883_v56 = vadd.f32 %v1882_v48, %v1819_v15  ;;  %v1827_v11 = vmul.f32 %v3755_v17, %v3755_v17  ;;  %v1892_v0 = vadd.f32 %v1891_v61, %v1826_v23  ;;  %v1839_v27 = vmul.f32 %v3750_v3, %v3750_v3  ;;  %v1656_v15 = vld [vmem:[%s2864_s23 + $0x10] sm:$0xff]  ;;  %v1654_v48 = vld [vmem:[%s2864_s23] sm:$0xff]  ;;  %v1661_v17 = vld [vmem:[%s2864_s23 + $0x38] sm:$0xff] }
 0x1d2   : > { %v1852_v44 = vmul.f32 %v3756_v50, %v3756_v50  ;;  %v1853_v43 = vmul.f32 %v3757_v52, %v3757_v52  ;;  %v1898_v31 = vadd.f32 %v1897_v46, %v1831_v28  ;;  %v1907_v29 = vadd.f32 %v1906_v30, %v1838_v57  ;;  %v1657_v28 = vld [vmem:[%s2864_s23 + $0x18] sm:$0xff]  ;;  %v1655_v46 = vld [vmem:[%s2864_s23 + $0x8] sm:$0xff] }
 0x1d3   : > { %v1835_v18 = vmul.f32 %v3758_v16, %v3758_v16  ;;  %v1846_v63 = vmul.f32 %v3748_v41, %v3748_v41  ;;  %v1902_v1 = vadd.f32 %v1901_v53, %v1834_v32  ;;  %v1916_v39 = vadd.f32 %v1845_v19, %v1844_v62  ;;  %v1659_v62 = vld [vmem:[%s2864_s23 + $0x28] sm:$0xff]  ;;  %v1658_v19 = vld [vmem:[%s2864_s23 + $0x20] sm:$0xff] }
 0x1d4   : > { %1869 = vadd.xlane.f32.xlu1 %v1868_v7  ;;  %1864 = vadd.xlane.f32.xlu0 %v1863_v38  ;;  %v1842_v36 = vmul.f32 %v3759_v45, %v3759_v45  ;;  %v1911_v3 = vadd.f32 %v1841_v42, %v1840_v8  ;;  %v1893_v4 = vadd.f32 %v1892_v0, %v1827_v11  ;;  %v3761_v7 = vld [vmem:[#allocation17_spill] sm:$0xff]  ;;  %v1926_v41 = vsel %vm1739_vm13, %v1852_v44, 0.0  ;;  %v1660_v11 = vld [vmem:[%s2864_s23 + $0x30] sm:$0xff]  ;;  %v1663_v52 = vld [vmem:[%s2864_s23 + $0x48] sm:$0xff] }
 0x1d5   : > { %v1848_v20 = vmul.f32 %v3760_v2, %v3760_v2  ;;  %v1849_v9 = vmul.f32 %v3761_v7, %v3761_v7  ;;  %v1854_v10 = vmul.f32 %v3233_v21, %v3233_v21  ;;  %v1927_v38 = vsel %vm1739_vm13, %v1853_v43, 0.0  ;;  %v1662_v43 = vld [vmem:[%s2864_s23 + $0x40] sm:$0xff] }
 0x1d6   : > { %v1908_v35 = vadd.f32 %v1907_v29, %v1839_v27  ;;  %v1847_v54 = vmul.f32 %v3752_v34, %v3752_v34  ;;  %v1903_v6 = vadd.f32 %v1902_v1, %v1835_v18  ;;  %v1917_v59 = vadd.f32 %v1916_v39, %v1846_v63  ;;  %v1665_v63 = vld [vmem:[%s2864_s23 + $0x58] sm:$0xff]  ;;  %v1664_v1 = vld [vmem:[%s2864_s23 + $0x50] sm:$0xff]  ;;  %v1666_v2 = vld [vmem:[%s2864_s23 + $0x60] sm:$0xff] }
 0x1d7   : > { %v1843_v33 = vmul.f32 %v3749_v55, %v3749_v55  ;;  %v1912_v37 = vadd.f32 %v1911_v3, %v1842_v36  ;;  %v1928_v25 = vadd.f32 %v1927_v38, %v1926_v41  ;;  %v1850_v21 = vmul.f32 %v3762_v26, %v3762_v26  ;;  %v1781_v41 = vld [vmem:[%s2871_s26] sm:$0xff]  ;;  %v1668_v38 = vld [vmem:[%s2864_s23 + $0x70] sm:$0x7f] }
 0x1d8   : > { %1879 = vadd.xlane.f32.xlu1 %v1878_v60  ;;  %1874 = vadd.xlane.f32.xlu0 %v1873_v49  ;;  %v1921_v24 = vadd.f32 %v1849_v9, %v1848_v20  ;;  %v1855_v40 = vmul.f32 %v3238_v22, %v3238_v22  ;;  %v1929_v47 = vsel %vm1739_vm13, %v1854_v10, 0.0  ;;  %v1918_v34 = vadd.f32 %v1917_v59, %v1847_v54 }
 0x1d9   : > { %v1913_v58 = vadd.f32 %v1912_v37, %v1843_v33  ;;  %v1930_v55 = vadd.f32 %v1929_v47, %v1928_v25  ;;  %v1851_v5 = vmul.f32 %v3751_v13, %v3751_v13  ;;  %v1783_v33 = vld [vmem:[%s2871_s26 + $0x10] sm:$0xff]  ;;  %v1782_v37 = vld [vmem:[%s2871_s26 + $0x8] sm:$0xff]  ;;  %v1784_v47 = vld [vmem:[%s2871_s26 + $0x18] sm:$0xff] }
 0x1da   : > { %v1922_v14 = vadd.f32 %v1921_v24, %v1850_v21  ;;  %v1931_v60 = vsel %vm1739_vm13, %v1855_v40, 0.0  ;;  %v1785_v40 = vld [vmem:[%s2871_s26 + $0x20] sm:$0xff] }
 0x1db   : > { %v1932_v22 = vadd.f32 %v1931_v60, %v1930_v55  ;;  %v1786_v60 = vld [vmem:[%s2871_s26 + $0x28] sm:$0xff] }
 0x1dc   : > { %1889 = vadd.xlane.f32.xlu1 %v1888_v51  ;;  %1884 = vadd.xlane.f32.xlu0 %v1883_v56  ;;  %v1923_v49 = vadd.f32 %v1922_v14, %v1851_v5  ;;  %v1787_v14 = vld [vmem:[%s2871_s26 + $0x30] sm:$0xff] }
 0x1e0   : > { %1899 = vadd.xlane.f32.xlu1 %v1898_v31  ;;  %1894 = vadd.xlane.f32.xlu0 %v1893_v4  ;;  %v1667_v4 = vld [vmem:[%s2864_s23 + $0x68] sm:$0xff] }
 0x1e4   : > { %1909 = vadd.xlane.f32.xlu1 %v1908_v35  ;;  %1904 = vadd.xlane.f32.xlu0 %v1903_v6 }
 0x1e8   : > { %1919 = vadd.xlane.f32.xlu1 %v1918_v34  ;;  %1914 = vadd.xlane.f32.xlu0 %v1913_v58 }
 0x1ec   : > { %1933 = vadd.xlane.f32.xlu1 %v1932_v22  ;;  %1924 = vadd.xlane.f32.xlu0 %v1923_v49 }
 0x241   : > { %v1683_v13 = vpop.xlane.xlu1 %1682  ;;  %v1673_v23 = vpop.xlane.xlu0 %1672 }
 0x242   : > { %v1751_v61 = vadd.f32 %v1683_v13, %v1656_v15  ;;  %v1749_v51 = vadd.f32 %v1673_v23, %v1654_v48  ;;  %v1789_v13 = vld [vmem:[%s2871_s26 + $0x40] sm:$0xff]  ;;  %v1788_v23 = vld [vmem:[%s2871_s26 + $0x38] sm:$0xff] }
 0x244   : > { %1767 = vst.msk [vmem:[%s2864_s23 + $0x10] sm:$0xff] %vm1764_vm14, %v1751_v61  ;;  %1765 = vst.msk [vmem:[%s2864_s23] sm:$0xff] %vm1764_vm14, %v1749_v51 }
 0x245   : > { %v1688_v57 = vpop.xlane.xlu1 %1687  ;;  %v1678_v30 = vpop.xlane.xlu0 %1677 }
 0x246   : > { %v1752_v32 = vadd.f32 %v1688_v57, %v1657_v28  ;;  %v1750_v53 = vadd.f32 %v1678_v30, %v1655_v46  ;;  %v1791_v57 = vld [vmem:[%s2871_s26 + $0x50] sm:$0xff]  ;;  %v1790_v30 = vld [vmem:[%s2871_s26 + $0x48] sm:$0xff] }
 0x248   : > { %1768 = vst.msk [vmem:[%s2864_s23 + $0x18] sm:$0xff] %vm1764_vm14, %v1752_v32  ;;  %1766 = vst.msk [vmem:[%s2864_s23 + $0x8] sm:$0xff] %vm1764_vm14, %v1750_v53 }
 0x249   : > { %v1698_v8 = vpop.xlane.xlu1 %1697  ;;  %v1693_v12 = vpop.xlane.xlu0 %1692 }
 0x24a   : > { %v1754_v42 = vadd.f32 %v1698_v8, %v1659_v62  ;;  %v1753_v56 = vadd.f32 %v1693_v12, %v1658_v19  ;;  %v1793_v8 = vld [vmem:[%s2871_s26 + $0x60] sm:$0xff]  ;;  %v1792_v12 = vld [vmem:[%s2871_s26 + $0x58] sm:$0xff] }
 0x24c   : > { %1770 = vst.msk [vmem:[%s2864_s23 + $0x28] sm:$0xff] %vm1764_vm14, %v1754_v42  ;;  %1769 = vst.msk [vmem:[%s2864_s23 + $0x20] sm:$0xff] %vm1764_vm14, %v1753_v56 }
 0x24d   : > { %v1708_v0 = vpop.xlane.xlu1 %1707  ;;  %v1703_v27 = vpop.xlane.xlu0 %1702 }
 0x24e   : > { %v1756_v50 = vadd.f32 %v1708_v0, %v1661_v17  ;;  %v1755_v44 = vadd.f32 %v1703_v27, %v1660_v11  ;;  %v1795_v0 = vld [vmem:[%s2871_s26 + $0x70] sm:$0x7f]  ;;  %v1794_v27 = vld [vmem:[%s2871_s26 + $0x68] sm:$0xff] }
 0x250   : > { %1772 = vst.msk [vmem:[%s2864_s23 + $0x38] sm:$0xff] %vm1764_vm14, %v1756_v50  ;;  %1771 = vst.msk [vmem:[%s2864_s23 + $0x30] sm:$0xff] %vm1764_vm14, %v1755_v44 }
 0x251   : > { %v1718_v31 = vpop.xlane.xlu1 %1717  ;;  %v1713_v29 = vpop.xlane.xlu0 %1712 }
 0x252   : > { %v1758_v16 = vadd.f32 %v1718_v31, %v1663_v52  ;;  %v1757_v18 = vadd.f32 %v1713_v29, %v1662_v43  ;;  %v1999_v31 = vld [vmem:[%s3026_s24] sm:$0xff] (%p2761_p9)  ;;  %v2001_v29 = vld [vmem:[%s3026_s24 + $0x8] sm:$0xff] (%p2761_p9) }
 0x253   : > { %2000 = vst [vmem:[%s3603_s29] sm:$0xff] (%p2761_p9), %v1999_v31  ;;  %2002 = vst [vmem:[%s3603_s29 + $0x8] sm:$0xff] (%p2761_p9), %v2001_v29 }
 0x254   : > { %1774 = vst.msk [vmem:[%s2864_s23 + $0x48] sm:$0xff] %vm1764_vm14, %v1758_v16  ;;  %1773 = vst.msk [vmem:[%s2864_s23 + $0x40] sm:$0xff] %vm1764_vm14, %v1757_v18  ;;  %v2003_v16 = vld [vmem:[%s3026_s24 + $0x10] sm:$0xff] (%p2761_p9)  ;;  %v2005_v18 = vld [vmem:[%s3026_s24 + $0x18] sm:$0xff] (%p2761_p9) }
 0x255   : > { %v1728_v39 = vpop.xlane.xlu1 %1727  ;;  %v1723_v45 = vpop.xlane.xlu0 %1722  ;;  %2004 = vst [vmem:[%s3603_s29 + $0x20] sm:$0xff] (%p2761_p9), %v2003_v16  ;;  %2006 = vst [vmem:[%s3603_s29 + $0x28] sm:$0xff] (%p2761_p9), %v2005_v18 }
 0x256   : > { %v1760_v36 = vadd.f32 %v1728_v39, %v1665_v63  ;;  %v1759_v3 = vadd.f32 %v1723_v45, %v1664_v1  ;;  %v2007_v63 = vld [vmem:[%s3026_s24 + $0x20] sm:$0xff] (%p2761_p9)  ;;  %v2009_v1 = vld [vmem:[%s3026_s24 + $0x28] sm:$0xff] (%p2761_p9)  ;;  %v2011_v39 = vld [vmem:[%s3026_s24 + $0x30] sm:$0xff] (%p2761_p9) }
 0x257   : > { %v2013_v45 = vld [vmem:[%s3026_s24 + $0x38] sm:$0xff] (%p2761_p9)  ;;  %2008 = vst [vmem:[%s3603_s29 + $0x40] sm:$0xff] (%p2761_p9), %v2007_v63  ;;  %2010 = vst [vmem:[%s3603_s29 + $0x48] sm:$0xff] (%p2761_p9), %v2009_v1 }
 0x258   : > { %1776 = vst.msk [vmem:[%s2864_s23 + $0x58] sm:$0xff] %vm1764_vm14, %v1760_v36  ;;  %1775 = vst.msk [vmem:[%s2864_s23 + $0x50] sm:$0xff] %vm1764_vm14, %v1759_v3  ;;  %v2015_v36 = vld [vmem:[%s3026_s24 + $0x40] sm:$0xff] (%p2761_p9)  ;;  %v2017_v3 = vld [vmem:[%s3026_s24 + $0x48] sm:$0xff] (%p2761_p9) }
 0x259   : > { %v1738_v20 = vpop.xlane.xlu1 %1737  ;;  %v1733_v7 = vpop.xlane.xlu0 %1732  ;;  %2012 = vst [vmem:[%s3603_s29 + $0x60] sm:$0xff] (%p2761_p9), %v2011_v39  ;;  %2014 = vst [vmem:[%s3603_s29 + $0x68] sm:$0xff] (%p2761_p9), %v2013_v45 }
 0x25a   : > { %v1762_v9 = vadd.f32 %v1738_v20, %v1667_v4  ;;  %v1761_v10 = vadd.f32 %v1733_v7, %v1666_v2  ;;  %v2019_v4 = vld [vmem:[%s3026_s24 + $0x50] sm:$0xff] (%p2761_p9)  ;;  %v2021_v2 = vld [vmem:[%s3026_s24 + $0x58] sm:$0xff] (%p2761_p9)  ;;  %v2023_v20 = vld [vmem:[%s3026_s24 + $0x60] sm:$0xff] (%p2761_p9)  ;;  %2016 = vst [vmem:[%s3603_s29 + $0x80] sm:$0xff] (%p2761_p9), %v2015_v36 }
 0x25b   : > { %v2025_v7 = vld [vmem:[%s3026_s24 + $0x68] sm:$0xff] (%p2761_p9)  ;;  %2018 = vst [vmem:[%s3603_s29 + $0x88] sm:$0xff] (%p2761_p9), %v2017_v3  ;;  %2020 = vst [vmem:[%s3603_s29 + $0xa0] sm:$0xff] (%p2761_p9), %v2019_v4 }
 0x25c   : > { %1778 = vst.msk [vmem:[%s2864_s23 + $0x68] sm:$0xff] %vm1764_vm14, %v1762_v9  ;;  %1777 = vst.msk [vmem:[%s2864_s23 + $0x60] sm:$0xff] %vm1764_vm14, %v1761_v10  ;;  %v2027_v9 = vld [vmem:[%s3026_s24 + $0x70] sm:$0xff] (%p2761_p9)  ;;  %v2029_v10 = vld [vmem:[%s3026_s24 + $0x78] sm:$0xff] (%p2761_p9) }
 0x25d   : > { %v1860_v35 = vpop.xlane.xlu1 %1859  ;;  %v1748_v54 = vpop.xlane.xlu0 %1747  ;;  %2022 = vst [vmem:[%s3603_s29 + $0xa8] sm:$0xff] (%p2761_p9), %v2021_v2  ;;  %2024 = vst [vmem:[%s3603_s29 + $0xc0] sm:$0xff] (%p2761_p9), %v2023_v20 }
 0x25e   : > { %v1935_v6 = vadd.f32 %v1860_v35, %v1781_v41  ;;  %v1763_v59 = vadd.f32 %v1748_v54, %v1668_v38  ;;  %2026 = vst [vmem:[%s3603_s29 + $0xc8] sm:$0xff] (%p2761_p9), %v2025_v7  ;;  %2028 = vst [vmem:[%s3603_s29 + $0xe0] sm:$0xff] (%p2761_p9), %v2027_v9  ;;  %v2031_v41 = vld [vmem:[%s3026_s24 + $0x80] sm:$0xff] (%p2761_p9)  ;;  %v2033_v38 = vld [vmem:[%s3026_s24 + $0x88] sm:$0xff] (%p2761_p9) }
 0x25f   : > { %2030 = vst [vmem:[%s3603_s29 + $0xe8] sm:$0xff] (%p2761_p9), %v2029_v10  ;;  %2032 = vst [vmem:[%s3603_s29 + $0x100] sm:$0xff] (%p2761_p9), %v2031_v41  ;;  %v2035_v35 = vld [vmem:[%s3026_s24 + $0x90] sm:$0xff] (%p2761_p9)  ;;  %v2037_v54 = vld [vmem:[%s3026_s24 + $0x98] sm:$0xff] (%p2761_p9) }
 0x260   : > { %1950 = vst.msk [vmem:[%s2871_s26] sm:$0xff] %vm1764_vm14, %v1935_v6  ;;  %2034 = vst [vmem:[%s3603_s29 + $0x108] sm:$0xff] (%p2761_p9), %v2033_v38  ;;  %v2039_v6 = vld [vmem:[%s3026_s24 + $0xa0] sm:$0xff] (%p2761_p9) }
 0x261   : > { %1780 = vst.msk [vmem:[%s2864_s23 + $0x70] sm:$0x7f] %vm1779_vm15, %v1763_v59  ;;  %v1870_v25 = vpop.xlane.xlu1 %1869  ;;  %v1865_v26 = vpop.xlane.xlu0 %1864  ;;  %2036 = vst [vmem:[%s3603_s29 + $0x120] sm:$0xff] (%p2761_p9), %v2035_v35  ;;  %v2041_v59 = vld [vmem:[%s3026_s24 + $0xa8] sm:$0xff] (%p2761_p9) }
 0x262   : > { %v1937_v21 = vadd.f32 %v1870_v25, %v1783_v33  ;;  %v1936_v24 = vadd.f32 %v1865_v26, %v1782_v37  ;;  %2038 = vst [vmem:[%s3603_s29 + $0x128] sm:$0xff] (%p2761_p9), %v2037_v54  ;;  %2040 = vst [vmem:[%s3603_s29 + $0x140] sm:$0xff] (%p2761_p9), %v2039_v6  ;;  %v2043_v33 = vld [vmem:[%s3026_s24 + $0xb0] sm:$0xff] (%p2761_p9)  ;;  %v2045_v37 = vld [vmem:[%s3026_s24 + $0xb8] sm:$0xff] (%p2761_p9) }
 0x263   : > { %2042 = vst [vmem:[%s3603_s29 + $0x148] sm:$0xff] (%p2761_p9), %v2041_v59  ;;  %2044 = vst [vmem:[%s3603_s29 + $0x160] sm:$0xff] (%p2761_p9), %v2043_v33  ;;  %v2047_v25 = vld [vmem:[%s3026_s24 + $0xc0] sm:$0xff] (%p2761_p9)  ;;  %v2049_v26 = vld [vmem:[%s3026_s24 + $0xc8] sm:$0xff] (%p2761_p9) }
 0x264   : > { %1952 = vst.msk [vmem:[%s2871_s26 + $0x10] sm:$0xff] %vm1764_vm14, %v1937_v21  ;;  %1951 = vst.msk [vmem:[%s2871_s26 + $0x8] sm:$0xff] %vm1764_vm14, %v1936_v24  ;;  %v2051_v21 = vld [vmem:[%s3026_s24 + $0xd0] sm:$0xff] (%p2761_p9)  ;;  %v2053_v24 = vld [vmem:[%s3026_s24 + $0xd8] sm:$0xff] (%p2761_p9) }
 0x265   : > { %v1880_v34 = vpop.xlane.xlu1 %1879  ;;  %v1875_v58 = vpop.xlane.xlu0 %1874  ;;  %2046 = vst [vmem:[%s3603_s29 + $0x168] sm:$0xff] (%p2761_p9), %v2045_v37  ;;  %2048 = vst [vmem:[%s3603_s29 + $0x180] sm:$0xff] (%p2761_p9), %v2047_v25 }
 0x266   : > { %v1939_v55 = vadd.f32 %v1880_v34, %v1785_v40  ;;  %v1938_v5 = vadd.f32 %v1875_v58, %v1784_v47  ;;  %2050 = vst [vmem:[%s3603_s29 + $0x188] sm:$0xff] (%p2761_p9), %v2049_v26  ;;  %2052 = vst [vmem:[%s3603_s29 + $0x1a0] sm:$0xff] (%p2761_p9), %v2051_v21  ;;  %v2055_v40 = vld [vmem:[%s3026_s24 + $0xe0] sm:$0xff] (%p2761_p9)  ;;  %v2057_v47 = vld [vmem:[%s3026_s24 + $0xe8] sm:$0xff] (%p2761_p9) }
 0x267   : > { %2054 = vst [vmem:[%s3603_s29 + $0x1a8] sm:$0xff] (%p2761_p9), %v2053_v24  ;;  %2056 = vst [vmem:[%s3603_s29 + $0x1c0] sm:$0xff] (%p2761_p9), %v2055_v40 }
 0x268   : > { %1954 = vst.msk [vmem:[%s2871_s26 + $0x20] sm:$0xff] %vm1764_vm14, %v1939_v55  ;;  %1953 = vst.msk [vmem:[%s2871_s26 + $0x18] sm:$0xff] %vm1764_vm14, %v1938_v5 }
 0x269   : > { %v1890_v22 = vpop.xlane.xlu1 %1889  ;;  %v1885_v49 = vpop.xlane.xlu0 %1884  ;;  %2058 = vst [vmem:[%s3603_s29 + $0x1c8] sm:$0xff] (%p2761_p9), %v2057_v47 }
 0x26a   : > { %v1941_v15 = vadd.f32 %v1890_v22, %v1787_v14  ;;  %v1940_v48 = vadd.f32 %v1885_v49, %v1786_v60 }
 0x26c   : > { %1956 = vst.msk [vmem:[%s2871_s26 + $0x30] sm:$0xff] %vm1764_vm14, %v1941_v15  ;;  %1955 = vst.msk [vmem:[%s2871_s26 + $0x28] sm:$0xff] %vm1764_vm14, %v1940_v48 }
 0x26d   : > { %v1900_v61 = vpop.xlane.xlu1 %1899  ;;  %v1895_v51 = vpop.xlane.xlu0 %1894 }
 0x26e   : > { %v1943_v28 = vadd.f32 %v1900_v61, %v1789_v13  ;;  %v1942_v46 = vadd.f32 %v1895_v51, %v1788_v23 }
 0x270   : > { %1958 = vst.msk [vmem:[%s2871_s26 + $0x40] sm:$0xff] %vm1764_vm14, %v1943_v28  ;;  %1957 = vst.msk [vmem:[%s2871_s26 + $0x38] sm:$0xff] %vm1764_vm14, %v1942_v46 }
 0x271   : > { %v1910_v32 = vpop.xlane.xlu1 %1909  ;;  %v1905_v53 = vpop.xlane.xlu0 %1904 }
 0x272   : > { %v1945_v62 = vadd.f32 %v1910_v32, %v1791_v57  ;;  %v1944_v19 = vadd.f32 %v1905_v53, %v1790_v30 }
 0x274   : > { %1960 = vst.msk [vmem:[%s2871_s26 + $0x50] sm:$0xff] %vm1764_vm14, %v1945_v62  ;;  %1959 = vst.msk [vmem:[%s2871_s26 + $0x48] sm:$0xff] %vm1764_vm14, %v1944_v19 }
 0x275   : > { %v1920_v42 = vpop.xlane.xlu1 %1919  ;;  %v1915_v56 = vpop.xlane.xlu0 %1914 }
 0x276   : > { %v1947_v17 = vadd.f32 %v1920_v42, %v1793_v8  ;;  %v1946_v11 = vadd.f32 %v1915_v56, %v1792_v12 }
 0x277   : > { %1981 = sbr.rel (!%p2761_p9) target bundleno = 638 (0x27e), region = 71 }
 0x278   : > { %1962 = vst.msk [vmem:[%s2871_s26 + $0x60] sm:$0xff] %vm1764_vm14, %v1947_v17  ;;  %1961 = vst.msk [vmem:[%s2871_s26 + $0x58] sm:$0xff] %vm1764_vm14, %v1946_v11 }
 0x279   : > { %v1934_v50 = vpop.xlane.xlu1 %1933  ;;  %v1925_v44 = vpop.xlane.xlu0 %1924 }
 0x27a   : > { %v1949_v52 = vadd.f32 %v1934_v50, %v1795_v0  ;;  %v1948_v43 = vadd.f32 %v1925_v44, %v1794_v27 }
 0x27c   : > { %1964 = vst.msk [vmem:[%s2871_s26 + $0x70] sm:$0x7f] %vm1779_vm15, %v1949_v52 }
 0x27d   : > { %1963 = vst.msk [vmem:[%s2871_s26 + $0x68] sm:$0xff] %vm1764_vm14, %v1948_v43 }
 0x27e PF: > { %s18_s9 = sadd.s32 1, %s2648_s9   ;;  %s3763_s14 = sld [smem:[#allocation4_spill]] }
 0x27f   : > { %p15_p3 = scmp.ge.s32.totalorder %s18_s9, 6   ;;  %s3764_s12 = sld [smem:[#allocation5_spill]] }
 0x280   : > { %s3765_s24 = smov %s2620_s25  ;;  %s3766_s25 = smov %s2766_s20 }
 0x281   : > { %s3767_s26 = smov %s2628_s27  ;;  %s3768_s27 = smov %s2755_s16 }
 0x282   : > { %s3769_s28 = smov %s2640_s30  ;;  %s3770_s29 = smov %s2644_s8 }
 0x283   :  { %17 = sbr.rel (!%p15_p3) target bundleno = 7 (0x7), region = 161 }
 0x284   : > { %s3771_s30 = smov %s3763_s14 }
 0x285   : > { %s3772_s8 = smov %s3764_s12 }

// kernel: ae_pointnet_dcg_forward.26
= control target key start
LH: loop header
LB: loop body
LE: loop exit
PB: predicated region body
PF: predicated region fallthrough
CT: control target
= control target key end

     0   :  { %s1906_s0 = inlined_call_operand.vmem [shape: bf16[2,59,1024], index: 0, kind: input, shape index: {}]   ;;  %s1907_s1 = inlined_call_operand.vmem [shape: f32[2,59,1], index: 1, kind: input, shape index: {}]   ;;  %s1908_s2 = inlined_call_operand.vmem [shape: f32[2,59,1], index: 2, kind: input, shape index: {}]   ;;  %s1909_s3 = inlined_call_operand.vmem [shape: bf16[2,29,59], index: 3, kind: input, shape index: {}]   ;;  %s1910_s4 = inlined_call_operand.vmem [shape: f32[2,29,1], index: 4, kind: input, shape index: {}]   ;;  %s1911_s5 = inlined_call_operand.vmem [shape: bf16[2,29,1024], index: 5, kind: output, shape index: {0}]   ;;  %s1912_s6 = inlined_call_operand.vmem [shape: f32[2,29,1], index: 6, kind: output, shape index: {1}]   ;;  %s1913_s7 = inlined_call_operand.vmem [shape: f32[2,29,1], index: 7, kind: output, shape index: {2}]  }
   0x1   :  { %1914 = sst [smem:[#allocation4_spill]] %s1906_s0 }
   0x2   :  { %s1494_s24 = smov 0   ;;  %s1496_s25 = smov 0  }
   0x3   :  { %s1498_s26 = smov 0   ;;  %s1500_s27 = smov 0  }
   0x4   :  { %s1502_s28 = smov 0   ;;  %s1504_s29 = smov 0  }
   0x5   :  { %s1506_s30 = smov 0  }
   0x6 LB: > { %s27_s8 = sadd.s32 1, %s1441_s28  ;;  %s30_s9 = sadd.s32 1, %s1445_s29  ;;  %s1449_s30 = sphi %s1506_s30, %s18_s30   ;;  %s1445_s29 = sphi %s1504_s29, %s1926_s29   ;;  %s1441_s28 = sphi %s1502_s28, %s1925_s28   ;;  %s1437_s27 = sphi %s1500_s27, %s1924_s27   ;;  %s1433_s26 = sphi %s1498_s26, %s1923_s26   ;;  %s1429_s25 = sphi %s1496_s25, %s1922_s25   ;;  %s1425_s24 = sphi %s1494_s24, %s1921_s24  }
   0x7   : > { %p28_p0 = scmp.ge.s32.totalorder %s27_s8, 2  ;;  %s1274_s10 = sadd.s32 4294967295, %s1449_s30  }
   0x8   : > { %p46_p1 = scmp.ne.s32.totalorder %s1429_s25, %s1425_s24  ;;  %p47_p2 = scmp.eq.s32.totalorder %s1449_s30, 0 }
   0x9   : > { %s1928_s8 = smov (%p28_p0, %s27_s8), 0  ;;  %s1930_s9 = smov (!%p28_p0, %s30_s9), %s1445_s29 }
   0xa   : > { %p32_p3 = scmp.ge.s32.totalorder %s1930_s9, 2  ;;  %p182_p4 = scmp.eq.s32.totalorder %s1274_s10, 3 }
   0xb   : > { %s35_s11 = ssub.s32 %s1441_s28, %s1928_s8  ;;  %p48_p5 = por %p47_p2, %p46_p1 }
   0xc   : > { %s1932_s9 = smov (%p32_p3, %s1930_s9), 0  ;;  %p1542_p6 = por %p182_p4, %p46_p1 }
   0xd   : > { %s34_s13 = ssub.s32 %s1445_s29, %s1932_s9  ;;  %s39_s15 = sadd.s32 1, %s1429_s25 }
   0xe   : > { %s36_s14 = sor.u32 %s35_s11, %s34_s13  ;;  %p1277_p8 = scmp.ge.s32.totalorder %s1449_s30, 4 }
   0xf   : > { %p37_p7 = scmp.eq.s32.totalorder %s36_s14, 0 }
  0x10   : > { %256 = sbr.rel (%p1277_p8) target bundleno = 41 (0x29), region = 16 }
  0x11   : > { %s1550_s16 = scalar_select %p37_p7, %s1429_s25, %s39_s15  }
  0x17   : > { %259 = sbr.rel (!%p48_p5) target bundleno = 41 (0x29), region = 20  ;;  %s261_s17 = sand.u32 (%p48_p5), 1, %s1429_s25  }
  0x18   : > { %s1279_s18 = sshll.u32 (%p48_p5), %s1441_s28, 2  ;;  %s1278_s19 = sshll.u32 (%p48_p5), %s261_s17, 7 }
  0x19   : > { %s1280_s20 = sshll.u32 (%p48_p5), %s1445_s29, 6  ;;  %s1916_s0 = sld [smem:[#allocation4_spill]] (%p48_p5) }
  0x1a   : > { %s266_s21 = sadd.s32 (%p48_p5), %s1280_s20, %s1279_s18  ;;  %s263_s13 = scalar_lea.vmem (%p48_p5), [#allocation2], %s1278_s19 }
  0x1b   : > { %s1281_s22 = sshll.u32 (%p48_p5), %s266_s21, 2 }
  0x1f   : > { %s1559_s11 = scalar_lea.vmem %s1916_s0, %s1281_s22 }
  0x20   : > { %v281_v0 = vld [vmem:[%s1559_s11] sm:$0xff]  ;;  %v283_v1 = vld [vmem:[%s1559_s11 + $0x8] sm:$0xff] }
  0x21   : > { %v285_v2 = vld [vmem:[%s1559_s11 + $0x20] sm:$0xff]  ;;  %282 = vst [vmem:[%s263_s13] sm:$0xff] %v281_v0  ;;  %284 = vst [vmem:[%s263_s13 + $0x8] sm:$0xff] %v283_v1  ;;  %v287_v3 = vld [vmem:[%s1559_s11 + $0x28] sm:$0xff] }
  0x22   : > { %286 = vst [vmem:[%s263_s13 + $0x10] sm:$0xff] %v285_v2  ;;  %v289_v4 = vld [vmem:[%s1559_s11 + $0x40] sm:$0xff]  ;;  %v291_v5 = vld [vmem:[%s1559_s11 + $0x48] sm:$0xff]  ;;  %288 = vst [vmem:[%s263_s13 + $0x18] sm:$0xff] %v287_v3 }
  0x23   : > { %290 = vst [vmem:[%s263_s13 + $0x20] sm:$0xff] %v289_v4  ;;  %292 = vst [vmem:[%s263_s13 + $0x28] sm:$0xff] %v291_v5  ;;  %v293_v6 = vld [vmem:[%s1559_s11 + $0x60] sm:$0xff]  ;;  %v295_v7 = vld [vmem:[%s1559_s11 + $0x68] sm:$0xff] }
  0x24   : > { %v297_v8 = vld [vmem:[%s1559_s11 + $0x80] sm:$0xff]  ;;  %294 = vst [vmem:[%s263_s13 + $0x30] sm:$0xff] %v293_v6  ;;  %296 = vst [vmem:[%s263_s13 + $0x38] sm:$0xff] %v295_v7  ;;  %v299_v9 = vld [vmem:[%s1559_s11 + $0x88] sm:$0xff] }
  0x25   : > { %298 = vst [vmem:[%s263_s13 + $0x40] sm:$0xff] %v297_v8  ;;  %v301_v10 = vld [vmem:[%s1559_s11 + $0xa0] sm:$0xff]  ;;  %v303_v11 = vld [vmem:[%s1559_s11 + $0xa8] sm:$0xff]  ;;  %300 = vst [vmem:[%s263_s13 + $0x48] sm:$0xff] %v299_v9 }
  0x26   : > { %302 = vst [vmem:[%s263_s13 + $0x50] sm:$0xff] %v301_v10  ;;  %304 = vst [vmem:[%s263_s13 + $0x58] sm:$0xff] %v303_v11  ;;  %v305_v12 = vld [vmem:[%s1559_s11 + $0xc0] sm:$0xff]  ;;  %v307_v13 = vld [vmem:[%s1559_s11 + $0xc8] sm:$0xff] }
  0x27   : > { %v309_v14 = vld [vmem:[%s1559_s11 + $0xe0] sm:$0xff]  ;;  %306 = vst [vmem:[%s263_s13 + $0x60] sm:$0xff] %v305_v12  ;;  %308 = vst [vmem:[%s263_s13 + $0x68] sm:$0xff] %v307_v13  ;;  %v311_v15 = vld [vmem:[%s1559_s11 + $0xe8] sm:$0xff] }
  0x28   : > { %310 = vst [vmem:[%s263_s13 + $0x70] sm:$0xff] %v309_v14  ;;  %312 = vst [vmem:[%s263_s13 + $0x78] sm:$0xff] %v311_v15 }
  0x29 PF: > { %p1282_p9 = scmp.ge.s32.totalorder %s1449_s30, 1  ;;  %p349_p10 = scmp.lt.s32.totalorder %s1449_s30, 5 }
  0x2b   : > { %p350_p11 = pnand %p1282_p9, %p349_p10 }
  0x2c   : > { %p417_p12 = scmp.lt.s32.totalorder (!%p350_p11), %s1437_s27, 1  ;;  %v1451_v16 = vmov (!%p350_p11), 0   ;;  %vm750_vm0 = vcmask (!%p350_p11), 1044480   ;;  %vm751_vm1 = vcmask (!%p350_p11), 1045504   ;;  %vm743_vm2 = vcmask (!%p350_p11), 482304   ;;  %p1311_p13 = scmp.ne.s32.totalorder (!%p350_p11), %s1433_s26, 0 }
  0x2d   : > { %353 = sbr.rel (%p350_p11) target bundleno = 625 (0x271), region = 59  ;;  %1392 = vset.pattern.permute.xlu1 (!%p350_p11), %v1451_v16  ;;  %1391 = vset.pattern.permute.xlu0 (!%p350_p11), %v1451_v16  ;;  %vm926_vm3 = vcmask (!%p350_p11), 1042432   ;;  %vm927_vm4 = vsmask.f32 (!%p350_p11), 2304  ;;  %vm929_vm5 = vcmask (!%p350_p11), 1046532  }
  0x2e   : > { %798 = vmatprep.mubr.bf16.mxu0 (!%p350_p11), %v1451_v16  ;;  %851 = vmatprep.mubr.bf16.mxu1 (!%p350_p11), %v1451_v16  ;;  %vm930_vm6 = vsmask.f32 (!%p350_p11), 6400  ;;  %vm1760_vm7 = vmand (!%p350_p11), %vm926_vm3, %vm927_vm4 }
  0x2f   : > { %vm1769_vm8 = vmand (!%p350_p11), %vm929_vm5, %vm930_vm6 }
  0x30   : > { %vm932_vm9 = vmor (!%p350_p11), %vm1769_vm8, %vm1760_vm7 }
  0x34   : > { %s1583_s14 = scalar_select %p417_p12, %s1437_s27, 1 }
  0x35   : > { %vm943_vm10 = vcmask (!%p1311_p13), 7168   ;;  %vm947_vm11 = vcmask (!%p1311_p13), 4096  }
  0x36   : > { %s1318_s15 = sshll.u32 %s1583_s14, 6  ;;  %s1589_s17 = sshll.u32 %s1583_s14, 5 }
  0x37   : > { %s1594_s20 = scalar_lea.vmem %s1908_s2, %s1318_s15  ;;  %s421_s23 = scalar_lea.vmem %s1907_s1, %s1318_s15 }
  0x38   : > { %v577_v17 = vld [vmem:[%s1594_s20] sm:$0xff]  ;;  %s1604_s13 = scalar_lea.vmem %s1912_s6, %s1589_s17  ;;  %s1610_s0 = scalar_lea.vmem %s1913_s7, %s1589_s17  ;;  %v578_v19 = vld [vmem:[%s1594_s20 + $0x8] sm:$0xff]  ;;  %v500_v21 = vld [vmem:[%s421_s23 + $0x18] sm:$0xff] }
  0x39   : > { %v497_v18 = vld [vmem:[%s421_s23] sm:$0xff]  ;;  %587 = vperm.xlu1 %1392, %v577_v17   ;;  %v498_v20 = vld [vmem:[%s421_s23 + $0x8] sm:$0xff]  ;;  %v499_v22 = vld [vmem:[%s421_s23 + $0x10] sm:$0xff]  ;;  %s436_s22 = scalar_lea.vmem %s1910_s4, %s1589_s17 }
  0x3a   : > { %507 = vperm.xlu0 %1391, %v497_v18   ;;  %v580_v23 = vld [vmem:[%s1594_s20 + $0x18] sm:$0xff]  ;;  %v579_v24 = vld [vmem:[%s1594_s20 + $0x10] sm:$0xff]  ;;  %v502_v25 = vld [vmem:[%s421_s23 + $0x28] sm:$0xff] }
  0x3b   : > { %v501_v26 = vld [vmem:[%s421_s23 + $0x20] sm:$0xff]  ;;  %v504_v27 = vld [vmem:[%s421_s23 + $0x38] sm:$0x7]  ;;  %v503_v28 = vld [vmem:[%s421_s23 + $0x30] sm:$0xff]  ;;  %s1320_s23 = sshll.u32 %s1583_s14, 4 }
  0x3c   : > { %v582_v29 = vld [vmem:[%s1594_s20 + $0x28] sm:$0xff]  ;;  %v581_v30 = vld [vmem:[%s1594_s20 + $0x20] sm:$0xff]  ;;  %v584_v31 = vld [vmem:[%s1594_s20 + $0x38] sm:$0x7]  ;;  %s1627_s18 = scalar_lea.vmem %s1909_s3, %s1320_s23 }
  0x3d   : > { %592 = vperm.xlu1 %1392, %v578_v19   ;;  %v583_v32 = vld [vmem:[%s1594_s20 + $0x30] sm:$0xff]  ;;  %v709_v33 = vld [vmem:[%s436_s22] sm:$0xff]  ;;  %v712_v34 = vld [vmem:[%s436_s22 + $0x18] sm:$0x1f]  ;;  %s356_s20 = sand.u32 1, %s1425_s24  }
  0x3e   : > { %512 = vperm.xlu0 %1391, %v498_v20   ;;  %v711_v35 = vld [vmem:[%s436_s22 + $0x10] sm:$0xff]  ;;  %v710_v36 = vld [vmem:[%s436_s22 + $0x8] sm:$0xff]  ;;  %s1283_s19 = sshll.u32 %s356_s20, 7  ;;  %s1284_s14 = sshll.u32 %s356_s20, 6 }
  0x3f   : > { %s1632_s17 = scalar_lea.vmem [#allocation2], %s1283_s19  ;;  %s1746_s24 = scalar_lea.vmem [#allocation3], %s1284_s14 }
  0x40   : > { %v449_v37 = vld [vmem:[%s1632_s17] sm:$0xff]  ;;  %v450_v38 = vld [vmem:[%s1632_s17 + $0x8] sm:$0xff]  ;;  %v451_v39 = vld [vmem:[%s1632_s17 + $0x10] sm:$0xff] }
  0x41   : > { %522 = vperm.xlu1 %1392, %v500_v21   ;;  %v452_v40 = vld [vmem:[%s1632_s17 + $0x18] sm:$0xff]  ;;  %v1639_v41 = vld [vmem:[%s1632_s17 + $0x30] sm:$0xff]  ;;  %v465_v42 = vunpack.c.l.bf16 %v449_v37  ;;  %v467_v43 = vunpack.c.l.bf16 %v450_v38  ;;  %v1645_v45 = vld [vmem:[%s1632_s17 + $0x20] sm:$0xff]  ;;  %v466_v46 = vunpack.c.h.bf16 %v449_v37  ;;  %v468_v47 = vunpack.c.h.bf16 %v450_v38 }
  0x42   : > { %517 = vperm.xlu0 %1391, %v499_v22   ;;  %v1642_v44 = vld [vmem:[%s1632_s17 + $0x38] sm:$0xff]  ;;  %v469_v48 = vunpack.c.l.bf16 %v451_v39  ;;  %v471_v49 = vunpack.c.l.bf16 %v452_v40  ;;  %v477_v50 = vunpack.c.l.bf16 %v1639_v41  ;;  %v478_v51 = vunpack.c.h.bf16 %v1639_v41  ;;  %v1650_v52 = vld [vmem:[%s1632_s17 + $0x28] sm:$0xff]  ;;  %v1653_v54 = vld [vmem:[%s1632_s17 + $0x50] sm:$0xff] }
  0x43   : > { %v470_v53 = vunpack.c.h.bf16 %v451_v39  ;;  %v479_v57 = vunpack.c.l.bf16 %v1642_v44  ;;  %v480_v58 = vunpack.c.h.bf16 %v1642_v44  ;;  %v473_v59 = vunpack.c.l.bf16 %v1645_v45  ;;  %v1660_v61 = vld [vmem:[%s1632_s17 + $0x58] sm:$0xff]  ;;  %v1663_v62 = vld [vmem:[%s1632_s17 + $0x40] sm:$0xff]  ;;  %v1672_v10 = vld [vmem:[%s1632_s17 + $0x48] sm:$0xff] }
  0x44   : > { %v474_v60 = vunpack.c.h.bf16 %v1645_v45  ;;  %v475_v3 = vunpack.c.l.bf16 %v1650_v52  ;;  %v476_v4 = vunpack.c.h.bf16 %v1650_v52  ;;  %v472_v5 = vunpack.c.h.bf16 %v452_v40  ;;  %v1676_v12 = vld [vmem:[%s1632_s17 + $0x70] sm:$0x33] }
  0x45   : > { %602 = vperm.xlu1 %1392, %v580_v23   ;;  %v485_v6 = vunpack.c.l.bf16 %v1653_v54  ;;  %v486_v7 = vunpack.c.h.bf16 %v1653_v54  ;;  %v487_v8 = vunpack.c.l.bf16 %v1660_v61  ;;  %v488_v9 = vunpack.c.h.bf16 %v1660_v61 }
  0x46   : > { %597 = vperm.xlu0 %1391, %v579_v24   ;;  %v481_v11 = vunpack.c.l.bf16 %v1663_v62  ;;  %v482_v19 = vunpack.c.h.bf16 %v1663_v62  ;;  %v1680_v24 = vld [vmem:[%s1632_s17 + $0x78] sm:$0x33] }
  0x49   : > { %532 = vperm.xlu1 %1392, %v502_v25  }
  0x4a   : > { %527 = vperm.xlu0 %1391, %v501_v26   ;;  %v483_v26 = vunpack.c.l.bf16 %v1672_v10 }
  0x4d   : > { %542 = vperm.xlu1 %1392, %v504_v27   ;;  %v484_v27 = vunpack.c.h.bf16 %v1672_v10 }
  0x4e   : > { %537 = vperm.xlu0 %1391, %v503_v28   ;;  %v493_v28 = vunpack.c.l.bf16 %v1676_v12 }
  0x51   : > { %612 = vperm.xlu1 %1392, %v582_v29  }
  0x52   : > { %607 = vperm.xlu0 %1391, %v581_v30  }
  0x55   : > { %622 = vperm.xlu1 %1392, %v584_v31  }
  0x56   : > { %617 = vperm.xlu0 %1391, %v583_v32   ;;  %v494_v32 = vunpack.c.h.bf16 %v1676_v12 }
  0x59   : > { %715 = vperm.xlu1 %1392, %v709_v33  }
  0x5a   : > { %730 = vperm.xlu0 %1391, %v712_v34  }
  0x5d   : > { %725 = vperm.xlu1 %1392, %v711_v35  }
  0x5e   : > { %720 = vperm.xlu0 %1391, %v710_v36   ;;  %v495_v36 = vunpack.c.l.bf16 %v1680_v24 }
  0xb8   : > { %v588_v55 = vpop.permute.xlu1 %587 }
  0xb9   : > { %v508_v56 = vpop.permute.xlu0 %507 }
  0xba   : > { %v545_v63 = vmul.f32 %v508_v56, %v465_v42  ;;  %v547_v0 = vmul.f32 %v508_v56, %v467_v43  ;;  %v546_v1 = vmul.f32 %v508_v56, %v466_v46  ;;  %v548_v2 = vmul.f32 %v508_v56, %v468_v47 }
  0xbc   : > { %v593_v13 = vpop.permute.xlu1 %592  ;;  %v626_v15 = vadd.f32 %v588_v55, %v546_v1  ;;  %v628_v17 = vadd.f32 %v588_v55, %v548_v2  ;;  %v625_v18 = vadd.f32 %v588_v55, %v545_v63  ;;  %v627_v23 = vadd.f32 %v588_v55, %v547_v0 }
  0xbd   : > { %v513_v14 = vpop.permute.xlu0 %512 }
  0xbe   : > { %v549_v20 = vmul.f32 %v513_v14, %v469_v48  ;;  %v551_v21 = vmul.f32 %v513_v14, %v471_v49  ;;  %v550_v22 = vmul.f32 %v513_v14, %v470_v53  ;;  %v552_v25 = vmul.f32 %v513_v14, %v472_v5 }
  0xbf   : > { %v658_v37 = vmax.f32 %v626_v15, 0.0  ;;  %v660_v38 = vmax.f32 %v628_v17, 0.0  ;;  %v657_v39 = vmax.f32 %v625_v18, 0.0  ;;  %v659_v40 = vmax.f32 %v627_v23, 0.0 }
  0xc0   : > { %v630_v29 = vadd.f32 %v593_v13, %v550_v22  ;;  %v629_v30 = vadd.f32 %v593_v13, %v549_v20  ;;  %v631_v31 = vadd.f32 %v593_v13, %v551_v21  ;;  %v523_v33 = vpop.permute.xlu1 %522  ;;  %v632_v35 = vadd.f32 %v593_v13, %v552_v25  ;;  %v461_v13 = vld [vmem:[%s1632_s17 + $0x60] sm:$0xff] }
  0xc1   : > { %v518_v34 = vpop.permute.xlu0 %517  ;;  %v557_v41 = vmul.f32 %v523_v33, %v477_v50  ;;  %v558_v42 = vmul.f32 %v523_v33, %v478_v51  ;;  %v559_v43 = vmul.f32 %v523_v33, %v479_v57  ;;  %v560_v44 = vmul.f32 %v523_v33, %v480_v58 }
  0xc2   : > { %v662_v45 = vmax.f32 %v630_v29, 0.0  ;;  %v664_v46 = vmax.f32 %v632_v35, 0.0  ;;  %v661_v47 = vmax.f32 %v629_v30, 0.0  ;;  %v663_v48 = vmax.f32 %v631_v31, 0.0 }
  0xc3   : > { %v553_v49 = vmul.f32 %v518_v34, %v473_v59  ;;  %v554_v52 = vmul.f32 %v518_v34, %v474_v60  ;;  %v555_v53 = vmul.f32 %v518_v34, %v475_v3  ;;  %v556_v55 = vmul.f32 %v518_v34, %v476_v4  ;;  %v462_v59 = vld [vmem:[%s1632_s17 + $0x68] sm:$0xff] }
  0xc4   : > { %v603_v56 = vpop.permute.xlu1 %602  ;;  %v690_v14 = vpack.c.bf16 %v662_v45, %v658_v37  ;;  %v692_v15 = vpack.c.bf16 %v664_v46, %v660_v38  ;;  %v689_v17 = vpack.c.bf16 %v661_v47, %v657_v39  ;;  %v691_v18 = vpack.c.bf16 %v663_v48, %v659_v40 }
  0xc5   : > { %v598_v63 = vpop.permute.xlu0 %597  ;;  %v637_v0 = vadd.f32 %v603_v56, %v557_v41  ;;  %v638_v1 = vadd.f32 %v603_v56, %v558_v42  ;;  %v639_v2 = vadd.f32 %v603_v56, %v559_v43  ;;  %v640_v5 = vadd.f32 %v603_v56, %v560_v44 }
  0xc6   : > { %v633_v50 = vadd.f32 %v598_v63, %v553_v49  ;;  %v634_v51 = vadd.f32 %v598_v63, %v554_v52  ;;  %v635_v57 = vadd.f32 %v598_v63, %v555_v53  ;;  %v636_v58 = vadd.f32 %v598_v63, %v556_v55  ;;  %766 = vmatprep.subr.bf16.mxu0 %v690_v14 }
  0xc7   : > { %v670_v20 = vmax.f32 %v638_v1, 0.0  ;;  %v672_v22 = vmax.f32 %v640_v5, 0.0  ;;  %819 = vmatprep.subr.bf16.mxu1 %v692_v15  ;;  %v496_v23 = vunpack.c.h.bf16 %v1680_v24  ;;  %v489_v25 = vunpack.c.l.bf16 %v461_v13  ;;  %767 = vmatpush1.bf16.msra.mxu0 %v689_v17 }
  0xc8   : > { %v533_v60 = vpop.permute.xlu1 %532  ;;  %v666_v4 = vmax.f32 %v634_v51, 0.0  ;;  %v668_v21 = vmax.f32 %v636_v58, 0.0  ;;  %v490_v29 = vunpack.c.h.bf16 %v461_v13  ;;  %v665_v30 = vmax.f32 %v633_v50, 0.0  ;;  %820 = vmatpush1.bf16.msra.mxu1 %v691_v18 }
  0xc9   : > { %v528_v3 = vpop.permute.xlu0 %527  ;;  %v491_v31 = vunpack.c.l.bf16 %v462_v59  ;;  %v669_v33 = vmax.f32 %v637_v0, 0.0  ;;  %v1452_v34 = vmov 65535   ;;  %v565_v37 = vmul.f32 %v533_v60, %v485_v6 }
  0xca   : > { %v752_v35 = vsel %vm750_vm0, 4294967295, %v1452_v34  ;;  %v694_v38 = vpack.c.bf16 %v670_v20, %v666_v4  ;;  %v696_v39 = vpack.c.bf16 %v672_v22, %v668_v21  ;;  %v492_v40 = vunpack.c.h.bf16 %v462_v59 }
  0xcb   : > { %v566_v41 = vmul.f32 %v533_v60, %v486_v7  ;;  %v693_v44 = vpack.c.bf16 %v669_v33, %v665_v30  ;;  %v667_v45 = vmax.f32 %v635_v57, 0.0  ;;  %v671_v46 = vmax.f32 %v639_v2, 0.0 }
  0xcc   : > { %v543_v42 = vpop.permute.xlu1 %542  ;;  %v567_v47 = vmul.f32 %v533_v60, %v487_v8  ;;  %v568_v48 = vmul.f32 %v533_v60, %v488_v9  ;;  %v561_v6 = vmul.f32 %v528_v3, %v481_v11  ;;  %768 = vmatprep.subr.bf16.mxu0 %v694_v38  ;;  %821 = vmatprep.subr.bf16.mxu1 %v696_v39  ;;  %v1702_v49 = vsel %vm751_vm1, %v752_v35, 0 }
  0xcd   : > { %v538_v43 = vpop.permute.xlu0 %537  ;;  %v562_v54 = vmul.f32 %v528_v3, %v482_v19  ;;  %v563_v7 = vmul.f32 %v528_v3, %v483_v26  ;;  %v564_v8 = vmul.f32 %v528_v3, %v484_v27  ;;  %v573_v61 = vmul.f32 %v543_v42, %v493_v28  ;;  %769 = vmatpush1.bf16.msra.mxu0 %v693_v44 }
  0xce   : > { %v574_v9 = vmul.f32 %v543_v42, %v494_v32  ;;  %v575_v11 = vmul.f32 %v543_v42, %v495_v36  ;;  %v576_v52 = vmul.f32 %v543_v42, %v496_v23  ;;  %v695_v53 = vpack.c.bf16 %v671_v46, %v667_v45 }
  0xcf   : > { %v569_v62 = vmul.f32 %v538_v43, %v489_v25  ;;  %v570_v19 = vmul.f32 %v538_v43, %v490_v29  ;;  %v571_v55 = vmul.f32 %v538_v43, %v491_v31  ;;  %v572_v56 = vmul.f32 %v538_v43, %v492_v40 }
  0xd0   : > { %v613_v26 = vpop.permute.xlu1 %612  ;;  %822 = vmatpush1.bf16.msra.mxu1 %v695_v53 }
  0xd1   : > { %v608_v63 = vpop.permute.xlu0 %607  ;;  %v645_v10 = vadd.f32 %v613_v26, %v565_v37  ;;  %v646_v27 = vadd.f32 %v613_v26, %v566_v41  ;;  %v647_v0 = vadd.f32 %v613_v26, %v567_v47  ;;  %v648_v28 = vadd.f32 %v613_v26, %v568_v48  ;;  %v1393_v48 = vld [vmem:[%s1627_s18] sm:$0xff]  }
  0xd2   : > { %v641_v1 = vadd.f32 %v608_v63, %v561_v6  ;;  %v642_v2 = vadd.f32 %v608_v63, %v562_v54  ;;  %v643_v12 = vadd.f32 %v608_v63, %v563_v7  ;;  %v644_v32 = vadd.f32 %v608_v63, %v564_v8  ;;  %v1394_v6 = vld [vmem:[%s1627_s18 + $0x8] sm:$0x7f]  }
  0xd3   : > { %v678_v5 = vmax.f32 %v646_v27, 0.0  ;;  %v680_v24 = vmax.f32 %v648_v28, 0.0  ;;  %v677_v36 = vmax.f32 %v645_v10, 0.0  ;;  %v679_v50 = vmax.f32 %v647_v0, 0.0 }
  0xd4   : > { %v623_v51 = vpop.permute.xlu1 %622  ;;  %v674_v58 = vmax.f32 %v642_v2, 0.0  ;;  %v676_v13 = vmax.f32 %v644_v32, 0.0  ;;  %v673_v14 = vmax.f32 %v641_v1, 0.0  ;;  %v675_v15 = vmax.f32 %v643_v12, 0.0 }
  0xd5   : > { %v618_v57 = vpop.permute.xlu0 %617  ;;  %v653_v17 = vadd.f32 %v623_v51, %v573_v61  ;;  %v654_v18 = vadd.f32 %v623_v51, %v574_v9  ;;  %v655_v59 = vadd.f32 %v623_v51, %v575_v11  ;;  %v656_v60 = vadd.f32 %v623_v51, %v576_v52 }
  0xd6   : > { %v649_v3 = vadd.f32 %v618_v57, %v569_v62  ;;  %v650_v4 = vadd.f32 %v618_v57, %v570_v19  ;;  %v651_v20 = vadd.f32 %v618_v57, %v571_v55  ;;  %v652_v21 = vadd.f32 %v618_v57, %v572_v56 }
  0xd7   : > { %v685_v22 = vmax.f32 %v653_v17, 0.0  ;;  %v686_v23 = vmax.f32 %v654_v18, 0.0  ;;  %v687_v25 = vmax.f32 %v655_v59, 0.0  ;;  %v688_v29 = vmax.f32 %v656_v60, 0.0 }
  0xd8   : > { %v681_v30 = vmax.f32 %v649_v3, 0.0  ;;  %v682_v31 = vmax.f32 %v650_v4, 0.0  ;;  %v683_v33 = vmax.f32 %v651_v20, 0.0  ;;  %v684_v34 = vmax.f32 %v652_v21, 0.0  ;;  %v716_v7 = vpop.permute.xlu1 %715 }
  0xd9   : > { %v698_v35 = vpack.c.bf16 %v678_v5, %v674_v58  ;;  %v700_v37 = vpack.c.bf16 %v680_v24, %v676_v13  ;;  %v697_v38 = vpack.c.bf16 %v677_v36, %v673_v14  ;;  %v699_v39 = vpack.c.bf16 %v679_v50, %v675_v15  ;;  %v731_v54 = vpop.permute.xlu0 %730 }
  0xda   : > { %v702_v40 = vpack.c.bf16 %v686_v23, %v682_v31  ;;  %v704_v41 = vpack.c.bf16 %v688_v29, %v684_v34  ;;  %v701_v42 = vpack.c.bf16 %v685_v22, %v681_v30  ;;  %v703_v43 = vpack.c.bf16 %v687_v25, %v683_v33  ;;  %v933_v25 = vld [vmem:[%s1746_s24 + $0x30] sm:$0x77]  ;;  %v936_v29 = vld [vmem:[%s1746_s24 + $0x38] sm:$0x77] }
  0xdb   : > { %770 = vmatprep.subr.bf16.mxu0 %v698_v35  ;;  %823 = vmatprep.subr.bf16.mxu1 %v700_v37  ;;  %v1453_v35 = vmov (!%p1311_p13), 0.0  }
  0xdc   : > { %771 = vmatpush1.bf16.msra.mxu0 %v697_v38  ;;  %824 = vmatpush1.bf16.msra.mxu1 %v699_v39  ;;  %v758_v44 = vand.u32 %v1702_v49, %v702_v40  ;;  %v764_v45 = vand.u32 %v1702_v49, %v704_v41  ;;  %v755_v46 = vand.u32 %v1702_v49, %v701_v42  ;;  %v726_v32 = vpop.permute.xlu1 %725 }
  0xdd   : > { %v761_v47 = vand.u32 %v1702_v49, %v703_v43  ;;  %v721_v8 = vpop.permute.xlu0 %720  ;;  %944 = vst.msk [vmem:[%s1604_s13] sm:$0xff] (!%p1311_p13), %vm943_vm10, %v1453_v35  ;;  %945 = vst.msk [vmem:[%s1604_s13 + $0x8] sm:$0xff] (!%p1311_p13), %vm943_vm10, %v1453_v35 }
  0xde   : > { %772 = vmatprep.subr.bf16.mxu0 %v758_v44  ;;  %825 = vmatprep.subr.bf16.mxu1 %v764_v45  ;;  %946 = vst.msk [vmem:[%s1604_s13 + $0x10] sm:$0xff] (!%p1311_p13), %vm943_vm10, %v1453_v35  ;;  %949 = vst.msk [vmem:[%s1610_s0] sm:$0xff] (!%p1311_p13), %vm943_vm10, %v1453_v35 }
  0xdf   : > { %950 = vst.msk [vmem:[%s1610_s0 + $0x8] sm:$0xff] (!%p1311_p13), %vm943_vm10, %v1453_v35  ;;  %951 = vst.msk [vmem:[%s1610_s0 + $0x10] sm:$0xff] (!%p1311_p13), %vm943_vm10, %v1453_v35 }
  0xe0   : > { %773 = vmatpush1.bf16.msra.mxu0 %v755_v46  ;;  %826 = vmatpush1.bf16.msra.mxu1 %v761_v47  ;;  %948 = vst.msk [vmem:[%s1604_s13 + $0x18] sm:$0x1f] (!%p1311_p13), %vm947_vm11, %v1453_v35  ;;  %952 = vst.msk [vmem:[%s1610_s0 + $0x18] sm:$0x1f] (!%p1311_p13), %vm947_vm11, %v1453_v35 }
  0xe3   : > { %1299 = vmatmul.mubr.msk.bf16.vlgmr.msra.gmra.mrb[0].mxu0 %vm743_vm2, %v1393_v48  ;;  %1301 = vmatmul.mubr.msk.bf16.vlgmr.msra.gmra.mrb[0].mxu1 %vm743_vm2, %v1393_v48 }
  0xe4   : > { %808 = vmatprep.mubr.bf16.mxu0 %v1451_v16  ;;  %861 = vmatprep.mubr.bf16.mxu1 %v1451_v16 }
  0xeb   : > { %1300 = vmatmul.mubr.msk.bf16.gmra.mrb[4].mxu0 %vm743_vm2, %v1394_v6  ;;  %1302 = vmatmul.mubr.msk.bf16.gmra.mrb[4].mxu1 %vm743_vm2, %v1394_v6 }
 0x1b6   : > { %v800_v49 = vpop.f32.mrb[0].mxu0  ;;  %v853_v61 = vpop.f32.mrb[0].mxu1 }
 0x1b7   : > { %v1726_v9 = vadd.f32 %v800_v49, %v716_v7  ;;  %v1728_v11 = vadd.f32 %v853_v61, %v716_v7  ;;  %v802_v52 = vpop.f32.mrb[1].mxu0  ;;  %v855_v53 = vpop.f32.mrb[1].mxu1 }
 0x1b8   : > { %v1730_v62 = vadd.f32 %v802_v52, %v716_v7  ;;  %v1732_v19 = vadd.f32 %v855_v53, %v716_v7  ;;  %v804_v16 = vpop.f32.mrb[2].mxu0  ;;  %v857_v55 = vpop.f32.mrb[2].mxu1 }
 0x1b9   : > { %v1734_v56 = vadd.f32 %v804_v16, %v721_v8  ;;  %v1736_v26 = vadd.f32 %v857_v55, %v721_v8  ;;  %v806_v63 = vpop.f32.mrb[3].mxu0  ;;  %v859_v10 = vpop.f32.mrb[3].mxu1 }
 0x1ba   : > { %v1324_v27 = vpack.c.bf16 %v1730_v62, %v1726_v9  ;;  %v1325_v0 = vpack.c.bf16 %v1732_v19, %v1728_v11  ;;  %v1742_v28 = vadd.f32 %v806_v63, %v721_v8  ;;  %v1744_v1 = vadd.f32 %v859_v10, %v721_v8 }
 0x1bc   : > { %920 = vst [vmem:[%s1746_s24] sm:$0xff] %v1324_v27  ;;  %921 = vst [vmem:[%s1746_s24 + $0x8] sm:$0xff] %v1325_v0  ;;  %v1326_v2 = vpack.c.bf16 %v1742_v28, %v1734_v56  ;;  %v1327_v12 = vpack.c.bf16 %v1744_v1, %v1736_v26 }
 0x1be   : > { %922 = vst [vmem:[%s1746_s24 + $0x10] sm:$0xff] %v1326_v2  ;;  %923 = vst [vmem:[%s1746_s24 + $0x18] sm:$0xff] %v1327_v12  ;;  %v810_v5 = vpop.f32.mrb[4].mxu0  ;;  %v863_v24 = vpop.f32.mrb[4].mxu1 }
 0x1bf   : > { %v1756_v36 = vadd.f32 %v810_v5, %v726_v32  ;;  %v1758_v50 = vadd.f32 %v863_v24, %v726_v32  ;;  %v812_v51 = vpop.f32.mrb[5].mxu0  ;;  %v865_v57 = vpop.f32.mrb[5].mxu1 }
 0x1c0   : > { %v1764_v13 = vadd.f32 %v812_v51, %v726_v32  ;;  %v1766_v14 = vadd.f32 %v865_v57, %v726_v32  ;;  %v814_v15 = vpop.f32.mrb[6].mxu0  ;;  %v867_v17 = vpop.f32.mrb[6].mxu1 }
 0x1c1   : > { %v815_v59 = vadd.f32 %v814_v15, %v731_v54  ;;  %v1773_v60 = vadd.f32 %v867_v17, %v731_v54  ;;  %v816_v3 = vpop.f32.mrb[7].mxu0  ;;  %v869_v4 = vpop.f32.mrb[7].mxu1  ;;  %942 = sbr.rel (%p1311_p13) target bundleno = 456 (0x1c8), region = 67 }
 0x1c2   : > { %v1328_v20 = vpack.c.bf16 %v1764_v13, %v1756_v36  ;;  %v1329_v21 = vpack.c.bf16 %v1766_v14, %v1758_v50  ;;  %v817_v22 = vadd.f32 %v816_v3, %v731_v54  ;;  %v870_v23 = vadd.f32 %v869_v4, %v731_v54 }
 0x1c4   : > { %924 = vst [vmem:[%s1746_s24 + $0x20] sm:$0xff] %v1328_v20  ;;  %925 = vst [vmem:[%s1746_s24 + $0x28] sm:$0xff] %v1329_v21  ;;  %v1330_v30 = vpack.c.bf16 %v817_v22, %v815_v59  ;;  %v1331_v31 = vpack.c.bf16 %v870_v23, %v1773_v60 }
 0x1c6   : > { %v934_v33 = vsel %vm932_vm9, %v1330_v30, %v933_v25  ;;  %v937_v34 = vsel %vm932_vm9, %v1331_v31, %v936_v29 }
 0x1c7   : > { %935 = vst [vmem:[%s1746_s24 + $0x30] sm:$0x77] %v934_v33  ;;  %938 = vst [vmem:[%s1746_s24 + $0x38] sm:$0x77] %v937_v34 }
 0x1c8 PF: > { %v967_v37 = vadd.f32 %v1764_v13, %v1756_v36  ;;  %v957_v38 = vadd.f32 %v1730_v62, %v1726_v9  ;;  %v972_v39 = vsel %vm750_vm0, %v815_v59, 0.0  ;;  %v973_v40 = vsel %vm750_vm0, %v817_v22, 0.0  ;;  %v956_v21 = vld [vmem:[%s1604_s13 + $0x18] sm:$0x1f]  ;;  %v992_v31 = vld [vmem:[%s1610_s0 + $0x8] sm:$0xff]  ;;  %v991_v33 = vld [vmem:[%s1610_s0] sm:$0xff] }
 0x1c9   : > { %v974_v41 = vadd.f32 %v973_v40, %v972_v39  ;;  %v975_v42 = vsel %vm750_vm0, %v1773_v60, 0.0  ;;  %v977_v43 = vsel %vm750_vm0, %v870_v23, 0.0  ;;  %v962_v44 = vadd.f32 %v1742_v28, %v1734_v56  ;;  %v994_v39 = vld [vmem:[%s1610_s0 + $0x18] sm:$0x1f]  ;;  %v993_v40 = vld [vmem:[%s1610_s0 + $0x10] sm:$0xff]  ;;  %s1314_s15 = sshll.u32 (%p1542_p6), %s1437_s27, 5 }
 0x1ca   : > { %v968_v45 = vadd.f32 %v967_v37, %v1758_v50  ;;  %v958_v46 = vadd.f32 %v957_v38, %v1728_v11  ;;  %v999_v47 = vmul.f32 %v1734_v56, %v1734_v56  ;;  %v1000_v48 = vmul.f32 %v1742_v28, %v1742_v28 }
 0x1cb   : > { %v976_v6 = vadd.f32 %v975_v42, %v974_v41  ;;  %v963_v54 = vadd.f32 %v962_v44, %v1736_v26  ;;  %v1001_v7 = vmul.f32 %v1736_v26, %v1736_v26  ;;  %v1002_v8 = vmul.f32 %v1744_v1, %v1744_v1 }
 0x1cc   : > { %v969_v49 = vadd.f32 %v968_v45, %v1766_v14  ;;  %v959_v61 = vadd.f32 %v958_v46, %v1732_v19  ;;  %v1016_v52 = vadd.f32 %v1000_v48, %v999_v47  ;;  %v995_v53 = vmul.f32 %v1726_v9, %v1726_v9  ;;  %v1077_v45 = vld [vmem:[%s1746_s24] sm:$0xff] (%p1542_p6)  ;;  %v1079_v46 = vld [vmem:[%s1746_s24 + $0x8] sm:$0xff] (%p1542_p6)  ;;  %v1081_v47 = vld [vmem:[%s1746_s24 + $0x10] sm:$0xff] (%p1542_p6) }
 0x1cd   : > { %v978_v16 = vadd.f32 %v977_v43, %v976_v6  ;;  %v964_v55 = vadd.f32 %v963_v54, %v1744_v1  ;;  %v996_v56 = vmul.f32 %v1730_v62, %v1730_v62  ;;  %v997_v26 = vmul.f32 %v1728_v11, %v1728_v11  ;;  %v1083_v48 = vld [vmem:[%s1746_s24 + $0x18] sm:$0xff] (%p1542_p6)  ;;  %v1085_v6 = vld [vmem:[%s1746_s24 + $0x20] sm:$0xff] (%p1542_p6)  ;;  %v1087_v54 = vld [vmem:[%s1746_s24 + $0x28] sm:$0xff] (%p1542_p6) }
 0x1ce   : > { %970 = vadd.xlane.f32.xlu1 %v969_v49  ;;  %960 = vadd.xlane.f32.xlu0 %v959_v61  ;;  %v1017_v63 = vadd.f32 %v1016_v52, %v1001_v7  ;;  %v998_v10 = vmul.f32 %v1732_v19, %v1732_v19  ;;  %v1007_v27 = vmul.f32 %v815_v59, %v815_v59  ;;  %vm985_vm12 = vcmask 7168   ;;  %v1089_v7 = vld [vmem:[%s1746_s24 + $0x30] sm:$0xff] (%p1542_p6) }
 0x1cf   : > { %v1011_v0 = vadd.f32 %v996_v56, %v995_v53  ;;  %v1008_v28 = vmul.f32 %v817_v22, %v817_v22  ;;  %v1009_v9 = vmul.f32 %v1773_v60, %v1773_v60  ;;  %v1010_v2 = vmul.f32 %v870_v23, %v870_v23  ;;  %v953_v60 = vld [vmem:[%s1604_s13] sm:$0xff]  ;;  %v954_v22 = vld [vmem:[%s1604_s13 + $0x8] sm:$0xff] }
 0x1d0   : > { %v1026_v1 = vsel %vm750_vm0, %v1007_v27, 0.0  ;;  %v1003_v62 = vmul.f32 %v1756_v36, %v1756_v36  ;;  %v1004_v11 = vmul.f32 %v1764_v13, %v1764_v13  ;;  %v1018_v5 = vadd.f32 %v1017_v63, %v1002_v8  ;;  %v1091_v8 = vld [vmem:[%s1746_s24 + $0x38] sm:$0xff] (%p1542_p6) }
 0x1d1   : > { %v1012_v12 = vadd.f32 %v1011_v0, %v997_v26  ;;  %v1027_v32 = vsel %vm750_vm0, %v1008_v28, 0.0  ;;  %v1029_v19 = vsel %vm750_vm0, %v1009_v9, 0.0  ;;  %v1005_v51 = vmul.f32 %v1758_v50, %v1758_v50  ;;  %v955_v50 = vld [vmem:[%s1604_s13 + $0x10] sm:$0xff] }
 0x1d2   : > { %979 = vadd.xlane.f32.xlu1 %v978_v16  ;;  %965 = vadd.xlane.f32.xlu0 %v964_v55  ;;  %v1028_v24 = vadd.f32 %v1027_v32, %v1026_v1  ;;  %v1031_v36 = vsel %vm750_vm0, %v1010_v2, 0.0  ;;  %v1006_v58 = vmul.f32 %v1766_v14, %v1766_v14  ;;  %v1021_v13 = vadd.f32 %v1004_v11, %v1003_v62 }
 0x1d3   : > { %v1013_v57 = vadd.f32 %v1012_v12, %v998_v10  ;;  %vm989_vm13 = vcmask 4096  }
 0x1d4   : > { %v1030_v15 = vadd.f32 %v1029_v19, %v1028_v24  ;;  %v1022_v17 = vadd.f32 %v1021_v13, %v1005_v51 }
 0x1d6   : > { %1019 = vadd.xlane.f32.xlu1 %v1018_v5  ;;  %1014 = vadd.xlane.f32.xlu0 %v1013_v57  ;;  %v1032_v18 = vadd.f32 %v1031_v36, %v1030_v15  ;;  %v1023_v59 = vadd.f32 %v1022_v17, %v1006_v58 }
 0x1da   : > { %1033 = vadd.xlane.f32.xlu1 %v1032_v18  ;;  %1024 = vadd.xlane.f32.xlu0 %v1023_v59 }
 0x25b   : > { %v971_v14 = vpop.xlane.xlu1 %970  ;;  %v961_v3 = vpop.xlane.xlu0 %960 }
 0x25c   : > { %v983_v4 = vadd.f32 %v971_v14, %v955_v50  ;;  %v981_v20 = vadd.f32 %v961_v3, %v953_v60 }
 0x25e   : > { %988 = vst.msk [vmem:[%s1604_s13 + $0x10] sm:$0xff] %vm985_vm12, %v983_v4  ;;  %986 = vst.msk [vmem:[%s1604_s13] sm:$0xff] %vm985_vm12, %v981_v20 }
 0x25f   : > { %v980_v23 = vpop.xlane.xlu1 %979  ;;  %v966_v25 = vpop.xlane.xlu0 %965 }
 0x260   : > { %v984_v29 = vadd.f32 %v980_v23, %v956_v21  ;;  %v982_v30 = vadd.f32 %v966_v25, %v954_v22 }
 0x262   : > { %990 = vst.msk [vmem:[%s1604_s13 + $0x18] sm:$0x1f] %vm989_vm13, %v984_v29 }
 0x263   : > { %987 = vst.msk [vmem:[%s1604_s13 + $0x8] sm:$0xff] %vm985_vm12, %v982_v30  ;;  %v1020_v34 = vpop.xlane.xlu1 %1019  ;;  %v1015_v35 = vpop.xlane.xlu0 %1014  ;;  %s1313_s13 = sshll.u32 (%p1542_p6), %s1433_s26, 2 }
 0x264   : > { %v1036_v37 = vadd.f32 %v1020_v34, %v992_v31  ;;  %v1035_v38 = vadd.f32 %v1015_v35, %v991_v33  ;;  %s1062_s21 = sadd.s32 (%p1542_p6), %s1314_s15, %s1313_s13 }
 0x265   : > { %1059 = sbr.rel (!%p1542_p6) target bundleno = 625 (0x271), region = 71 }
 0x266   : > { %1040 = vst.msk [vmem:[%s1610_s0 + $0x8] sm:$0xff] %vm985_vm12, %v1036_v37  ;;  %1039 = vst.msk [vmem:[%s1610_s0] sm:$0xff] %vm985_vm12, %v1035_v38 }
 0x267   : > { %v1034_v41 = vpop.xlane.xlu1 %1033  ;;  %v1025_v42 = vpop.xlane.xlu0 %1024 }
 0x268   : > { %v1038_v43 = vadd.f32 %v1034_v41, %v994_v39  ;;  %v1037_v44 = vadd.f32 %v1025_v42, %v993_v40 }
 0x26a   : > { %1042 = vst.msk [vmem:[%s1610_s0 + $0x18] sm:$0x1f] %vm989_vm13, %v1038_v43 }
 0x26b   : > { %1041 = vst.msk [vmem:[%s1610_s0 + $0x10] sm:$0xff] %vm985_vm12, %v1037_v44  ;;  %s1315_s0 = sshll.u32 (%p1542_p6), %s1062_s21, 2 }
 0x26c   : > { %s1064_s23 = scalar_lea.vmem %s1911_s5, %s1315_s0 }
 0x26d   : > { %1078 = vst [vmem:[%s1064_s23] sm:$0xff] %v1077_v45  ;;  %1080 = vst [vmem:[%s1064_s23 + $0x8] sm:$0xff] %v1079_v46 }
 0x26e   : > { %1082 = vst [vmem:[%s1064_s23 + $0x20] sm:$0xff] %v1081_v47  ;;  %1084 = vst [vmem:[%s1064_s23 + $0x28] sm:$0xff] %v1083_v48 }
 0x26f   : > { %1086 = vst [vmem:[%s1064_s23 + $0x40] sm:$0xff] %v1085_v6  ;;  %1088 = vst [vmem:[%s1064_s23 + $0x48] sm:$0xff] %v1087_v54 }
 0x270   : > { %1090 = vst [vmem:[%s1064_s23 + $0x60] sm:$0xff] %v1089_v7  ;;  %1092 = vst [vmem:[%s1064_s23 + $0x68] sm:$0xff] %v1091_v8 }
 0x271 PF: > { %s18_s30 = sadd.s32 1, %s1449_s30   ;;  %s1921_s24 = smov %s1429_s25 }
 0x272   : > { %p15_p0 = scmp.ge.s32.totalorder %s18_s30, 6   ;;  %s1922_s25 = smov %s1550_s16 }
 0x273   : > { %s1923_s26 = smov %s1441_s28  ;;  %s1924_s27 = smov %s1445_s29 }
 0x274   : > { %s1925_s28 = smov %s1928_s8  ;;  %s1926_s29 = smov %s1932_s9 }
 0x275   :  { %17 = sbr.rel (!%p15_p0) target bundleno = 6 (0x6), region = 161 }

// kernel: ae_pointnet_dcg_forward.25
= control target key start
LH: loop header
LB: loop body
LE: loop exit
PB: predicated region body
PF: predicated region fallthrough
CT: control target
= control target key end

     0   :  { %s2013_s24 = smov 0   ;;  %s2015_s25 = smov 0   ;;  %s2843_s0 = inlined_call_operand.vmem [shape: bf16[2,119,1024], index: 0, kind: input, shape index: {}]   ;;  %s2844_s1 = inlined_call_operand.vmem [shape: f32[2,119,1], index: 1, kind: input, shape index: {}]   ;;  %s2845_s2 = inlined_call_operand.vmem [shape: f32[2,119,1], index: 2, kind: input, shape index: {}]   ;;  %s2846_s3 = inlined_call_operand.vmem [shape: bf16[2,59,119], index: 3, kind: input, shape index: {}]   ;;  %s2847_s4 = inlined_call_operand.vmem [shape: f32[2,59,1], index: 4, kind: input, shape index: {}]   ;;  %s2848_s5 = inlined_call_operand.vmem [shape: bf16[2,59,1024], index: 5, kind: output, shape index: {0}]   ;;  %s2849_s6 = inlined_call_operand.vmem [shape: f32[2,59,1], index: 6, kind: output, shape index: {1}]   ;;  %s2850_s7 = inlined_call_operand.vmem [shape: f32[2,59,1], index: 7, kind: output, shape index: {2}]  }
   0x1   :  { %s2017_s26 = smov 0   ;;  %s2019_s27 = smov 0  }
   0x2   :  { %s2021_s28 = smov 0   ;;  %s2023_s29 = smov 0  }
   0x3   :  { %s2025_s30 = smov 0  }
   0x4 LB: > { %s27_s8 = sadd.s32 1, %s1960_s28  ;;  %s30_s9 = sadd.s32 1, %s1964_s29  ;;  %s1968_s30 = sphi %s2025_s30, %s18_s30   ;;  %s1964_s29 = sphi %s2023_s29, %s2880_s29   ;;  %s1960_s28 = sphi %s2021_s28, %s2879_s28   ;;  %s1956_s27 = sphi %s2019_s27, %s2878_s27   ;;  %s1952_s26 = sphi %s2017_s26, %s2877_s26   ;;  %s1948_s25 = sphi %s2015_s25, %s2876_s25   ;;  %s1944_s24 = sphi %s2013_s24, %s2875_s24  }
   0x5   : > { %p28_p0 = scmp.ge.s32.totalorder %s27_s8, 2  ;;  %s1772_s10 = sadd.s32 4294967295, %s1968_s30  }
   0x6   : > { %p46_p1 = scmp.ne.s32.totalorder %s1948_s25, %s1944_s24  ;;  %p47_p2 = scmp.eq.s32.totalorder %s1968_s30, 0 }
   0x7   : > { %s2882_s8 = smov (%p28_p0, %s27_s8), 0  ;;  %s2884_s9 = smov (!%p28_p0, %s30_s9), %s1964_s29 }
   0x8   : > { %p32_p3 = scmp.ge.s32.totalorder %s2884_s9, 2  ;;  %p182_p4 = scmp.eq.s32.totalorder %s1772_s10, 3 }
   0x9   : > { %s35_s11 = ssub.s32 %s1960_s28, %s2882_s8  ;;  %p48_p5 = por %p47_p2, %p46_p1 }
   0xa   : > { %s2886_s9 = smov (%p32_p3, %s2884_s9), 0  ;;  %p2061_p6 = por %p182_p4, %p46_p1 }
   0xb   : > { %s34_s13 = ssub.s32 %s1964_s29, %s2886_s9  ;;  %s39_s15 = sadd.s32 1, %s1948_s25 }
   0xc   : > { %s36_s14 = sor.u32 %s35_s11, %s34_s13  ;;  %p1775_p8 = scmp.ge.s32.totalorder %s1968_s30, 4 }
   0xd   : > { %p37_p7 = scmp.eq.s32.totalorder %s36_s14, 0 }
   0xe   : > { %256 = sbr.rel (%p1775_p8) target bundleno = 44 (0x2c), region = 16 }
   0xf   : > { %s2069_s16 = scalar_select %p37_p7, %s1948_s25, %s39_s15  }
  0x15   : > { %259 = sbr.rel (!%p48_p5) target bundleno = 44 (0x2c), region = 20  ;;  %s261_s17 = sand.u32 (%p48_p5), 1, %s1948_s25  }
  0x16   : > { %s1845_s18 = smul.u32 (%p48_p5), 240, %s261_s17  ;;  %s1776_s19 = sshll.u32 (%p48_p5), %s1960_s28, 2 }
  0x17   : > { %s1846_s20 = smul.u32 (%p48_p5), 120, %s1964_s29 }
  0x18   : > { %s2083_s13 = scalar_lea.vmem (%p48_p5), [#allocation2], %s1845_s18 }
  0x19   : > { %s266_s21 = sadd.s32 (%p48_p5), %s1846_s20, %s1776_s19 }
  0x1a   : > { %s1777_s22 = sshll.u32 (%p48_p5), %s266_s21, 2 }
  0x1b   : > { %s2078_s11 = scalar_lea.vmem (%p48_p5), %s2843_s0, %s1777_s22 }
  0x1c   : > { %v281_v0 = vld [vmem:[%s2078_s11] sm:$0xff]  ;;  %v283_v1 = vld [vmem:[%s2078_s11 + $0x8] sm:$0xff] }
  0x1d   : > { %v285_v2 = vld [vmem:[%s2078_s11 + $0x20] sm:$0xff]  ;;  %282 = vst [vmem:[%s2083_s13] sm:$0xff] %v281_v0  ;;  %284 = vst [vmem:[%s2083_s13 + $0x8] sm:$0xff] %v283_v1  ;;  %v287_v3 = vld [vmem:[%s2078_s11 + $0x28] sm:$0xff] }
  0x1e   : > { %286 = vst [vmem:[%s2083_s13 + $0x10] sm:$0xff] %v285_v2  ;;  %v289_v4 = vld [vmem:[%s2078_s11 + $0x40] sm:$0xff]  ;;  %v291_v5 = vld [vmem:[%s2078_s11 + $0x48] sm:$0xff]  ;;  %288 = vst [vmem:[%s2083_s13 + $0x18] sm:$0xff] %v287_v3 }
  0x1f   : > { %290 = vst [vmem:[%s2083_s13 + $0x20] sm:$0xff] %v289_v4  ;;  %292 = vst [vmem:[%s2083_s13 + $0x28] sm:$0xff] %v291_v5  ;;  %v293_v6 = vld [vmem:[%s2078_s11 + $0x60] sm:$0xff]  ;;  %v295_v7 = vld [vmem:[%s2078_s11 + $0x68] sm:$0xff] }
  0x20   : > { %v297_v8 = vld [vmem:[%s2078_s11 + $0x80] sm:$0xff]  ;;  %294 = vst [vmem:[%s2083_s13 + $0x30] sm:$0xff] %v293_v6  ;;  %296 = vst [vmem:[%s2083_s13 + $0x38] sm:$0xff] %v295_v7  ;;  %v299_v9 = vld [vmem:[%s2078_s11 + $0x88] sm:$0xff] }
  0x21   : > { %298 = vst [vmem:[%s2083_s13 + $0x40] sm:$0xff] %v297_v8  ;;  %v301_v10 = vld [vmem:[%s2078_s11 + $0xa0] sm:$0xff]  ;;  %v303_v11 = vld [vmem:[%s2078_s11 + $0xa8] sm:$0xff]  ;;  %300 = vst [vmem:[%s2083_s13 + $0x48] sm:$0xff] %v299_v9 }
  0x22   : > { %302 = vst [vmem:[%s2083_s13 + $0x50] sm:$0xff] %v301_v10  ;;  %304 = vst [vmem:[%s2083_s13 + $0x58] sm:$0xff] %v303_v11  ;;  %v305_v12 = vld [vmem:[%s2078_s11 + $0xc0] sm:$0xff]  ;;  %v307_v13 = vld [vmem:[%s2078_s11 + $0xc8] sm:$0xff] }
  0x23   : > { %v309_v14 = vld [vmem:[%s2078_s11 + $0xe0] sm:$0xff]  ;;  %306 = vst [vmem:[%s2083_s13 + $0x60] sm:$0xff] %v305_v12  ;;  %308 = vst [vmem:[%s2083_s13 + $0x68] sm:$0xff] %v307_v13  ;;  %v311_v15 = vld [vmem:[%s2078_s11 + $0xe8] sm:$0xff] }
  0x24   : > { %310 = vst [vmem:[%s2083_s13 + $0x70] sm:$0xff] %v309_v14  ;;  %v313_v16 = vld [vmem:[%s2078_s11 + $0x100] sm:$0xff]  ;;  %v315_v17 = vld [vmem:[%s2078_s11 + $0x108] sm:$0xff]  ;;  %312 = vst [vmem:[%s2083_s13 + $0x78] sm:$0xff] %v311_v15 }
  0x25   : > { %314 = vst [vmem:[%s2083_s13 + $0x80] sm:$0xff] %v313_v16  ;;  %316 = vst [vmem:[%s2083_s13 + $0x88] sm:$0xff] %v315_v17  ;;  %v317_v18 = vld [vmem:[%s2078_s11 + $0x120] sm:$0xff]  ;;  %v319_v19 = vld [vmem:[%s2078_s11 + $0x128] sm:$0xff] }
  0x26   : > { %v321_v20 = vld [vmem:[%s2078_s11 + $0x140] sm:$0xff]  ;;  %318 = vst [vmem:[%s2083_s13 + $0x90] sm:$0xff] %v317_v18  ;;  %320 = vst [vmem:[%s2083_s13 + $0x98] sm:$0xff] %v319_v19  ;;  %v323_v21 = vld [vmem:[%s2078_s11 + $0x148] sm:$0xff] }
  0x27   : > { %322 = vst [vmem:[%s2083_s13 + $0xa0] sm:$0xff] %v321_v20  ;;  %v325_v22 = vld [vmem:[%s2078_s11 + $0x160] sm:$0xff]  ;;  %v327_v23 = vld [vmem:[%s2078_s11 + $0x168] sm:$0xff]  ;;  %324 = vst [vmem:[%s2083_s13 + $0xa8] sm:$0xff] %v323_v21 }
  0x28   : > { %326 = vst [vmem:[%s2083_s13 + $0xb0] sm:$0xff] %v325_v22  ;;  %328 = vst [vmem:[%s2083_s13 + $0xb8] sm:$0xff] %v327_v23  ;;  %v329_v24 = vld [vmem:[%s2078_s11 + $0x180] sm:$0xff]  ;;  %v331_v25 = vld [vmem:[%s2078_s11 + $0x188] sm:$0xff] }
  0x29   : > { %v333_v26 = vld [vmem:[%s2078_s11 + $0x1a0] sm:$0xff]  ;;  %330 = vst [vmem:[%s2083_s13 + $0xc0] sm:$0xff] %v329_v24  ;;  %332 = vst [vmem:[%s2083_s13 + $0xc8] sm:$0xff] %v331_v25  ;;  %v335_v27 = vld [vmem:[%s2078_s11 + $0x1a8] sm:$0xff] }
  0x2a   : > { %334 = vst [vmem:[%s2083_s13 + $0xd0] sm:$0xff] %v333_v26  ;;  %v337_v28 = vld [vmem:[%s2078_s11 + $0x1c0] sm:$0xff]  ;;  %v339_v29 = vld [vmem:[%s2078_s11 + $0x1c8] sm:$0xff]  ;;  %336 = vst [vmem:[%s2083_s13 + $0xd8] sm:$0xff] %v335_v27 }
  0x2b   : > { %338 = vst [vmem:[%s2083_s13 + $0xe0] sm:$0xff] %v337_v28  ;;  %340 = vst [vmem:[%s2083_s13 + $0xe8] sm:$0xff] %v339_v29 }
  0x2c PF: > { %p1778_p9 = scmp.ge.s32.totalorder %s1968_s30, 1  ;;  %p377_p10 = scmp.lt.s32.totalorder %s1968_s30, 5 }
  0x2e   : > { %p378_p11 = pnand %p1778_p9, %p377_p10 }
  0x2f   : > { %p445_p12 = scmp.lt.s32.totalorder (!%p378_p11), %s1956_s27, 1  ;;  %v2851_v30 = vmov (!%p378_p11), 0   ;;  %s384_s18 = sand.u32 (!%p378_p11), 1, %s1944_s24   ;;  %vm1048_vm0 = vcmask (!%p378_p11), 1042432   ;;  %vm1049_vm1 = vcmask (!%p378_p11), 1043456   ;;  %vm1035_vm2 = vcmask (!%p378_p11), 973824  }
  0x30   : > { %381 = sbr.rel (%p378_p11) target bundleno = 702 (0x2be), region = 59  ;;  %1909 = vset.pattern.permute.xlu1 (!%p378_p11), %v2851_v30  ;;  %1908 = vset.pattern.permute.xlu0 (!%p378_p11), %v2851_v30  ;;  %vm1320_vm3 = vcmask (!%p378_p11), 1041408   ;;  %vm1321_vm4 = vsmask.f32 (!%p378_p11), 1280  ;;  %vm1323_vm5 = vcmask (!%p378_p11), 1045508   ;;  %p1818_p13 = scmp.ne.s32.totalorder (!%p378_p11), %s1952_s26, 0 }
  0x31   : > { %1096 = vmatprep.mubr.bf16.mxu0 (!%p378_p11), %v2851_v30  ;;  %1169 = vmatprep.mubr.bf16.mxu1 (!%p378_p11), %v2851_v30  ;;  %s1847_s19 = smul.u32 (!%p378_p11), 240, %s384_s18  ;;  %vm1324_vm6 = vsmask.f32 (!%p378_p11), 5376  ;;  %vm2571_vm7 = vmand (!%p378_p11), %vm1320_vm3, %vm1321_vm4 }
  0x32   : > { %vm2580_vm8 = vmand (!%p378_p11), %vm1323_vm5, %vm1324_vm6 }
  0x33   : > { %vm1326_vm9 = vmor (!%p378_p11), %vm2580_vm8, %vm2571_vm7 }
  0x37   : > { %s2148_s14 = scalar_select %p445_p12, %s1956_s27, 1 }
  0x38   : > { %vm1337_vm10 = vcmask (!%p1818_p13), 7168   ;;  %vm1345_vm11 = vcmask (!%p1818_p13), 2048  }
  0x39   : > { %s1848_s15 = smul.u32 120, %s2148_s14  ;;  %s2154_s17 = sshll.u32 %s2148_s14, 6 }
  0x3a   : > { %s2160_s20 = scalar_lea.vmem %s2849_s6, %s2154_s17  ;;  %s2178_s21 = scalar_lea.vmem %s2850_s7, %s2154_s17 }
  0x3b   : > { %s2165_s23 = scalar_lea.vmem %s2845_s2, %s1848_s15  ;;  %s2170_s13 = scalar_lea.vmem %s2844_s1, %s1848_s15 }
  0x3c   : > { %v717_v31 = vld [vmem:[%s2165_s23] sm:$0xff]  ;;  %v718_v33 = vld [vmem:[%s2165_s23 + $0x8] sm:$0xff]  ;;  %v570_v35 = vld [vmem:[%s2170_s13 + $0x18] sm:$0xff]  ;;  %s464_s10 = scalar_lea.vmem %s2847_s4, %s2154_s17  ;;  %s2221_s15 = scalar_lea.vmem [#allocation2], %s1847_s19 }
  0x3d   : > { %v567_v32 = vld [vmem:[%s2170_s13] sm:$0xff]  ;;  %734 = vperm.xlu1 %1909, %v717_v31   ;;  %v568_v34 = vld [vmem:[%s2170_s13 + $0x8] sm:$0xff]  ;;  %v569_v36 = vld [vmem:[%s2170_s13 + $0x10] sm:$0xff] }
  0x3e   : > { %584 = vperm.xlu0 %1908, %v567_v32   ;;  %v720_v37 = vld [vmem:[%s2165_s23 + $0x18] sm:$0xff]  ;;  %v719_v38 = vld [vmem:[%s2165_s23 + $0x10] sm:$0xff]  ;;  %v572_v39 = vld [vmem:[%s2170_s13 + $0x28] sm:$0xff] }
  0x3f   : > { %v571_v40 = vld [vmem:[%s2170_s13 + $0x20] sm:$0xff]  ;;  %v722_v41 = vld [vmem:[%s2165_s23 + $0x28] sm:$0xff]  ;;  %v574_v43 = vld [vmem:[%s2170_s13 + $0x38] sm:$0xff] }
  0x40   : > { %v721_v42 = vld [vmem:[%s2165_s23 + $0x20] sm:$0xff]  ;;  %v573_v44 = vld [vmem:[%s2170_s13 + $0x30] sm:$0xff]  ;;  %v724_v45 = vld [vmem:[%s2165_s23 + $0x38] sm:$0xff] }
  0x41   : > { %739 = vperm.xlu1 %1909, %v718_v33   ;;  %v723_v46 = vld [vmem:[%s2165_s23 + $0x30] sm:$0xff]  ;;  %v576_v47 = vld [vmem:[%s2170_s13 + $0x48] sm:$0xff]  ;;  %v575_v48 = vld [vmem:[%s2170_s13 + $0x40] sm:$0xff] }
  0x42   : > { %589 = vperm.xlu0 %1908, %v568_v34   ;;  %v726_v49 = vld [vmem:[%s2165_s23 + $0x48] sm:$0xff]  ;;  %v725_v50 = vld [vmem:[%s2165_s23 + $0x40] sm:$0xff]  ;;  %v578_v51 = vld [vmem:[%s2170_s13 + $0x58] sm:$0xff] }
  0x43   : > { %v577_v52 = vld [vmem:[%s2170_s13 + $0x50] sm:$0xff]  ;;  %v728_v53 = vld [vmem:[%s2165_s23 + $0x58] sm:$0xff]  ;;  %v580_v55 = vld [vmem:[%s2170_s13 + $0x68] sm:$0xff] }
  0x44   : > { %v727_v54 = vld [vmem:[%s2165_s23 + $0x50] sm:$0xff]  ;;  %v579_v56 = vld [vmem:[%s2170_s13 + $0x60] sm:$0xff]  ;;  %v730_v60 = vld [vmem:[%s2165_s23 + $0x68] sm:$0xff] }
  0x45   : > { %599 = vperm.xlu1 %1909, %v570_v35   ;;  %v729_v57 = vld [vmem:[%s2165_s23 + $0x60] sm:$0xff]  ;;  %v581_v58 = vld [vmem:[%s2170_s13 + $0x70] sm:$0x7f]  ;;  %v974_v62 = vld [vmem:[%s464_s10 + $0x38] sm:$0x7] }
  0x46   : > { %594 = vperm.xlu0 %1908, %v569_v36   ;;  %v731_v59 = vld [vmem:[%s2165_s23 + $0x70] sm:$0x7f]  ;;  %v967_v61 = vld [vmem:[%s464_s10] sm:$0xff]  ;;  %v968_v0 = vld [vmem:[%s464_s10 + $0x8] sm:$0xff]  ;;  %s1825_s23 = sshll.u32 %s2148_s14, 5  ;;  %s1779_s14 = sshll.u32 %s384_s18, 7 }
  0x47   : > { %v969_v63 = vld [vmem:[%s464_s10 + $0x10] sm:$0xff]  ;;  %v971_v1 = vld [vmem:[%s464_s10 + $0x20] sm:$0xff]  ;;  %v970_v2 = vld [vmem:[%s464_s10 + $0x18] sm:$0xff]  ;;  %s2216_s13 = scalar_lea.vmem %s2846_s3, %s1825_s23  ;;  %s2501_s24 = scalar_lea.vmem [#allocation3], %s1779_s14 }
  0x48   : > { %v973_v3 = vld [vmem:[%s464_s10 + $0x30] sm:$0xff]  ;;  %v972_v4 = vld [vmem:[%s464_s10 + $0x28] sm:$0xff] }
  0x49   : > { %749 = vperm.xlu1 %1909, %v720_v37   ;;  %v477_v5 = vld [vmem:[%s2221_s15] sm:$0xff]  ;;  %v478_v6 = vld [vmem:[%s2221_s15 + $0x8] sm:$0xff]  ;;  %v2226_v7 = vld [vmem:[%s2221_s15 + $0x10] sm:$0xff] }
  0x4a   : > { %744 = vperm.xlu0 %1908, %v719_v38   ;;  %v2229_v8 = vld [vmem:[%s2221_s15 + $0x18] sm:$0xff]  ;;  %v2232_v9 = vld [vmem:[%s2221_s15 + $0x30] sm:$0xff]  ;;  %v507_v11 = vunpack.c.l.bf16 %v477_v5  ;;  %v2238_v12 = vld [vmem:[%s2221_s15 + $0x20] sm:$0xff]  ;;  %v509_v14 = vunpack.c.l.bf16 %v478_v6  ;;  %v511_v15 = vunpack.c.l.bf16 %v2226_v7  ;;  %v508_v17 = vunpack.c.h.bf16 %v477_v5 }
  0x4b   : > { %v2235_v10 = vld [vmem:[%s2221_s15 + $0x38] sm:$0xff]  ;;  %v2241_v13 = vld [vmem:[%s2221_s15 + $0x28] sm:$0xff]  ;;  %v513_v16 = vunpack.c.l.bf16 %v2229_v8  ;;  %v2246_v18 = vld [vmem:[%s2221_s15 + $0x50] sm:$0xff]  ;;  %v519_v19 = vunpack.c.l.bf16 %v2232_v9  ;;  %v520_v20 = vunpack.c.h.bf16 %v2232_v9  ;;  %v512_v22 = vunpack.c.h.bf16 %v2226_v7 }
  0x4c   : > { %v521_v21 = vunpack.c.l.bf16 %v2235_v10  ;;  %v2253_v23 = vld [vmem:[%s2221_s15 + $0x58] sm:$0xff]  ;;  %v2256_v24 = vld [vmem:[%s2221_s15 + $0x40] sm:$0xff]  ;;  %v522_v25 = vunpack.c.h.bf16 %v2235_v10  ;;  %v515_v26 = vunpack.c.l.bf16 %v2238_v12  ;;  %v516_v27 = vunpack.c.h.bf16 %v2238_v12  ;;  %v2263_v29 = vld [vmem:[%s2221_s15 + $0x48] sm:$0xff] }
  0x4d   : > { %609 = vperm.xlu1 %1909, %v572_v39   ;;  %v517_v28 = vunpack.c.l.bf16 %v2241_v13  ;;  %v2266_v31 = vld [vmem:[%s2221_s15 + $0x70] sm:$0xff]  ;;  %v518_v32 = vunpack.c.h.bf16 %v2241_v13  ;;  %v510_v33 = vunpack.c.h.bf16 %v478_v6  ;;  %v514_v34 = vunpack.c.h.bf16 %v2229_v8  ;;  %v2272_v36 = vld [vmem:[%s2221_s15 + $0x78] sm:$0xff]  ;;  %v2275_v37 = vld [vmem:[%s2221_s15 + $0x60] sm:$0xff] }
  0x4e   : > { %604 = vperm.xlu0 %1908, %v571_v40   ;;  %v527_v35 = vunpack.c.l.bf16 %v2246_v18  ;;  %v528_v38 = vunpack.c.h.bf16 %v2246_v18  ;;  %v529_v39 = vunpack.c.l.bf16 %v2253_v23  ;;  %v530_v40 = vunpack.c.h.bf16 %v2253_v23  ;;  %v2313_v5 = vld [vmem:[%s2221_s15 + $0xb0] sm:$0xff] }
  0x51   : > { %759 = vperm.xlu1 %1909, %v722_v41   ;;  %v523_v41 = vunpack.c.l.bf16 %v2256_v24 }
  0x52   : > { %754 = vperm.xlu0 %1908, %v721_v42   ;;  %v524_v42 = vunpack.c.h.bf16 %v2256_v24 }
  0x55   : > { %619 = vperm.xlu1 %1909, %v574_v43   ;;  %v525_v43 = vunpack.c.l.bf16 %v2263_v29 }
  0x56   : > { %614 = vperm.xlu0 %1908, %v573_v44   ;;  %v526_v44 = vunpack.c.h.bf16 %v2263_v29 }
  0x59   : > { %769 = vperm.xlu1 %1909, %v724_v45   ;;  %v535_v45 = vunpack.c.l.bf16 %v2266_v31 }
  0x5a   : > { %764 = vperm.xlu0 %1908, %v723_v46   ;;  %v2286_v46 = vld [vmem:[%s2221_s15 + $0x68] sm:$0xff] }
  0x5d   : > { %629 = vperm.xlu1 %1909, %v576_v47   ;;  %v2289_v47 = vld [vmem:[%s2221_s15 + $0x90] sm:$0xff] }
  0x5e   : > { %624 = vperm.xlu0 %1908, %v575_v48  }
  0x61   : > { %779 = vperm.xlu1 %1909, %v726_v49  }
  0x62   : > { %774 = vperm.xlu0 %1908, %v725_v50   ;;  %v536_v50 = vunpack.c.h.bf16 %v2266_v31  ;;  %v2855_v31 = vunpack.c.l.bf16 %v2286_v46 }
  0x65   : > { %639 = vperm.xlu1 %1909, %v578_v51   ;;  %v537_v51 = vunpack.c.l.bf16 %v2272_v36 }
  0x66   : > { %634 = vperm.xlu0 %1908, %v577_v52   ;;  %v538_v52 = vunpack.c.h.bf16 %v2272_v36 }
  0x69   : > { %789 = vperm.xlu1 %1909, %v728_v53   ;;  %v531_v53 = vunpack.c.l.bf16 %v2275_v37 }
  0x6a   : > { %784 = vperm.xlu0 %1908, %v727_v54   ;;  %v2296_v54 = vld [vmem:[%s2221_s15 + $0x98] sm:$0xff] }
  0x6d   : > { %649 = vperm.xlu1 %1909, %v580_v55   ;;  %v2299_v55 = vld [vmem:[%s2221_s15 + $0x80] sm:$0xff] }
  0x6e   : > { %644 = vperm.xlu0 %1908, %v579_v56  }
  0x71   : > { %794 = vperm.xlu1 %1909, %v729_v57  }
  0x72   : > { %654 = vperm.xlu0 %1908, %v581_v58  }
  0x75   : > { %804 = vperm.xlu1 %1909, %v731_v59  }
  0x76   : > { %799 = vperm.xlu0 %1908, %v730_v60  }
  0x79   : > { %977 = vperm.xlu1 %1909, %v967_v61  }
  0x7a   : > { %1012 = vperm.xlu0 %1908, %v974_v62  }
  0x7d   : > { %987 = vperm.xlu1 %1909, %v969_v63  }
  0x7e   : > { %982 = vperm.xlu0 %1908, %v968_v0   ;;  %v2317_v0 = vld [vmem:[%s2221_s15 + $0xb8] sm:$0xff] }
  0x81   : > { %997 = vperm.xlu1 %1909, %v971_v1  }
  0x82   : > { %992 = vperm.xlu0 %1908, %v970_v2   ;;  %v2320_v2 = vld [vmem:[%s2221_s15 + $0xa0] sm:$0xff] }
  0x85   : > { %1007 = vperm.xlu1 %1909, %v973_v3   ;;  %v2309_v3 = vld [vmem:[%s2221_s15 + $0x88] sm:$0xff] }
  0x86   : > { %1002 = vperm.xlu0 %1908, %v972_v4  }
  0xbc   : > { %v735_v48 = vpop.permute.xlu1 %734 }
  0xbd   : > { %v585_v49 = vpop.permute.xlu0 %584 }
  0xbe   : > { %v657_v56 = vmul.f32 %v585_v49, %v507_v11  ;;  %v659_v57 = vmul.f32 %v585_v49, %v509_v14  ;;  %v658_v58 = vmul.f32 %v585_v49, %v508_v17  ;;  %v660_v59 = vmul.f32 %v585_v49, %v510_v33 }
  0xc0   : > { %v740_v6 = vpop.permute.xlu1 %739  ;;  %v808_v8 = vadd.f32 %v735_v48, %v658_v58  ;;  %v810_v11 = vadd.f32 %v735_v48, %v660_v59  ;;  %v807_v14 = vadd.f32 %v735_v48, %v657_v56  ;;  %v809_v1 = vadd.f32 %v735_v48, %v659_v57 }
  0xc1   : > { %v590_v7 = vpop.permute.xlu0 %589 }
  0xc2   : > { %v661_v33 = vmul.f32 %v590_v7, %v511_v15  ;;  %v663_v49 = vmul.f32 %v590_v7, %v513_v16  ;;  %v662_v30 = vmul.f32 %v590_v7, %v512_v22  ;;  %v664_v63 = vmul.f32 %v590_v7, %v514_v34 }
  0xc3   : > { %v868_v7 = vmax.f32 %v808_v8, 0.0  ;;  %v870_v4 = vmax.f32 %v810_v11, 0.0  ;;  %v867_v60 = vmax.f32 %v807_v14, 0.0  ;;  %v869_v62 = vmax.f32 %v809_v1, 0.0 }
  0xc4   : > { %v812_v58 = vadd.f32 %v740_v6, %v662_v30  ;;  %v811_v59 = vadd.f32 %v740_v6, %v661_v33  ;;  %v813_v56 = vadd.f32 %v740_v6, %v663_v49  ;;  %v600_v15 = vpop.permute.xlu1 %599  ;;  %v814_v22 = vadd.f32 %v740_v6, %v664_v63 }
  0xc5   : > { %v595_v16 = vpop.permute.xlu0 %594  ;;  %v669_v30 = vmul.f32 %v600_v15, %v519_v19  ;;  %v670_v33 = vmul.f32 %v600_v15, %v520_v20  ;;  %v671_v49 = vmul.f32 %v600_v15, %v521_v21  ;;  %v672_v63 = vmul.f32 %v600_v15, %v522_v25 }
  0xc6   : > { %v872_v6 = vmax.f32 %v812_v58, 0.0  ;;  %v874_v57 = vmax.f32 %v814_v22, 0.0  ;;  %v871_v48 = vmax.f32 %v811_v59, 0.0  ;;  %v873_v34 = vmax.f32 %v813_v56, 0.0 }
  0xc7   : > { %v665_v8 = vmul.f32 %v595_v16, %v515_v26  ;;  %v666_v1 = vmul.f32 %v595_v16, %v516_v27  ;;  %v667_v9 = vmul.f32 %v595_v16, %v517_v28  ;;  %v668_v19 = vmul.f32 %v595_v16, %v518_v32 }
  0xc8   : > { %v750_v20 = vpop.permute.xlu1 %749  ;;  %v928_v26 = vpack.c.bf16 %v872_v6, %v868_v7  ;;  %v930_v22 = vpack.c.bf16 %v874_v57, %v870_v4  ;;  %v927_v12 = vpack.c.bf16 %v871_v48, %v867_v60  ;;  %v929_v27 = vpack.c.bf16 %v873_v34, %v869_v62  ;;  %v2357_v34 = vld [vmem:[%s2221_s15 + $0xa8] sm:$0xff] }
  0xc9   : > { %v745_v21 = vpop.permute.xlu0 %744  ;;  %v819_v10 = vadd.f32 %v750_v20, %v669_v30  ;;  %v820_v25 = vadd.f32 %v750_v20, %v670_v33  ;;  %v821_v11 = vadd.f32 %v750_v20, %v671_v49  ;;  %v822_v14 = vadd.f32 %v750_v20, %v672_v63 }
  0xca   : > { %v815_v58 = vadd.f32 %v745_v21, %v665_v8  ;;  %v816_v59 = vadd.f32 %v745_v21, %v666_v1  ;;  %v817_v56 = vadd.f32 %v745_v21, %v667_v9  ;;  %v818_v15 = vadd.f32 %v745_v21, %v668_v19  ;;  %1064 = vmatprep.subr.bf16.mxu0 %v928_v26  ;;  %v2367_v1 = vld [vmem:[%s2221_s15 + $0xd0] sm:$0xff] }
  0xcb   : > { %v880_v13 = vmax.f32 %v820_v25, 0.0  ;;  %v882_v16 = vmax.f32 %v822_v14, 0.0  ;;  %1137 = vmatprep.subr.bf16.mxu1 %v930_v22  ;;  %v548_v4 = vunpack.c.h.bf16 %v2320_v2  ;;  %1065 = vmatpush1.bf16.msra.mxu0 %v927_v12  ;;  %v879_v57 = vmax.f32 %v819_v10, 0.0 }
  0xcc   : > { %v610_v17 = vpop.permute.xlu1 %609  ;;  %v876_v28 = vmax.f32 %v816_v59, 0.0  ;;  %v878_v32 = vmax.f32 %v818_v15, 0.0  ;;  %v875_v49 = vmax.f32 %v815_v58, 0.0  ;;  %1138 = vmatpush1.bf16.msra.mxu1 %v929_v27  ;;  %v881_v63 = vmax.f32 %v821_v11, 0.0 }
  0xcd   : > { %v605_v61 = vpop.permute.xlu0 %604  ;;  %v677_v30 = vmul.f32 %v610_v17, %v527_v35  ;;  %v678_v33 = vmul.f32 %v610_v17, %v528_v38  ;;  %v679_v60 = vmul.f32 %v610_v17, %v529_v39  ;;  %v680_v62 = vmul.f32 %v610_v17, %v530_v40 }
  0xce   : > { %v673_v48 = vmul.f32 %v605_v61, %v523_v41  ;;  %v674_v18 = vmul.f32 %v605_v61, %v524_v42  ;;  %v675_v35 = vmul.f32 %v605_v61, %v525_v43  ;;  %v932_v38 = vpack.c.bf16 %v880_v13, %v876_v28 }
  0xcf   : > { %v934_v7 = vpack.c.bf16 %v882_v16, %v878_v32  ;;  %v676_v39 = vmul.f32 %v605_v61, %v526_v44  ;;  %v931_v17 = vpack.c.bf16 %v879_v57, %v875_v49  ;;  %v877_v41 = vmax.f32 %v817_v56, 0.0  ;;  %v2370_v44 = vld [vmem:[%s2221_s15 + $0xd8] sm:$0xff] }
  0xd0   : > { %v760_v23 = vpop.permute.xlu1 %759  ;;  %1066 = vmatprep.subr.bf16.mxu0 %v932_v38  ;;  %v549_v8 = vunpack.c.l.bf16 %v2357_v34  ;;  %v550_v59 = vunpack.c.h.bf16 %v2357_v34  ;;  %v559_v56 = vunpack.c.l.bf16 %v2367_v1  ;;  %v560_v22 = vunpack.c.h.bf16 %v2367_v1 }
  0xd1   : > { %v755_v40 = vpop.permute.xlu0 %754  ;;  %1139 = vmatprep.subr.bf16.mxu1 %v934_v7  ;;  %v827_v6 = vadd.f32 %v760_v23, %v677_v30  ;;  %v828_v24 = vadd.f32 %v760_v23, %v678_v33  ;;  %v829_v42 = vadd.f32 %v760_v23, %v679_v60  ;;  %v830_v43 = vadd.f32 %v760_v23, %v680_v62  ;;  %v2393_v7 = vld [vmem:[%s2221_s15 + $0xc0] sm:$0xff] }
  0xd2   : > { %v823_v9 = vadd.f32 %v755_v40, %v673_v48  ;;  %v824_v19 = vadd.f32 %v755_v40, %v674_v18  ;;  %v825_v29 = vadd.f32 %v755_v40, %v675_v35  ;;  %1067 = vmatpush1.bf16.msra.mxu0 %v931_v17  ;;  %v826_v61 = vadd.f32 %v755_v40, %v676_v39  ;;  %v2396_v40 = vld [vmem:[%s2221_s15 + $0xc8] sm:$0xff] }
  0xd3   : > { %v933_v20 = vpack.c.bf16 %v881_v63, %v877_v41  ;;  %v888_v21 = vmax.f32 %v828_v24, 0.0  ;;  %v887_v10 = vmax.f32 %v827_v6, 0.0  ;;  %v890_v15 = vmax.f32 %v830_v43, 0.0 }
  0xd4   : > { %v620_v25 = vpop.permute.xlu1 %619  ;;  %v884_v14 = vmax.f32 %v824_v19, 0.0  ;;  %v883_v58 = vmax.f32 %v823_v9, 0.0  ;;  %v885_v26 = vmax.f32 %v825_v29, 0.0  ;;  %v561_v12 = vunpack.c.l.bf16 %v2370_v44 }
  0xd5   : > { %v615_v11 = vpop.permute.xlu0 %614  ;;  %1140 = vmatpush1.bf16.msra.mxu1 %v933_v20  ;;  %v685_v27 = vmul.f32 %v620_v25, %v535_v45  ;;  %v686_v28 = vmul.f32 %v620_v25, %v536_v50  ;;  %v687_v13 = vmul.f32 %v620_v25, %v537_v51  ;;  %v688_v32 = vmul.f32 %v620_v25, %v538_v52 }
  0xd6   : > { %v936_v16 = vpack.c.bf16 %v888_v21, %v884_v14  ;;  %v886_v30 = vmax.f32 %v826_v61, 0.0  ;;  %v935_v33 = vpack.c.bf16 %v887_v10, %v883_v58  ;;  %v889_v49 = vmax.f32 %v829_v42, 0.0 }
  0xd7   : > { %v681_v60 = vmul.f32 %v615_v11, %v531_v53  ;;  %v2854_v62 = vunpack.c.h.bf16 %v2275_v37  ;;  %v683_v50 = vmul.f32 %v615_v11, %v2855_v31  ;;  %v2856_v51 = vunpack.c.h.bf16 %v2286_v46 }
  0xd8   : > { %v770_v36 = vpop.permute.xlu1 %769  ;;  %1068 = vmatprep.subr.bf16.mxu0 %v936_v16  ;;  %v938_v57 = vpack.c.bf16 %v890_v15, %v886_v30  ;;  %v937_v46 = vpack.c.bf16 %v889_v49, %v885_v26  ;;  %v562_v9 = vunpack.c.h.bf16 %v2370_v44  ;;  %v555_v19 = vunpack.c.l.bf16 %v2393_v7 }
  0xd9   : > { %v682_v45 = vmul.f32 %v615_v11, %v2854_v62  ;;  %v684_v48 = vmul.f32 %v615_v11, %v2856_v51  ;;  %v765_v52 = vpop.permute.xlu0 %764  ;;  %v835_v18 = vadd.f32 %v770_v36, %v685_v27  ;;  %v836_v35 = vadd.f32 %v770_v36, %v686_v28  ;;  %1069 = vmatpush1.bf16.msra.mxu0 %v935_v33 }
  0xda   : > { %v837_v38 = vadd.f32 %v770_v36, %v687_v13  ;;  %v838_v53 = vadd.f32 %v770_v36, %v688_v32  ;;  %v831_v39 = vadd.f32 %v765_v52, %v681_v60  ;;  %v833_v23 = vadd.f32 %v765_v52, %v683_v50  ;;  %1141 = vmatprep.subr.bf16.mxu1 %v938_v57  ;;  %v2419_v57 = vld [vmem:[%s2221_s15 + $0xe0] sm:$0xff] }
  0xdb   : > { %v832_v37 = vadd.f32 %v765_v52, %v682_v45  ;;  %v834_v17 = vadd.f32 %v765_v52, %v684_v48  ;;  %v896_v41 = vmax.f32 %v836_v35, 0.0  ;;  %v895_v63 = vmax.f32 %v835_v18, 0.0  ;;  %1142 = vmatpush1.bf16.msra.mxu1 %v937_v46 }
  0xdc   : > { %v630_v6 = vpop.permute.xlu1 %629  ;;  %v891_v43 = vmax.f32 %v831_v39, 0.0  ;;  %v898_v29 = vmax.f32 %v838_v53, 0.0  ;;  %v893_v61 = vmax.f32 %v833_v23, 0.0  ;;  %v556_v20 = vunpack.c.h.bf16 %v2393_v7 }
  0xdd   : > { %v625_v24 = vpop.permute.xlu0 %624  ;;  %v892_v42 = vmax.f32 %v832_v37, 0.0  ;;  %v557_v21 = vunpack.c.l.bf16 %v2396_v40  ;;  %v2857_v10 = vunpack.c.l.bf16 %v2289_v47  ;;  %v2858_v11 = vunpack.c.h.bf16 %v2289_v47 }
  0xde   : > { %v2859_v58 = vunpack.c.l.bf16 %v2296_v54  ;;  %v2860_v26 = vunpack.c.h.bf16 %v2296_v54  ;;  %v894_v13 = vmax.f32 %v834_v17, 0.0  ;;  %v939_v32 = vpack.c.bf16 %v895_v63, %v891_v43 }
  0xdf   : > { %v693_v25 = vmul.f32 %v630_v6, %v2857_v10  ;;  %v694_v14 = vmul.f32 %v630_v6, %v2858_v11  ;;  %v940_v28 = vpack.c.bf16 %v896_v41, %v892_v42  ;;  %v897_v16 = vmax.f32 %v837_v38, 0.0 }
  0xe0   : > { %v695_v15 = vmul.f32 %v630_v6, %v2859_v58  ;;  %v696_v27 = vmul.f32 %v630_v6, %v2860_v26  ;;  %v2861_v30 = vunpack.c.l.bf16 %v2299_v55  ;;  %v2862_v49 = vunpack.c.h.bf16 %v2299_v55  ;;  %v780_v50 = vpop.permute.xlu1 %779 }
  0xe1   : > { %v2863_v47 = vunpack.c.l.bf16 %v2309_v3  ;;  %v2864_v45 = vunpack.c.h.bf16 %v2309_v3  ;;  %v775_v54 = vpop.permute.xlu0 %774  ;;  %1070 = vmatprep.subr.bf16.mxu0 %v940_v28  ;;  %v942_v51 = vpack.c.bf16 %v898_v29, %v894_v13  ;;  %v843_v48 = vadd.f32 %v780_v50, %v693_v25 }
  0xe2   : > { %v689_v33 = vmul.f32 %v625_v24, %v2861_v30  ;;  %v690_v60 = vmul.f32 %v625_v24, %v2862_v49  ;;  %v844_v36 = vadd.f32 %v780_v50, %v694_v14  ;;  %v845_v52 = vadd.f32 %v780_v50, %v695_v15  ;;  %1071 = vmatpush1.bf16.msra.mxu0 %v939_v32 }
  0xe3   : > { %v691_v62 = vmul.f32 %v625_v24, %v2863_v47  ;;  %v692_v31 = vmul.f32 %v625_v24, %v2864_v45  ;;  %v846_v18 = vadd.f32 %v780_v50, %v696_v27  ;;  %1143 = vmatprep.subr.bf16.mxu1 %v942_v51  ;;  %v941_v39 = vpack.c.bf16 %v897_v16, %v893_v61  ;;  %v506_v45 = vld [vmem:[%s2221_s15 + $0xe8] sm:$0xff] }
  0xe4   : > { %v839_v35 = vadd.f32 %v775_v54, %v689_v33  ;;  %v840_v38 = vadd.f32 %v775_v54, %v690_v60  ;;  %v904_v37 = vmax.f32 %v844_v36, 0.0  ;;  %v903_v3 = vmax.f32 %v843_v48, 0.0  ;;  %v640_v23 = vpop.permute.xlu1 %639 }
  0xe5   : > { %v841_v55 = vadd.f32 %v775_v54, %v691_v62  ;;  %v842_v53 = vadd.f32 %v775_v54, %v692_v31  ;;  %v635_v17 = vpop.permute.xlu0 %634  ;;  %v558_v63 = vunpack.c.h.bf16 %v2396_v40  ;;  %v563_v6 = vunpack.c.l.bf16 %v2419_v57  ;;  %1144 = vmatpush1.bf16.msra.mxu1 %v941_v39 }
  0xe6   : > { %v900_v46 = vmax.f32 %v840_v38, 0.0  ;;  %v899_v41 = vmax.f32 %v839_v35, 0.0  ;;  %v906_v24 = vmax.f32 %v846_v18, 0.0  ;;  %v2865_v43 = vunpack.c.l.bf16 %v2313_v5 }
  0xe7   : > { %v901_v42 = vmax.f32 %v841_v55, 0.0  ;;  %v2866_v10 = vunpack.c.h.bf16 %v2313_v5  ;;  %v2867_v25 = vunpack.c.l.bf16 %v2317_v0  ;;  %v2868_v14 = vunpack.c.h.bf16 %v2317_v0 }
  0xe8   : > { %v701_v29 = vmul.f32 %v640_v23, %v2865_v43  ;;  %v944_v15 = vpack.c.bf16 %v904_v37, %v900_v46  ;;  %v902_v26 = vmax.f32 %v842_v53, 0.0  ;;  %v943_v27 = vpack.c.bf16 %v903_v3, %v899_v41  ;;  %v790_v33 = vpop.permute.xlu1 %789 }
  0xe9   : > { %v702_v61 = vmul.f32 %v640_v23, %v2866_v10  ;;  %v703_v11 = vmul.f32 %v640_v23, %v2867_v25  ;;  %v704_v58 = vmul.f32 %v640_v23, %v2868_v14  ;;  %v905_v28 = vmax.f32 %v845_v52, 0.0  ;;  %v785_v0 = vpop.permute.xlu0 %784 }
  0xea   : > { %v2869_v13 = vunpack.c.l.bf16 %v2320_v2  ;;  %v698_v16 = vmul.f32 %v635_v17, %v548_v4  ;;  %v699_v5 = vmul.f32 %v635_v17, %v549_v8  ;;  %v700_v30 = vmul.f32 %v635_v17, %v550_v59  ;;  %1072 = vmatprep.subr.bf16.mxu0 %v944_v15 }
  0xeb   : > { %v946_v49 = vpack.c.bf16 %v906_v24, %v902_v26  ;;  %v851_v60 = vadd.f32 %v790_v33, %v701_v29  ;;  %v852_v47 = vadd.f32 %v790_v33, %v702_v61  ;;  %v853_v62 = vadd.f32 %v790_v33, %v703_v11  ;;  %1073 = vmatpush1.bf16.msra.mxu0 %v943_v27 }
  0xec   : > { %v697_v32 = vmul.f32 %v635_v17, %v2869_v13  ;;  %v854_v31 = vadd.f32 %v790_v33, %v704_v58  ;;  %v848_v54 = vadd.f32 %v785_v0, %v698_v16  ;;  %v849_v51 = vadd.f32 %v785_v0, %v699_v5  ;;  %v650_v34 = vpop.permute.xlu1 %649 }
  0xed   : > { %1145 = vmatprep.subr.bf16.mxu1 %v946_v49  ;;  %v850_v2 = vadd.f32 %v785_v0, %v700_v30  ;;  %v945_v4 = vpack.c.bf16 %v905_v28, %v901_v42  ;;  %v912_v8 = vmax.f32 %v852_v47, 0.0  ;;  %v911_v48 = vmax.f32 %v851_v60, 0.0  ;;  %v645_v59 = vpop.permute.xlu0 %644 }
  0xee   : > { %v847_v50 = vadd.f32 %v785_v0, %v697_v32  ;;  %v908_v36 = vmax.f32 %v848_v54, 0.0  ;;  %v564_v52 = vunpack.c.h.bf16 %v2419_v57  ;;  %v565_v18 = vunpack.c.l.bf16 %v506_v45 }
  0xef   : > { %1146 = vmatpush1.bf16.msra.mxu1 %v945_v4  ;;  %v914_v38 = vmax.f32 %v854_v31, 0.0  ;;  %v566_v55 = vunpack.c.h.bf16 %v506_v45  ;;  %v1971_v53 = vmov 65535   ;;  %v705_v37 = vmul.f32 %v645_v59, %v555_v19 }
  0xf0   : > { %v907_v35 = vmax.f32 %v847_v50, 0.0  ;;  %v1050_v39 = vsel %vm1048_vm0, 4294967295, %v1971_v53  ;;  %v706_v3 = vmul.f32 %v645_v59, %v556_v20  ;;  %v707_v23 = vmul.f32 %v645_v59, %v557_v21  ;;  %v795_v61 = vpop.permute.xlu1 %794  ;;  %v1911_v53 = vld [vmem:[%s2216_s13 + $0x8] sm:$0xff]  }
  0xf1   : > { %v909_v17 = vmax.f32 %v849_v51, 0.0  ;;  %v948_v46 = vpack.c.bf16 %v912_v8, %v908_v36  ;;  %v910_v41 = vmax.f32 %v850_v2, 0.0  ;;  %v913_v42 = vmax.f32 %v853_v62, 0.0  ;;  %v655_v19 = vpop.permute.xlu0 %654 }
  0xf2   : > { %v947_v24 = vpack.c.bf16 %v911_v48, %v907_v35  ;;  %v709_v43 = vmul.f32 %v650_v34, %v559_v56  ;;  %v710_v29 = vmul.f32 %v650_v34, %v560_v22  ;;  %v708_v10 = vmul.f32 %v645_v59, %v558_v63 }
  0xf3   : > { %v1051_v7 = vsel %vm1049_vm1, %v1050_v39, 0  ;;  %1074 = vmatprep.subr.bf16.mxu0 %v948_v46  ;;  %v950_v20 = vpack.c.bf16 %v914_v38, %v910_v41  ;;  %v855_v40 = vadd.f32 %v795_v61, %v705_v37  ;;  %v856_v21 = vadd.f32 %v795_v61, %v706_v3  ;;  %v1910_v38 = vld [vmem:[%s2216_s13] sm:$0xff]   ;;  %v1912_v39 = vld [vmem:[%s2216_s13 + $0x10] sm:$0xff]   ;;  %v1913_v37 = vld [vmem:[%s2216_s13 + $0x18] sm:$0x3f]  }
  0xf4   : > { %v857_v25 = vadd.f32 %v795_v61, %v707_v23  ;;  %v711_v11 = vmul.f32 %v650_v34, %v561_v12  ;;  %v712_v14 = vmul.f32 %v650_v34, %v562_v9  ;;  %v858_v56 = vadd.f32 %v795_v61, %v708_v10  ;;  %1075 = vmatpush1.bf16.msra.mxu0 %v947_v24  ;;  %v805_v26 = vpop.permute.xlu1 %804 }
  0xf5   : > { %v713_v1 = vmul.f32 %v655_v19, %v563_v6  ;;  %1147 = vmatprep.subr.bf16.mxu1 %v950_v20  ;;  %v714_v22 = vmul.f32 %v655_v19, %v564_v52  ;;  %v715_v63 = vmul.f32 %v655_v19, %v565_v18  ;;  %v716_v58 = vmul.f32 %v655_v19, %v566_v55  ;;  %v800_v27 = vpop.permute.xlu0 %799 }
  0xf6   : > { %v949_v15 = vpack.c.bf16 %v913_v42, %v909_v17  ;;  %v916_v28 = vmax.f32 %v856_v21, 0.0  ;;  %v918_v13 = vmax.f32 %v858_v56, 0.0  ;;  %v915_v32 = vmax.f32 %v855_v40, 0.0 }
  0xf7   : > { %v917_v16 = vmax.f32 %v857_v25, 0.0  ;;  %v863_v12 = vadd.f32 %v805_v26, %v713_v1  ;;  %v864_v44 = vadd.f32 %v805_v26, %v714_v22  ;;  %v865_v9 = vadd.f32 %v805_v26, %v715_v63 }
  0xf8   : > { %1148 = vmatpush1.bf16.msra.mxu1 %v949_v15  ;;  %v866_v5 = vadd.f32 %v805_v26, %v716_v58  ;;  %v859_v30 = vadd.f32 %v800_v27, %v709_v43  ;;  %v860_v57 = vadd.f32 %v800_v27, %v710_v29  ;;  %v861_v6 = vadd.f32 %v800_v27, %v711_v11  ;;  %v978_v23 = vpop.permute.xlu1 %977 }
  0xf9   : > { %v862_v33 = vadd.f32 %v800_v27, %v712_v14  ;;  %v923_v0 = vmax.f32 %v863_v12, 0.0  ;;  %v924_v49 = vmax.f32 %v864_v44, 0.0  ;;  %v925_v60 = vmax.f32 %v865_v9, 0.0  ;;  %v2477_v3 = vpop.permute.xlu0 %1012 }
  0xfa   : > { %v926_v47 = vmax.f32 %v866_v5, 0.0  ;;  %v920_v62 = vmax.f32 %v860_v57, 0.0  ;;  %v919_v31 = vmax.f32 %v859_v30, 0.0  ;;  %v921_v50 = vmax.f32 %v861_v6, 0.0 }
  0xfb   : > { %v922_v45 = vmax.f32 %v862_v33, 0.0  ;;  %v956_v54 = vpack.c.bf16 %v924_v49, %v924_v49  ;;  %v955_v36 = vpack.c.bf16 %v923_v0, %v923_v0  ;;  %v957_v52 = vpack.c.bf16 %v925_v60, %v925_v60 }
  0xfc   : > { %v958_v51 = vpack.c.bf16 %v926_v47, %v926_v47  ;;  %v952_v2 = vpack.c.bf16 %v920_v62, %v916_v28  ;;  %v951_v8 = vpack.c.bf16 %v919_v31, %v915_v32  ;;  %v953_v48 = vpack.c.bf16 %v921_v50, %v917_v16  ;;  %v988_v58 = vpop.permute.xlu1 %987 }
  0xfd   : > { %v954_v4 = vpack.c.bf16 %v922_v45, %v918_v13  ;;  %v1056_v34 = vand.u32 %v1051_v7, %v956_v54  ;;  %v1053_v18 = vand.u32 %v1051_v7, %v955_v36  ;;  %v1059_v35 = vand.u32 %v1051_v7, %v957_v52  ;;  %v983_v17 = vpop.permute.xlu0 %982 }
  0xfe   : > { %v1062_v59 = vand.u32 %v1051_v7, %v958_v51  ;;  %1076 = vmatprep.subr.bf16.mxu0 %v952_v2  ;;  %v2870_v55 = vmov 0  }
  0xff   : > { %1149 = vmatprep.subr.bf16.mxu1 %v954_v4  ;;  %1077 = vmatpush1.bf16.msra.mxu0 %v951_v8 }
 0x100   : > { %1150 = vmatpush1.bf16.msra.mxu1 %v953_v48  ;;  %1078 = vmatprep.subr.bf16.mxu0 %v1056_v34  ;;  %v998_v31 = vpop.permute.xlu1 %997 }
 0x101   : > { %1151 = vmatprep.subr.bf16.mxu1 %v1062_v59  ;;  %v993_v15 = vpop.permute.xlu0 %992 }
 0x103   : > { %1079 = vmatpush1.bf16.msra.mxu0 %v1053_v18 }
 0x104   : > { %1152 = vmatpush1.bf16.msra.mxu1 %v1059_v35 }
 0x105   : > { %v1003_v50 = vpop.permute.xlu0 %1002 }
 0x106   : > { %1794 = vmatmul.mubr.msk.bf16.vlgmr.msra.gmra.mrb[0].mxu0 %vm1035_vm2, %v1910_v38 }
 0x107   : > { %1798 = vmatmul.mubr.msk.bf16.vlgmr.msra.gmra.mrb[0].mxu1 %vm1035_vm2, %v1910_v38  ;;  %1106 = vmatprep.mubr.bf16.mxu0 %v2870_v55 }
 0x108   : > { %1179 = vmatprep.mubr.bf16.mxu1 %v2870_v55 }
 0x10e   : > { %1795 = vmatmul.mubr.msk.bf16.gmra.mrb[4].mxu0 %vm1035_vm2, %v1911_v53 }
 0x10f   : > { %1799 = vmatmul.mubr.msk.bf16.gmra.mrb[4].mxu1 %vm1035_vm2, %v1911_v53  ;;  %1116 = vmatprep.mubr.bf16.mxu0 %v2870_v55 }
 0x110   : > { %1189 = vmatprep.mubr.bf16.mxu1 %v2870_v55 }
 0x116   : > { %1796 = vmatmul.mubr.msk.bf16.gmra.mrb[8].mxu0 %vm1035_vm2, %v1912_v39 }
 0x117   : > { %1800 = vmatmul.mubr.msk.bf16.gmra.mrb[8].mxu1 %vm1035_vm2, %v1912_v39  ;;  %1126 = vmatprep.mubr.bf16.mxu0 %v2870_v55 }
 0x118   : > { %1199 = vmatprep.mubr.bf16.mxu1 %v2870_v55 }
 0x11e   : > { %1797 = vmatmul.mubr.msk.bf16.gmra.mrb[12].mxu0 %vm1035_vm2, %v1913_v37 }
 0x11f   : > { %1801 = vmatmul.mubr.msk.bf16.gmra.mrb[12].mxu1 %vm1035_vm2, %v1913_v37 }
 0x1d9   : > { %v1098_v46 = vpop.f32.mrb[0].mxu0 }
 0x1da   : > { %v1171_v41 = vpop.f32.mrb[0].mxu1  ;;  %v2481_v24 = vadd.f32 %v1098_v46, %v978_v23  ;;  %v1100_v43 = vpop.f32.mrb[1].mxu0 }
 0x1db   : > { %v2483_v42 = vadd.f32 %v1171_v41, %v978_v23  ;;  %v1173_v29 = vpop.f32.mrb[1].mxu1  ;;  %v2485_v10 = vadd.f32 %v1100_v43, %v978_v23  ;;  %v1102_v19 = vpop.f32.mrb[2].mxu0 }
 0x1dc   : > { %v2487_v61 = vadd.f32 %v1173_v29, %v978_v23  ;;  %v1175_v7 = vpop.f32.mrb[2].mxu1  ;;  %v2489_v20 = vadd.f32 %v1102_v19, %v983_v17  ;;  %v1104_v21 = vpop.f32.mrb[3].mxu0 }
 0x1dd   : > { %v2491_v40 = vadd.f32 %v1175_v7, %v983_v17  ;;  %v1177_v25 = vpop.f32.mrb[3].mxu1  ;;  %v1829_v11 = vpack.c.bf16 %v2485_v10, %v2481_v24  ;;  %v2497_v56 = vadd.f32 %v1104_v21, %v983_v17  ;;  %v1008_v41 = vpop.permute.xlu1 %1007 }
 0x1de   : > { %v1830_v14 = vpack.c.bf16 %v2487_v61, %v2483_v42  ;;  %v2499_v1 = vadd.f32 %v1177_v25, %v983_v17 }
 0x1df   : > { %1306 = vst [vmem:[%s2501_s24] sm:$0xff] %v1829_v11  ;;  %v1831_v22 = vpack.c.bf16 %v2497_v56, %v2489_v20 }
 0x1e0   : > { %1307 = vst [vmem:[%s2501_s24 + $0x8] sm:$0xff] %v1830_v14  ;;  %v1832_v63 = vpack.c.bf16 %v2499_v1, %v2491_v40 }
 0x1e1   : > { %1308 = vst [vmem:[%s2501_s24 + $0x10] sm:$0xff] %v1831_v22  ;;  %v1108_v26 = vpop.f32.mrb[4].mxu0 }
 0x1e2   : > { %1309 = vst [vmem:[%s2501_s24 + $0x18] sm:$0xff] %v1832_v63  ;;  %v1181_v27 = vpop.f32.mrb[4].mxu1  ;;  %v2511_v28 = vadd.f32 %v1108_v26, %v988_v58  ;;  %v1110_v32 = vpop.f32.mrb[5].mxu0 }
 0x1e3   : > { %v2513_v13 = vadd.f32 %v1181_v27, %v988_v58  ;;  %v1183_v16 = vpop.f32.mrb[5].mxu1  ;;  %v2515_v12 = vadd.f32 %v1110_v32, %v988_v58  ;;  %v1112_v9 = vpop.f32.mrb[6].mxu0 }
 0x1e4   : > { %v2517_v44 = vadd.f32 %v1183_v16, %v988_v58  ;;  %v1185_v5 = vpop.f32.mrb[6].mxu1  ;;  %v2519_v30 = vadd.f32 %v1112_v9, %v993_v15  ;;  %v1114_v6 = vpop.f32.mrb[7].mxu0 }
 0x1e5   : > { %v2521_v57 = vadd.f32 %v1185_v5, %v993_v15  ;;  %v1187_v33 = vpop.f32.mrb[7].mxu1  ;;  %v1833_v0 = vpack.c.bf16 %v2515_v12, %v2511_v28  ;;  %v2527_v60 = vadd.f32 %v1114_v6, %v993_v15 }
 0x1e6   : > { %v1834_v49 = vpack.c.bf16 %v2517_v44, %v2513_v13  ;;  %v2529_v47 = vadd.f32 %v1187_v33, %v993_v15 }
 0x1e7   : > { %1310 = vst [vmem:[%s2501_s24 + $0x20] sm:$0xff] %v1833_v0  ;;  %v1835_v62 = vpack.c.bf16 %v2527_v60, %v2519_v30  ;;  %v1327_v0 = vld [vmem:[%s2501_s24 + $0x70] sm:$0x33] }
 0x1e8   : > { %1311 = vst [vmem:[%s2501_s24 + $0x28] sm:$0xff] %v1834_v49  ;;  %v1836_v45 = vpack.c.bf16 %v2529_v47, %v2521_v57  ;;  %v1330_v49 = vld [vmem:[%s2501_s24 + $0x78] sm:$0x33] }
 0x1e9   : > { %1312 = vst [vmem:[%s2501_s24 + $0x30] sm:$0xff] %v1835_v62  ;;  %v1118_v54 = vpop.f32.mrb[8].mxu0 }
 0x1ea   : > { %1313 = vst [vmem:[%s2501_s24 + $0x38] sm:$0xff] %v1836_v45  ;;  %v1191_v51 = vpop.f32.mrb[8].mxu1  ;;  %v2539_v2 = vadd.f32 %v1118_v54, %v998_v31  ;;  %v1120_v8 = vpop.f32.mrb[9].mxu0 }
 0x1eb   : > { %v2541_v4 = vadd.f32 %v1191_v51, %v998_v31  ;;  %v1193_v48 = vpop.f32.mrb[9].mxu1  ;;  %v2543_v34 = vadd.f32 %v1120_v8, %v998_v31  ;;  %v1122_v36 = vpop.f32.mrb[10].mxu0 }
 0x1ec   : > { %v2545_v59 = vadd.f32 %v1193_v48, %v998_v31  ;;  %v1195_v52 = vpop.f32.mrb[10].mxu1  ;;  %v2547_v18 = vadd.f32 %v1122_v36, %v1003_v50  ;;  %v1124_v38 = vpop.f32.mrb[11].mxu0 }
 0x1ed   : > { %v2549_v35 = vadd.f32 %v1195_v52, %v1003_v50  ;;  %v1197_v55 = vpop.f32.mrb[11].mxu1  ;;  %v1837_v53 = vpack.c.bf16 %v2543_v34, %v2539_v2  ;;  %v2555_v37 = vadd.f32 %v1124_v38, %v1003_v50 }
 0x1ee   : > { %v1838_v39 = vpack.c.bf16 %v2545_v59, %v2541_v4  ;;  %v2557_v23 = vadd.f32 %v1197_v55, %v1003_v50 }
 0x1ef   : > { %1314 = vst [vmem:[%s2501_s24 + $0x40] sm:$0xff] %v1837_v53  ;;  %v1839_v17 = vpack.c.bf16 %v2555_v37, %v2547_v18 }
 0x1f0   : > { %1315 = vst [vmem:[%s2501_s24 + $0x48] sm:$0xff] %v1838_v39  ;;  %v1840_v46 = vpack.c.bf16 %v2557_v23, %v2549_v35 }
 0x1f1   : > { %1316 = vst [vmem:[%s2501_s24 + $0x50] sm:$0xff] %v1839_v17  ;;  %v1128_v43 = vpop.f32.mrb[12].mxu0 }
 0x1f2   : > { %1317 = vst [vmem:[%s2501_s24 + $0x58] sm:$0xff] %v1840_v46  ;;  %v1201_v29 = vpop.f32.mrb[12].mxu1  ;;  %v2567_v19 = vadd.f32 %v1128_v43, %v1008_v41  ;;  %v1130_v21 = vpop.f32.mrb[13].mxu0 }
 0x1f3   : > { %v2569_v7 = vadd.f32 %v1201_v29, %v1008_v41  ;;  %v1203_v25 = vpop.f32.mrb[13].mxu1  ;;  %v2575_v14 = vadd.f32 %v1130_v21, %v1008_v41  ;;  %v1132_v63 = vpop.f32.mrb[14].mxu0 }
 0x1f4   : > { %v2577_v22 = vadd.f32 %v1203_v25, %v1008_v41  ;;  %v1205_v58 = vpop.f32.mrb[14].mxu1  ;;  %v2585_v26 = vadd.f32 %v1132_v63, %v2477_v3  ;;  %v1134_v32 = vpop.f32.mrb[15].mxu0 }
 0x1f5   : > { %v2588_v27 = vadd.f32 %v1205_v58, %v2477_v3  ;;  %v1207_v16 = vpop.f32.mrb[15].mxu1  ;;  %v1841_v9 = vpack.c.bf16 %v2575_v14, %v2567_v19  ;;  %v2595_v6 = vadd.f32 %v1134_v32, %v2477_v3  ;;  %1336 = sbr.rel (%p1818_p13) target bundleno = 513 (0x201), region = 67 }
 0x1f6   : > { %v1842_v5 = vpack.c.bf16 %v2577_v22, %v2569_v7  ;;  %v2598_v33 = vadd.f32 %v1207_v16, %v2477_v3  ;;  %v1972_v3 = vmov (!%p1818_p13), 0.0  }
 0x1f7   : > { %1318 = vst [vmem:[%s2501_s24 + $0x60] sm:$0xff] %v1841_v9  ;;  %v1843_v62 = vpack.c.bf16 %v2595_v6, %v2585_v26  ;;  %1338 = vst.msk [vmem:[%s2160_s20] sm:$0xff] (!%p1818_p13), %vm1337_vm10, %v1972_v3 }
 0x1f8   : > { %1319 = vst [vmem:[%s2501_s24 + $0x68] sm:$0xff] %v1842_v5  ;;  %v1844_v45 = vpack.c.bf16 %v2598_v33, %v2588_v27  ;;  %1339 = vst.msk [vmem:[%s2160_s20 + $0x8] sm:$0xff] (!%p1818_p13), %vm1337_vm10, %v1972_v3 }
 0x1f9   : > { %v1328_v31 = vsel %vm1326_vm9, %v1843_v62, %v1327_v0  ;;  %1340 = vst.msk [vmem:[%s2160_s20 + $0x10] sm:$0xff] (!%p1818_p13), %vm1337_vm10, %v1972_v3  ;;  %1341 = vst.msk [vmem:[%s2160_s20 + $0x18] sm:$0xff] (!%p1818_p13), %vm1337_vm10, %v1972_v3 }
 0x1fa   : > { %v1331_v50 = vsel %vm1326_vm9, %v1844_v45, %v1330_v49  ;;  %1329 = vst [vmem:[%s2501_s24 + $0x70] sm:$0x33] %v1328_v31  ;;  %1342 = vst.msk [vmem:[%s2160_s20 + $0x20] sm:$0xff] (!%p1818_p13), %vm1337_vm10, %v1972_v3 }
 0x1fb   : > { %1332 = vst [vmem:[%s2501_s24 + $0x78] sm:$0x33] %v1331_v50  ;;  %1343 = vst.msk [vmem:[%s2160_s20 + $0x28] sm:$0xff] (!%p1818_p13), %vm1337_vm10, %v1972_v3 }
 0x1fc   : > { %1344 = vst.msk [vmem:[%s2160_s20 + $0x30] sm:$0xff] %vm1337_vm10, %v1972_v3  ;;  %1347 = vst.msk [vmem:[%s2178_s21] sm:$0xff] %vm1337_vm10, %v1972_v3 }
 0x1fd   : > { %1348 = vst.msk [vmem:[%s2178_s21 + $0x8] sm:$0xff] %vm1337_vm10, %v1972_v3  ;;  %1349 = vst.msk [vmem:[%s2178_s21 + $0x10] sm:$0xff] %vm1337_vm10, %v1972_v3 }
 0x1fe   : > { %1350 = vst.msk [vmem:[%s2178_s21 + $0x18] sm:$0xff] %vm1337_vm10, %v1972_v3  ;;  %1351 = vst.msk [vmem:[%s2178_s21 + $0x20] sm:$0xff] %vm1337_vm10, %v1972_v3 }
 0x1ff   : > { %1352 = vst.msk [vmem:[%s2178_s21 + $0x28] sm:$0xff] %vm1337_vm10, %v1972_v3  ;;  %1353 = vst.msk [vmem:[%s2178_s21 + $0x30] sm:$0xff] %vm1337_vm10, %v1972_v3 }
 0x200   : > { %1346 = vst.msk [vmem:[%s2160_s20 + $0x38] sm:$0x7] %vm1345_vm11, %v1972_v3  ;;  %1354 = vst.msk [vmem:[%s2178_s21 + $0x38] sm:$0x7] %vm1345_vm11, %v1972_v3 }
 0x201 PF: > { %v1373_v54 = vadd.f32 %v2515_v12, %v2511_v28  ;;  %v1363_v51 = vadd.f32 %v2485_v10, %v2481_v24  ;;  %v1378_v8 = vadd.f32 %v2527_v60, %v2519_v30  ;;  %v1368_v48 = vadd.f32 %v2497_v56, %v2489_v20  ;;  %s1821_s22 = sshll.u32 (%p2061_p6), %s1956_s27, 6 }
 0x202   : > { %v1388_v36 = vadd.f32 %v2555_v37, %v2547_v18  ;;  %v1383_v52 = vadd.f32 %v2543_v34, %v2539_v2  ;;  %v1398_v38 = vsel %vm1048_vm0, %v2585_v26, 0.0  ;;  %v1399_v55 = vsel %vm1048_vm0, %v2595_v6, 0.0 }
 0x203   : > { %v1374_v53 = vadd.f32 %v1373_v54, %v2513_v13  ;;  %v1364_v39 = vadd.f32 %v1363_v51, %v2483_v42  ;;  %v1379_v17 = vadd.f32 %v1378_v8, %v2521_v57  ;;  %v1369_v46 = vadd.f32 %v1368_v48, %v2491_v40 }
 0x204   : > { %v1389_v29 = vadd.f32 %v1388_v36, %v2549_v35  ;;  %v1400_v21 = vadd.f32 %v1399_v55, %v1398_v38  ;;  %v1384_v63 = vadd.f32 %v1383_v52, %v2541_v4  ;;  %v1401_v58 = vsel %vm1048_vm0, %v2588_v27, 0.0 }
 0x205   : > { %v1375_v41 = vadd.f32 %v1374_v53, %v2517_v44  ;;  %v1365_v43 = vadd.f32 %v1364_v39, %v2487_v61  ;;  %v1380_v25 = vadd.f32 %v1379_v17, %v2529_v47  ;;  %v1370_v11 = vadd.f32 %v1369_v46, %v2499_v1 }
 0x206   : > { %v1393_v15 = vadd.f32 %v2575_v14, %v2567_v19  ;;  %v1437_v32 = vmul.f32 %v2489_v20, %v2489_v20  ;;  %v1438_v16 = vmul.f32 %v2497_v56, %v2497_v56  ;;  %v1439_v9 = vmul.f32 %v2491_v40, %v2491_v40 }
 0x207   : > { %1376 = vadd.xlane.f32.xlu1 %v1375_v41  ;;  %1366 = vadd.xlane.f32.xlu0 %v1365_v43  ;;  %v1433_v5 = vmul.f32 %v2481_v24, %v2481_v24  ;;  %v1390_v0 = vadd.f32 %v1389_v29, %v2557_v23  ;;  %v1402_v49 = vadd.f32 %v1401_v58, %v1400_v21  ;;  %v1403_v20 = vsel %vm1048_vm0, %v2598_v33, 0.0 }
 0x208   : > { %v1470_v62 = vadd.f32 %v1438_v16, %v1437_v32  ;;  %v1434_v45 = vmul.f32 %v2485_v10, %v2485_v10  ;;  %v1385_v31 = vadd.f32 %v1384_v63, %v2545_v59  ;;  %v1445_v56 = vmul.f32 %v2519_v30, %v2519_v30 }
 0x209   : > { %v1446_v40 = vmul.f32 %v2527_v60, %v2527_v60  ;;  %v1394_v24 = vadd.f32 %v1393_v15, %v2569_v7  ;;  %v1435_v50 = vmul.f32 %v2483_v42, %v2483_v42  ;;  %v1440_v10 = vmul.f32 %v2499_v1, %v2499_v1 }
 0x20a   : > { %v1465_v3 = vadd.f32 %v1434_v45, %v1433_v5  ;;  %v1471_v54 = vadd.f32 %v1470_v62, %v1439_v9  ;;  %v1441_v51 = vmul.f32 %v2511_v28, %v2511_v28  ;;  %v1442_v30 = vmul.f32 %v2515_v12, %v2515_v12 }
 0x20b   : > { %1381 = vadd.xlane.f32.xlu1 %v1380_v25  ;;  %1371 = vadd.xlane.f32.xlu0 %v1370_v11  ;;  %v1404_v8 = vadd.f32 %v1403_v20, %v1402_v49  ;;  %v1447_v60 = vmul.f32 %v2521_v57, %v2521_v57  ;;  %v1480_v48 = vadd.f32 %v1446_v40, %v1445_v56  ;;  %vm1415_vm12 = vcmask 7168   ;;  %v1358_v20 = vld [vmem:[%s2160_s20 + $0x18] sm:$0xff]  ;;  %v1356_v56 = vld [vmem:[%s2160_s20 + $0x8] sm:$0xff] }
 0x20c   : > { %v1443_v36 = vmul.f32 %v2513_v13, %v2513_v13  ;;  %v1475_v42 = vadd.f32 %v1442_v30, %v1441_v51  ;;  %v1453_v52 = vmul.f32 %v2547_v18, %v2547_v18  ;;  %v1454_v1 = vmul.f32 %v2555_v37, %v2555_v37 }
 0x20d   : > { %v1395_v28 = vadd.f32 %v1394_v24, %v2577_v22  ;;  %v1436_v12 = vmul.f32 %v2487_v61, %v2487_v61  ;;  %v1466_v38 = vadd.f32 %v1465_v3, %v1435_v50  ;;  %v1472_v57 = vadd.f32 %v1471_v54, %v1440_v10  ;;  %v1360_v10 = vld [vmem:[%s2160_s20 + $0x28] sm:$0xff]  ;;  %v1359_v54 = vld [vmem:[%s2160_s20 + $0x20] sm:$0xff] }
 0x20e   : > { %v1448_v55 = vmul.f32 %v2529_v47, %v2529_v47  ;;  %v1444_v13 = vmul.f32 %v2517_v44, %v2517_v44  ;;  %v1449_v18 = vmul.f32 %v2539_v2, %v2539_v2  ;;  %v1481_v53 = vadd.f32 %v1480_v48, %v1447_v60  ;;  %v1362_v48 = vld [vmem:[%s2160_s20 + $0x38] sm:$0x7] }
 0x20f   : > { %1391 = vadd.xlane.f32.xlu1 %v1390_v0  ;;  %1386 = vadd.xlane.f32.xlu0 %v1385_v31  ;;  %v1455_v37 = vmul.f32 %v2549_v35, %v2549_v35  ;;  %v1450_v39 = vmul.f32 %v2543_v34, %v2543_v34  ;;  %v1461_v61 = vmul.f32 %v2585_v26, %v2585_v26  ;;  %v1357_v0 = vld [vmem:[%s2160_s20 + $0x10] sm:$0xff]  ;;  %vm1423_vm13 = vcmask 2048  }
 0x210   : > { %v1476_v17 = vadd.f32 %v1475_v42, %v1443_v36  ;;  %v1490_v46 = vadd.f32 %v1454_v1, %v1453_v52  ;;  %v1451_v47 = vmul.f32 %v2541_v4, %v2541_v4  ;;  %v1462_v44 = vmul.f32 %v2595_v6, %v2595_v6  ;;  %v1361_v36 = vld [vmem:[%s2160_s20 + $0x30] sm:$0xff] }
 0x211   : > { %v1467_v2 = vadd.f32 %v1466_v38, %v1436_v12  ;;  %v1485_v41 = vadd.f32 %v1450_v39, %v1449_v18  ;;  %v1457_v35 = vmul.f32 %v2567_v19, %v2567_v19  ;;  %v1463_v34 = vmul.f32 %v2588_v27, %v2588_v27  ;;  %v1426_v12 = vld [vmem:[%s2178_s21 + $0x8] sm:$0xff]  ;;  %v1425_v38 = vld [vmem:[%s2178_s21] sm:$0xff] }
 0x212   : > { %v1500_v26 = vsel %vm1048_vm0, %v1461_v61, 0.0  ;;  %v1501_v43 = vsel %vm1048_vm0, %v1462_v44, 0.0  ;;  %v1458_v4 = vmul.f32 %v2575_v14, %v2575_v14  ;;  %v1482_v29 = vadd.f32 %v1481_v53, %v1448_v55  ;;  %v1428_v53 = vld [vmem:[%s2178_s21 + $0x18] sm:$0xff]  ;;  %v1429_v44 = vld [vmem:[%s2178_s21 + $0x20] sm:$0xff] }
 0x213   : > { %1405 = vadd.xlane.f32.xlu1 %v1404_v8  ;;  %1396 = vadd.xlane.f32.xlu0 %v1395_v28  ;;  %v1456_v6 = vmul.f32 %v2557_v23, %v2557_v23  ;;  %v1477_v21 = vadd.f32 %v1476_v17, %v1444_v13  ;;  %v1491_v25 = vadd.f32 %v1490_v46, %v1455_v37  ;;  %v1503_v15 = vsel %vm1048_vm0, %v1463_v34, 0.0  ;;  %v1427_v37 = vld [vmem:[%s2178_s21 + $0x10] sm:$0xff] }
 0x214   : > { %v1452_v11 = vmul.f32 %v2545_v59, %v2545_v59  ;;  %v1486_v19 = vadd.f32 %v1485_v41, %v1451_v47  ;;  %v1502_v27 = vadd.f32 %v1501_v43, %v1500_v26  ;;  %v1459_v63 = vmul.f32 %v2569_v7, %v2569_v7  ;;  %v1430_v47 = vld [vmem:[%s2178_s21 + $0x28] sm:$0xff]  ;;  %v1432_v26 = vld [vmem:[%s2178_s21 + $0x38] sm:$0x7]  ;;  %v1431_v43 = vld [vmem:[%s2178_s21 + $0x30] sm:$0xff] }
 0x215   : > { %v1495_v58 = vadd.f32 %v1458_v4, %v1457_v35  ;;  %v1464_v14 = vmul.f32 %v2598_v33, %v2598_v33  ;;  %v1492_v23 = vadd.f32 %v1491_v25, %v1456_v6  ;;  %v1460_v32 = vmul.f32 %v2577_v22, %v2577_v22  ;;  %v1355_v22 = vld [vmem:[%s2160_s20] sm:$0xff] }
 0x216   : > { %v1487_v59 = vadd.f32 %v1486_v19, %v1452_v11  ;;  %v1504_v16 = vadd.f32 %v1503_v15, %v1502_v27  ;;  %v1559_v25 = vld [vmem:[%s2501_s24] sm:$0xff] (%p2061_p6)  ;;  %v1561_v11 = vld [vmem:[%s2501_s24 + $0x8] sm:$0xff] (%p2061_p6)  ;;  %v1563_v19 = vld [vmem:[%s2501_s24 + $0x10] sm:$0xff] (%p2061_p6) }
 0x217   : > { %1473 = vadd.xlane.f32.xlu1 %v1472_v57  ;;  %1468 = vadd.xlane.f32.xlu0 %v1467_v2  ;;  %v1496_v9 = vadd.f32 %v1495_v58, %v1459_v63  ;;  %v1505_v7 = vsel %vm1048_vm0, %v1464_v14, 0.0  ;;  %v1565_v27 = vld [vmem:[%s2501_s24 + $0x18] sm:$0xff] (%p2061_p6)  ;;  %v1567_v63 = vld [vmem:[%s2501_s24 + $0x20] sm:$0xff] (%p2061_p6)  ;;  %v1569_v58 = vld [vmem:[%s2501_s24 + $0x28] sm:$0xff] (%p2061_p6) }
 0x218   : > { %v1506_v33 = vadd.f32 %v1505_v7, %v1504_v16  ;;  %v1571_v14 = vld [vmem:[%s2501_s24 + $0x30] sm:$0xff] (%p2061_p6)  ;;  %v1573_v15 = vld [vmem:[%s2501_s24 + $0x38] sm:$0xff] (%p2061_p6)  ;;  %v1585_v7 = vld [vmem:[%s2501_s24 + $0x68] sm:$0xff] (%p2061_p6) }
 0x219   : > { %v1497_v5 = vadd.f32 %v1496_v9, %v1460_v32  ;;  %v1577_v32 = vld [vmem:[%s2501_s24 + $0x48] sm:$0xff] (%p2061_p6)  ;;  %v1581_v16 = vld [vmem:[%s2501_s24 + $0x58] sm:$0xff] (%p2061_p6)  ;;  %v1583_v9 = vld [vmem:[%s2501_s24 + $0x60] sm:$0xff] (%p2061_p6) }
 0x21b   : > { %1483 = vadd.xlane.f32.xlu1 %v1482_v29  ;;  %1478 = vadd.xlane.f32.xlu0 %v1477_v21 }
 0x21f   : > { %1493 = vadd.xlane.f32.xlu1 %v1492_v23  ;;  %1488 = vadd.xlane.f32.xlu0 %v1487_v59  ;;  %v1575_v23 = vld [vmem:[%s2501_s24 + $0x40] sm:$0xff] (%p2061_p6)  ;;  %v1579_v59 = vld [vmem:[%s2501_s24 + $0x50] sm:$0xff] (%p2061_p6) }
 0x223   : > { %1507 = vadd.xlane.f32.xlu1 %v1506_v33  ;;  %1498 = vadd.xlane.f32.xlu0 %v1497_v5  ;;  %v1587_v33 = vld [vmem:[%s2501_s24 + $0x70] sm:$0xff] (%p2061_p6)  ;;  %v1589_v5 = vld [vmem:[%s2501_s24 + $0x78] sm:$0xff] (%p2061_p6) }
 0x294   : > { %v1377_v49 = vpop.xlane.xlu1 %1376  ;;  %v1367_v62 = vpop.xlane.xlu0 %1366 }
 0x295   : > { %v1409_v45 = vadd.f32 %v1377_v49, %v1357_v0  ;;  %v1407_v31 = vadd.f32 %v1367_v62, %v1355_v22 }
 0x297   : > { %1418 = vst.msk [vmem:[%s2160_s20 + $0x10] sm:$0xff] %vm1415_vm12, %v1409_v45  ;;  %1416 = vst.msk [vmem:[%s2160_s20] sm:$0xff] %vm1415_vm12, %v1407_v31 }
 0x298   : > { %v1382_v40 = vpop.xlane.xlu1 %1381  ;;  %v1372_v24 = vpop.xlane.xlu0 %1371 }
 0x299   : > { %v1410_v50 = vadd.f32 %v1382_v40, %v1358_v20  ;;  %v1408_v3 = vadd.f32 %v1372_v24, %v1356_v56 }
 0x29b   : > { %1419 = vst.msk [vmem:[%s2160_s20 + $0x18] sm:$0xff] %vm1415_vm12, %v1410_v50  ;;  %1417 = vst.msk [vmem:[%s2160_s20 + $0x8] sm:$0xff] %vm1415_vm12, %v1408_v3 }
 0x29c   : > { %v1392_v51 = vpop.xlane.xlu1 %1391  ;;  %v1387_v30 = vpop.xlane.xlu0 %1386 }
 0x29d   : > { %v1412_v8 = vadd.f32 %v1392_v51, %v1360_v10  ;;  %v1411_v60 = vadd.f32 %v1387_v30, %v1359_v54 }
 0x29f   : > { %1421 = vst.msk [vmem:[%s2160_s20 + $0x28] sm:$0xff] %vm1415_vm12, %v1412_v8  ;;  %1420 = vst.msk [vmem:[%s2160_s20 + $0x20] sm:$0xff] %vm1415_vm12, %v1411_v60 }
 0x2a0   : > { %v1406_v42 = vpop.xlane.xlu1 %1405  ;;  %v1397_v52 = vpop.xlane.xlu0 %1396 }
 0x2a1   : > { %v1414_v1 = vadd.f32 %v1406_v42, %v1362_v48  ;;  %v1413_v28 = vadd.f32 %v1397_v52, %v1361_v36 }
 0x2a3   : > { %1424 = vst.msk [vmem:[%s2160_s20 + $0x38] sm:$0x7] %vm1423_vm13, %v1414_v1 }
 0x2a4   : > { %1422 = vst.msk [vmem:[%s2160_s20 + $0x30] sm:$0xff] %vm1415_vm12, %v1413_v28  ;;  %v1474_v57 = vpop.xlane.xlu1 %1473  ;;  %v1469_v55 = vpop.xlane.xlu0 %1468  ;;  %s1820_s20 = sshll.u32 (%p2061_p6), %s1952_s26, 2 }
 0x2a5   : > { %v1510_v13 = vadd.f32 %v1474_v57, %v1426_v12  ;;  %v1509_v18 = vadd.f32 %v1469_v55, %v1425_v38  ;;  %s1544_s12 = sadd.s32 (%p2061_p6), %s1821_s22, %s1820_s20 }
 0x2a7   : > { %1518 = vst.msk [vmem:[%s2178_s21 + $0x8] sm:$0xff] %vm1415_vm12, %v1510_v13  ;;  %1517 = vst.msk [vmem:[%s2178_s21] sm:$0xff] %vm1415_vm12, %v1509_v18 }
 0x2a8   : > { %v1484_v39 = vpop.xlane.xlu1 %1483  ;;  %v1479_v61 = vpop.xlane.xlu0 %1478 }
 0x2a9   : > { %v1512_v17 = vadd.f32 %v1484_v39, %v1428_v53  ;;  %v1511_v46 = vadd.f32 %v1479_v61, %v1427_v37 }
 0x2ab   : > { %1520 = vst.msk [vmem:[%s2178_s21 + $0x18] sm:$0xff] %vm1415_vm12, %v1512_v17  ;;  %1519 = vst.msk [vmem:[%s2178_s21 + $0x10] sm:$0xff] %vm1415_vm12, %v1511_v46 }
 0x2ac   : > { %v1494_v2 = vpop.xlane.xlu1 %1493  ;;  %v1489_v41 = vpop.xlane.xlu0 %1488 }
 0x2ad   : > { %v1514_v35 = vadd.f32 %v1494_v2, %v1430_v47  ;;  %v1513_v34 = vadd.f32 %v1489_v41, %v1429_v44 }
 0x2ae   : > { %1541 = sbr.rel (!%p2061_p6) target bundleno = 702 (0x2be), region = 71 }
 0x2af   : > { %1522 = vst.msk [vmem:[%s2178_s21 + $0x28] sm:$0xff] %vm1415_vm12, %v1514_v35  ;;  %1521 = vst.msk [vmem:[%s2178_s21 + $0x20] sm:$0xff] %vm1415_vm12, %v1513_v34 }
 0x2b0   : > { %v1508_v4 = vpop.xlane.xlu1 %1507  ;;  %v1499_v29 = vpop.xlane.xlu0 %1498 }
 0x2b1   : > { %v1516_v6 = vadd.f32 %v1508_v4, %v1432_v26  ;;  %v1515_v21 = vadd.f32 %v1499_v29, %v1431_v43 }
 0x2b3   : > { %1524 = vst.msk [vmem:[%s2178_s21 + $0x38] sm:$0x7] %vm1423_vm13, %v1516_v6 }
 0x2b4   : > { %1523 = vst.msk [vmem:[%s2178_s21 + $0x30] sm:$0xff] %vm1415_vm12, %v1515_v21  ;;  %s1822_s21 = sshll.u32 (%p2061_p6), %s1544_s12, 2 }
 0x2b5   : > { %s1546_s17 = scalar_lea.vmem %s2848_s5, %s1822_s21 }
 0x2b6   : > { %1560 = vst [vmem:[%s1546_s17] sm:$0xff] %v1559_v25  ;;  %1562 = vst [vmem:[%s1546_s17 + $0x8] sm:$0xff] %v1561_v11 }
 0x2b7   : > { %1564 = vst [vmem:[%s1546_s17 + $0x20] sm:$0xff] %v1563_v19  ;;  %1566 = vst [vmem:[%s1546_s17 + $0x28] sm:$0xff] %v1565_v27 }
 0x2b8   : > { %1568 = vst [vmem:[%s1546_s17 + $0x40] sm:$0xff] %v1567_v63  ;;  %1570 = vst [vmem:[%s1546_s17 + $0x48] sm:$0xff] %v1569_v58 }
 0x2b9   : > { %1572 = vst [vmem:[%s1546_s17 + $0x60] sm:$0xff] %v1571_v14  ;;  %1574 = vst [vmem:[%s1546_s17 + $0x68] sm:$0xff] %v1573_v15 }
 0x2ba   : > { %1576 = vst [vmem:[%s1546_s17 + $0x80] sm:$0xff] %v1575_v23  ;;  %1578 = vst [vmem:[%s1546_s17 + $0x88] sm:$0xff] %v1577_v32 }
 0x2bb   : > { %1580 = vst [vmem:[%s1546_s17 + $0xa0] sm:$0xff] %v1579_v59  ;;  %1582 = vst [vmem:[%s1546_s17 + $0xa8] sm:$0xff] %v1581_v16 }
 0x2bc   : > { %1584 = vst [vmem:[%s1546_s17 + $0xc0] sm:$0xff] %v1583_v9  ;;  %1586 = vst [vmem:[%s1546_s17 + $0xc8] sm:$0xff] %v1585_v7 }
 0x2bd   : > { %1588 = vst [vmem:[%s1546_s17 + $0xe0] sm:$0xff] %v1587_v33  ;;  %1590 = vst [vmem:[%s1546_s17 + $0xe8] sm:$0xff] %v1589_v5 }
 0x2be PF: > { %s18_s30 = sadd.s32 1, %s1968_s30   ;;  %s2875_s24 = smov %s1948_s25 }
 0x2bf   : > { %p15_p0 = scmp.ge.s32.totalorder %s18_s30, 6   ;;  %s2876_s25 = smov %s2069_s16 }
 0x2c0   : > { %s2877_s26 = smov %s1960_s28  ;;  %s2878_s27 = smov %s1964_s29 }
 0x2c1   : > { %s2879_s28 = smov %s2882_s8  ;;  %s2880_s29 = smov %s2886_s9 }
 0x2c2   :  { %17 = sbr.rel (!%p15_p0) target bundleno = 4 (0x4), region = 161 }

</bundles_post_ra>
